<compile_context>
chip_gen: v5e
topology: v5e:2x2
jax: 0.10.0
libtpu: 0.0.40
codegen_flags: <defaults>
</compile_context>

<pallas_src>
import jax
import jax.numpy as jnp
from jax import lax
from jax.experimental import pallas as pl
from jax.experimental.pallas import tpu as pltpu

# ---------------- small, module-consistent config ----------------
EMB_DIM = 32            # emb_dim
EMB_RNA = 8             # emb_RNA
RNA_COMPONENT = 16      # RNA_component
RNA_TOKENS = RNA_COMPONENT * EMB_RNA   # RNA_tokens (= 128)
ENCODER_LAYERS = 2      # encoder_layer
MASK_RATIO = 0.25       # mask_ratio
BATCH = 2

# Mamba defaults (mamba_ssm)
D_STATE = 16
D_CONV = 4
EXPAND = 2
D_INNER = EXPAND * EMB_DIM
DT_RANK = max(1, -(-EMB_DIM // 16))    # ceil(d_model / 16)

REMAIN_T = int(RNA_COMPONENT * (1 - MASK_RATIO))   # 12
SEQ_LEN = REMAIN_T + 1                             # +1 cls token -> 13
BL = BATCH * SEQ_LEN                               # 26 time-major rows: r = t*BATCH + b
DIN = D_INNER * D_STATE                            # 1024 lane-flattened state axis

VEC_ROWS_PER_LAYER = D_CONV + 3   # [conv_w tap 0..K-1 | conv_b | dt_b | D]

_VMEM = pl.BlockSpec(memory_space=pltpu.MemorySpace.VMEM)
_SMEM = pl.BlockSpec(memory_space=pltpu.MemorySpace.SMEM)


def _silu(v):
    # sigmoid via EUP reciprocal (exp already on EUP; reciprocal slot is free)
    return v * pl.reciprocal(1.0 + jnp.exp(-v), approx=True)


# ---------------- the single fused encoder kernel ----------------
def _encoder_kernel(idx_ref,                      # SMEM (REMAIN_T*BATCH,) int32
                    patches_ref,                  # (B, 128)
                    w_tok_ref, b_tok_ref,         # (128,128), (1,128)
                    w_emb_big_ref, bias_pos_ref,  # (128, C*E), (1, C*E)
                    cls_ref,                      # (1, E)
                    shift_ref,                    # (K-1, BL, BL)  banded causal shifts
                    w_in_ref,                     # (L, E, 2*Di)
                    w_dt_ref,                     # (L, Di, Di)   dt low-rank folded
                    w_out_ref,                    # (L, Di, E)
                    big3_ref,                     # (3*L, Di, Di*N) bf16 [a_scat|w_bt|w_ct]
                    k_rep_ref,                    # (Di, Di*N)  bf16
                    k_red_ref,                    # (Di*N, Di)  bf16
                    vec_ref,                      # (L*7, Di)   packed small per-layer rows
                    ln_ref,                       # (2, E)      [gamma; beta]
                    o_ref,                        # (BL, E)     time-major output
                    emb_sc, x_sc, dA_sc, dBu_sc, h_sc):
    # ---- front: tokens Linear -> block-diag component embedding -> + positional ----
    t_lin = jnp.dot(patches_ref[...], w_tok_ref[...],
                    preferred_element_type=jnp.float32) + b_tok_ref[...]         # (B, 128)
    emb = jnp.dot(t_lin, w_emb_big_ref[...],
                  preferred_element_type=jnp.float32) + bias_pos_ref[...]        # (B, C*E)
    # scatter component-major into emb_sc: row = c*BATCH + b
    for c in range(RNA_COMPONENT):
        emb_sc[pl.ds(c * BATCH, BATCH), :] = emb[:, c * EMB_DIM:(c + 1) * EMB_DIM]

    # ---- MAE patch-shuffle gather + cls concat, assembled time-major in VMEM ----
    x_sc[pl.ds(0, BATCH), :] = jnp.broadcast_to(cls_ref[...], (BATCH, EMB_DIM))
    for t in range(REMAIN_T):
        for b in range(BATCH):
            comp = idx_ref[t * BATCH + b]                      # SMEM scalar read
            x_sc[pl.ds((t + 1) * BATCH + b, 1), :] = emb_sc[pl.ds(comp * BATCH + b, 1), :]
    h = x_sc[...]                                                                 # (BL, E)

    # ---- Mamba stack (static unroll over layers), all rows time-major ----
    for l in range(ENCODER_LAYERS):
        vbase = l * VEC_ROWS_PER_LAYER
        a_scat = big3_ref[3 * l + 0]        # (Di, Di*N) bf16, block-diagonal A
        w_bt = big3_ref[3 * l + 1]          # (Di, Di*N) bf16, x_w_B @ t_tile
        w_ct = big3_ref[3 * l + 2]          # (Di, Di*N) bf16, x_w_C @ t_tile

        # fused in_proj: one 128-lane matmul, split x / z by static lane slice
        xz = jnp.dot(h, w_in_ref[l], preferred_element_type=jnp.float32)          # (BL, 128)
        x_p = xz[:, :D_INNER]
        z_p = xz[:, D_INNER:]

        # causal depthwise conv1d: constant banded shift matrices (causality + batch
        # separation folded in), per-tap channel weights from the packed vec slab.
        acc = x_p * vec_ref[pl.ds(vbase + D_CONV - 1, 1), :] \
              + vec_ref[pl.ds(vbase + D_CONV, 1), :]                               # tap K-1 + bias
        for s in range(1, D_CONV):
            acc = acc + jnp.dot(shift_ref[s - 1], x_p,
                                preferred_element_type=jnp.float32) \
                        * vec_ref[pl.ds(vbase + D_CONV - 1 - s, 1), :]
        x_c = _silu(acc)                                                           # (BL, Di)

        # dt (low-rank dt_proj folded into one (Di,Di) weight) + bias, softplus
        dt = jnp.dot(x_c, w_dt_ref[l], preferred_element_type=jnp.float32) \
             + vec_ref[pl.ds(vbase + D_CONV + 1, 1), :]
        dt = jnp.maximum(dt, 0.0) + jnp.log(1.0 + jnp.exp(-jnp.abs(dt)))           # softplus

        # discretize on the lane-flattened Di*N axis; bf16 operands at the dot only
        dt16 = dt.astype(jnp.bfloat16)
        xc16 = x_c.astype(jnp.bfloat16)
        dA_sc[...] = jnp.exp(jnp.dot(dt16, a_scat, preferred_element_type=jnp.float32))
        dBu_sc[...] = (jnp.dot((dt * x_c).astype(jnp.bfloat16), k_rep_ref[...],
                               preferred_element_type=jnp.float32)
                       * jnp.dot(xc16, w_bt, preferred_element_type=jnp.float32))  # (BL, Di*N)

        # selective scan: 13 steps over (BATCH, Di*N) slabs, states into VMEM scratch
        s_state = jnp.zeros((BATCH, DIN), jnp.float32)
        for t in range(SEQ_LEN):
            rs = pl.ds(t * BATCH, BATCH)
            s_state = dA_sc[rs, :] * s_state + dBu_sc[rs, :]
            h_sc[rs, :] = s_state

        # y_t = C_t . h_t (grouped lane reduction as one matmul), + D skip, gate, out_proj
        c_t = jnp.dot(xc16, w_ct, preferred_element_type=jnp.float32)              # (BL, Di*N)
        hc16 = (h_sc[...] * c_t).astype(jnp.bfloat16)
        y = jnp.dot(hc16, k_red_ref[...], preferred_element_type=jnp.float32)      # (BL, Di)
        y = y + x_c * vec_ref[pl.ds(vbase + D_CONV + 2, 1), :]
        y = y * _silu(z_p)
        h = jnp.dot(y, w_out_ref[l], preferred_element_type=jnp.float32)           # (BL, E)

    # ---- final LayerNorm over the feature dim (eps = 1e-5, PyTorch default) ----
    mu = jnp.mean(h, axis=-1, keepdims=True)
    var = jnp.mean(jnp.square(h - mu), axis=-1, keepdims=True)
    hn = (h - mu) * lax.rsqrt(var + 1e-5)
    o_ref[...] = hn * ln_ref[pl.ds(0, 1), :] + ln_ref[pl.ds(1, 1), :]


def encoder_fused(idx_flat, patches, fused):
    return pl.pallas_call(
        _encoder_kernel,
        in_specs=[_SMEM] + [_VMEM] * 15,
        out_specs=_VMEM,
        out_shape=jax.ShapeDtypeStruct((BL, EMB_DIM), jnp.float32),
        scratch_shapes=[
            pltpu.VMEM((RNA_COMPONENT * BATCH, EMB_DIM), jnp.float32),  # emb_sc (comp-major)
            pltpu.VMEM((BL, EMB_DIM), jnp.float32),                     # x_sc (mamba input)
            pltpu.VMEM((BL, DIN), jnp.float32),                         # dA_sc
            pltpu.VMEM((BL, DIN), jnp.float32),                         # dBu_sc
            pltpu.VMEM((BL, DIN), jnp.float32),                         # h_sc (scan states)
        ],
    )(idx_flat, patches,
      fused["w_tok"], fused["b_tok"], fused["w_emb_big"], fused["bias_pos"], fused["cls"],
      fused["shift_mats"], fused["w_in"], fused["w_dt"], fused["w_out"],
      fused["big3"], fused["k_rep"], fused["k_red"], fused["vecs"], fused["ln"])


# ---------------- deterministic parameter initialization (natural / per-op form) ----------------
def init_params(key):
    ks = jax.random.split(key, 8)

    def normal(k, shape, scale):
        return (scale * jax.random.normal(k, shape)).astype(jnp.float32)

    params = {
        "w_tok": normal(ks[0], (RNA_TOKENS, RNA_TOKENS), 1.0 / float(RNA_TOKENS) ** 0.5),
        "b_tok": normal(ks[1], (1, RNA_TOKENS), 0.01),
        "w_emb": normal(ks[2], (EMB_RNA, EMB_DIM), 1.0 / float(EMB_RNA) ** 0.5),
        "b_emb": normal(ks[3], (1, EMB_DIM), 0.01),
        # trunc_normal_(std=0.02) approximated by plain normal (synthetic init)
        "cls_token": normal(ks[4], (1, 1, EMB_DIM), 0.02),
        "pos": normal(ks[5], (RNA_COMPONENT, EMB_DIM), 0.02),
        "ln_g": jnp.ones((1, EMB_DIM), jnp.float32),
        "ln_b": jnp.zeros((1, EMB_DIM), jnp.float32),
        "mamba_layers": [],
    }
    lkeys = jax.random.split(ks[6], ENCODER_LAYERS)
    for lk in lkeys:
        sk = jax.random.split(lk, 10)
        A = -jnp.tile(jnp.arange(1, D_STATE + 1, dtype=jnp.float32), (D_INNER, 1))
        layer = {
            "in_w_x": normal(sk[0], (EMB_DIM, D_INNER), 1.0 / float(EMB_DIM) ** 0.5),
            "in_w_z": normal(sk[1], (EMB_DIM, D_INNER), 1.0 / float(EMB_DIM) ** 0.5),
            "conv_w": normal(sk[2], (D_CONV, D_INNER), 1.0 / float(D_CONV) ** 0.5),
            "conv_b": normal(sk[3], (1, D_INNER), 0.01),
            "x_w_dt": normal(sk[4], (D_INNER, DT_RANK), 1.0 / float(D_INNER) ** 0.5),
            "x_w_B": normal(sk[5], (D_INNER, D_STATE), 1.0 / float(D_INNER) ** 0.5),
            "x_w_C": normal(sk[6], (D_INNER, D_STATE), 1.0 / float(D_INNER) ** 0.5),
            "dt_w": normal(sk[7], (DT_RANK, D_INNER), 1.0 / float(DT_RANK) ** 0.5),
            "dt_b": normal(sk[8], (1, D_INNER), 0.1) - 4.0,   # softplus^-1 of small dt
            "A": A,
            "D": jnp.ones((1, D_INNER), jnp.float32),
            "out_w": normal(sk[9], (D_INNER, EMB_DIM), 1.0 / float(D_INNER) ** 0.5),
        }
        params["mamba_layers"].append(layer)
    return params


# ---------------- parameter fusion / constant matrices for the kernel ----------------
def fuse_params(p):
    eye_di = jnp.eye(D_INNER, dtype=jnp.float32)
    # lane-repeat:  (x @ k_rep)[r, d*N+n] = x[r, d]
    k_rep = jnp.kron(eye_di, jnp.ones((1, D_STATE), jnp.float32))          # (Di, Di*N)
    # lane-tile:    (x @ t_tile)[r, d*N+n] = x[r, n]
    t_tile = jnp.tile(jnp.eye(D_STATE, dtype=jnp.float32), (1, D_INNER))   # (N, Di*N)
    # grouped-sum:  (x @ k_red)[r, d] = sum_n x[r, d*N+n]
    k_red = jnp.kron(eye_di, jnp.ones((D_STATE, 1), jnp.float32))          # (Di*N, Di)

    # time-major banded shift matrices for the causal depthwise conv (shift = 1..K-1):
    # S_s[t*B+b, (t-s)*B+b] = 1 for t >= s; zero rows encode the causal mask and the
    # per-batch boundary (no cross-batch leakage possible).
    rows = jnp.arange(BL)
    shift_list = []
    for s in range(1, D_CONV):
        src = rows - s * BATCH
        m = ((src[:, None] == rows[None, :]) & (src[:, None] >= 0)).astype(jnp.float32)
        shift_list.append(m)
    shift_mats = jnp.stack(shift_list)                                     # (K-1, BL, BL)

    w_in, w_dt, w_out, big3, vec_rows = [], [], [], [], []
    for lp in p["mamba_layers"]:
        w_in.append(jnp.concatenate([lp["in_w_x"], lp["in_w_z"]], axis=1))       # (E, 2Di)
        w_dt.append(lp["x_w_dt"] @ lp["dt_w"])                                   # (Di, Di)
        w_out.append(lp["out_w"])                                                # (Di, E)
        big3.append(k_rep * lp["A"].reshape(1, DIN))                             # a_scat
        big3.append(lp["x_w_B"] @ t_tile)                                        # w_bt
        big3.append(lp["x_w_C"] @ t_tile)                                        # w_ct
        vec_rows.extend([lp["conv_w"][k] for k in range(D_CONV)])                # conv taps
        vec_rows.extend([lp["conv_b"][0], lp["dt_b"][0], lp["D"][0]])            # conv_b, dt_b, D

    return {
        # front
        "w_tok": p["w_tok"],
        "b_tok": p["b_tok"],
        "w_emb_big": jnp.kron(jnp.eye(RNA_COMPONENT, dtype=jnp.float32), p["w_emb"]),  # (128, C*E)
        "bias_pos": jnp.tile(p["b_emb"], (1, RNA_COMPONENT)) + p["pos"].reshape(1, -1),
        "cls": p["cls_token"].reshape(1, EMB_DIM),
        # mamba stack
        "shift_mats": shift_mats,
        "w_in": jnp.stack(w_in),
        "w_dt": jnp.stack(w_dt),
        "w_out": jnp.stack(w_out),
        "big3": jnp.stack(big3).astype(jnp.bfloat16),            # (3L, Di, Di*N) bf16
        "k_rep": k_rep.astype(jnp.bfloat16),
        "k_red": k_red.astype(jnp.bfloat16),
        "vecs": jnp.stack(vec_rows),                             # (L*7, Di)
        "ln": jnp.concatenate([p["ln_g"], p["ln_b"]], axis=0),   # (2, E)
    }


# ---------------- full RNA_Encoder forward ----------------
def rna_encoder_forward(fused, patches, shuffle_key):
    B = patches.shape[0]
    assert B == BATCH, "kernel is specialized for BATCH"

    # MAE patch shuffle index generation stays in plain JAX (random permutation + argsort)
    keys = jax.random.split(shuffle_key, B)
    forward = jnp.stack(
        [jax.random.permutation(keys[b], RNA_COMPONENT) for b in range(B)], axis=-1
    ).astype(jnp.int32)                                                   # (C, B)
    backward_indexes = jnp.argsort(forward, axis=0).astype(jnp.int32)     # (C, B)
    idx_flat = forward[:REMAIN_T].reshape(-1)                             # time-major (t*B + b)

    out_flat = encoder_fused(idx_flat, patches, fused)                    # (BL, E), time-major
    features = out_flat.reshape(SEQ_LEN, B, EMB_DIM)                      # 't b c' directly
    return features, backward_indexes


if __name__ == "__main__":
    key = jax.random.PRNGKey(0)
    pkey, xkey, skey = jax.random.split(key, 3)
    params = init_params(pkey)
    fused = fuse_params(params)
    patches = jax.random.normal(xkey, (BATCH, RNA_TOKENS), dtype=jnp.float32)

    fwd = jax.jit(rna_encoder_forward)
    features, backward_indexes = fwd(fused, patches, skey)
    features = jax.block_until_ready(features)
    backward_indexes = jax.block_until_ready(backward_indexes)

    assert features.shape == (SEQ_LEN, BATCH, EMB_DIM), features.shape
    assert backward_indexes.shape == (RNA_COMPONENT, BATCH), backward_indexes.shape
    assert bool(jnp.all(jnp.isfinite(features)))
    print("KERNEL_OK")
</pallas_src>

<mosaic_0001>
module attributes {stable_mosaic.version = 11 : i64} {
  func.func @_encoder_kernel(%arg0: memref<24xi32, #tpu.memory_space<smem>>, %arg1: memref<2x128xf32, #tpu.memory_space<vmem>>, %arg2: memref<128x128xf32, #tpu.memory_space<vmem>>, %arg3: memref<1x128xf32, #tpu.memory_space<vmem>>, %arg4: memref<128x512xf32, #tpu.memory_space<vmem>>, %arg5: memref<1x512xf32, #tpu.memory_space<vmem>>, %arg6: memref<1x32xf32, #tpu.memory_space<vmem>>, %arg7: memref<3x26x26xf32, #tpu.memory_space<vmem>>, %arg8: memref<2x32x128xf32, #tpu.memory_space<vmem>>, %arg9: memref<2x64x64xf32, #tpu.memory_space<vmem>>, %arg10: memref<2x64x32xf32, #tpu.memory_space<vmem>>, %arg11: memref<6x64x1024xbf16, #tpu.memory_space<vmem>>, %arg12: memref<64x1024xbf16, #tpu.memory_space<vmem>>, %arg13: memref<1024x64xbf16, #tpu.memory_space<vmem>>, %arg14: memref<14x64xf32, #tpu.memory_space<vmem>>, %arg15: memref<2x32xf32, #tpu.memory_space<vmem>>, %arg16: memref<26x32xf32, #tpu.memory_space<vmem>>, %arg17: memref<32x32xf32, #tpu.memory_space<vmem>>, %arg18: memref<26x32xf32, #tpu.memory_space<vmem>>, %arg19: memref<26x1024xf32, #tpu.memory_space<vmem>>, %arg20: memref<26x1024xf32, #tpu.memory_space<vmem>>, %arg21: memref<26x1024xf32, #tpu.memory_space<vmem>>) attributes {dimension_semantics = [], scalar_prefetch = 0 : i64, scratch_operands = 5 : i64, tpu.core_type = #tpu.core_type<tc>} {
    %c0 = arith.constant 0 : index
    %c0_0 = arith.constant 0 : index
    %0 = vector.load %arg1[%c0, %c0_0] : memref<2x128xf32, #tpu.memory_space<vmem>>, vector<2x128xf32>
    %c0_1 = arith.constant 0 : index
    %c0_2 = arith.constant 0 : index
    %1 = vector.load %arg2[%c0_1, %c0_2] : memref<128x128xf32, #tpu.memory_space<vmem>>, vector<128x128xf32>
    %cst = arith.constant dense<0.000000e+00> : vector<2x128xf32>
    %2 = tpu.matmul %0, %1, %cst {dimension_numbers = #tpu.dot_dimension_numbers<[1], [0], [0], [1], [0, 0, 1, 1], [], []>} : vector<2x128xf32>, vector<128x128xf32>, vector<2x128xf32> -> vector<2x128xf32>
    %c0_3 = arith.constant 0 : index
    %c0_4 = arith.constant 0 : index
    %3 = vector.load %arg3[%c0_3, %c0_4] : memref<1x128xf32, #tpu.memory_space<vmem>>, vector<1x128xf32>
    %4 = vector.broadcast %3 : vector<1x128xf32> to vector<2x128xf32>
    %5 = arith.addf %2, %4 : vector<2x128xf32>
    %c0_5 = arith.constant 0 : index
    %c0_6 = arith.constant 0 : index
    %6 = vector.load %arg4[%c0_5, %c0_6] : memref<128x512xf32, #tpu.memory_space<vmem>>, vector<128x512xf32>
    %cst_7 = arith.constant dense<0.000000e+00> : vector<2x512xf32>
    %7 = tpu.matmul %5, %6, %cst_7 {dimension_numbers = #tpu.dot_dimension_numbers<[1], [0], [0], [1], [0, 0, 1, 1], [], []>} : vector<2x128xf32>, vector<128x512xf32>, vector<2x512xf32> -> vector<2x512xf32>
    %c0_8 = arith.constant 0 : index
    %c0_9 = arith.constant 0 : index
    %8 = vector.load %arg5[%c0_8, %c0_9] : memref<1x512xf32, #tpu.memory_space<vmem>>, vector<1x512xf32>
    %9 = vector.broadcast %8 : vector<1x512xf32> to vector<2x512xf32>
    %10 = arith.addf %7, %9 : vector<2x512xf32>
    %11 = vector.extract_strided_slice %10 {offsets = [0, 0], sizes = [2, 32], strides = [1, 1]} : vector<2x512xf32> to vector<2x32xf32>
    %c0_10 = arith.constant 0 : index
    %c0_11 = arith.constant 0 : index
    %12 = vector.load %arg17[%c0_10, %c0_11] : memref<32x32xf32, #tpu.memory_space<vmem>>, vector<2x32xf32>
    tpu.vector_store %arg17[%c0_10, %c0_11], %11 {strides = array<i32>} : memref<32x32xf32, #tpu.memory_space<vmem>>, vector<2x32xf32>,
    %13 = vector.extract_strided_slice %10 {offsets = [0, 32], sizes = [2, 32], strides = [1, 1]} : vector<2x512xf32> to vector<2x32xf32>
    %c2 = arith.constant 2 : index
    %c0_12 = arith.constant 0 : index
    %14 = vector.load %arg17[%c2, %c0_12] : memref<32x32xf32, #tpu.memory_space<vmem>>, vector<2x32xf32>
    tpu.vector_store %arg17[%c2, %c0_12], %13 {strides = array<i32>} : memref<32x32xf32, #tpu.memory_space<vmem>>, vector<2x32xf32>,
    %15 = vector.extract_strided_slice %10 {offsets = [0, 64], sizes = [2, 32], strides = [1, 1]} : vector<2x512xf32> to vector<2x32xf32>
    %c4 = arith.constant 4 : index
    %c0_13 = arith.constant 0 : index
    %16 = vector.load %arg17[%c4, %c0_13] : memref<32x32xf32, #tpu.memory_space<vmem>>, vector<2x32xf32>
    tpu.vector_store %arg17[%c4, %c0_13], %15 {strides = array<i32>} : memref<32x32xf32, #tpu.memory_space<vmem>>, vector<2x32xf32>,
    %17 = vector.extract_strided_slice %10 {offsets = [0, 96], sizes = [2, 32], strides = [1, 1]} : vector<2x512xf32> to vector<2x32xf32>
    %c6 = arith.constant 6 : index
    %c0_14 = arith.constant 0 : index
    %18 = vector.load %arg17[%c6, %c0_14] : memref<32x32xf32, #tpu.memory_space<vmem>>, vector<2x32xf32>
    tpu.vector_store %arg17[%c6, %c0_14], %17 {strides = array<i32>} : memref<32x32xf32, #tpu.memory_space<vmem>>, vector<2x32xf32>,
    %19 = vector.extract_strided_slice %10 {offsets = [0, 128], sizes = [2, 32], strides = [1, 1]} : vector<2x512xf32> to vector<2x32xf32>
    %c8 = arith.constant 8 : index
    %c0_15 = arith.constant 0 : index
    %20 = vector.load %arg17[%c8, %c0_15] : memref<32x32xf32, #tpu.memory_space<vmem>>, vector<2x32xf32>
    tpu.vector_store %arg17[%c8, %c0_15], %19 {strides = array<i32>} : memref<32x32xf32, #tpu.memory_space<vmem>>, vector<2x32xf32>,
    %21 = vector.extract_strided_slice %10 {offsets = [0, 160], sizes = [2, 32], strides = [1, 1]} : vector<2x512xf32> to vector<2x32xf32>
    %c10 = arith.constant 10 : index
    %c0_16 = arith.constant 0 : index
    %22 = vector.load %arg17[%c10, %c0_16] : memref<32x32xf32, #tpu.memory_space<vmem>>, vector<2x32xf32>
    tpu.vector_store %arg17[%c10, %c0_16], %21 {strides = array<i32>} : memref<32x32xf32, #tpu.memory_space<vmem>>, vector<2x32xf32>,
    %23 = vector.extract_strided_slice %10 {offsets = [0, 192], sizes = [2, 32], strides = [1, 1]} : vector<2x512xf32> to vector<2x32xf32>
    %c12 = arith.constant 12 : index
    %c0_17 = arith.constant 0 : index
    %24 = vector.load %arg17[%c12, %c0_17] : memref<32x32xf32, #tpu.memory_space<vmem>>, vector<2x32xf32>
    tpu.vector_store %arg17[%c12, %c0_17], %23 {strides = array<i32>} : memref<32x32xf32, #tpu.memory_space<vmem>>, vector<2x32xf32>,
    %25 = vector.extract_strided_slice %10 {offsets = [0, 224], sizes = [2, 32], strides = [1, 1]} : vector<2x512xf32> to vector<2x32xf32>
    %c14 = arith.constant 14 : index
    %c0_18 = arith.constant 0 : index
    %26 = vector.load %arg17[%c14, %c0_18] : memref<32x32xf32, #tpu.memory_space<vmem>>, vector<2x32xf32>
    tpu.vector_store %arg17[%c14, %c0_18], %25 {strides = array<i32>} : memref<32x32xf32, #tpu.memory_space<vmem>>, vector<2x32xf32>,
    %27 = vector.extract_strided_slice %10 {offsets = [0, 256], sizes = [2, 32], strides = [1, 1]} : vector<2x512xf32> to vector<2x32xf32>
    %c16 = arith.constant 16 : index
    %c0_19 = arith.constant 0 : index
    %28 = vector.load %arg17[%c16, %c0_19] : memref<32x32xf32, #tpu.memory_space<vmem>>, vector<2x32xf32>
    tpu.vector_store %arg17[%c16, %c0_19], %27 {strides = array<i32>} : memref<32x32xf32, #tpu.memory_space<vmem>>, vector<2x32xf32>,
    %29 = vector.extract_strided_slice %10 {offsets = [0, 288], sizes = [2, 32], strides = [1, 1]} : vector<2x512xf32> to vector<2x32xf32>
    %c18 = arith.constant 18 : index
    %c0_20 = arith.constant 0 : index
    %30 = vector.load %arg17[%c18, %c0_20] : memref<32x32xf32, #tpu.memory_space<vmem>>, vector<2x32xf32>
    tpu.vector_store %arg17[%c18, %c0_20], %29 {strides = array<i32>} : memref<32x32xf32, #tpu.memory_space<vmem>>, vector<2x32xf32>,
    %31 = vector.extract_strided_slice %10 {offsets = [0, 320], sizes = [2, 32], strides = [1, 1]} : vector<2x512xf32> to vector<2x32xf32>
    %c20 = arith.constant 20 : index
    %c0_21 = arith.constant 0 : index
    %32 = vector.load %arg17[%c20, %c0_21] : memref<32x32xf32, #tpu.memory_space<vmem>>, vector<2x32xf32>
    tpu.vector_store %arg17[%c20, %c0_21], %31 {strides = array<i32>} : memref<32x32xf32, #tpu.memory_space<vmem>>, vector<2x32xf32>,
    %33 = vector.extract_strided_slice %10 {offsets = [0, 352], sizes = [2, 32], strides = [1, 1]} : vector<2x512xf32> to vector<2x32xf32>
    %c22 = arith.constant 22 : index
    %c0_22 = arith.constant 0 : index
    %34 = vector.load %arg17[%c22, %c0_22] : memref<32x32xf32, #tpu.memory_space<vmem>>, vector<2x32xf32>
    tpu.vector_store %arg17[%c22, %c0_22], %33 {strides = array<i32>} : memref<32x32xf32, #tpu.memory_space<vmem>>, vector<2x32xf32>,
    %35 = vector.extract_strided_slice %10 {offsets = [0, 384], sizes = [2, 32], strides = [1, 1]} : vector<2x512xf32> to vector<2x32xf32>
    %c24 = arith.constant 24 : index
    %c0_23 = arith.constant 0 : index
    %36 = vector.load %arg17[%c24, %c0_23] : memref<32x32xf32, #tpu.memory_space<vmem>>, vector<2x32xf32>
    tpu.vector_store %arg17[%c24, %c0_23], %35 {strides = array<i32>} : memref<32x32xf32, #tpu.memory_space<vmem>>, vector<2x32xf32>,
    %37 = vector.extract_strided_slice %10 {offsets = [0, 416], sizes = [2, 32], strides = [1, 1]} : vector<2x512xf32> to vector<2x32xf32>
    %c26 = arith.constant 26 : index
    %c0_24 = arith.constant 0 : index
    %38 = vector.load %arg17[%c26, %c0_24] : memref<32x32xf32, #tpu.memory_space<vmem>>, vector<2x32xf32>
    tpu.vector_store %arg17[%c26, %c0_24], %37 {strides = array<i32>} : memref<32x32xf32, #tpu.memory_space<vmem>>, vector<2x32xf32>,
    %39 = vector.extract_strided_slice %10 {offsets = [0, 448], sizes = [2, 32], strides = [1, 1]} : vector<2x512xf32> to vector<2x32xf32>
    %c28 = arith.constant 28 : index
    %c0_25 = arith.constant 0 : index
    %40 = vector.load %arg17[%c28, %c0_25] : memref<32x32xf32, #tpu.memory_space<vmem>>, vector<2x32xf32>
    tpu.vector_store %arg17[%c28, %c0_25], %39 {strides = array<i32>} : memref<32x32xf32, #tpu.memory_space<vmem>>, vector<2x32xf32>,
    %41 = vector.extract_strided_slice %10 {offsets = [0, 480], sizes = [2, 32], strides = [1, 1]} : vector<2x512xf32> to vector<2x32xf32>
    %c30 = arith.constant 30 : index
    %c0_26 = arith.constant 0 : index
    %42 = vector.load %arg17[%c30, %c0_26] : memref<32x32xf32, #tpu.memory_space<vmem>>, vector<2x32xf32>
    tpu.vector_store %arg17[%c30, %c0_26], %41 {strides = array<i32>} : memref<32x32xf32, #tpu.memory_space<vmem>>, vector<2x32xf32>,
    %c0_27 = arith.constant 0 : index
    %c0_28 = arith.constant 0 : index
    %43 = vector.load %arg6[%c0_27, %c0_28] : memref<1x32xf32, #tpu.memory_space<vmem>>, vector<1x32xf32>
    %44 = vector.shape_cast %43 : vector<1x32xf32> to vector<1x32xf32>
    %45 = vector.broadcast %44 : vector<1x32xf32> to vector<2x32xf32>
    %c0_29 = arith.constant 0 : index
    %c0_30 = arith.constant 0 : index
    %46 = vector.load %arg18[%c0_29, %c0_30] : memref<26x32xf32, #tpu.memory_space<vmem>>, vector<2x32xf32>
    tpu.vector_store %arg18[%c0_29, %c0_30], %45 {strides = array<i32>} : memref<26x32xf32, #tpu.memory_space<vmem>>, vector<2x32xf32>,
    %c0_31 = arith.constant 0 : index
    %47 = memref.load %arg0[%c0_31] : memref<24xi32, #tpu.memory_space<smem>>
    %c2_i32 = arith.constant 2 : i32
    %48 = arith.muli %47, %c2_i32 : i32
    %c0_i32 = arith.constant 0 : i32
    %49 = arith.addi %48, %c0_i32 : i32
    %50 = arith.index_cast %49 : i32 to index
    %c0_32 = arith.constant 0 : index
    %51 = vector.load %arg17[%50, %c0_32] : memref<32x32xf32, #tpu.memory_space<vmem>>, vector<1x32xf32>
    %c2_33 = arith.constant 2 : index
    %c0_34 = arith.constant 0 : index
    %52 = vector.load %arg18[%c2_33, %c0_34] : memref<26x32xf32, #tpu.memory_space<vmem>>, vector<1x32xf32>
    tpu.vector_store %arg18[%c2_33, %c0_34], %51 {strides = array<i32>} : memref<26x32xf32, #tpu.memory_space<vmem>>, vector<1x32xf32>,
    %c1 = arith.constant 1 : index
    %53 = memref.load %arg0[%c1] : memref<24xi32, #tpu.memory_space<smem>>
    %c2_i32_35 = arith.constant 2 : i32
    %54 = arith.muli %53, %c2_i32_35 : i32
    %c1_i32 = arith.constant 1 : i32
    %55 = arith.addi %54, %c1_i32 : i32
    %56 = arith.index_cast %55 : i32 to index
    %c0_36 = arith.constant 0 : index
    %57 = vector.load %arg17[%56, %c0_36] : memref<32x32xf32, #tpu.memory_space<vmem>>, vector<1x32xf32>
    %c3 = arith.constant 3 : index
    %c0_37 = arith.constant 0 : index
    %58 = vector.load %arg18[%c3, %c0_37] : memref<26x32xf32, #tpu.memory_space<vmem>>, vector<1x32xf32>
    tpu.vector_store %arg18[%c3, %c0_37], %57 {strides = array<i32>} : memref<26x32xf32, #tpu.memory_space<vmem>>, vector<1x32xf32>,
    %c2_38 = arith.constant 2 : index
    %59 = memref.load %arg0[%c2_38] : memref<24xi32, #tpu.memory_space<smem>>
    %c2_i32_39 = arith.constant 2 : i32
    %60 = arith.muli %59, %c2_i32_39 : i32
    %c0_i32_40 = arith.constant 0 : i32
    %61 = arith.addi %60, %c0_i32_40 : i32
    %62 = arith.index_cast %61 : i32 to index
    %c0_41 = arith.constant 0 : index
    %63 = vector.load %arg17[%62, %c0_41] : memref<32x32xf32, #tpu.memory_space<vmem>>, vector<1x32xf32>
    %c4_42 = arith.constant 4 : index
    %c0_43 = arith.constant 0 : index
    %64 = vector.load %arg18[%c4_42, %c0_43] : memref<26x32xf32, #tpu.memory_space<vmem>>, vector<1x32xf32>
    tpu.vector_store %arg18[%c4_42, %c0_43], %63 {strides = array<i32>} : memref<26x32xf32, #tpu.memory_space<vmem>>, vector<1x32xf32>,
    %c3_44 = arith.constant 3 : index
    %65 = memref.load %arg0[%c3_44] : memref<24xi32, #tpu.memory_space<smem>>
    %c2_i32_45 = arith.constant 2 : i32
    %66 = arith.muli %65, %c2_i32_45 : i32
    %c1_i32_46 = arith.constant 1 : i32
    %67 = arith.addi %66, %c1_i32_46 : i32
    %68 = arith.index_cast %67 : i32 to index
    %c0_47 = arith.constant 0 : index
    %69 = vector.load %arg17[%68, %c0_47] : memref<32x32xf32, #tpu.memory_space<vmem>>, vector<1x32xf32>
    %c5 = arith.constant 5 : index
    %c0_48 = arith.constant 0 : index
    %70 = vector.load %arg18[%c5, %c0_48] : memref<26x32xf32, #tpu.memory_space<vmem>>, vector<1x32xf32>
    tpu.vector_store %arg18[%c5, %c0_48], %69 {strides = array<i32>} : memref<26x32xf32, #tpu.memory_space<vmem>>, vector<1x32xf32>,
    %c4_49 = arith.constant 4 : index
    %71 = memref.load %arg0[%c4_49] : memref<24xi32, #tpu.memory_space<smem>>
    %c2_i32_50 = arith.constant 2 : i32
    %72 = arith.muli %71, %c2_i32_50 : i32
    %c0_i32_51 = arith.constant 0 : i32
    %73 = arith.addi %72, %c0_i32_51 : i32
    %74 = arith.index_cast %73 : i32 to index
    %c0_52 = arith.constant 0 : index
    %75 = vector.load %arg17[%74, %c0_52] : memref<32x32xf32, #tpu.memory_space<vmem>>, vector<1x32xf32>
    %c6_53 = arith.constant 6 : index
    %c0_54 = arith.constant 0 : index
    %76 = vector.load %arg18[%c6_53, %c0_54] : memref<26x32xf32, #tpu.memory_space<vmem>>, vector<1x32xf32>
    tpu.vector_store %arg18[%c6_53, %c0_54], %75 {strides = array<i32>} : memref<26x32xf32, #tpu.memory_space<vmem>>, vector<1x32xf32>,
    %c5_55 = arith.constant 5 : index
    %77 = memref.load %arg0[%c5_55] : memref<24xi32, #tpu.memory_space<smem>>
    %c2_i32_56 = arith.constant 2 : i32
    %78 = arith.muli %77, %c2_i32_56 : i32
    %c1_i32_57 = arith.constant 1 : i32
    %79 = arith.addi %78, %c1_i32_57 : i32
    %80 = arith.index_cast %79 : i32 to index
    %c0_58 = arith.constant 0 : index
    %81 = vector.load %arg17[%80, %c0_58] : memref<32x32xf32, #tpu.memory_space<vmem>>, vector<1x32xf32>
    %c7 = arith.constant 7 : index
    %c0_59 = arith.constant 0 : index
    %82 = vector.load %arg18[%c7, %c0_59] : memref<26x32xf32, #tpu.memory_space<vmem>>, vector<1x32xf32>
    tpu.vector_store %arg18[%c7, %c0_59], %81 {strides = array<i32>} : memref<26x32xf32, #tpu.memory_space<vmem>>, vector<1x32xf32>,
    %c6_60 = arith.constant 6 : index
    %83 = memref.load %arg0[%c6_60] : memref<24xi32, #tpu.memory_space<smem>>
    %c2_i32_61 = arith.constant 2 : i32
    %84 = arith.muli %83, %c2_i32_61 : i32
    %c0_i32_62 = arith.constant 0 : i32
    %85 = arith.addi %84, %c0_i32_62 : i32
    %86 = arith.index_cast %85 : i32 to index
    %c0_63 = arith.constant 0 : index
    %87 = vector.load %arg17[%86, %c0_63] : memref<32x32xf32, #tpu.memory_space<vmem>>, vector<1x32xf32>
    %c8_64 = arith.constant 8 : index
    %c0_65 = arith.constant 0 : index
    %88 = vector.load %arg18[%c8_64, %c0_65] : memref<26x32xf32, #tpu.memory_space<vmem>>, vector<1x32xf32>
    tpu.vector_store %arg18[%c8_64, %c0_65], %87 {strides = array<i32>} : memref<26x32xf32, #tpu.memory_space<vmem>>, vector<1x32xf32>,
    %c7_66 = arith.constant 7 : index
    %89 = memref.load %arg0[%c7_66] : memref<24xi32, #tpu.memory_space<smem>>
    %c2_i32_67 = arith.constant 2 : i32
    %90 = arith.muli %89, %c2_i32_67 : i32
    %c1_i32_68 = arith.constant 1 : i32
    %91 = arith.addi %90, %c1_i32_68 : i32
    %92 = arith.index_cast %91 : i32 to index
    %c0_69 = arith.constant 0 : index
    %93 = vector.load %arg17[%92, %c0_69] : memref<32x32xf32, #tpu.memory_space<vmem>>, vector<1x32xf32>
    %c9 = arith.constant 9 : index
    %c0_70 = arith.constant 0 : index
    %94 = vector.load %arg18[%c9, %c0_70] : memref<26x32xf32, #tpu.memory_space<vmem>>, vector<1x32xf32>
    tpu.vector_store %arg18[%c9, %c0_70], %93 {strides = array<i32>} : memref<26x32xf32, #tpu.memory_space<vmem>>, vector<1x32xf32>,
    %c8_71 = arith.constant 8 : index
    %95 = memref.load %arg0[%c8_71] : memref<24xi32, #tpu.memory_space<smem>>
    %c2_i32_72 = arith.constant 2 : i32
    %96 = arith.muli %95, %c2_i32_72 : i32
    %c0_i32_73 = arith.constant 0 : i32
    %97 = arith.addi %96, %c0_i32_73 : i32
    %98 = arith.index_cast %97 : i32 to index
    %c0_74 = arith.constant 0 : index
    %99 = vector.load %arg17[%98, %c0_74] : memref<32x32xf32, #tpu.memory_space<vmem>>, vector<1x32xf32>
    %c10_75 = arith.constant 10 : index
    %c0_76 = arith.constant 0 : index
    %100 = vector.load %arg18[%c10_75, %c0_76] : memref<26x32xf32, #tpu.memory_space<vmem>>, vector<1x32xf32>
    tpu.vector_store %arg18[%c10_75, %c0_76], %99 {strides = array<i32>} : memref<26x32xf32, #tpu.memory_space<vmem>>, vector<1x32xf32>,
    %c9_77 = arith.constant 9 : index
    %101 = memref.load %arg0[%c9_77] : memref<24xi32, #tpu.memory_space<smem>>
    %c2_i32_78 = arith.constant 2 : i32
    %102 = arith.muli %101, %c2_i32_78 : i32
    %c1_i32_79 = arith.constant 1 : i32
    %103 = arith.addi %102, %c1_i32_79 : i32
    %104 = arith.index_cast %103 : i32 to index
    %c0_80 = arith.constant 0 : index
    %105 = vector.load %arg17[%104, %c0_80] : memref<32x32xf32, #tpu.memory_space<vmem>>, vector<1x32xf32>
    %c11 = arith.constant 11 : index
    %c0_81 = arith.constant 0 : index
    %106 = vector.load %arg18[%c11, %c0_81] : memref<26x32xf32, #tpu.memory_space<vmem>>, vector<1x32xf32>
    tpu.vector_store %arg18[%c11, %c0_81], %105 {strides = array<i32>} : memref<26x32xf32, #tpu.memory_space<vmem>>, vector<1x32xf32>,
    %c10_82 = arith.constant 10 : index
    %107 = memref.load %arg0[%c10_82] : memref<24xi32, #tpu.memory_space<smem>>
    %c2_i32_83 = arith.constant 2 : i32
    %108 = arith.muli %107, %c2_i32_83 : i32
    %c0_i32_84 = arith.constant 0 : i32
    %109 = arith.addi %108, %c0_i32_84 : i32
    %110 = arith.index_cast %109 : i32 to index
    %c0_85 = arith.constant 0 : index
    %111 = vector.load %arg17[%110, %c0_85] : memref<32x32xf32, #tpu.memory_space<vmem>>, vector<1x32xf32>
    %c12_86 = arith.constant 12 : index
    %c0_87 = arith.constant 0 : index
    %112 = vector.load %arg18[%c12_86, %c0_87] : memref<26x32xf32, #tpu.memory_space<vmem>>, vector<1x32xf32>
    tpu.vector_store %arg18[%c12_86, %c0_87], %111 {strides = array<i32>} : memref<26x32xf32, #tpu.memory_space<vmem>>, vector<1x32xf32>,
    %c11_88 = arith.constant 11 : index
    %113 = memref.load %arg0[%c11_88] : memref<24xi32, #tpu.memory_space<smem>>
    %c2_i32_89 = arith.constant 2 : i32
    %114 = arith.muli %113, %c2_i32_89 : i32
    %c1_i32_90 = arith.constant 1 : i32
    %115 = arith.addi %114, %c1_i32_90 : i32
    %116 = arith.index_cast %115 : i32 to index
    %c0_91 = arith.constant 0 : index
    %117 = vector.load %arg17[%116, %c0_91] : memref<32x32xf32, #tpu.memory_space<vmem>>, vector<1x32xf32>
    %c13 = arith.constant 13 : index
    %c0_92 = arith.constant 0 : index
    %118 = vector.load %arg18[%c13, %c0_92] : memref<26x32xf32, #tpu.memory_space<vmem>>, vector<1x32xf32>
    tpu.vector_store %arg18[%c13, %c0_92], %117 {strides = array<i32>} : memref<26x32xf32, #tpu.memory_space<vmem>>, vector<1x32xf32>,
    %c12_93 = arith.constant 12 : index
    %119 = memref.load %arg0[%c12_93] : memref<24xi32, #tpu.memory_space<smem>>
    %c2_i32_94 = arith.constant 2 : i32
    %120 = arith.muli %119, %c2_i32_94 : i32
    %c0_i32_95 = arith.constant 0 : i32
    %121 = arith.addi %120, %c0_i32_95 : i32
    %122 = arith.index_cast %121 : i32 to index
    %c0_96 = arith.constant 0 : index
    %123 = vector.load %arg17[%122, %c0_96] : memref<32x32xf32, #tpu.memory_space<vmem>>, vector<1x32xf32>
    %c14_97 = arith.constant 14 : index
    %c0_98 = arith.constant 0 : index
    %124 = vector.load %arg18[%c14_97, %c0_98] : memref<26x32xf32, #tpu.memory_space<vmem>>, vector<1x32xf32>
    tpu.vector_store %arg18[%c14_97, %c0_98], %123 {strides = array<i32>} : memref<26x32xf32, #tpu.memory_space<vmem>>, vector<1x32xf32>,
    %c13_99 = arith.constant 13 : index
    %125 = memref.load %arg0[%c13_99] : memref<24xi32, #tpu.memory_space<smem>>
    %c2_i32_100 = arith.constant 2 : i32
    %126 = arith.muli %125, %c2_i32_100 : i32
    %c1_i32_101 = arith.constant 1 : i32
    %127 = arith.addi %126, %c1_i32_101 : i32
    %128 = arith.index_cast %127 : i32 to index
    %c0_102 = arith.constant 0 : index
    %129 = vector.load %arg17[%128, %c0_102] : memref<32x32xf32, #tpu.memory_space<vmem>>, vector<1x32xf32>
    %c15 = arith.constant 15 : index
    %c0_103 = arith.constant 0 : index
    %130 = vector.load %arg18[%c15, %c0_103] : memref<26x32xf32, #tpu.memory_space<vmem>>, vector<1x32xf32>
    tpu.vector_store %arg18[%c15, %c0_103], %129 {strides = array<i32>} : memref<26x32xf32, #tpu.memory_space<vmem>>, vector<1x32xf32>,
    %c14_104 = arith.constant 14 : index
    %131 = memref.load %arg0[%c14_104] : memref<24xi32, #tpu.memory_space<smem>>
    %c2_i32_105 = arith.constant 2 : i32
    %132 = arith.muli %131, %c2_i32_105 : i32
    %c0_i32_106 = arith.constant 0 : i32
    %133 = arith.addi %132, %c0_i32_106 : i32
    %134 = arith.index_cast %133 : i32 to index
    %c0_107 = arith.constant 0 : index
    %135 = vector.load %arg17[%134, %c0_107] : memref<32x32xf32, #tpu.memory_space<vmem>>, vector<1x32xf32>
    %c16_108 = arith.constant 16 : index
    %c0_109 = arith.constant 0 : index
    %136 = vector.load %arg18[%c16_108, %c0_109] : memref<26x32xf32, #tpu.memory_space<vmem>>, vector<1x32xf32>
    tpu.vector_store %arg18[%c16_108, %c0_109], %135 {strides = array<i32>} : memref<26x32xf32, #tpu.memory_space<vmem>>, vector<1x32xf32>,
    %c15_110 = arith.constant 15 : index
    %137 = memref.load %arg0[%c15_110] : memref<24xi32, #tpu.memory_space<smem>>
    %c2_i32_111 = arith.constant 2 : i32
    %138 = arith.muli %137, %c2_i32_111 : i32
    %c1_i32_112 = arith.constant 1 : i32
    %139 = arith.addi %138, %c1_i32_112 : i32
    %140 = arith.index_cast %139 : i32 to index
    %c0_113 = arith.constant 0 : index
    %141 = vector.load %arg17[%140, %c0_113] : memref<32x32xf32, #tpu.memory_space<vmem>>, vector<1x32xf32>
    %c17 = arith.constant 17 : index
    %c0_114 = arith.constant 0 : index
    %142 = vector.load %arg18[%c17, %c0_114] : memref<26x32xf32, #tpu.memory_space<vmem>>, vector<1x32xf32>
    tpu.vector_store %arg18[%c17, %c0_114], %141 {strides = array<i32>} : memref<26x32xf32, #tpu.memory_space<vmem>>, vector<1x32xf32>,
    %c16_115 = arith.constant 16 : index
    %143 = memref.load %arg0[%c16_115] : memref<24xi32, #tpu.memory_space<smem>>
    %c2_i32_116 = arith.constant 2 : i32
    %144 = arith.muli %143, %c2_i32_116 : i32
    %c0_i32_117 = arith.constant 0 : i32
    %145 = arith.addi %144, %c0_i32_117 : i32
    %146 = arith.index_cast %145 : i32 to index
    %c0_118 = arith.constant 0 : index
    %147 = vector.load %arg17[%146, %c0_118] : memref<32x32xf32, #tpu.memory_space<vmem>>, vector<1x32xf32>
    %c18_119 = arith.constant 18 : index
    %c0_120 = arith.constant 0 : index
    %148 = vector.load %arg18[%c18_119, %c0_120] : memref<26x32xf32, #tpu.memory_space<vmem>>, vector<1x32xf32>
    tpu.vector_store %arg18[%c18_119, %c0_120], %147 {strides = array<i32>} : memref<26x32xf32, #tpu.memory_space<vmem>>, vector<1x32xf32>,
    %c17_121 = arith.constant 17 : index
    %149 = memref.load %arg0[%c17_121] : memref<24xi32, #tpu.memory_space<smem>>
    %c2_i32_122 = arith.constant 2 : i32
    %150 = arith.muli %149, %c2_i32_122 : i32
    %c1_i32_123 = arith.constant 1 : i32
    %151 = arith.addi %150, %c1_i32_123 : i32
    %152 = arith.index_cast %151 : i32 to index
    %c0_124 = arith.constant 0 : index
    %153 = vector.load %arg17[%152, %c0_124] : memref<32x32xf32, #tpu.memory_space<vmem>>, vector<1x32xf32>
    %c19 = arith.constant 19 : index
    %c0_125 = arith.constant 0 : index
    %154 = vector.load %arg18[%c19, %c0_125] : memref<26x32xf32, #tpu.memory_space<vmem>>, vector<1x32xf32>
    tpu.vector_store %arg18[%c19, %c0_125], %153 {strides = array<i32>} : memref<26x32xf32, #tpu.memory_space<vmem>>, vector<1x32xf32>,
    %c18_126 = arith.constant 18 : index
    %155 = memref.load %arg0[%c18_126] : memref<24xi32, #tpu.memory_space<smem>>
    %c2_i32_127 = arith.constant 2 : i32
    %156 = arith.muli %155, %c2_i32_127 : i32
    %c0_i32_128 = arith.constant 0 : i32
    %157 = arith.addi %156, %c0_i32_128 : i32
    %158 = arith.index_cast %157 : i32 to index
    %c0_129 = arith.constant 0 : index
    %159 = vector.load %arg17[%158, %c0_129] : memref<32x32xf32, #tpu.memory_space<vmem>>, vector<1x32xf32>
    %c20_130 = arith.constant 20 : index
    %c0_131 = arith.constant 0 : index
    %160 = vector.load %arg18[%c20_130, %c0_131] : memref<26x32xf32, #tpu.memory_space<vmem>>, vector<1x32xf32>
    tpu.vector_store %arg18[%c20_130, %c0_131], %159 {strides = array<i32>} : memref<26x32xf32, #tpu.memory_space<vmem>>, vector<1x32xf32>,
    %c19_132 = arith.constant 19 : index
    %161 = memref.load %arg0[%c19_132] : memref<24xi32, #tpu.memory_space<smem>>
    %c2_i32_133 = arith.constant 2 : i32
    %162 = arith.muli %161, %c2_i32_133 : i32
    %c1_i32_134 = arith.constant 1 : i32
    %163 = arith.addi %162, %c1_i32_134 : i32
    %164 = arith.index_cast %163 : i32 to index
    %c0_135 = arith.constant 0 : index
    %165 = vector.load %arg17[%164, %c0_135] : memref<32x32xf32, #tpu.memory_space<vmem>>, vector<1x32xf32>
    %c21 = arith.constant 21 : index
    %c0_136 = arith.constant 0 : index
    %166 = vector.load %arg18[%c21, %c0_136] : memref<26x32xf32, #tpu.memory_space<vmem>>, vector<1x32xf32>
    tpu.vector_store %arg18[%c21, %c0_136], %165 {strides = array<i32>} : memref<26x32xf32, #tpu.memory_space<vmem>>, vector<1x32xf32>,
    %c20_137 = arith.constant 20 : index
    %167 = memref.load %arg0[%c20_137] : memref<24xi32, #tpu.memory_space<smem>>
    %c2_i32_138 = arith.constant 2 : i32
    %168 = arith.muli %167, %c2_i32_138 : i32
    %c0_i32_139 = arith.constant 0 : i32
    %169 = arith.addi %168, %c0_i32_139 : i32
    %170 = arith.index_cast %169 : i32 to index
    %c0_140 = arith.constant 0 : index
    %171 = vector.load %arg17[%170, %c0_140] : memref<32x32xf32, #tpu.memory_space<vmem>>, vector<1x32xf32>
    %c22_141 = arith.constant 22 : index
    %c0_142 = arith.constant 0 : index
    %172 = vector.load %arg18[%c22_141, %c0_142] : memref<26x32xf32, #tpu.memory_space<vmem>>, vector<1x32xf32>
    tpu.vector_store %arg18[%c22_141, %c0_142], %171 {strides = array<i32>} : memref<26x32xf32, #tpu.memory_space<vmem>>, vector<1x32xf32>,
    %c21_143 = arith.constant 21 : index
    %173 = memref.load %arg0[%c21_143] : memref<24xi32, #tpu.memory_space<smem>>
    %c2_i32_144 = arith.constant 2 : i32
    %174 = arith.muli %173, %c2_i32_144 : i32
    %c1_i32_145 = arith.constant 1 : i32
    %175 = arith.addi %174, %c1_i32_145 : i32
    %176 = arith.index_cast %175 : i32 to index
    %c0_146 = arith.constant 0 : index
    %177 = vector.load %arg17[%176, %c0_146] : memref<32x32xf32, #tpu.memory_space<vmem>>, vector<1x32xf32>
    %c23 = arith.constant 23 : index
    %c0_147 = arith.constant 0 : index
    %178 = vector.load %arg18[%c23, %c0_147] : memref<26x32xf32, #tpu.memory_space<vmem>>, vector<1x32xf32>
    tpu.vector_store %arg18[%c23, %c0_147], %177 {strides = array<i32>} : memref<26x32xf32, #tpu.memory_space<vmem>>, vector<1x32xf32>,
    %c22_148 = arith.constant 22 : index
    %179 = memref.load %arg0[%c22_148] : memref<24xi32, #tpu.memory_space<smem>>
    %c2_i32_149 = arith.constant 2 : i32
    %180 = arith.muli %179, %c2_i32_149 : i32
    %c0_i32_150 = arith.constant 0 : i32
    %181 = arith.addi %180, %c0_i32_150 : i32
    %182 = arith.index_cast %181 : i32 to index
    %c0_151 = arith.constant 0 : index
    %183 = vector.load %arg17[%182, %c0_151] : memref<32x32xf32, #tpu.memory_space<vmem>>, vector<1x32xf32>
    %c24_152 = arith.constant 24 : index
    %c0_153 = arith.constant 0 : index
    %184 = vector.load %arg18[%c24_152, %c0_153] : memref<26x32xf32, #tpu.memory_space<vmem>>, vector<1x32xf32>
    tpu.vector_store %arg18[%c24_152, %c0_153], %183 {strides = array<i32>} : memref<26x32xf32, #tpu.memory_space<vmem>>, vector<1x32xf32>,
    %c23_154 = arith.constant 23 : index
    %185 = memref.load %arg0[%c23_154] : memref<24xi32, #tpu.memory_space<smem>>
    %c2_i32_155 = arith.constant 2 : i32
    %186 = arith.muli %185, %c2_i32_155 : i32
    %c1_i32_156 = arith.constant 1 : i32
    %187 = arith.addi %186, %c1_i32_156 : i32
    %188 = arith.index_cast %187 : i32 to index
    %c0_157 = arith.constant 0 : index
    %189 = vector.load %arg17[%188, %c0_157] : memref<32x32xf32, #tpu.memory_space<vmem>>, vector<1x32xf32>
    %c25 = arith.constant 25 : index
    %c0_158 = arith.constant 0 : index
    %190 = vector.load %arg18[%c25, %c0_158] : memref<26x32xf32, #tpu.memory_space<vmem>>, vector<1x32xf32>
    tpu.vector_store %arg18[%c25, %c0_158], %189 {strides = array<i32>} : memref<26x32xf32, #tpu.memory_space<vmem>>, vector<1x32xf32>,
    %c0_159 = arith.constant 0 : index
    %c0_160 = arith.constant 0 : index
    %191 = vector.load %arg18[%c0_159, %c0_160] : memref<26x32xf32, #tpu.memory_space<vmem>>, vector<26x32xf32>
    %c0_161 = arith.constant 0 : index
    %c0_162 = arith.constant 0 : index
    %c0_163 = arith.constant 0 : index
    %192 = vector.load %arg11[%c0_161, %c0_162, %c0_163] : memref<6x64x1024xbf16, #tpu.memory_space<vmem>>, vector<1x64x1024xbf16>
    %193 = vector.shape_cast %192 : vector<1x64x1024xbf16> to vector<64x1024xbf16>
    %c1_164 = arith.constant 1 : index
    %c0_165 = arith.constant 0 : index
    %c0_166 = arith.constant 0 : index
    %194 = vector.load %arg11[%c1_164, %c0_165, %c0_166] : memref<6x64x1024xbf16, #tpu.memory_space<vmem>>, vector<1x64x1024xbf16>
    %195 = vector.shape_cast %194 : vector<1x64x1024xbf16> to vector<64x1024xbf16>
    %c2_167 = arith.constant 2 : index
    %c0_168 = arith.constant 0 : index
    %c0_169 = arith.constant 0 : index
    %196 = vector.load %arg11[%c2_167, %c0_168, %c0_169] : memref<6x64x1024xbf16, #tpu.memory_space<vmem>>, vector<1x64x1024xbf16>
    %197 = vector.shape_cast %196 : vector<1x64x1024xbf16> to vector<64x1024xbf16>
    %c0_170 = arith.constant 0 : index
    %c0_171 = arith.constant 0 : index
    %c0_172 = arith.constant 0 : index
    %198 = vector.load %arg8[%c0_170, %c0_171, %c0_172] : memref<2x32x128xf32, #tpu.memory_space<vmem>>, vector<1x32x128xf32>
    %199 = vector.shape_cast %198 : vector<1x32x128xf32> to vector<32x128xf32>
    %cst_173 = arith.constant dense<0.000000e+00> : vector<26x128xf32>
    %200 = tpu.matmul %191, %199, %cst_173 {dimension_numbers = #tpu.dot_dimension_numbers<[1], [0], [0], [1], [0, 0, 1, 1], [], []>} : vector<26x32xf32>, vector<32x128xf32>, vector<26x128xf32> -> vector<26x128xf32>
    %201 = vector.extract_strided_slice %200 {offsets = [0, 0], sizes = [26, 64], strides = [1, 1]} : vector<26x128xf32> to vector<26x64xf32>
    %202 = vector.extract_strided_slice %200 {offsets = [0, 64], sizes = [26, 64], strides = [1, 1]} : vector<26x128xf32> to vector<26x64xf32>
    %c3_174 = arith.constant 3 : index
    %c0_175 = arith.constant 0 : index
    %203 = vector.load %arg14[%c3_174, %c0_175] : memref<14x64xf32, #tpu.memory_space<vmem>>, vector<1x64xf32>
    %204 = vector.broadcast %203 : vector<1x64xf32> to vector<26x64xf32>
    %205 = arith.mulf %201, %204 : vector<26x64xf32>
    %c4_176 = arith.constant 4 : index
    %c0_177 = arith.constant 0 : index
    %206 = vector.load %arg14[%c4_176, %c0_177] : memref<14x64xf32, #tpu.memory_space<vmem>>, vector<1x64xf32>
    %207 = vector.broadcast %206 : vector<1x64xf32> to vector<26x64xf32>
    %208 = arith.addf %205, %207 : vector<26x64xf32>
    %c0_178 = arith.constant 0 : index
    %c0_179 = arith.constant 0 : index
    %c0_180 = arith.constant 0 : index
    %209 = vector.load %arg7[%c0_178, %c0_179, %c0_180] : memref<3x26x26xf32, #tpu.memory_space<vmem>>, vector<1x26x26xf32>
    %210 = vector.shape_cast %209 : vector<1x26x26xf32> to vector<26x26xf32>
    %cst_181 = arith.constant dense<0.000000e+00> : vector<26x64xf32>
    %211 = tpu.matmul %210, %201, %cst_181 {dimension_numbers = #tpu.dot_dimension_numbers<[1], [0], [0], [1], [0, 0, 1, 1], [], []>} : vector<26x26xf32>, vector<26x64xf32>, vector<26x64xf32> -> vector<26x64xf32>
    %c2_182 = arith.constant 2 : index
    %c0_183 = arith.constant 0 : index
    %212 = vector.load %arg14[%c2_182, %c0_183] : memref<14x64xf32, #tpu.memory_space<vmem>>, vector<1x64xf32>
    %213 = vector.broadcast %212 : vector<1x64xf32> to vector<26x64xf32>
    %214 = arith.mulf %211, %213 : vector<26x64xf32>
    %215 = arith.addf %208, %214 : vector<26x64xf32>
    %c1_184 = arith.constant 1 : index
    %c0_185 = arith.constant 0 : index
    %c0_186 = arith.constant 0 : index
    %216 = vector.load %arg7[%c1_184, %c0_185, %c0_186] : memref<3x26x26xf32, #tpu.memory_space<vmem>>, vector<1x26x26xf32>
    %217 = vector.shape_cast %216 : vector<1x26x26xf32> to vector<26x26xf32>
    %cst_187 = arith.constant dense<0.000000e+00> : vector<26x64xf32>
    %218 = tpu.matmul %217, %201, %cst_187 {dimension_numbers = #tpu.dot_dimension_numbers<[1], [0], [0], [1], [0, 0, 1, 1], [], []>} : vector<26x26xf32>, vector<26x64xf32>, vector<26x64xf32> -> vector<26x64xf32>
    %c1_188 = arith.constant 1 : index
    %c0_189 = arith.constant 0 : index
    %219 = vector.load %arg14[%c1_188, %c0_189] : memref<14x64xf32, #tpu.memory_space<vmem>>, vector<1x64xf32>
    %220 = vector.broadcast %219 : vector<1x64xf32> to vector<26x64xf32>
    %221 = arith.mulf %218, %220 : vector<26x64xf32>
    %222 = arith.addf %215, %221 : vector<26x64xf32>
    %c2_190 = arith.constant 2 : index
    %c0_191 = arith.constant 0 : index
    %c0_192 = arith.constant 0 : index
    %223 = vector.load %arg7[%c2_190, %c0_191, %c0_192] : memref<3x26x26xf32, #tpu.memory_space<vmem>>, vector<1x26x26xf32>
    %224 = vector.shape_cast %223 : vector<1x26x26xf32> to vector<26x26xf32>
    %cst_193 = arith.constant dense<0.000000e+00> : vector<26x64xf32>
    %225 = tpu.matmul %224, %201, %cst_193 {dimension_numbers = #tpu.dot_dimension_numbers<[1], [0], [0], [1], [0, 0, 1, 1], [], []>} : vector<26x26xf32>, vector<26x64xf32>, vector<26x64xf32> -> vector<26x64xf32>
    %c0_194 = arith.constant 0 : index
    %c0_195 = arith.constant 0 : index
    %226 = vector.load %arg14[%c0_194, %c0_195] : memref<14x64xf32, #tpu.memory_space<vmem>>, vector<1x64xf32>
    %227 = vector.broadcast %226 : vector<1x64xf32> to vector<26x64xf32>
    %228 = arith.mulf %225, %227 : vector<26x64xf32>
    %229 = arith.addf %222, %228 : vector<26x64xf32>
    %cst_196 = arith.constant 0.000000e+00 : f32
    %230 = vector.broadcast %cst_196 : f32 to vector<26x64xf32>
    %231 = arith.subf %230, %229 : vector<26x64xf32>
    %232 = math.exp %231 : vector<26x64xf32>
    %cst_197 = arith.constant 1.000000e+00 : f32
    %233 = vector.broadcast %cst_197 : f32 to vector<26x64xf32>
    %234 = arith.addf %233, %232 : vector<26x64xf32>
    %235 = tpu.reciprocal %234 {approx = true} : vector<26x64xf32> -> vector<26x64xf32>
    %236 = arith.mulf %229, %235 : vector<26x64xf32>
    %c0_198 = arith.constant 0 : index
    %c0_199 = arith.constant 0 : index
    %c0_200 = arith.constant 0 : index
    %237 = vector.load %arg9[%c0_198, %c0_199, %c0_200] : memref<2x64x64xf32, #tpu.memory_space<vmem>>, vector<1x64x64xf32>
    %238 = vector.shape_cast %237 : vector<1x64x64xf32> to vector<64x64xf32>
    %cst_201 = arith.constant dense<0.000000e+00> : vector<26x64xf32>
    %239 = tpu.matmul %236, %238, %cst_201 {dimension_numbers = #tpu.dot_dimension_numbers<[1], [0], [0], [1], [0, 0, 1, 1], [], []>} : vector<26x64xf32>, vector<64x64xf32>, vector<26x64xf32> -> vector<26x64xf32>
    %c5_202 = arith.constant 5 : index
    %c0_203 = arith.constant 0 : index
    %240 = vector.load %arg14[%c5_202, %c0_203] : memref<14x64xf32, #tpu.memory_space<vmem>>, vector<1x64xf32>
    %241 = vector.broadcast %240 : vector<1x64xf32> to vector<26x64xf32>
    %242 = arith.addf %239, %241 : vector<26x64xf32>
    %cst_204 = arith.constant 0.000000e+00 : f32
    %243 = vector.broadcast %cst_204 : f32 to vector<26x64xf32>
    %244 = arith.maximumf %242, %243 : vector<26x64xf32>
    %245 = math.absf %242 : vector<26x64xf32>
    %cst_205 = arith.constant 0.000000e+00 : f32
    %246 = vector.broadcast %cst_205 : f32 to vector<26x64xf32>
    %247 = arith.subf %246, %245 : vector<26x64xf32>
    %248 = math.exp %247 : vector<26x64xf32>
    %cst_206 = arith.constant 1.000000e+00 : f32
    %249 = vector.broadcast %cst_206 : f32 to vector<26x64xf32>
    %250 = arith.addf %249, %248 : vector<26x64xf32>
    %251 = math.log %250 : vector<26x64xf32>
    %252 = arith.addf %244, %251 : vector<26x64xf32>
    %253 = arith.truncf %252 : vector<26x64xf32> to vector<26x64xbf16>
    %254 = arith.truncf %236 : vector<26x64xf32> to vector<26x64xbf16>
    %cst_207 = arith.constant dense<0.000000e+00> : vector<26x1024xf32>
    %255 = tpu.matmul %253, %193, %cst_207 {dimension_numbers = #tpu.dot_dimension_numbers<[1], [0], [0], [1], [0, 0, 1, 1], [], []>} : vector<26x64xbf16>, vector<64x1024xbf16>, vector<26x1024xf32> -> vector<26x1024xf32>
    %256 = math.exp %255 : vector<26x1024xf32>
    %c0_208 = arith.constant 0 : index
    %c0_209 = arith.constant 0 : index
    %257 = vector.load %arg19[%c0_208, %c0_209] : memref<26x1024xf32, #tpu.memory_space<vmem>>, vector<26x1024xf32>
    tpu.vector_store %arg19[%c0_208, %c0_209], %256 {strides = array<i32>} : memref<26x1024xf32, #tpu.memory_space<vmem>>, vector<26x1024xf32>,
    %258 = arith.mulf %252, %236 : vector<26x64xf32>
    %259 = arith.truncf %258 : vector<26x64xf32> to vector<26x64xbf16>
    %c0_210 = arith.constant 0 : index
    %c0_211 = arith.constant 0 : index
    %260 = vector.load %arg12[%c0_210, %c0_211] : memref<64x1024xbf16, #tpu.memory_space<vmem>>, vector<64x1024xbf16>
    %cst_212 = arith.constant dense<0.000000e+00> : vector<26x1024xf32>
    %261 = tpu.matmul %259, %260, %cst_212 {dimension_numbers = #tpu.dot_dimension_numbers<[1], [0], [0], [1], [0, 0, 1, 1], [], []>} : vector<26x64xbf16>, vector<64x1024xbf16>, vector<26x1024xf32> -> vector<26x1024xf32>
    %cst_213 = arith.constant dense<0.000000e+00> : vector<26x1024xf32>
    %262 = tpu.matmul %254, %195, %cst_213 {dimension_numbers = #tpu.dot_dimension_numbers<[1], [0], [0], [1], [0, 0, 1, 1], [], []>} : vector<26x64xbf16>, vector<64x1024xbf16>, vector<26x1024xf32> -> vector<26x1024xf32>
    %263 = arith.mulf %261, %262 : vector<26x1024xf32>
    %c0_214 = arith.constant 0 : index
    %c0_215 = arith.constant 0 : index
    %264 = vector.load %arg20[%c0_214, %c0_215] : memref<26x1024xf32, #tpu.memory_space<vmem>>, vector<26x1024xf32>
    tpu.vector_store %arg20[%c0_214, %c0_215], %263 {strides = array<i32>} : memref<26x1024xf32, #tpu.memory_space<vmem>>, vector<26x1024xf32>,
    %cst_216 = arith.constant 0.000000e+00 : f32
    %265 = vector.broadcast %cst_216 : f32 to vector<2x1024xf32>
    %c0_217 = arith.constant 0 : index
    %c0_218 = arith.constant 0 : index
    %266 = vector.load %arg19[%c0_217, %c0_218] : memref<26x1024xf32, #tpu.memory_space<vmem>>, vector<2x1024xf32>
    %267 = arith.mulf %266, %265 : vector<2x1024xf32>
    %c0_219 = arith.constant 0 : index
    %c0_220 = arith.constant 0 : index
    %268 = vector.load %arg20[%c0_219, %c0_220] : memref<26x1024xf32, #tpu.memory_space<vmem>>, vector<2x1024xf32>
    %269 = arith.addf %267, %268 : vector<2x1024xf32>
    %c0_221 = arith.constant 0 : index
    %c0_222 = arith.constant 0 : index
    %270 = vector.load %arg21[%c0_221, %c0_222] : memref<26x1024xf32, #tpu.memory_space<vmem>>, vector<2x1024xf32>
    tpu.vector_store %arg21[%c0_221, %c0_222], %269 {strides = array<i32>} : memref<26x1024xf32, #tpu.memory_space<vmem>>, vector<2x1024xf32>,
    %c2_223 = arith.constant 2 : index
    %c0_224 = arith.constant 0 : index
    %271 = vector.load %arg19[%c2_223, %c0_224] : memref<26x1024xf32, #tpu.memory_space<vmem>>, vector<2x1024xf32>
    %272 = arith.mulf %271, %269 : vector<2x1024xf32>
    %c2_225 = arith.constant 2 : index
    %c0_226 = arith.constant 0 : index
    %273 = vector.load %arg20[%c2_225, %c0_226] : memref<26x1024xf32, #tpu.memory_space<vmem>>, vector<2x1024xf32>
    %274 = arith.addf %272, %273 : vector<2x1024xf32>
    %c2_227 = arith.constant 2 : index
    %c0_228 = arith.constant 0 : index
    %275 = vector.load %arg21[%c2_227, %c0_228] : memref<26x1024xf32, #tpu.memory_space<vmem>>, vector<2x1024xf32>
    tpu.vector_store %arg21[%c2_227, %c0_228], %274 {strides = array<i32>} : memref<26x1024xf32, #tpu.memory_space<vmem>>, vector<2x1024xf32>,
    %c4_229 = arith.constant 4 : index
    %c0_230 = arith.constant 0 : index
    %276 = vector.load %arg19[%c4_229, %c0_230] : memref<26x1024xf32, #tpu.memory_space<vmem>>, vector<2x1024xf32>
    %277 = arith.mulf %276, %274 : vector<2x1024xf32>
    %c4_231 = arith.constant 4 : index
    %c0_232 = arith.constant 0 : index
    %278 = vector.load %arg20[%c4_231, %c0_232] : memref<26x1024xf32, #tpu.memory_space<vmem>>, vector<2x1024xf32>
    %279 = arith.addf %277, %278 : vector<2x1024xf32>
    %c4_233 = arith.constant 4 : index
    %c0_234 = arith.constant 0 : index
    %280 = vector.load %arg21[%c4_233, %c0_234] : memref<26x1024xf32, #tpu.memory_space<vmem>>, vector<2x1024xf32>
    tpu.vector_store %arg21[%c4_233, %c0_234], %279 {strides = array<i32>} : memref<26x1024xf32, #tpu.memory_space<vmem>>, vector<2x1024xf32>,
    %c6_235 = arith.constant 6 : index
    %c0_236 = arith.constant 0 : index
    %281 = vector.load %arg19[%c6_235, %c0_236] : memref<26x1024xf32, #tpu.memory_space<vmem>>, vector<2x1024xf32>
    %282 = arith.mulf %281, %279 : vector<2x1024xf32>
    %c6_237 = arith.constant 6 : index
    %c0_238 = arith.constant 0 : index
    %283 = vector.load %arg20[%c6_237, %c0_238] : memref<26x1024xf32, #tpu.memory_space<vmem>>, vector<2x1024xf32>
    %284 = arith.addf %282, %283 : vector<2x1024xf32>
    %c6_239 = arith.constant 6 : index
    %c0_240 = arith.constant 0 : index
    %285 = vector.load %arg21[%c6_239, %c0_240] : memref<26x1024xf32, #tpu.memory_space<vmem>>, vector<2x1024xf32>
    tpu.vector_store %arg21[%c6_239, %c0_240], %284 {strides = array<i32>} : memref<26x1024xf32, #tpu.memory_space<vmem>>, vector<2x1024xf32>,
    %c8_241 = arith.constant 8 : index
    %c0_242 = arith.constant 0 : index
    %286 = vector.load %arg19[%c8_241, %c0_242] : memref<26x1024xf32, #tpu.memory_space<vmem>>, vector<2x1024xf32>
    %287 = arith.mulf %286, %284 : vector<2x1024xf32>
    %c8_243 = arith.constant 8 : index
    %c0_244 = arith.constant 0 : index
    %288 = vector.load %arg20[%c8_243, %c0_244] : memref<26x1024xf32, #tpu.memory_space<vmem>>, vector<2x1024xf32>
    %289 = arith.addf %287, %288 : vector<2x1024xf32>
    %c8_245 = arith.constant 8 : index
    %c0_246 = arith.constant 0 : index
    %290 = vector.load %arg21[%c8_245, %c0_246] : memref<26x1024xf32, #tpu.memory_space<vmem>>, vector<2x1024xf32>
    tpu.vector_store %arg21[%c8_245, %c0_246], %289 {strides = array<i32>} : memref<26x1024xf32, #tpu.memory_space<vmem>>, vector<2x1024xf32>,
    %c10_247 = arith.constant 10 : index
    %c0_248 = arith.constant 0 : index
    %291 = vector.load %arg19[%c10_247, %c0_248] : memref<26x1024xf32, #tpu.memory_space<vmem>>, vector<2x1024xf32>
    %292 = arith.mulf %291, %289 : vector<2x1024xf32>
    %c10_249 = arith.constant 10 : index
    %c0_250 = arith.constant 0 : index
    %293 = vector.load %arg20[%c10_249, %c0_250] : memref<26x1024xf32, #tpu.memory_space<vmem>>, vector<2x1024xf32>
    %294 = arith.addf %292, %293 : vector<2x1024xf32>
    %c10_251 = arith.constant 10 : index
    %c0_252 = arith.constant 0 : index
    %295 = vector.load %arg21[%c10_251, %c0_252] : memref<26x1024xf32, #tpu.memory_space<vmem>>, vector<2x1024xf32>
    tpu.vector_store %arg21[%c10_251, %c0_252], %294 {strides = array<i32>} : memref<26x1024xf32, #tpu.memory_space<vmem>>, vector<2x1024xf32>,
    %c12_253 = arith.constant 12 : index
    %c0_254 = arith.constant 0 : index
    %296 = vector.load %arg19[%c12_253, %c0_254] : memref<26x1024xf32, #tpu.memory_space<vmem>>, vector<2x1024xf32>
    %297 = arith.mulf %296, %294 : vector<2x1024xf32>
    %c12_255 = arith.constant 12 : index
    %c0_256 = arith.constant 0 : index
    %298 = vector.load %arg20[%c12_255, %c0_256] : memref<26x1024xf32, #tpu.memory_space<vmem>>, vector<2x1024xf32>
    %299 = arith.addf %297, %298 : vector<2x1024xf32>
    %c12_257 = arith.constant 12 : index
    %c0_258 = arith.constant 0 : index
    %300 = vector.load %arg21[%c12_257, %c0_258] : memref<26x1024xf32, #tpu.memory_space<vmem>>, vector<2x1024xf32>
    tpu.vector_store %arg21[%c12_257, %c0_258], %299 {strides = array<i32>} : memref<26x1024xf32, #tpu.memory_space<vmem>>, vector<2x1024xf32>,
    %c14_259 = arith.constant 14 : index
    %c0_260 = arith.constant 0 : index
    %301 = vector.load %arg19[%c14_259, %c0_260] : memref<26x1024xf32, #tpu.memory_space<vmem>>, vector<2x1024xf32>
    %302 = arith.mulf %301, %299 : vector<2x1024xf32>
    %c14_261 = arith.constant 14 : index
    %c0_262 = arith.constant 0 : index
    %303 = vector.load %arg20[%c14_261, %c0_262] : memref<26x1024xf32, #tpu.memory_space<vmem>>, vector<2x1024xf32>
    %304 = arith.addf %302, %303 : vector<2x1024xf32>
    %c14_263 = arith.constant 14 : index
    %c0_264 = arith.constant 0 : index
    %305 = vector.load %arg21[%c14_263, %c0_264] : memref<26x1024xf32, #tpu.memory_space<vmem>>, vector<2x1024xf32>
    tpu.vector_store %arg21[%c14_263, %c0_264], %304 {strides = array<i32>} : memref<26x1024xf32, #tpu.memory_space<vmem>>, vector<2x1024xf32>,
    %c16_265 = arith.constant 16 : index
    %c0_266 = arith.constant 0 : index
    %306 = vector.load %arg19[%c16_265, %c0_266] : memref<26x1024xf32, #tpu.memory_space<vmem>>, vector<2x1024xf32>
    %307 = arith.mulf %306, %304 : vector<2x1024xf32>
    %c16_267 = arith.constant 16 : index
    %c0_268 = arith.constant 0 : index
    %308 = vector.load %arg20[%c16_267, %c0_268] : memref<26x1024xf32, #tpu.memory_space<vmem>>, vector<2x1024xf32>
    %309 = arith.addf %307, %308 : vector<2x1024xf32>
    %c16_269 = arith.constant 16 : index
    %c0_270 = arith.constant 0 : index
    %310 = vector.load %arg21[%c16_269, %c0_270] : memref<26x1024xf32, #tpu.memory_space<vmem>>, vector<2x1024xf32>
    tpu.vector_store %arg21[%c16_269, %c0_270], %309 {strides = array<i32>} : memref<26x1024xf32, #tpu.memory_space<vmem>>, vector<2x1024xf32>,
    %c18_271 = arith.constant 18 : index
    %c0_272 = arith.constant 0 : index
    %311 = vector.load %arg19[%c18_271, %c0_272] : memref<26x1024xf32, #tpu.memory_space<vmem>>, vector<2x1024xf32>
    %312 = arith.mulf %311, %309 : vector<2x1024xf32>
    %c18_273 = arith.constant 18 : index
    %c0_274 = arith.constant 0 : index
    %313 = vector.load %arg20[%c18_273, %c0_274] : memref<26x1024xf32, #tpu.memory_space<vmem>>, vector<2x1024xf32>
    %314 = arith.addf %312, %313 : vector<2x1024xf32>
    %c18_275 = arith.constant 18 : index
    %c0_276 = arith.constant 0 : index
    %315 = vector.load %arg21[%c18_275, %c0_276] : memref<26x1024xf32, #tpu.memory_space<vmem>>, vector<2x1024xf32>
    tpu.vector_store %arg21[%c18_275, %c0_276], %314 {strides = array<i32>} : memref<26x1024xf32, #tpu.memory_space<vmem>>, vector<2x1024xf32>,
    %c20_277 = arith.constant 20 : index
    %c0_278 = arith.constant 0 : index
    %316 = vector.load %arg19[%c20_277, %c0_278] : memref<26x1024xf32, #tpu.memory_space<vmem>>, vector<2x1024xf32>
    %317 = arith.mulf %316, %314 : vector<2x1024xf32>
    %c20_279 = arith.constant 20 : index
    %c0_280 = arith.constant 0 : index
    %318 = vector.load %arg20[%c20_279, %c0_280] : memref<26x1024xf32, #tpu.memory_space<vmem>>, vector<2x1024xf32>
    %319 = arith.addf %317, %318 : vector<2x1024xf32>
    %c20_281 = arith.constant 20 : index
    %c0_282 = arith.constant 0 : index
    %320 = vector.load %arg21[%c20_281, %c0_282] : memref<26x1024xf32, #tpu.memory_space<vmem>>, vector<2x1024xf32>
    tpu.vector_store %arg21[%c20_281, %c0_282], %319 {strides = array<i32>} : memref<26x1024xf32, #tpu.memory_space<vmem>>, vector<2x1024xf32>,
    %c22_283 = arith.constant 22 : index
    %c0_284 = arith.constant 0 : index
    %321 = vector.load %arg19[%c22_283, %c0_284] : memref<26x1024xf32, #tpu.memory_space<vmem>>, vector<2x1024xf32>
    %322 = arith.mulf %321, %319 : vector<2x1024xf32>
    %c22_285 = arith.constant 22 : index
    %c0_286 = arith.constant 0 : index
    %323 = vector.load %arg20[%c22_285, %c0_286] : memref<26x1024xf32, #tpu.memory_space<vmem>>, vector<2x1024xf32>
    %324 = arith.addf %322, %323 : vector<2x1024xf32>
    %c22_287 = arith.constant 22 : index
    %c0_288 = arith.constant 0 : index
    %325 = vector.load %arg21[%c22_287, %c0_288] : memref<26x1024xf32, #tpu.memory_space<vmem>>, vector<2x1024xf32>
    tpu.vector_store %arg21[%c22_287, %c0_288], %324 {strides = array<i32>} : memref<26x1024xf32, #tpu.memory_space<vmem>>, vector<2x1024xf32>,
    %c24_289 = arith.constant 24 : index
    %c0_290 = arith.constant 0 : index
    %326 = vector.load %arg19[%c24_289, %c0_290] : memref<26x1024xf32, #tpu.memory_space<vmem>>, vector<2x1024xf32>
    %327 = arith.mulf %326, %324 : vector<2x1024xf32>
    %c24_291 = arith.constant 24 : index
    %c0_292 = arith.constant 0 : index
    %328 = vector.load %arg20[%c24_291, %c0_292] : memref<26x1024xf32, #tpu.memory_space<vmem>>, vector<2x1024xf32>
    %329 = arith.addf %327, %328 : vector<2x1024xf32>
    %c24_293 = arith.constant 24 : index
    %c0_294 = arith.constant 0 : index
    %330 = vector.load %arg21[%c24_293, %c0_294] : memref<26x1024xf32, #tpu.memory_space<vmem>>, vector<2x1024xf32>
    tpu.vector_store %arg21[%c24_293, %c0_294], %329 {strides = array<i32>} : memref<26x1024xf32, #tpu.memory_space<vmem>>, vector<2x1024xf32>,
    %cst_295 = arith.constant dense<0.000000e+00> : vector<26x1024xf32>
    %331 = tpu.matmul %254, %197, %cst_295 {dimension_numbers = #tpu.dot_dimension_numbers<[1], [0], [0], [1], [0, 0, 1, 1], [], []>} : vector<26x64xbf16>, vector<64x1024xbf16>, vector<26x1024xf32> -> vector<26x1024xf32>
    %c0_296 = arith.constant 0 : index
    %c0_297 = arith.constant 0 : index
    %332 = vector.load %arg21[%c0_296, %c0_297] : memref<26x1024xf32, #tpu.memory_space<vmem>>, vector<26x1024xf32>
    %333 = arith.mulf %332, %331 : vector<26x1024xf32>
    %334 = arith.truncf %333 : vector<26x1024xf32> to vector<26x1024xbf16>
    %c0_298 = arith.constant 0 : index
    %c0_299 = arith.constant 0 : index
    %335 = vector.load %arg13[%c0_298, %c0_299] : memref<1024x64xbf16, #tpu.memory_space<vmem>>, vector<1024x64xbf16>
    %cst_300 = arith.constant dense<0.000000e+00> : vector<26x64xf32>
    %336 = tpu.matmul %334, %335, %cst_300 {dimension_numbers = #tpu.dot_dimension_numbers<[1], [0], [0], [1], [0, 0, 1, 1], [], []>} : vector<26x1024xbf16>, vector<1024x64xbf16>, vector<26x64xf32> -> vector<26x64xf32>
    %c6_301 = arith.constant 6 : index
    %c0_302 = arith.constant 0 : index
    %337 = vector.load %arg14[%c6_301, %c0_302] : memref<14x64xf32, #tpu.memory_space<vmem>>, vector<1x64xf32>
    %338 = vector.broadcast %337 : vector<1x64xf32> to vector<26x64xf32>
    %339 = arith.mulf %236, %338 : vector<26x64xf32>
    %340 = arith.addf %336, %339 : vector<26x64xf32>
    %cst_303 = arith.constant 0.000000e+00 : f32
    %341 = vector.broadcast %cst_303 : f32 to vector<26x64xf32>
    %342 = arith.subf %341, %202 : vector<26x64xf32>
    %343 = math.exp %342 : vector<26x64xf32>
    %cst_304 = arith.constant 1.000000e+00 : f32
    %344 = vector.broadcast %cst_304 : f32 to vector<26x64xf32>
    %345 = arith.addf %344, %343 : vector<26x64xf32>
    %346 = tpu.reciprocal %345 {approx = true} : vector<26x64xf32> -> vector<26x64xf32>
    %347 = arith.mulf %202, %346 : vector<26x64xf32>
    %348 = arith.mulf %340, %347 : vector<26x64xf32>
    %c0_305 = arith.constant 0 : index
    %c0_306 = arith.constant 0 : index
    %c0_307 = arith.constant 0 : index
    %349 = vector.load %arg10[%c0_305, %c0_306, %c0_307] : memref<2x64x32xf32, #tpu.memory_space<vmem>>, vector<1x64x32xf32>
    %350 = vector.shape_cast %349 : vector<1x64x32xf32> to vector<64x32xf32>
    %cst_308 = arith.constant dense<0.000000e+00> : vector<26x32xf32>
    %351 = tpu.matmul %348, %350, %cst_308 {dimension_numbers = #tpu.dot_dimension_numbers<[1], [0], [0], [1], [0, 0, 1, 1], [], []>} : vector<26x64xf32>, vector<64x32xf32>, vector<26x32xf32> -> vector<26x32xf32>
    %c3_309 = arith.constant 3 : index
    %c0_310 = arith.constant 0 : index
    %c0_311 = arith.constant 0 : index
    %352 = vector.load %arg11[%c3_309, %c0_310, %c0_311] : memref<6x64x1024xbf16, #tpu.memory_space<vmem>>, vector<1x64x1024xbf16>
    %353 = vector.shape_cast %352 : vector<1x64x1024xbf16> to vector<64x1024xbf16>
    %c4_312 = arith.constant 4 : index
    %c0_313 = arith.constant 0 : index
    %c0_314 = arith.constant 0 : index
    %354 = vector.load %arg11[%c4_312, %c0_313, %c0_314] : memref<6x64x1024xbf16, #tpu.memory_space<vmem>>, vector<1x64x1024xbf16>
    %355 = vector.shape_cast %354 : vector<1x64x1024xbf16> to vector<64x1024xbf16>
    %c5_315 = arith.constant 5 : index
    %c0_316 = arith.constant 0 : index
    %c0_317 = arith.constant 0 : index
    %356 = vector.load %arg11[%c5_315, %c0_316, %c0_317] : memref<6x64x1024xbf16, #tpu.memory_space<vmem>>, vector<1x64x1024xbf16>
    %357 = vector.shape_cast %356 : vector<1x64x1024xbf16> to vector<64x1024xbf16>
    %c1_318 = arith.constant 1 : index
    %c0_319 = arith.constant 0 : index
    %c0_320 = arith.constant 0 : index
    %358 = vector.load %arg8[%c1_318, %c0_319, %c0_320] : memref<2x32x128xf32, #tpu.memory_space<vmem>>, vector<1x32x128xf32>
    %359 = vector.shape_cast %358 : vector<1x32x128xf32> to vector<32x128xf32>
    %cst_321 = arith.constant dense<0.000000e+00> : vector<26x128xf32>
    %360 = tpu.matmul %351, %359, %cst_321 {dimension_numbers = #tpu.dot_dimension_numbers<[1], [0], [0], [1], [0, 0, 1, 1], [], []>} : vector<26x32xf32>, vector<32x128xf32>, vector<26x128xf32> -> vector<26x128xf32>
    %361 = vector.extract_strided_slice %360 {offsets = [0, 0], sizes = [26, 64], strides = [1, 1]} : vector<26x128xf32> to vector<26x64xf32>
    %362 = vector.extract_strided_slice %360 {offsets = [0, 64], sizes = [26, 64], strides = [1, 1]} : vector<26x128xf32> to vector<26x64xf32>
    %c10_322 = arith.constant 10 : index
    %c0_323 = arith.constant 0 : index
    %363 = vector.load %arg14[%c10_322, %c0_323] : memref<14x64xf32, #tpu.memory_space<vmem>>, vector<1x64xf32>
    %364 = vector.broadcast %363 : vector<1x64xf32> to vector<26x64xf32>
    %365 = arith.mulf %361, %364 : vector<26x64xf32>
    %c11_324 = arith.constant 11 : index
    %c0_325 = arith.constant 0 : index
    %366 = vector.load %arg14[%c11_324, %c0_325] : memref<14x64xf32, #tpu.memory_space<vmem>>, vector<1x64xf32>
    %367 = vector.broadcast %366 : vector<1x64xf32> to vector<26x64xf32>
    %368 = arith.addf %365, %367 : vector<26x64xf32>
    %c0_326 = arith.constant 0 : index
    %c0_327 = arith.constant 0 : index
    %c0_328 = arith.constant 0 : index
    %369 = vector.load %arg7[%c0_326, %c0_327, %c0_328] : memref<3x26x26xf32, #tpu.memory_space<vmem>>, vector<1x26x26xf32>
    %370 = vector.shape_cast %369 : vector<1x26x26xf32> to vector<26x26xf32>
    %cst_329 = arith.constant dense<0.000000e+00> : vector<26x64xf32>
    %371 = tpu.matmul %370, %361, %cst_329 {dimension_numbers = #tpu.dot_dimension_numbers<[1], [0], [0], [1], [0, 0, 1, 1], [], []>} : vector<26x26xf32>, vector<26x64xf32>, vector<26x64xf32> -> vector<26x64xf32>
    %c9_330 = arith.constant 9 : index
    %c0_331 = arith.constant 0 : index
    %372 = vector.load %arg14[%c9_330, %c0_331] : memref<14x64xf32, #tpu.memory_space<vmem>>, vector<1x64xf32>
    %373 = vector.broadcast %372 : vector<1x64xf32> to vector<26x64xf32>
    %374 = arith.mulf %371, %373 : vector<26x64xf32>
    %375 = arith.addf %368, %374 : vector<26x64xf32>
    %c1_332 = arith.constant 1 : index
    %c0_333 = arith.constant 0 : index
    %c0_334 = arith.constant 0 : index
    %376 = vector.load %arg7[%c1_332, %c0_333, %c0_334] : memref<3x26x26xf32, #tpu.memory_space<vmem>>, vector<1x26x26xf32>
    %377 = vector.shape_cast %376 : vector<1x26x26xf32> to vector<26x26xf32>
    %cst_335 = arith.constant dense<0.000000e+00> : vector<26x64xf32>
    %378 = tpu.matmul %377, %361, %cst_335 {dimension_numbers = #tpu.dot_dimension_numbers<[1], [0], [0], [1], [0, 0, 1, 1], [], []>} : vector<26x26xf32>, vector<26x64xf32>, vector<26x64xf32> -> vector<26x64xf32>
    %c8_336 = arith.constant 8 : index
    %c0_337 = arith.constant 0 : index
    %379 = vector.load %arg14[%c8_336, %c0_337] : memref<14x64xf32, #tpu.memory_space<vmem>>, vector<1x64xf32>
    %380 = vector.broadcast %379 : vector<1x64xf32> to vector<26x64xf32>
    %381 = arith.mulf %378, %380 : vector<26x64xf32>
    %382 = arith.addf %375, %381 : vector<26x64xf32>
    %c2_338 = arith.constant 2 : index
    %c0_339 = arith.constant 0 : index
    %c0_340 = arith.constant 0 : index
    %383 = vector.load %arg7[%c2_338, %c0_339, %c0_340] : memref<3x26x26xf32, #tpu.memory_space<vmem>>, vector<1x26x26xf32>
    %384 = vector.shape_cast %383 : vector<1x26x26xf32> to vector<26x26xf32>
    %cst_341 = arith.constant dense<0.000000e+00> : vector<26x64xf32>
    %385 = tpu.matmul %384, %361, %cst_341 {dimension_numbers = #tpu.dot_dimension_numbers<[1], [0], [0], [1], [0, 0, 1, 1], [], []>} : vector<26x26xf32>, vector<26x64xf32>, vector<26x64xf32> -> vector<26x64xf32>
    %c7_342 = arith.constant 7 : index
    %c0_343 = arith.constant 0 : index
    %386 = vector.load %arg14[%c7_342, %c0_343] : memref<14x64xf32, #tpu.memory_space<vmem>>, vector<1x64xf32>
    %387 = vector.broadcast %386 : vector<1x64xf32> to vector<26x64xf32>
    %388 = arith.mulf %385, %387 : vector<26x64xf32>
    %389 = arith.addf %382, %388 : vector<26x64xf32>
    %cst_344 = arith.constant 0.000000e+00 : f32
    %390 = vector.broadcast %cst_344 : f32 to vector<26x64xf32>
    %391 = arith.subf %390, %389 : vector<26x64xf32>
    %392 = math.exp %391 : vector<26x64xf32>
    %cst_345 = arith.constant 1.000000e+00 : f32
    %393 = vector.broadcast %cst_345 : f32 to vector<26x64xf32>
    %394 = arith.addf %393, %392 : vector<26x64xf32>
    %395 = tpu.reciprocal %394 {approx = true} : vector<26x64xf32> -> vector<26x64xf32>
    %396 = arith.mulf %389, %395 : vector<26x64xf32>
    %c1_346 = arith.constant 1 : index
    %c0_347 = arith.constant 0 : index
    %c0_348 = arith.constant 0 : index
    %397 = vector.load %arg9[%c1_346, %c0_347, %c0_348] : memref<2x64x64xf32, #tpu.memory_space<vmem>>, vector<1x64x64xf32>
    %398 = vector.shape_cast %397 : vector<1x64x64xf32> to vector<64x64xf32>
    %cst_349 = arith.constant dense<0.000000e+00> : vector<26x64xf32>
    %399 = tpu.matmul %396, %398, %cst_349 {dimension_numbers = #tpu.dot_dimension_numbers<[1], [0], [0], [1], [0, 0, 1, 1], [], []>} : vector<26x64xf32>, vector<64x64xf32>, vector<26x64xf32> -> vector<26x64xf32>
    %c12_350 = arith.constant 12 : index
    %c0_351 = arith.constant 0 : index
    %400 = vector.load %arg14[%c12_350, %c0_351] : memref<14x64xf32, #tpu.memory_space<vmem>>, vector<1x64xf32>
    %401 = vector.broadcast %400 : vector<1x64xf32> to vector<26x64xf32>
    %402 = arith.addf %399, %401 : vector<26x64xf32>
    %cst_352 = arith.constant 0.000000e+00 : f32
    %403 = vector.broadcast %cst_352 : f32 to vector<26x64xf32>
    %404 = arith.maximumf %402, %403 : vector<26x64xf32>
    %405 = math.absf %402 : vector<26x64xf32>
    %cst_353 = arith.constant 0.000000e+00 : f32
    %406 = vector.broadcast %cst_353 : f32 to vector<26x64xf32>
    %407 = arith.subf %406, %405 : vector<26x64xf32>
    %408 = math.exp %407 : vector<26x64xf32>
    %cst_354 = arith.constant 1.000000e+00 : f32
    %409 = vector.broadcast %cst_354 : f32 to vector<26x64xf32>
    %410 = arith.addf %409, %408 : vector<26x64xf32>
    %411 = math.log %410 : vector<26x64xf32>
    %412 = arith.addf %404, %411 : vector<26x64xf32>
    %413 = arith.truncf %412 : vector<26x64xf32> to vector<26x64xbf16>
    %414 = arith.truncf %396 : vector<26x64xf32> to vector<26x64xbf16>
    %cst_355 = arith.constant dense<0.000000e+00> : vector<26x1024xf32>
    %415 = tpu.matmul %413, %353, %cst_355 {dimension_numbers = #tpu.dot_dimension_numbers<[1], [0], [0], [1], [0, 0, 1, 1], [], []>} : vector<26x64xbf16>, vector<64x1024xbf16>, vector<26x1024xf32> -> vector<26x1024xf32>
    %416 = math.exp %415 : vector<26x1024xf32>
    %c0_356 = arith.constant 0 : index
    %c0_357 = arith.constant 0 : index
    %417 = vector.load %arg19[%c0_356, %c0_357] : memref<26x1024xf32, #tpu.memory_space<vmem>>, vector<26x1024xf32>
    tpu.vector_store %arg19[%c0_356, %c0_357], %416 {strides = array<i32>} : memref<26x1024xf32, #tpu.memory_space<vmem>>, vector<26x1024xf32>,
    %418 = arith.mulf %412, %396 : vector<26x64xf32>
    %419 = arith.truncf %418 : vector<26x64xf32> to vector<26x64xbf16>
    %c0_358 = arith.constant 0 : index
    %c0_359 = arith.constant 0 : index
    %420 = vector.load %arg12[%c0_358, %c0_359] : memref<64x1024xbf16, #tpu.memory_space<vmem>>, vector<64x1024xbf16>
    %cst_360 = arith.constant dense<0.000000e+00> : vector<26x1024xf32>
    %421 = tpu.matmul %419, %420, %cst_360 {dimension_numbers = #tpu.dot_dimension_numbers<[1], [0], [0], [1], [0, 0, 1, 1], [], []>} : vector<26x64xbf16>, vector<64x1024xbf16>, vector<26x1024xf32> -> vector<26x1024xf32>
    %cst_361 = arith.constant dense<0.000000e+00> : vector<26x1024xf32>
    %422 = tpu.matmul %414, %355, %cst_361 {dimension_numbers = #tpu.dot_dimension_numbers<[1], [0], [0], [1], [0, 0, 1, 1], [], []>} : vector<26x64xbf16>, vector<64x1024xbf16>, vector<26x1024xf32> -> vector<26x1024xf32>
    %423 = arith.mulf %421, %422 : vector<26x1024xf32>
    %c0_362 = arith.constant 0 : index
    %c0_363 = arith.constant 0 : index
    %424 = vector.load %arg20[%c0_362, %c0_363] : memref<26x1024xf32, #tpu.memory_space<vmem>>, vector<26x1024xf32>
    tpu.vector_store %arg20[%c0_362, %c0_363], %423 {strides = array<i32>} : memref<26x1024xf32, #tpu.memory_space<vmem>>, vector<26x1024xf32>,
    %cst_364 = arith.constant 0.000000e+00 : f32
    %425 = vector.broadcast %cst_364 : f32 to vector<2x1024xf32>
    %c0_365 = arith.constant 0 : index
    %c0_366 = arith.constant 0 : index
    %426 = vector.load %arg19[%c0_365, %c0_366] : memref<26x1024xf32, #tpu.memory_space<vmem>>, vector<2x1024xf32>
    %427 = arith.mulf %426, %425 : vector<2x1024xf32>
    %c0_367 = arith.constant 0 : index
    %c0_368 = arith.constant 0 : index
    %428 = vector.load %arg20[%c0_367, %c0_368] : memref<26x1024xf32, #tpu.memory_space<vmem>>, vector<2x1024xf32>
    %429 = arith.addf %427, %428 : vector<2x1024xf32>
    %c0_369 = arith.constant 0 : index
    %c0_370 = arith.constant 0 : index
    %430 = vector.load %arg21[%c0_369, %c0_370] : memref<26x1024xf32, #tpu.memory_space<vmem>>, vector<2x1024xf32>
    tpu.vector_store %arg21[%c0_369, %c0_370], %429 {strides = array<i32>} : memref<26x1024xf32, #tpu.memory_space<vmem>>, vector<2x1024xf32>,
    %c2_371 = arith.constant 2 : index
    %c0_372 = arith.constant 0 : index
    %431 = vector.load %arg19[%c2_371, %c0_372] : memref<26x1024xf32, #tpu.memory_space<vmem>>, vector<2x1024xf32>
    %432 = arith.mulf %431, %429 : vector<2x1024xf32>
    %c2_373 = arith.constant 2 : index
    %c0_374 = arith.constant 0 : index
    %433 = vector.load %arg20[%c2_373, %c0_374] : memref<26x1024xf32, #tpu.memory_space<vmem>>, vector<2x1024xf32>
    %434 = arith.addf %432, %433 : vector<2x1024xf32>
    %c2_375 = arith.constant 2 : index
    %c0_376 = arith.constant 0 : index
    %435 = vector.load %arg21[%c2_375, %c0_376] : memref<26x1024xf32, #tpu.memory_space<vmem>>, vector<2x1024xf32>
    tpu.vector_store %arg21[%c2_375, %c0_376], %434 {strides = array<i32>} : memref<26x1024xf32, #tpu.memory_space<vmem>>, vector<2x1024xf32>,
    %c4_377 = arith.constant 4 : index
    %c0_378 = arith.constant 0 : index
    %436 = vector.load %arg19[%c4_377, %c0_378] : memref<26x1024xf32, #tpu.memory_space<vmem>>, vector<2x1024xf32>
    %437 = arith.mulf %436, %434 : vector<2x1024xf32>
    %c4_379 = arith.constant 4 : index
    %c0_380 = arith.constant 0 : index
    %438 = vector.load %arg20[%c4_379, %c0_380] : memref<26x1024xf32, #tpu.memory_space<vmem>>, vector<2x1024xf32>
    %439 = arith.addf %437, %438 : vector<2x1024xf32>
    %c4_381 = arith.constant 4 : index
    %c0_382 = arith.constant 0 : index
    %440 = vector.load %arg21[%c4_381, %c0_382] : memref<26x1024xf32, #tpu.memory_space<vmem>>, vector<2x1024xf32>
    tpu.vector_store %arg21[%c4_381, %c0_382], %439 {strides = array<i32>} : memref<26x1024xf32, #tpu.memory_space<vmem>>, vector<2x1024xf32>,
    %c6_383 = arith.constant 6 : index
    %c0_384 = arith.constant 0 : index
    %441 = vector.load %arg19[%c6_383, %c0_384] : memref<26x1024xf32, #tpu.memory_space<vmem>>, vector<2x1024xf32>
    %442 = arith.mulf %441, %439 : vector<2x1024xf32>
    %c6_385 = arith.constant 6 : index
    %c0_386 = arith.constant 0 : index
    %443 = vector.load %arg20[%c6_385, %c0_386] : memref<26x1024xf32, #tpu.memory_space<vmem>>, vector<2x1024xf32>
    %444 = arith.addf %442, %443 : vector<2x1024xf32>
    %c6_387 = arith.constant 6 : index
    %c0_388 = arith.constant 0 : index
    %445 = vector.load %arg21[%c6_387, %c0_388] : memref<26x1024xf32, #tpu.memory_space<vmem>>, vector<2x1024xf32>
    tpu.vector_store %arg21[%c6_387, %c0_388], %444 {strides = array<i32>} : memref<26x1024xf32, #tpu.memory_space<vmem>>, vector<2x1024xf32>,
    %c8_389 = arith.constant 8 : index
    %c0_390 = arith.constant 0 : index
    %446 = vector.load %arg19[%c8_389, %c0_390] : memref<26x1024xf32, #tpu.memory_space<vmem>>, vector<2x1024xf32>
    %447 = arith.mulf %446, %444 : vector<2x1024xf32>
    %c8_391 = arith.constant 8 : index
    %c0_392 = arith.constant 0 : index
    %448 = vector.load %arg20[%c8_391, %c0_392] : memref<26x1024xf32, #tpu.memory_space<vmem>>, vector<2x1024xf32>
    %449 = arith.addf %447, %448 : vector<2x1024xf32>
    %c8_393 = arith.constant 8 : index
    %c0_394 = arith.constant 0 : index
    %450 = vector.load %arg21[%c8_393, %c0_394] : memref<26x1024xf32, #tpu.memory_space<vmem>>, vector<2x1024xf32>
    tpu.vector_store %arg21[%c8_393, %c0_394], %449 {strides = array<i32>} : memref<26x1024xf32, #tpu.memory_space<vmem>>, vector<2x1024xf32>,
    %c10_395 = arith.constant 10 : index
    %c0_396 = arith.constant 0 : index
    %451 = vector.load %arg19[%c10_395, %c0_396] : memref<26x1024xf32, #tpu.memory_space<vmem>>, vector<2x1024xf32>
    %452 = arith.mulf %451, %449 : vector<2x1024xf32>
    %c10_397 = arith.constant 10 : index
    %c0_398 = arith.constant 0 : index
    %453 = vector.load %arg20[%c10_397, %c0_398] : memref<26x1024xf32, #tpu.memory_space<vmem>>, vector<2x1024xf32>
    %454 = arith.addf %452, %453 : vector<2x1024xf32>
    %c10_399 = arith.constant 10 : index
    %c0_400 = arith.constant 0 : index
    %455 = vector.load %arg21[%c10_399, %c0_400] : memref<26x1024xf32, #tpu.memory_space<vmem>>, vector<2x1024xf32>
    tpu.vector_store %arg21[%c10_399, %c0_400], %454 {strides = array<i32>} : memref<26x1024xf32, #tpu.memory_space<vmem>>, vector<2x1024xf32>,
    %c12_401 = arith.constant 12 : index
    %c0_402 = arith.constant 0 : index
    %456 = vector.load %arg19[%c12_401, %c0_402] : memref<26x1024xf32, #tpu.memory_space<vmem>>, vector<2x1024xf32>
    %457 = arith.mulf %456, %454 : vector<2x1024xf32>
    %c12_403 = arith.constant 12 : index
    %c0_404 = arith.constant 0 : index
    %458 = vector.load %arg20[%c12_403, %c0_404] : memref<26x1024xf32, #tpu.memory_space<vmem>>, vector<2x1024xf32>
    %459 = arith.addf %457, %458 : vector<2x1024xf32>
    %c12_405 = arith.constant 12 : index
    %c0_406 = arith.constant 0 : index
    %460 = vector.load %arg21[%c12_405, %c0_406] : memref<26x1024xf32, #tpu.memory_space<vmem>>, vector<2x1024xf32>
    tpu.vector_store %arg21[%c12_405, %c0_406], %459 {strides = array<i32>} : memref<26x1024xf32, #tpu.memory_space<vmem>>, vector<2x1024xf32>,
    %c14_407 = arith.constant 14 : index
    %c0_408 = arith.constant 0 : index
    %461 = vector.load %arg19[%c14_407, %c0_408] : memref<26x1024xf32, #tpu.memory_space<vmem>>, vector<2x1024xf32>
    %462 = arith.mulf %461, %459 : vector<2x1024xf32>
    %c14_409 = arith.constant 14 : index
    %c0_410 = arith.constant 0 : index
    %463 = vector.load %arg20[%c14_409, %c0_410] : memref<26x1024xf32, #tpu.memory_space<vmem>>, vector<2x1024xf32>
    %464 = arith.addf %462, %463 : vector<2x1024xf32>
    %c14_411 = arith.constant 14 : index
    %c0_412 = arith.constant 0 : index
    %465 = vector.load %arg21[%c14_411, %c0_412] : memref<26x1024xf32, #tpu.memory_space<vmem>>, vector<2x1024xf32>
    tpu.vector_store %arg21[%c14_411, %c0_412], %464 {strides = array<i32>} : memref<26x1024xf32, #tpu.memory_space<vmem>>, vector<2x1024xf32>,
    %c16_413 = arith.constant 16 : index
    %c0_414 = arith.constant 0 : index
    %466 = vector.load %arg19[%c16_413, %c0_414] : memref<26x1024xf32, #tpu.memory_space<vmem>>, vector<2x1024xf32>
    %467 = arith.mulf %466, %464 : vector<2x1024xf32>
    %c16_415 = arith.constant 16 : index
    %c0_416 = arith.constant 0 : index
    %468 = vector.load %arg20[%c16_415, %c0_416] : memref<26x1024xf32, #tpu.memory_space<vmem>>, vector<2x1024xf32>
    %469 = arith.addf %467, %468 : vector<2x1024xf32>
    %c16_417 = arith.constant 16 : index
    %c0_418 = arith.constant 0 : index
    %470 = vector.load %arg21[%c16_417, %c0_418] : memref<26x1024xf32, #tpu.memory_space<vmem>>, vector<2x1024xf32>
    tpu.vector_store %arg21[%c16_417, %c0_418], %469 {strides = array<i32>} : memref<26x1024xf32, #tpu.memory_space<vmem>>, vector<2x1024xf32>,
    %c18_419 = arith.constant 18 : index
    %c0_420 = arith.constant 0 : index
    %471 = vector.load %arg19[%c18_419, %c0_420] : memref<26x1024xf32, #tpu.memory_space<vmem>>, vector<2x1024xf32>
    %472 = arith.mulf %471, %469 : vector<2x1024xf32>
    %c18_421 = arith.constant 18 : index
    %c0_422 = arith.constant 0 : index
    %473 = vector.load %arg20[%c18_421, %c0_422] : memref<26x1024xf32, #tpu.memory_space<vmem>>, vector<2x1024xf32>
    %474 = arith.addf %472, %473 : vector<2x1024xf32>
    %c18_423 = arith.constant 18 : index
    %c0_424 = arith.constant 0 : index
    %475 = vector.load %arg21[%c18_423, %c0_424] : memref<26x1024xf32, #tpu.memory_space<vmem>>, vector<2x1024xf32>
    tpu.vector_store %arg21[%c18_423, %c0_424], %474 {strides = array<i32>} : memref<26x1024xf32, #tpu.memory_space<vmem>>, vector<2x1024xf32>,
    %c20_425 = arith.constant 20 : index
    %c0_426 = arith.constant 0 : index
    %476 = vector.load %arg19[%c20_425, %c0_426] : memref<26x1024xf32, #tpu.memory_space<vmem>>, vector<2x1024xf32>
    %477 = arith.mulf %476, %474 : vector<2x1024xf32>
    %c20_427 = arith.constant 20 : index
    %c0_428 = arith.constant 0 : index
    %478 = vector.load %arg20[%c20_427, %c0_428] : memref<26x1024xf32, #tpu.memory_space<vmem>>, vector<2x1024xf32>
    %479 = arith.addf %477, %478 : vector<2x1024xf32>
    %c20_429 = arith.constant 20 : index
    %c0_430 = arith.constant 0 : index
    %480 = vector.load %arg21[%c20_429, %c0_430] : memref<26x1024xf32, #tpu.memory_space<vmem>>, vector<2x1024xf32>
    tpu.vector_store %arg21[%c20_429, %c0_430], %479 {strides = array<i32>} : memref<26x1024xf32, #tpu.memory_space<vmem>>, vector<2x1024xf32>,
    %c22_431 = arith.constant 22 : index
    %c0_432 = arith.constant 0 : index
    %481 = vector.load %arg19[%c22_431, %c0_432] : memref<26x1024xf32, #tpu.memory_space<vmem>>, vector<2x1024xf32>
    %482 = arith.mulf %481, %479 : vector<2x1024xf32>
    %c22_433 = arith.constant 22 : index
    %c0_434 = arith.constant 0 : index
    %483 = vector.load %arg20[%c22_433, %c0_434] : memref<26x1024xf32, #tpu.memory_space<vmem>>, vector<2x1024xf32>
    %484 = arith.addf %482, %483 : vector<2x1024xf32>
    %c22_435 = arith.constant 22 : index
    %c0_436 = arith.constant 0 : index
    %485 = vector.load %arg21[%c22_435, %c0_436] : memref<26x1024xf32, #tpu.memory_space<vmem>>, vector<2x1024xf32>
    tpu.vector_store %arg21[%c22_435, %c0_436], %484 {strides = array<i32>} : memref<26x1024xf32, #tpu.memory_space<vmem>>, vector<2x1024xf32>,
    %c24_437 = arith.constant 24 : index
    %c0_438 = arith.constant 0 : index
    %486 = vector.load %arg19[%c24_437, %c0_438] : memref<26x1024xf32, #tpu.memory_space<vmem>>, vector<2x1024xf32>
    %487 = arith.mulf %486, %484 : vector<2x1024xf32>
    %c24_439 = arith.constant 24 : index
    %c0_440 = arith.constant 0 : index
    %488 = vector.load %arg20[%c24_439, %c0_440] : memref<26x1024xf32, #tpu.memory_space<vmem>>, vector<2x1024xf32>
    %489 = arith.addf %487, %488 : vector<2x1024xf32>
    %c24_441 = arith.constant 24 : index
    %c0_442 = arith.constant 0 : index
    %490 = vector.load %arg21[%c24_441, %c0_442] : memref<26x1024xf32, #tpu.memory_space<vmem>>, vector<2x1024xf32>
    tpu.vector_store %arg21[%c24_441, %c0_442], %489 {strides = array<i32>} : memref<26x1024xf32, #tpu.memory_space<vmem>>, vector<2x1024xf32>,
    %cst_443 = arith.constant dense<0.000000e+00> : vector<26x1024xf32>
    %491 = tpu.matmul %414, %357, %cst_443 {dimension_numbers = #tpu.dot_dimension_numbers<[1], [0], [0], [1], [0, 0, 1, 1], [], []>} : vector<26x64xbf16>, vector<64x1024xbf16>, vector<26x1024xf32> -> vector<26x1024xf32>
    %c0_444 = arith.constant 0 : index
    %c0_445 = arith.constant 0 : index
    %492 = vector.load %arg21[%c0_444, %c0_445] : memref<26x1024xf32, #tpu.memory_space<vmem>>, vector<26x1024xf32>
    %493 = arith.mulf %492, %491 : vector<26x1024xf32>
    %494 = arith.truncf %493 : vector<26x1024xf32> to vector<26x1024xbf16>
    %c0_446 = arith.constant 0 : index
    %c0_447 = arith.constant 0 : index
    %495 = vector.load %arg13[%c0_446, %c0_447] : memref<1024x64xbf16, #tpu.memory_space<vmem>>, vector<1024x64xbf16>
    %cst_448 = arith.constant dense<0.000000e+00> : vector<26x64xf32>
    %496 = tpu.matmul %494, %495, %cst_448 {dimension_numbers = #tpu.dot_dimension_numbers<[1], [0], [0], [1], [0, 0, 1, 1], [], []>} : vector<26x1024xbf16>, vector<1024x64xbf16>, vector<26x64xf32> -> vector<26x64xf32>
    %c13_449 = arith.constant 13 : index
    %c0_450 = arith.constant 0 : index
    %497 = vector.load %arg14[%c13_449, %c0_450] : memref<14x64xf32, #tpu.memory_space<vmem>>, vector<1x64xf32>
    %498 = vector.broadcast %497 : vector<1x64xf32> to vector<26x64xf32>
    %499 = arith.mulf %396, %498 : vector<26x64xf32>
    %500 = arith.addf %496, %499 : vector<26x64xf32>
    %cst_451 = arith.constant 0.000000e+00 : f32
    %501 = vector.broadcast %cst_451 : f32 to vector<26x64xf32>
    %502 = arith.subf %501, %362 : vector<26x64xf32>
    %503 = math.exp %502 : vector<26x64xf32>
    %cst_452 = arith.constant 1.000000e+00 : f32
    %504 = vector.broadcast %cst_452 : f32 to vector<26x64xf32>
    %505 = arith.addf %504, %503 : vector<26x64xf32>
    %506 = tpu.reciprocal %505 {approx = true} : vector<26x64xf32> -> vector<26x64xf32>
    %507 = arith.mulf %362, %506 : vector<26x64xf32>
    %508 = arith.mulf %500, %507 : vector<26x64xf32>
    %c1_453 = arith.constant 1 : index
    %c0_454 = arith.constant 0 : index
    %c0_455 = arith.constant 0 : index
    %509 = vector.load %arg10[%c1_453, %c0_454, %c0_455] : memref<2x64x32xf32, #tpu.memory_space<vmem>>, vector<1x64x32xf32>
    %510 = vector.shape_cast %509 : vector<1x64x32xf32> to vector<64x32xf32>
    %cst_456 = arith.constant dense<0.000000e+00> : vector<26x32xf32>
    %511 = tpu.matmul %508, %510, %cst_456 {dimension_numbers = #tpu.dot_dimension_numbers<[1], [0], [0], [1], [0, 0, 1, 1], [], []>} : vector<26x64xf32>, vector<64x32xf32>, vector<26x32xf32> -> vector<26x32xf32>
    %cst_457 = arith.constant dense<0.000000e+00> : vector<26xf32>
    %512 = vector.multi_reduction <add>, %511, %cst_457 [1] : vector<26x32xf32> to vector<26xf32>
    %513 = vector.shape_cast %512 : vector<26xf32> to vector<26x1xf32>
    %cst_458 = arith.constant 3.200000e+01 : f32
    %514 = vector.broadcast %cst_458 : f32 to vector<26x1xf32>
    %515 = arith.divf %513, %514 : vector<26x1xf32>
    %516 = vector.broadcast %515 : vector<26x1xf32> to vector<26x32xf32>
    %517 = arith.subf %511, %516 : vector<26x32xf32>
    %518 = arith.mulf %517, %517 : vector<26x32xf32>
    %cst_459 = arith.constant dense<0.000000e+00> : vector<26xf32>
    %519 = vector.multi_reduction <add>, %518, %cst_459 [1] : vector<26x32xf32> to vector<26xf32>
    %520 = vector.shape_cast %519 : vector<26xf32> to vector<26x1xf32>
    %cst_460 = arith.constant 3.200000e+01 : f32
    %521 = vector.broadcast %cst_460 : f32 to vector<26x1xf32>
    %522 = arith.divf %520, %521 : vector<26x1xf32>
    %523 = vector.broadcast %515 : vector<26x1xf32> to vector<26x32xf32>
    %524 = arith.subf %511, %523 : vector<26x32xf32>
    %cst_461 = arith.constant 9.99999974E-6 : f32
    %525 = vector.broadcast %cst_461 : f32 to vector<26x1xf32>
    %526 = arith.addf %522, %525 : vector<26x1xf32>
    %527 = math.rsqrt %526 : vector<26x1xf32>
    %528 = vector.broadcast %527 : vector<26x1xf32> to vector<26x32xf32>
    %529 = arith.mulf %524, %528 : vector<26x32xf32>
    %c0_462 = arith.constant 0 : index
    %c0_463 = arith.constant 0 : index
    %530 = vector.load %arg15[%c0_462, %c0_463] : memref<2x32xf32, #tpu.memory_space<vmem>>, vector<1x32xf32>
    %531 = vector.broadcast %530 : vector<1x32xf32> to vector<26x32xf32>
    %532 = arith.mulf %529, %531 : vector<26x32xf32>
    %c1_464 = arith.constant 1 : index
    %c0_465 = arith.constant 0 : index
    %533 = vector.load %arg15[%c1_464, %c0_465] : memref<2x32xf32, #tpu.memory_space<vmem>>, vector<1x32xf32>
    %534 = vector.broadcast %533 : vector<1x32xf32> to vector<26x32xf32>
    %535 = arith.addf %532, %534 : vector<26x32xf32>
    %c0_466 = arith.constant 0 : index
    %c0_467 = arith.constant 0 : index
    %536 = vector.load %arg16[%c0_466, %c0_467] : memref<26x32xf32, #tpu.memory_space<vmem>>, vector<26x32xf32>
    tpu.vector_store %arg16[%c0_466, %c0_467], %535 {strides = array<i32>} : memref<26x32xf32, #tpu.memory_space<vmem>>, vector<26x32xf32>,
    return
  }
}

</mosaic_0001>

<bundles_post_ra>
// kernel: rna_encoder_forward.1
= control target key start
LH: loop header
LB: loop body
LE: loop exit
PB: predicated region body
PF: predicated region fallthrough
CT: control target
= control target key end

     0   :  { %s12880_s0 = inlined_call_operand.vmem [shape: s32[24], index: 0, kind: input, shape index: {}]   ;;  %s12881_s1 = inlined_call_operand.vmem [shape: f32[2,128], index: 1, kind: input, shape index: {}]   ;;  %s12882_s2 = inlined_call_operand.vmem [shape: f32[128,128], index: 2, kind: input, shape index: {}]   ;;  %s12883_s3 = inlined_call_operand.vmem [shape: f32[1,128], index: 3, kind: input, shape index: {}]   ;;  %s12884_s4 = inlined_call_operand.vmem [shape: f32[128,512], index: 4, kind: input, shape index: {}]   ;;  %s12885_s5 = inlined_call_operand.vmem [shape: f32[1,512], index: 5, kind: input, shape index: {}]   ;;  %s12886_s6 = inlined_call_operand.vmem [shape: f32[1,32], index: 6, kind: input, shape index: {}]   ;;  %s12887_s7 = inlined_call_operand.vmem [shape: f32[3,26,26], index: 7, kind: input, shape index: {}]   ;;  %s12888_s8 = inlined_call_operand.hbm [shape: f32[2,32,128], index: 8, kind: input, shape index: {}]   ;;  %s12889_s9 = inlined_call_operand.hbm [shape: f32[2,64,64], index: 9, kind: input, shape index: {}]   ;;  %s12890_s10 = inlined_call_operand.vmem [shape: f32[2,64,32], index: 10, kind: input, shape index: {}]   ;;  %s12891_s11 = inlined_call_operand.hbm [shape: bf16[6,64,1024], index: 11, kind: input, shape index: {}]   ;;  %s12892_s12 = inlined_call_operand.vmem [shape: bf16[64,1024], index: 12, kind: input, shape index: {}]   ;;  %s12893_s13 = inlined_call_operand.vmem [shape: bf16[1024,64], index: 13, kind: input, shape index: {}]   ;;  %s12894_s14 = inlined_call_operand.vmem [shape: f32[14,64], index: 14, kind: input, shape index: {}]   ;;  %s12895_s15 = inlined_call_operand.vmem [shape: f32[2,32], index: 15, kind: input, shape index: {}]   ;;  %s12896_s16 = inlined_call_operand.vmem [shape: f32[26,32], index: 16, kind: output, shape index: {}]  }
   0x1   :  { %12903 = sst [smem:[#allocation17_spill]] %s12880_s0 }
   0x2   :  { %12904 = sst [smem:[#allocation18_spill]] %s12890_s10 }
   0x3   :  { %12905 = sst [smem:[#allocation19_spill]] %s12893_s13 }
   0x4   :  { %12906 = sst [smem:[#allocation20_spill]] %s12895_s15 }
   0x5   :  { %12907 = sst [smem:[#allocation21_spill]] %s12896_s16 }
   0x6   :  { %21 = vsyncpa [#allocation9], 0 }
   0x7   :  { %22 = vsyncpa [#allocation8], 0 }
   0x8   :  { %23 = vsyncpa [#allocation12], 0  ;;  %s64_s23 = sshll.u32 %s12889_s9, 4  ;;  %s10352_s24 = smov [#allocation11]   ;;  %s65_s23 = int_to_ptr.hbm [resolvable:$true] %s64_s23 }
   0x9   :  { %s66_s25 = sshll.u32 %s10352_s24, 4  ;;  %s12908_s28 = sld [smem:[#allocation17_spill]]  ;;  %s67_s25 = int_to_ptr.vmem [resolvable:$true] %s66_s25 }
   0xa   :  { %s10353_s30 = smov 128   ;;  %s10354_s0 = smov 8  }
   0xb   :  { %72 = dma.hbm_to_vmem [thread:$0]  %s65_s23, 2048, %s67_s25, [#allocation12], %s10353_s30, %s10353_s30, %s10354_s0  }
   0xc   :  { %s10355_s17 = smov [#allocation7]   ;;  %s51_s20 = sshll.u32 %s12888_s8, 4  ;;  %s52_s20 = int_to_ptr.hbm [resolvable:$true] %s51_s20 }
   0xd   :  { %s10356_s9 = smov [#allocation10]   ;;  %s79_s16 = sshll.u32 %s12891_s11, 4  ;;  %s80_s16 = int_to_ptr.hbm [resolvable:$true] %s79_s16 }
   0xe   :  { %s53_s21 = sshll.u32 %s10356_s9, 4  ;;  %s10357_s26 = smov [#allocation13]   ;;  %s54_s21 = int_to_ptr.vmem [resolvable:$true] %s53_s21 }
   0xf   :  { %s29_s29 = sshll.u32 %s12908_s28, 4  ;;  %s81_s27 = sshll.u32 %s10357_s26, 4  ;;  %s30_s29 = int_to_ptr.vmem [resolvable:$true] %s29_s29  ;;  %s82_s27 = int_to_ptr.vmem [resolvable:$true] %s81_s27 }
  0x10   :  { %32 = dma.vmem_to_smem %s30_s29, 16, %s10355_s17, [#allocation9]  }
  0x11   :  { %59 = dma.hbm_to_vmem [thread:$0]  %s52_s20, 1024, %s54_s21, [#allocation8], %s10353_s30, %s10353_s30, %s10354_s0  }
  0x12   :  { %s10358_s23 = smov 512   ;;  %s10359_s25 = smov 32  }
  0x13   :  { %87 = dma.hbm_to_vmem [thread:$0]  %s80_s16, 24576, %s82_s27, [#allocation12], %s10358_s23, %s10358_s23, %s10359_s25  }
  0x14   :  { %10346 = dma.done.wait [#allocation9], 16  }
  0x15   :  { %10347 = vsyncadd [#allocation9], 4294967280 }
  0x16   :  { %10348 = dma.done.wait [#allocation8], 1024  }
  0x17   :  { %10349 = vsyncadd [#allocation8], 4294966272 }
  0x18   :  { %10350 = dma.done.wait [#allocation12], 26624  }
  0x19   :  { %10351 = vsyncadd [#allocation12], 4294940672 }
  0x1a   :  { %112 = sfence }
  0x1b   :  { %v130_v0 = vld [vmem:[%s12882_s2 + $0x78] sm:$0xff]  ;;  %v129_v1 = vld [vmem:[%s12882_s2 + $0x70] sm:$0xff]  ;;  %v128_v2 = vld [vmem:[%s12882_s2 + $0x68] sm:$0xff]  ;;  %vm309_vm0 = vcmask 254976   ;;  %s10729_s27 = sld [smem:[#allocation7 + $0x1]]  ;;  %vm375_vm1 = vcmask 253952  }
  0x1c   :  { %135 = vmatpush.msra.mxu0 %v130_v0  ;;  %v127_v3 = vld [vmem:[%s12882_s2 + $0x60] sm:$0xff]  ;;  %v126_v5 = vld [vmem:[%s12882_s2 + $0x58] sm:$0xff]  ;;  %v216_v6 = vld [vmem:[%s12884_s4 + $0x1e8] sm:$0xff]  ;;  %s10735_s23 = sld [smem:[#allocation7 + $0x3]]  ;;  %vm610_vm2 = vcmask 261120   ;;  %vm681_vm3 = vcmask 1041408  }
  0x1d   :  { %v215_v4 = vld [vmem:[%s12884_s4 + $0x1e0] sm:$0xff]  ;;  %v217_v7 = vld [vmem:[%s12884_s4 + $0x1f0] sm:$0xff]  ;;  %249 = vmatpush.msra.mxu2 %v216_v6  ;;  %v212_v9 = vld [vmem:[%s12884_s4 + $0x1c8] sm:$0xff]  ;;  %s10738_s8 = sld [smem:[#allocation7 + $0x4]]  ;;  %vm668_vm4 = vcmask 211968   ;;  %vm870_vm5 = vcmask 523264  }
  0x1e   :  { %136 = vmatpush.msra.mxu0 %v129_v1  ;;  %229 = vmatpush.msra.mxu1 %v215_v4  ;;  %v211_v8 = vld [vmem:[%s12884_s4 + $0x1c0] sm:$0xff]  ;;  %v213_v10 = vld [vmem:[%s12884_s4 + $0x1d0] sm:$0xff]  ;;  %v208_v13 = vld [vmem:[%s12884_s4 + $0x1a8] sm:$0xff]  ;;  %s10741_s11 = sld [smem:[#allocation7 + $0x5]] }
  0x1f   :  { %v125_v11 = vld [vmem:[%s12882_s2 + $0x50] sm:$0xff]  ;;  %269 = vmatpush.msra.mxu3 %v217_v7  ;;  %v207_v12 = vld [vmem:[%s12884_s4 + $0x1a0] sm:$0xff]  ;;  %250 = vmatpush.msra.mxu2 %v212_v9  ;;  %v124_v16 = vld [vmem:[%s12882_s2 + $0x48] sm:$0xff]  ;;  %s10744_s30 = sld [smem:[#allocation7 + $0x6]] }
  0x20   :  { %137 = vmatpush.msra.mxu0 %v128_v2  ;;  %230 = vmatpush.msra.mxu1 %v211_v8  ;;  %v209_v14 = vld [vmem:[%s12884_s4 + $0x1b0] sm:$0xff]  ;;  %v203_v15 = vld [vmem:[%s12884_s4 + $0x180] sm:$0xff]  ;;  %v204_v17 = vld [vmem:[%s12884_s4 + $0x188] sm:$0xff]  ;;  %s10746_s0 = sld [smem:[#allocation7 + $0x7]] }
  0x21   :  { %270 = vmatpush.msra.mxu3 %v213_v10  ;;  %251 = vmatpush.msra.mxu2 %v208_v13  ;;  %v205_v18 = vld [vmem:[%s12884_s4 + $0x190] sm:$0xff]  ;;  %v199_v19 = vld [vmem:[%s12884_s4 + $0x160] sm:$0xff]  ;;  %v200_v21 = vld [vmem:[%s12884_s4 + $0x168] sm:$0xff]  ;;  %s7804_s29 = sshll.u32 %s10729_s27, 1  ;;  %s10749_s16 = sld [smem:[#allocation7 + $0x8]] }
  0x22   :  { %138 = vmatpush.msra.mxu0 %v127_v3  ;;  %231 = vmatpush.msra.mxu1 %v207_v12  ;;  %v123_v20 = vld [vmem:[%s12882_s2 + $0x40] sm:$0xff]  ;;  %v201_v22 = vld [vmem:[%s12884_s4 + $0x170] sm:$0xff]  ;;  %v122_v24 = vld [vmem:[%s12882_s2 + $0x38] sm:$0xff]  ;;  %s10753_s17 = sld [smem:[#allocation7 + $0x9]]  ;;  %s7745_s24 = scalar_lea.vmem [#allocation2], %s7804_s29 }
  0x23   :  { %271 = vmatpush.msra.mxu3 %v209_v14  ;;  %252 = vmatpush.msra.mxu2 %v204_v17  ;;  %v195_v23 = vld [vmem:[%s12884_s4 + $0x140] sm:$0xff]  ;;  %v196_v25 = vld [vmem:[%s12884_s4 + $0x148] sm:$0xff]  ;;  %v197_v26 = vld [vmem:[%s12884_s4 + $0x150] sm:$0xff]  ;;  %s10757_s19 = sld [smem:[#allocation7 + $0xa]]  ;;  %s12909_s10 = sshll.u32 %s10735_s23, 1 }
  0x24   :  { %139 = vmatpush.msra.mxu0 %v126_v5  ;;  %232 = vmatpush.msra.mxu1 %v203_v15  ;;  %v191_v27 = vld [vmem:[%s12884_s4 + $0x120] sm:$0xff]  ;;  %v121_v28 = vld [vmem:[%s12882_s2 + $0x30] sm:$0xff]  ;;  %v192_v29 = vld [vmem:[%s12884_s4 + $0x128] sm:$0xff]  ;;  %s10760_s9 = sld [smem:[#allocation7 + $0xb]]  ;;  %s7750_s13 = scalar_lea.vmem [#allocation2], %s12909_s10 }
  0x25   :  { %272 = vmatpush.msra.mxu3 %v205_v18  ;;  %253 = vmatpush.msra.mxu2 %v200_v21  ;;  %v193_v30 = vld [vmem:[%s12884_s4 + $0x130] sm:$0xff]  ;;  %v187_v31 = vld [vmem:[%s12884_s4 + $0x100] sm:$0xff]  ;;  %v120_v32 = vld [vmem:[%s12882_s2 + $0x28] sm:$0xff]  ;;  %s10763_s22 = sld [smem:[#allocation7 + $0xc]]  ;;  %s12910_s27 = sshll.u32 %s10738_s8, 1 }
  0x26   :  { %140 = vmatpush.msra.mxu0 %v125_v11  ;;  %233 = vmatpush.msra.mxu1 %v199_v19  ;;  %v188_v33 = vld [vmem:[%s12884_s4 + $0x108] sm:$0xff]  ;;  %v119_v34 = vld [vmem:[%s12882_s2 + $0x20] sm:$0xff]  ;;  %v189_v35 = vld [vmem:[%s12884_s4 + $0x110] sm:$0xff]  ;;  %s10779_s26 = sld [smem:[#allocation7 + $0xf]] }
  0x27   :  { %273 = vmatpush.msra.mxu3 %v201_v22  ;;  %254 = vmatpush.msra.mxu2 %v196_v25  ;;  %v183_v36 = vld [vmem:[%s12884_s4 + $0xe0] sm:$0xff]  ;;  %v118_v37 = vld [vmem:[%s12882_s2 + $0x18] sm:$0xff]  ;;  %v184_v38 = vld [vmem:[%s12884_s4 + $0xe8] sm:$0xff]  ;;  %s10783_s20 = sld [smem:[#allocation7 + $0x10]] }
  0x28   :  { %141 = vmatpush.msra.mxu0 %v124_v16  ;;  %234 = vmatpush.msra.mxu1 %v195_v23  ;;  %v185_v39 = vld [vmem:[%s12884_s4 + $0xf0] sm:$0xff]  ;;  %v179_v40 = vld [vmem:[%s12884_s4 + $0xc0] sm:$0xff]  ;;  %v180_v41 = vld [vmem:[%s12884_s4 + $0xc8] sm:$0xff]  ;;  %s10785_s21 = sld [smem:[#allocation7 + $0x11]] }
  0x29   :  { %274 = vmatpush.msra.mxu3 %v197_v26  ;;  %255 = vmatpush.msra.mxu2 %v192_v29  ;;  %v117_v42 = vld [vmem:[%s12882_s2 + $0x10] sm:$0xff]  ;;  %v175_v44 = vld [vmem:[%s12884_s4 + $0xa0] sm:$0xff]  ;;  %v176_v45 = vld [vmem:[%s12884_s4 + $0xa8] sm:$0xff]  ;;  %s10788_s18 = sld [smem:[#allocation7 + $0x12]] }
  0x2a   :  { %142 = vmatpush.msra.mxu0 %v123_v20  ;;  %235 = vmatpush.msra.mxu1 %v191_v27  ;;  %v181_v43 = vld [vmem:[%s12884_s4 + $0xd0] sm:$0xff]  ;;  %v116_v47 = vld [vmem:[%s12882_s2 + $0x8] sm:$0xff]  ;;  %v171_v48 = vld [vmem:[%s12884_s4 + $0x80] sm:$0xff]  ;;  %s10816_s8 = sld [smem:[#allocation7 + $0x15]] }
  0x2b   :  { %275 = vmatpush.msra.mxu3 %v193_v30  ;;  %256 = vmatpush.msra.mxu2 %v188_v33  ;;  %v177_v46 = vld [vmem:[%s12884_s4 + $0xb0] sm:$0xff]  ;;  %v172_v49 = vld [vmem:[%s12884_s4 + $0x88] sm:$0xff]  ;;  %v167_v51 = vld [vmem:[%s12884_s4 + $0x60] sm:$0xff] }
  0x2c   :  { %143 = vmatpush.msra.mxu0 %v122_v24  ;;  %236 = vmatpush.msra.mxu1 %v187_v31  ;;  %v173_v50 = vld [vmem:[%s12884_s4 + $0x90] sm:$0xff]  ;;  %v115_v52 = vld [vmem:[%s12882_s2] sm:$0xff]  ;;  %v168_v53 = vld [vmem:[%s12884_s4 + $0x68] sm:$0xff]  ;;  %s7839_s29 = sshll.u32 %s10779_s26, 1 }
  0x2d   :  { %276 = vmatpush.msra.mxu3 %v189_v35  ;;  %257 = vmatpush.msra.mxu2 %v184_v38  ;;  %v114_v54 = vld [vmem:[%s12881_s1] sm:$0x3]  ;;  %v169_v55 = vld [vmem:[%s12884_s4 + $0x70] sm:$0xff]  ;;  %v218_v56 = vld [vmem:[%s12884_s4 + $0x1f8] sm:$0xff]  ;;  %s10775_s1 = sld [smem:[#allocation7 + $0xe]]  ;;  %s7842_s23 = sshll.u32 %s10783_s20, 1 }
  0x2e   :  { %144 = vmatpush.msra.mxu0 %v121_v28  ;;  %237 = vmatpush.msra.mxu1 %v183_v36  ;;  %v163_v57 = vld [vmem:[%s12884_s4 + $0x40] sm:$0xff]  ;;  %v164_v58 = vld [vmem:[%s12884_s4 + $0x48] sm:$0xff]  ;;  %v165_v59 = vld [vmem:[%s12884_s4 + $0x50] sm:$0xff]  ;;  %s7844_s10 = sshll.u32 %s10785_s21, 1 }
  0x2f   :  { %277 = vmatpush.msra.mxu3 %v185_v39  ;;  %258 = vmatpush.msra.mxu2 %v180_v41  ;;  %v214_v60 = vld [vmem:[%s12884_s4 + $0x1d8] sm:$0xff]  ;;  %v159_v9 = vld [vmem:[%s12884_s4 + $0x20] sm:$0xff]  ;;  %v160_v10 = vld [vmem:[%s12884_s4 + $0x28] sm:$0xff] }
  0x30   :  { %145 = vmatpush.msra.mxu0 %v120_v32  ;;  %238 = vmatpush.msra.mxu1 %v179_v40  ;;  %v210_v61 = vld [vmem:[%s12884_s4 + $0x1b8] sm:$0xff]  ;;  %v161_v11 = vld [vmem:[%s12884_s4 + $0x30] sm:$0xff]  ;;  %v155_v13 = vld [vmem:[%s12884_s4] sm:$0xff] }
  0x31   :  { %278 = vmatpush.msra.mxu3 %v181_v43  ;;  %259 = vmatpush.msra.mxu2 %v176_v45  ;;  %v206_v62 = vld [vmem:[%s12884_s4 + $0x198] sm:$0xff]  ;;  %v156_v14 = vld [vmem:[%s12884_s4 + $0x8] sm:$0xff]  ;;  %v157_v15 = vld [vmem:[%s12884_s4 + $0x10] sm:$0xff] }
  0x32   :  { %146 = vmatpush.msra.mxu0 %v119_v34  ;;  %239 = vmatpush.msra.mxu1 %v175_v44  ;;  %v202_v63 = vld [vmem:[%s12884_s4 + $0x178] sm:$0xff]  ;;  %v10010_v17 = vld [vmem:[%s12883_s3] ss:$0 sm:$0xff]  ;;  %s10360_s3 = smov 96  }
  0x33   :  { %279 = vmatpush.msra.mxu3 %v177_v46  ;;  %260 = vmatpush.msra.mxu2 %v172_v49  ;;  %v198_v0 = vld [vmem:[%s12884_s4 + $0x158] sm:$0xff]  ;;  %v219_v20 = vld [vmem:[%s12885_s5] sm:$0xf]  ;;  %s10727_s5 = sld [smem:[#allocation7]] }
  0x34   :  { %147 = vmatpush.msra.mxu0 %v118_v37  ;;  %240 = vmatpush.msra.mxu1 %v171_v48  ;;  %v194_v1 = vld [vmem:[%s12884_s4 + $0x138] sm:$0xff]  ;;  %v221_v21 = vperm.slane %v219_v20, 0  ;;  %v224_v22 = vperm.slane %v219_v20, 3  ;;  %v222_v27 = vperm.slane %v219_v20, 1  ;;  %v223_v28 = vperm.slane %v219_v20, 2  ;;  %v607_v48 = vld [vmem:[#allocation10 + $0x8] sm:$0xff] }
  0x35   :  { %280 = vmatpush.msra.mxu3 %v173_v50  ;;  %261 = vmatpush.msra.mxu2 %v168_v53  ;;  %v190_v2 = vld [vmem:[%s12884_s4 + $0x118] sm:$0xff]  ;;  %v10011_v43 = vld [vmem:[%s12886_s6] ss:$0 sm:$0xff]  ;;  %s10796_s6 = sld [smem:[#allocation7 + $0x13]] }
  0x36   :  { %148 = vmatpush.msra.mxu0 %v117_v42  ;;  %241 = vmatpush.msra.mxu1 %v167_v51  ;;  %v186_v3 = vld [vmem:[%s12884_s4 + $0xf8] sm:$0xff]  ;;  %370 = vst.msk [vmem:[#allocation3] sm:$0x3] %vm309_vm0, %v10011_v43  ;;  %v606_v49 = vld [vmem:[#allocation10] sm:$0xff] }
  0x37   :  { %281 = vmatpush.msra.mxu3 %v169_v55  ;;  %262 = vmatpush.msra.mxu2 %v164_v58  ;;  %v182_v4 = vld [vmem:[%s12884_s4 + $0xd8] sm:$0xff] }
  0x38   :  { %149 = vmatpush.msra.mxu0 %v116_v47  ;;  %242 = vmatpush.msra.mxu1 %v163_v57  ;;  %v178_v5 = vld [vmem:[%s12884_s4 + $0xb8] sm:$0xff]  ;;  %v608_v47 = vld [vmem:[#allocation10 + $0x10] sm:$0xff] }
  0x39   :  { %282 = vmatpush.msra.mxu3 %v165_v59  ;;  %v174_v6 = vld [vmem:[%s12884_s4 + $0x98] sm:$0xff]  ;;  %263 = vmatpush.msra.mxu2 %v160_v10  ;;  %s7802_s28 = sshll.u32 %s10727_s5, 1  ;;  %s10801_s5 = sld [smem:[#allocation7 + $0x14]] }
  0x3a   :  { %150 = vmatpush.msra.mxu0 %v115_v52  ;;  %v170_v7 = vld [vmem:[%s12884_s4 + $0x78] sm:$0xff]  ;;  %243 = vmatpush.msra.mxu1 %v159_v9 }
  0x3b   :  { %151 = vmatmul.f32.vlgmr.msra.gmra.mxu0 %v114_v54  ;;  %v166_v8 = vld [vmem:[%s12884_s4 + $0x58] sm:$0xff]  ;;  %283 = vmatpush.msra.mxu3 %v161_v11 }
  0x3c   :  { %289 = vmatpush.msrb.mxu0 %v218_v56  ;;  %v162_v12 = vld [vmem:[%s12884_s4 + $0x38] sm:$0xff]  ;;  %244 = vmatpush.msra.mxu1 %v155_v13 }
  0x3d   :  { %264 = vmatpush.msra.mxu2 %v156_v14  ;;  %v158_v16 = vld [vmem:[%s12884_s4 + $0x18] sm:$0xff]  ;;  %284 = vmatpush.msra.mxu3 %v157_v15  ;;  %s12898_s4 = smov 64  }
  0x3e   :  { %290 = vmatpush.msrb.mxu0 %v214_v60  ;;  %v609_v46 = vld [vmem:[#allocation10 + $0x18] sm:$0xff] }
  0x3f   :  { %635 = vmatpush.msrb.mxu1 %v609_v46  ;;  %9987 = vmatpush.msrb.mxu3 %v609_v46  ;;  %v7880_v46 = vld [vmem:[%s12887_s7 + $0x48] sm:$0xff] }
  0x40   :  { %291 = vmatpush.msrb.mxu0 %v210_v61 }
  0x41   :  { %636 = vmatpush.msrb.mxu1 %v608_v47  ;;  %9988 = vmatpush.msrb.mxu3 %v608_v47  ;;  %v7882_v47 = vld [vmem:[%s12887_s7 + $0x58] sm:$0x3] }
  0x42   :  { %292 = vmatpush.msrb.mxu0 %v206_v62 }
  0x43   :  { %637 = vmatpush.msrb.mxu1 %v607_v48  ;;  %9989 = vmatpush.msrb.mxu3 %v607_v48 }
  0x44   :  { %293 = vmatpush.msrb.mxu0 %v202_v63 }
  0x45   :  { %638 = vmatpush.msrb.mxu1 %v606_v49  ;;  %9990 = vmatpush.msrb.mxu3 %v606_v49 }
  0x46   :  { %294 = vmatpush.msrb.mxu0 %v198_v0 }
  0x48   :  { %295 = vmatpush.msrb.mxu0 %v194_v1 }
  0x4a   :  { %296 = vmatpush.msrb.mxu0 %v190_v2 }
  0x4c   :  { %297 = vmatpush.msrb.mxu0 %v186_v3 }
  0x4e   :  { %298 = vmatpush.msrb.mxu0 %v182_v4 }
  0x50   :  { %299 = vmatpush.msrb.mxu0 %v178_v5 }
  0x52   :  { %300 = vmatpush.msrb.mxu0 %v174_v6 }
  0x54   :  { %301 = vmatpush.msrb.mxu0 %v170_v7 }
  0x56   :  { %302 = vmatpush.msrb.mxu0 %v166_v8 }
  0x58   :  { %303 = vmatpush.msrb.mxu0 %v162_v12 }
  0x5a   :  { %304 = vmatpush.msrb.mxu0 %v158_v16 }
  0xb8   :  { %v152_v18 = vpop.f32.mrf.mxu0 }
  0xb9   :  { %v153_v19 = vadd.f32 %v10010_v17, %v152_v18 }
  0xbb   :  { %245 = vmatmul.f32.vlgmr.msra.gmra.mxu1 %v153_v19  ;;  %265 = vmatmul.f32.vlgmr.msra.gmra.mxu2 %v153_v19 }
  0xbc   :  { %285 = vmatmul.f32.vlgmr.msra.gmra.mxu3 %v153_v19  ;;  %305 = vmatmul.f32.vlgmr.msrb.gmra.mxu0 %v153_v19 }
 0x138   :  { %v246_v23 = vpop.f32.mrf.mxu1 }
 0x139   :  { %v247_v24 = vadd.f32 %v246_v23, %v221_v21  ;;  %v306_v25 = vpop.f32.mrf.mxu0 }
 0x13a   :  { %v307_v26 = vadd.f32 %v306_v25, %v224_v22 }
 0x13b   :  { %310 = vst.msk [vmem:[#allocation2] sm:$0x3] %vm309_vm0, %v247_v24  ;;  %320 = vrot.lane.b32.xlu1 %v247_v24, %s10359_s25  ;;  %312 = vrot.lane.b32.xlu0 %v247_v24, %s10360_s3 }
 0x13c   :  { %352 = vst.msk [vmem:[#allocation2 + $0x18] sm:$0x3] %vm309_vm0, %v307_v26 }
 0x13e   :  { %v266_v29 = vpop.f32.mrf.mxu2 }
 0x13f   :  { %v267_v30 = vadd.f32 %v266_v29, %v222_v27  ;;  %v286_v31 = vpop.f32.mrf.mxu3 }
 0x140   :  { %v287_v32 = vadd.f32 %v286_v31, %v223_v28 }
 0x141   :  { %324 = vst.msk [vmem:[#allocation2 + $0x8] sm:$0x3] %vm309_vm0, %v267_v30  ;;  %330 = vrot.lane.b32.xlu2 %v267_v30, %s12898_s4 }
 0x142   :  { %338 = vst.msk [vmem:[#allocation2 + $0x10] sm:$0x3] %vm309_vm0, %v287_v32 }
 0x143   :  { %326 = vrot.lane.b32.xlu1 %v267_v30, %s10360_s3  ;;  %316 = vrot.lane.b32.xlu0 %v247_v24, %s12898_s4 }
 0x149   :  { %334 = vrot.lane.b32.xlu2 %v267_v30, %s10359_s25 }
 0x14b   :  { %344 = vrot.lane.b32.xlu1 %v287_v32, %s12898_s4  ;;  %340 = vrot.lane.b32.xlu0 %v287_v32, %s10360_s3 }
 0x151   :  { %348 = vrot.lane.b32.xlu2 %v287_v32, %s10359_s25 }
 0x153   :  { %358 = vrot.lane.b32.xlu1 %v307_v26, %s12898_s4  ;;  %354 = vrot.lane.b32.xlu0 %v307_v26, %s10360_s3  ;;  %s10769_s4 = sld [smem:[#allocation7 + $0xd]]  ;;  %s373_s3 = scalar_lea.vmem [#allocation2], %s7802_s28 }
 0x154   :  { %s396_s28 = scalar_lea.vmem [#allocation2], %s12910_s27 }
 0x159   :  { %362 = vrot.lane.b32.xlu2 %v307_v26, %s10359_s25  ;;  %s10732_s25 = sld [smem:[#allocation7 + $0x2]] }
 0x15f   :  { %s7807_s2 = sshll.u32 %s10732_s25, 1  ;;  %s7837_s25 = sshll.u32 %s10775_s1, 1 }
 0x160   :  { %s385_s15 = scalar_lea.vmem [#allocation2], %s7807_s2  ;;  %s7785_s1 = scalar_lea.vmem [#allocation2], %s7844_s10 }
 0x19b   :  { %v331_v33 = vpop.permute.xlu2 %330 }
 0x19c   :  { %333 = vst.msk [vmem:[#allocation2 + $0xc] sm:$0x3] %vm309_vm0, %v331_v33 }
 0x1a3   :  { %v335_v34 = vpop.permute.xlu2 %334 }
 0x1a4   :  { %337 = vst.msk [vmem:[#allocation2 + $0xe] sm:$0x3] %vm309_vm0, %v335_v34 }
 0x1ab   :  { %v349_v35 = vpop.permute.xlu2 %348 }
 0x1ac   :  { %351 = vst.msk [vmem:[#allocation2 + $0x16] sm:$0x3] %vm309_vm0, %v349_v35  ;;  %v664_v35 = vld [vmem:[%s12887_s7] sm:$0xff] }
 0x1ad   :  { %v321_v36 = vpop.permute.xlu1 %320  ;;  %v313_v37 = vpop.permute.xlu0 %312 }
 0x1ae   :  { %323 = vst.msk [vmem:[#allocation2 + $0x6] sm:$0x3] %vm309_vm0, %v321_v36  ;;  %v7870_v36 = vld [vmem:[%s12887_s7 + $0x20] sm:$0xff] }
 0x1af   :  { %315 = vst.msk [vmem:[#allocation2 + $0x2] sm:$0x3] %vm309_vm0, %v313_v37 }
 0x1b3   :  { %v363_v38 = vpop.permute.xlu2 %362 }
 0x1b4   :  { %365 = vst.msk [vmem:[#allocation2 + $0x1e] sm:$0x3] %vm309_vm0, %v363_v38  ;;  %v7879_v38 = vld [vmem:[%s12887_s7 + $0x40] sm:$0xff] }
 0x1b5   :  { %v327_v39 = vpop.permute.xlu1 %326  ;;  %v317_v40 = vpop.permute.xlu0 %316 }
 0x1b6   :  { %329 = vst.msk [vmem:[#allocation2 + $0xa] sm:$0x3] %vm309_vm0, %v327_v39  ;;  %v7881_v39 = vld [vmem:[%s12887_s7 + $0x50] sm:$0xff] }
 0x1b7   :  { %319 = vst.msk [vmem:[#allocation2 + $0x4] sm:$0x3] %vm309_vm0, %v317_v40 }
 0x1bd   :  { %v345_v41 = vpop.permute.xlu1 %344  ;;  %v341_v42 = vpop.permute.xlu0 %340 }
 0x1be   :  { %347 = vst.msk [vmem:[#allocation2 + $0x14] sm:$0x3] %vm309_vm0, %v345_v41 }
 0x1bf   :  { %343 = vst.msk [vmem:[#allocation2 + $0x12] sm:$0x3] %vm309_vm0, %v341_v42 }
 0x1c5   :  { %v359_v44 = vpop.permute.xlu1 %358  ;;  %v355_v45 = vpop.permute.xlu0 %354 }
 0x1c6   :  { %361 = vst.msk [vmem:[#allocation2 + $0x1c] sm:$0x3] %vm309_vm0, %v359_v44  ;;  %v665_v44 = vld [vmem:[%s12887_s7 + $0x8] sm:$0xff] }
 0x1c7   :  { %357 = vst.msk [vmem:[#allocation2 + $0x1a] sm:$0x3] %vm309_vm0, %v355_v45  ;;  %v7871_v45 = vld [vmem:[%s12887_s7 + $0x28] sm:$0xff] }
 0x1ce   :  { %v374_v50 = vld [vmem:[%s373_s3] sm:$0x1]  ;;  %v7805_v51 = vld [vmem:[%s7745_s24 + $0x1] sm:$0x1]  ;;  %s12913_s3 = sshll.u32 %s10746_s0, 1  ;;  %s12916_s0 = sshll.u32 %s10757_s19, 1 }
 0x1cf   :  { %v386_v52 = vld [vmem:[%s385_s15] sm:$0x1]  ;;  %376 = vst.msk [vmem:[#allocation3 + $0x2] sm:$0x1] %vm375_vm1, %v374_v50  ;;  %v7810_v53 = vld [vmem:[%s7750_s13 + $0x1] sm:$0x1] }
 0x1d0   :  { %382 = vst.msk [vmem:[#allocation3 + $0x3] sm:$0x1] %vm375_vm1, %v7805_v51  ;;  %v397_v54 = vld [vmem:[%s396_s28] sm:$0x1]  ;;  %s12911_s15 = sshll.u32 %s10741_s11, 1  ;;  %s12912_s13 = sshll.u32 %s10744_s30, 1 }
 0x1d1   :  { %387 = vst.msk [vmem:[#allocation3 + $0x4] sm:$0x1] %vm375_vm1, %v386_v52  ;;  %s7755_s2 = scalar_lea.vmem [#allocation2], %s12911_s15  ;;  %s407_s24 = scalar_lea.vmem [#allocation2], %s12912_s13  ;;  %v7845_v4 = vld [vmem:[%s7785_s1 + $0x1] sm:$0x1] }
 0x1d2   :  { %v7815_v55 = vld [vmem:[%s7755_s2 + $0x1] sm:$0x1]  ;;  %393 = vst.msk [vmem:[#allocation3 + $0x5] sm:$0x1] %vm375_vm1, %v7810_v53  ;;  %v408_v56 = vld [vmem:[%s407_s24] sm:$0x1] }
 0x1d3   :  { %398 = vst.msk [vmem:[#allocation3 + $0x6] sm:$0x1] %vm375_vm1, %v397_v54  ;;  %s7760_s27 = scalar_lea.vmem [#allocation2], %s12913_s3  ;;  %s10821_s11 = sld [smem:[#allocation7 + $0x16]]  ;;  %v666_v50 = vld [vmem:[%s12887_s7 + $0x10] sm:$0xff]  ;;  %v867_v54 = vld [vmem:[#allocation11 + $0x38] sm:$0xff] }
 0x1d4   :  { %v7820_v57 = vld [vmem:[%s7760_s27 + $0x1] sm:$0x1]  ;;  %404 = vst.msk [vmem:[#allocation3 + $0x7] sm:$0x1] %vm375_vm1, %v7815_v55  ;;  %s12914_s28 = sshll.u32 %s10749_s16, 1  ;;  %s10826_s30 = sld [smem:[#allocation7 + $0x17]] }
 0x1d5   :  { %s418_s15 = scalar_lea.vmem [#allocation2], %s12914_s28  ;;  %409 = vst.msk [vmem:[#allocation3 + $0x8] sm:$0x1] %vm375_vm1, %v408_v56  ;;  %s12915_s2 = sshll.u32 %s10753_s17, 1  ;;  %v7872_v51 = vld [vmem:[%s12887_s7 + $0x30] sm:$0xff] }
 0x1d6   :  { %v419_v58 = vld [vmem:[%s418_s15] sm:$0x1]  ;;  %s7765_s13 = scalar_lea.vmem [#allocation2], %s12915_s2  ;;  %415 = vst.msk [vmem:[#allocation3 + $0x9] sm:$0x1] %vm375_vm1, %v7820_v57  ;;  %s429_s24 = scalar_lea.vmem [#allocation2], %s12916_s0 }
 0x1d7   :  { %v7825_v59 = vld [vmem:[%s7765_s13 + $0x1] sm:$0x1]  ;;  %v430_v60 = vld [vmem:[%s429_s24] sm:$0x1]  ;;  %s7847_s3 = sshll.u32 %s10788_s18, 1  ;;  %s12917_s16 = sshll.u32 %s10760_s9, 1 }
 0x1d8   :  { %420 = vst.msk [vmem:[#allocation3 + $0xa] sm:$0x1] %vm375_vm1, %v419_v58  ;;  %s7770_s27 = scalar_lea.vmem [#allocation2], %s12917_s16  ;;  %s12918_s17 = sshll.u32 %s10763_s22, 1  ;;  %v667_v52 = vld [vmem:[%s12887_s7 + $0x18] sm:$0x3] }
 0x1d9   :  { %v7830_v61 = vld [vmem:[%s7770_s27 + $0x1] sm:$0x1]  ;;  %426 = vst.msk [vmem:[#allocation3 + $0xb] sm:$0x1] %vm375_vm1, %v7825_v59  ;;  %s440_s28 = scalar_lea.vmem [#allocation2], %s12918_s17  ;;  %s7849_s15 = sshll.u32 %s10796_s6, 1 }
 0x1da   :  { %v441_v62 = vld [vmem:[%s440_s28] sm:$0x1]  ;;  %431 = vst.msk [vmem:[#allocation3 + $0xc] sm:$0x1] %vm375_vm1, %v430_v60  ;;  %s12919_s19 = sshll.u32 %s10769_s4, 1  ;;  %s7852_s13 = sshll.u32 %s10801_s5, 1 }
 0x1db   :  { %s7775_s2 = scalar_lea.vmem [#allocation2], %s12919_s19  ;;  %437 = vst.msk [vmem:[#allocation3 + $0xd] sm:$0x1] %vm375_vm1, %v7830_v61  ;;  %s451_s9 = scalar_lea.vmem [#allocation2], %s7837_s25  ;;  %v504_v2 = vld [vmem:[#allocation3] sm:$0xff]  ;;  %v866_v56 = vld [vmem:[#allocation11 + $0x30] sm:$0xff] }
 0x1dc   :  { %v7835_v63 = vld [vmem:[%s7775_s2 + $0x1] sm:$0x1]  ;;  %v452_v0 = vld [vmem:[%s451_s9] sm:$0x1]  ;;  %s7854_s22 = sshll.u32 %s10816_s8, 1  ;;  %s7780_s6 = scalar_lea.vmem [#allocation2], %s7839_s29  ;;  %7861 = vmatmul.msk.f32.vlgmr.msrb.gmra.mxu1 %vm610_vm2, %v504_v2 }
 0x1dd   :  { %442 = vst.msk [vmem:[#allocation3 + $0xe] sm:$0x1] %vm375_vm1, %v441_v62  ;;  %v7840_v1 = vld [vmem:[%s7780_s6 + $0x1] sm:$0x1]  ;;  %s7857_s4 = sshll.u32 %s10821_s11, 1  ;;  %s462_s0 = scalar_lea.vmem [#allocation2], %s7842_s23 }
 0x1de   :  { %448 = vst.msk [vmem:[#allocation3 + $0xf] sm:$0x1] %vm375_vm1, %v7835_v63  ;;  %v463_v3 = vld [vmem:[%s462_s0] sm:$0x1]  ;;  %s7859_s5 = sshll.u32 %s10826_s30, 1  ;;  %s473_s26 = scalar_lea.vmem [#allocation2], %s7847_s3 }
 0x1df   :  { %453 = vst.msk [vmem:[#allocation3 + $0x10] sm:$0x1] %vm375_vm1, %v452_v0  ;;  %v474_v5 = vld [vmem:[%s473_s26] sm:$0x1]  ;;  %s7790_s25 = scalar_lea.vmem [#allocation2], %s7849_s15  ;;  %s484_s20 = scalar_lea.vmem [#allocation2], %s7852_s13 }
 0x1e0   :  { %459 = vst.msk [vmem:[#allocation3 + $0x11] sm:$0x1] %vm375_vm1, %v7840_v1  ;;  %v7850_v6 = vld [vmem:[%s7790_s25 + $0x1] sm:$0x1]  ;;  %v485_v7 = vld [vmem:[%s484_s20] sm:$0x1] }
 0x1e1   :  { %464 = vst.msk [vmem:[#allocation3 + $0x12] sm:$0x1] %vm375_vm1, %v463_v3  ;;  %s7795_s29 = scalar_lea.vmem [#allocation2], %s7854_s22  ;;  %s495_s21 = scalar_lea.vmem [#allocation2], %s7857_s4  ;;  %v7873_v53 = vld [vmem:[%s12887_s7 + $0x38] sm:$0x3] }
 0x1e2   :  { %470 = vst.msk [vmem:[#allocation3 + $0x13] sm:$0x1] %vm375_vm1, %v7845_v4  ;;  %v7855_v8 = vld [vmem:[%s7795_s29 + $0x1] sm:$0x1]  ;;  %v496_v9 = vld [vmem:[%s495_s21] sm:$0x1] }
 0x1e3   :  { %475 = vst.msk [vmem:[#allocation3 + $0x14] sm:$0x1] %vm375_vm1, %v474_v5  ;;  %s7800_s18 = scalar_lea.vmem [#allocation2], %s7859_s5  ;;  %s12920_s23 = smov 64   ;;  %v10012_v55 = vld [vmem:[%s12894_s14 + $0x3] ss:$0 sm:$0xff] }
 0x1e4   :  { %481 = vst.msk [vmem:[#allocation3 + $0x15] sm:$0x1] %vm375_vm1, %v7850_v6  ;;  %v7860_v10 = vld [vmem:[%s7800_s18 + $0x1] sm:$0x1]  ;;  %v865_v57 = vld [vmem:[#allocation11 + $0x28] sm:$0xff]  ;;  %v863_v1 = vld [vmem:[#allocation11 + $0x18] sm:$0xff] }
 0x1e5   :  { %486 = vst.msk [vmem:[#allocation3 + $0x16] sm:$0x1] %vm375_vm1, %v485_v7  ;;  %v505_v11 = vld [vmem:[#allocation3 + $0x8] sm:$0xff]  ;;  %v10013_v58 = vld [vmem:[%s12894_s14 + $0x4] ss:$0 sm:$0xff]  ;;  %v862_v7 = vld [vmem:[#allocation11 + $0x10] sm:$0xff] }
 0x1e6   :  { %492 = vst.msk [vmem:[#allocation3 + $0x17] sm:$0x1] %vm375_vm1, %v7855_v8  ;;  %7862 = vmatmul.msk.f32.gmra.mxu1 %vm610_vm2, %v505_v11  ;;  %v10014_v60 = vld [vmem:[%s12894_s14 + $0x2] ss:$0 sm:$0xff]  ;;  %v10015_v61 = vld [vmem:[%s12894_s14 + $0x1] ss:$0 sm:$0xff] }
 0x1e7   :  { %497 = vst.msk [vmem:[#allocation3 + $0x18] sm:$0x1] %vm375_vm1, %v496_v9  ;;  %v864_v63 = vld [vmem:[#allocation11 + $0x20] sm:$0xff]  ;;  %s12921_s24 = sld [smem:[#allocation19_spill]] }
 0x1e8   :  { %503 = vst.msk [vmem:[#allocation3 + $0x19] sm:$0x1] %vm375_vm1, %v7860_v10  ;;  %v10016_v0 = vld [vmem:[%s12894_s14] ss:$0 sm:$0xff]  ;;  %v861_v10 = vld [vmem:[#allocation11 + $0x8] sm:$0xff]  ;;  %s12922_s11 = sld [smem:[#allocation18_spill]] }
 0x1e9   :  { %s12923_s18 = sld [smem:[#allocation20_spill]] }
 0x1ea   :  { %s12924_s16 = sld [smem:[#allocation21_spill]] }
 0x1ed   :  { %v506_v12 = vld [vmem:[#allocation3 + $0x10] sm:$0xff] }
 0x1ee   :  { %7863 = vmatmul.msk.f32.gmra.mxu1 %vm610_vm2, %v506_v12 }
 0x1ef   :  { %v507_v13 = vld [vmem:[#allocation3 + $0x18] sm:$0x3] }
 0x1f0   :  { %7864 = vmatmul.msk.f32.vlgmr.msrb.gmra.mxu3 %vm610_vm2, %v507_v13  ;;  %v860_v13 = vld [vmem:[#allocation11] sm:$0xff] }
 0x259   :  { %v10876_v14 = vpop.f32.mrf.mxu1 }
 0x25a   :  { %v3974_v15 = vsub.f32 0.0, %v10876_v14  ;;  %v654_v59 = vmul.f32 %v10012_v55, %v10876_v14 }
 0x25c   :  { %v3978_v16 = vmul.f32 1.442695, %v3974_v15  ;;  %v660_v4 = vadd.f32 %v10013_v58, %v654_v59 }
 0x25e   :  { %10028 = vpow2.f32 %v3978_v16 }
 0x263   :  { %v10879_v17 = vpop.f32.mrf.mxu1 }
 0x264   :  { %v3975_v18 = vsub.f32 0.0, %v10879_v17  ;;  %v10029_v19 = vpop.eup %10028  ;;  %v655_v12 = vmul.f32 %v10012_v55, %v10879_v17 }
 0x265   :  { %v3986_v21 = vadd.f32 1.0, %v10029_v19 }
 0x266   :  { %v3980_v20 = vmul.f32 1.442695, %v3975_v18 }
 0x268   :  { %10030 = vpow2.f32 %v3980_v20  ;;  %v661_v20 = vadd.f32 %v10013_v58, %v655_v12  ;;  %v7992_v12 = vld [vmem:[#allocation13 + $0xe0] sm:$0xf0] }
 0x269   :  { %10032 = vrcp.f32 %v3986_v21 }
 0x26b   :  { %v10882_v22 = vpop.f32.mrf.mxu1 }
 0x26c   :  { %v3976_v23 = vsub.f32 0.0, %v10882_v22 }
 0x26e   :  { %v10031_v24 = vpop.eup %10030  ;;  %v3982_v25 = vmul.f32 1.442695, %v3976_v23 }
 0x26f   :  { %v10033_v26 = vpop.eup %10032  ;;  %v3987_v27 = vadd.f32 1.0, %v10031_v24 }
 0x270   :  { %v3994_v28 = vmul.f32 %v10033_v26, %v10876_v14  ;;  %10034 = vpow2.f32 %v3982_v25 }
 0x271   :  { %10036 = vrcp.f32 %v3987_v27 }
 0x272   :  { %4002 = vrot.lane.b32.xlu0 %v3994_v28, %s12920_s23  ;;  %v656_v28 = vmul.f32 %v10012_v55, %v10882_v22 }
 0x273   :  { %v10887_v29 = vpop.f32.mrf.mxu3 }
 0x274   :  { %7865 = vmatpush.msk.msrb.mxu2 %vm681_vm3, %v10887_v29  ;;  %7874 = vmatpush.msk.msra.mxu3 %vm681_vm3, %v10887_v29  ;;  %v3977_v30 = vsub.f32 0.0, %v10887_v29 }
 0x275   :  { %7883 = vmatpush.msk.msra.mxu0 %vm681_vm3, %v10887_v29  ;;  %9991 = vmatpush.msk.msra.mxu1 %vm681_vm3, %v10887_v29 }
 0x276   :  { %v10035_v31 = vpop.eup %10034  ;;  %698 = vmatpush.msrb.mxu2 %v10882_v22  ;;  %754 = vmatpush.msra.mxu3 %v10882_v22  ;;  %v3984_v32 = vmul.f32 1.442695, %v3977_v30 }
 0x277   :  { %v10037_v33 = vpop.eup %10036  ;;  %810 = vmatpush.msra.mxu0 %v10882_v22  ;;  %9992 = vmatpush.msra.mxu1 %v10882_v22  ;;  %v3988_v34 = vadd.f32 1.0, %v10035_v31 }
 0x278   :  { %699 = vmatpush.msrb.mxu2 %v10879_v17  ;;  %755 = vmatpush.msra.mxu3 %v10879_v17  ;;  %10038 = vpow2.f32 %v3984_v32  ;;  %v3995_v37 = vmul.f32 %v10037_v33, %v10879_v17 }
 0x279   :  { %811 = vmatpush.msra.mxu0 %v10879_v17  ;;  %9993 = vmatpush.msra.mxu1 %v10879_v17  ;;  %10040 = vrcp.f32 %v3988_v34  ;;  %v662_v34 = vadd.f32 %v10013_v58, %v656_v28  ;;  %v7960_v28 = vld [vmem:[#allocation13 + $0xa0] sm:$0xf0] }
 0x27a   :  { %700 = vmatpush.msrb.mxu2 %v10876_v14  ;;  %756 = vmatpush.msra.mxu3 %v10876_v14 }
 0x27b   :  { %812 = vmatpush.msra.mxu0 %v10876_v14  ;;  %9994 = vmatpush.msra.mxu1 %v10876_v14 }
 0x27c   :  { %7866 = vmatmul.msk.f32.vlgmr.msrb.gmra.mxu2 %vm668_vm4, %v664_v35  ;;  %7875 = vmatmul.msk.f32.vlgmr.msra.gmra.mxu3 %vm668_vm4, %v7870_v36 }
 0x27d   :  { %4004 = vrot.lane.b32.xlu1 %v3995_v37, %s12920_s23  ;;  %7884 = vmatmul.msk.f32.vlgmr.msra.gmra.mxu0 %vm668_vm4, %v7879_v38 }
 0x27e   :  { %v10039_v40 = vpop.eup %10038  ;;  %7886 = vmatmul.msk.f32.vlgmr.msra.gmra.mxu1 %vm668_vm4, %v7881_v39 }
 0x27f   :  { %v10041_v41 = vpop.eup %10040  ;;  %v3989_v42 = vadd.f32 1.0, %v10039_v40  ;;  %891 = vmatpush.msrb.mxu1 %v867_v54 }
 0x280   :  { %v3996_v43 = vmul.f32 %v10041_v41, %v10882_v22 }
 0x281   :  { %10042 = vrcp.f32 %v3989_v42  ;;  %892 = vmatpush.msrb.mxu1 %v866_v56 }
 0x282   :  { %4006 = vrot.lane.b32.xlu2 %v3996_v43, %s12920_s23  ;;  %v657_v43 = vmul.f32 %v10012_v55, %v10887_v29 }
 0x283   :  { %893 = vmatpush.msrb.mxu1 %v865_v57 }
 0x284   :  { %7867 = vmatmul.msk.f32.gmra.mxu2 %vm668_vm4, %v665_v44  ;;  %7876 = vmatmul.msk.f32.gmra.mxu3 %vm668_vm4, %v7871_v45 }
 0x285   :  { %7885 = vmatmul.msk.f32.gmra.mxu0 %vm668_vm4, %v7880_v46  ;;  %894 = vmatpush.msrb.mxu1 %v864_v63 }
 0x286   :  { %7887 = vmatmul.msk.f32.gmra.mxu1 %vm668_vm4, %v7882_v47 }
 0x287   :  { %v10043_v48 = vpop.eup %10042  ;;  %895 = vmatpush.msrb.mxu1 %v863_v1 }
 0x288   :  { %v3997_v49 = vmul.f32 %v10043_v48, %v10887_v29  ;;  %v663_v48 = vadd.f32 %v10013_v58, %v657_v43  ;;  %v7934_v43 = vld [vmem:[#allocation13 + $0x48] sm:$0xf] }
 0x289   :  { %896 = vmatpush.msrb.mxu1 %v862_v7  ;;  %v11002_v7 = vld [vmem:[%s12894_s14 + $0x5] ss:$0 sm:$0xff] }
 0x28a   :  { %4008 = vrot.lane.b32.xlu0 %v3997_v49, %s12920_s23 }
 0x28b   :  { %897 = vmatpush.msrb.mxu1 %v861_v10  ;;  %v9627_v10 = vld [vmem:[#allocation13 + $0xc4] sm:$0xf] }
 0x28c   :  { %7868 = vmatmul.msk.f32.gmra.mxu2 %vm668_vm4, %v666_v50  ;;  %7877 = vmatmul.msk.f32.gmra.mxu3 %vm668_vm4, %v7872_v51 }
 0x28d   :  { %898 = vmatpush.msrb.mxu1 %v860_v13  ;;  %v7998_v13 = vld [vmem:[#allocation13 + $0xc8] sm:$0xf] }
 0x294   :  { %7869 = vmatmul.msk.f32.gmra.mxu2 %vm668_vm4, %v667_v52  ;;  %7878 = vmatmul.msk.f32.gmra.mxu3 %vm668_vm4, %v7873_v53 }
 0x2fa   :  { %v814_v62 = vpop.f32.mrf.mxu0 }
 0x2fb   :  { %v828_v9 = vmul.f32 %v10016_v0, %v814_v62  ;;  %v820_v30 = vpop.f32.mrf.mxu1 }
 0x2fc   :  { %v830_v40 = vmul.f32 %v10016_v0, %v820_v30  ;;  %v7966_v30 = vld [vmem:[#allocation13 + $0x88] sm:$0xf] }
 0x2ff   :  { %v702_v2 = vpop.f32.mrf.mxu2  ;;  %v758_v3 = vpop.f32.mrf.mxu3 }
 0x300   :  { %v716_v5 = vmul.f32 %v10014_v60, %v702_v2  ;;  %v772_v6 = vmul.f32 %v10015_v61, %v758_v3 }
 0x302   :  { %v720_v8 = vadd.f32 %v716_v5, %v660_v4  ;;  %v817_v15 = vpop.f32.mrf.mxu0 }
 0x303   :  { %v829_v26 = vmul.f32 %v10016_v0, %v817_v15  ;;  %v823_v22 = vpop.f32.mrf.mxu1  ;;  %v7995_v15 = vor.u32 %v9627_v10, %v7992_v12 }
 0x304   :  { %v776_v11 = vadd.f32 %v772_v6, %v720_v8  ;;  %v831_v54 = vmul.f32 %v10016_v0, %v823_v22  ;;  %v7990_v8 = vld [vmem:[#allocation13 + $0xc0] sm:$0xf] }
 0x305   :  { %1141 = vmatpush.bf16.msrb.mxu3 %v7995_v15 }
 0x306   :  { %v832_v14 = vadd.f32 %v828_v9, %v776_v11  ;;  %v9631_v9 = vld [vmem:[#allocation13 + $0xdc] sm:$0xf0] }
 0x307   :  { %v705_v16 = vpop.f32.mrf.mxu2  ;;  %v761_v18 = vpop.f32.mrf.mxu3  ;;  %v7991_v11 = vor.u32 %v9631_v9, %v7990_v8 }
 0x308   :  { %v836_v19 = vsub.f32 0.0, %v832_v14  ;;  %v717_v21 = vmul.f32 %v10014_v60, %v705_v16  ;;  %v773_v23 = vmul.f32 %v10015_v61, %v761_v18  ;;  %v9628_v18 = vld [vmem:[#allocation13 + $0xcc] sm:$0xf] }
 0x309   :  { %1122 = vmatpush.bf16.msra.mxu2 %v7991_v11 }
 0x30a   :  { %v840_v24 = vmul.f32 1.442695, %v836_v19  ;;  %v721_v25 = vadd.f32 %v717_v21, %v661_v20  ;;  %v8000_v19 = vld [vmem:[#allocation13 + $0xe8] sm:$0xf0] }
 0x30b   :  { %v8003_v21 = vor.u32 %v9628_v18, %v8000_v19  ;;  %v8006_v19 = vld [vmem:[#allocation13 + $0xd0] sm:$0xf] }
 0x30c   :  { %10044 = vpow2.f32 %v840_v24  ;;  %v777_v27 = vadd.f32 %v773_v23, %v721_v25  ;;  %v7958_v24 = vld [vmem:[#allocation13 + $0x80] sm:$0xf] }
 0x30d   :  { %v9623_v25 = vld [vmem:[#allocation13 + $0x9c] sm:$0xf0]  ;;  %1179 = vmatpush.bf16.msra.mxu1 %v8003_v21 }
 0x30e   :  { %v833_v31 = vadd.f32 %v829_v26, %v777_v27  ;;  %v9619_v26 = vld [vmem:[#allocation13 + $0x84] sm:$0xf]  ;;  %v7959_v27 = vor.u32 %v9623_v25, %v7958_v24  ;;  %v9629_v25 = vld [vmem:[#allocation13 + $0xd4] sm:$0xf] }
 0x30f   :  { %v708_v17 = vpop.f32.mrf.mxu2  ;;  %v764_v32 = vpop.f32.mrf.mxu3 }
 0x310   :  { %v837_v33 = vsub.f32 0.0, %v833_v31  ;;  %v718_v35 = vmul.f32 %v10014_v60, %v708_v17  ;;  %v774_v36 = vmul.f32 %v10015_v61, %v764_v32  ;;  %v7963_v32 = vor.u32 %v9619_v26, %v7960_v28  ;;  %1123 = vmatpush.bf16.msra.mxu2 %v7959_v27  ;;  %v8008_v26 = vld [vmem:[#allocation13 + $0xf0] sm:$0xf0]  ;;  %v8014_v28 = vld [vmem:[#allocation13 + $0xd8] sm:$0xf] }
 0x311   :  { %v8011_v27 = vor.u32 %v9629_v25, %v8008_v26 }
 0x312   :  { %v10045_v37 = vpop.eup %10044  ;;  %v842_v38 = vmul.f32 1.442695, %v837_v33  ;;  %v722_v39 = vadd.f32 %v718_v35, %v662_v34  ;;  %v9620_v34 = vld [vmem:[#allocation13 + $0x8c] sm:$0xf]  ;;  %1142 = vmatpush.bf16.msrb.mxu3 %v7963_v32 }
 0x313   :  { %v848_v41 = vadd.f32 1.0, %v10045_v37  ;;  %v7968_v35 = vld [vmem:[#allocation13 + $0xa8] sm:$0xf0] }
 0x314   :  { %10046 = vpow2.f32 %v842_v38  ;;  %v778_v42 = vadd.f32 %v774_v36, %v722_v39  ;;  %v7971_v37 = vor.u32 %v9620_v34, %v7968_v35  ;;  %v7926_v38 = vld [vmem:[#allocation13 + $0x40] sm:$0xf]  ;;  %v8016_v34 = vld [vmem:[#allocation13 + $0xf8] sm:$0xf0] }
 0x315   :  { %10048 = vrcp.f32 %v848_v41  ;;  %v9615_v39 = vld [vmem:[#allocation13 + $0x5c] sm:$0xf0]  ;;  %v9611_v41 = vld [vmem:[#allocation13 + $0x44] sm:$0xf] }
 0x316   :  { %v834_v44 = vadd.f32 %v830_v40, %v778_v42  ;;  %v7927_v40 = vor.u32 %v9615_v39, %v7926_v38  ;;  %v7928_v42 = vld [vmem:[#allocation13 + $0x60] sm:$0xf0]  ;;  %1180 = vmatpush.bf16.msra.mxu1 %v7971_v37  ;;  %v9625_v37 = vld [vmem:[#allocation13 + $0xac] sm:$0xf0] }
 0x317   :  { %v711_v45 = vpop.f32.mrf.mxu2  ;;  %v767_v46 = vpop.f32.mrf.mxu3  ;;  %v7931_v22 = vor.u32 %v9611_v41, %v7928_v42  ;;  %v7976_v41 = vld [vmem:[#allocation13 + $0xb0] sm:$0xf0]  ;;  %v7982_v42 = vld [vmem:[#allocation13 + $0x98] sm:$0xf] }
 0x318   :  { %v838_v47 = vsub.f32 0.0, %v834_v44  ;;  %v719_v49 = vmul.f32 %v10014_v60, %v711_v45  ;;  %v775_v50 = vmul.f32 %v10015_v61, %v767_v46  ;;  %v9616_v45 = vld [vmem:[#allocation13 + $0x64] sm:$0xf0]  ;;  %v9612_v46 = vld [vmem:[#allocation13 + $0x4c] sm:$0xf]  ;;  %1124 = vmatpush.bf16.msra.mxu2 %v7927_v40 }
 0x319   :  { %1143 = vmatpush.bf16.msrb.mxu3 %v7931_v22  ;;  %v9622_v22 = vld [vmem:[#allocation13 + $0x9c] sm:$0xf] }
 0x31a   :  { %v10047_v51 = vpop.eup %10046  ;;  %v844_v52 = vmul.f32 1.442695, %v838_v47  ;;  %v723_v53 = vadd.f32 %v719_v49, %v663_v48  ;;  %v7935_v48 = vor.u32 %v9616_v45, %v7934_v43  ;;  %v7936_v49 = vld [vmem:[#allocation13 + $0x68] sm:$0xf0]  ;;  %v7984_v45 = vld [vmem:[#allocation13 + $0xb8] sm:$0xf0] }
 0x31b   :  { %v10049_v56 = vpop.eup %10048  ;;  %v849_v57 = vadd.f32 1.0, %v10047_v51  ;;  %v7939_v51 = vor.u32 %v9612_v46, %v7936_v49  ;;  %v7987_v49 = vor.u32 %v9622_v22, %v7984_v45  ;;  %v9719_v45 = vld [vmem:[%s12892_s12 + $0x9c] sm:$0xf0] }
 0x31c   :  { %v10983_v59 = vmul.f32 %v10049_v56, %v832_v14  ;;  %10050 = vpow2.f32 %v844_v52  ;;  %v779_v29 = vadd.f32 %v775_v50, %v723_v53  ;;  %v9632_v14 = vld [vmem:[#allocation13 + $0xe4] sm:$0xf0]  ;;  %v7894_v52 = vld [vmem:[#allocation13] sm:$0xf] }
 0x31d   :  { %10052 = vrcp.f32 %v849_v57  ;;  %v7999_v16 = vor.u32 %v9632_v14, %v7998_v13  ;;  %v9607_v53 = vld [vmem:[#allocation13 + $0x1c] sm:$0xf0]  ;;  %v7896_v57 = vld [vmem:[#allocation13 + $0x20] sm:$0xf0]  ;;  %1181 = vmatpush.bf16.msra.mxu1 %v7939_v51  ;;  %v7942_v51 = vld [vmem:[#allocation13 + $0x50] sm:$0xf] }
 0x31e   :  { %v835_v55 = vadd.f32 %v831_v54, %v779_v29  ;;  %7888 = vmatmul.msk.f32.vlgmr.msrb.gmra.mxu1 %vm870_vm5, %v10983_v59  ;;  %v9603_v54 = vld [vmem:[#allocation13 + $0x4] sm:$0xf]  ;;  %v7895_v56 = vor.u32 %v9607_v53, %v7894_v52  ;;  %v7902_v29 = vld [vmem:[#allocation13 + $0x8] sm:$0xf]  ;;  %v9617_v52 = vld [vmem:[#allocation13 + $0x6c] sm:$0xf0] }
 0x31f   :  { %1160 = vmatpush.bf16.msrb.mxu0 %v7999_v16 }
 0x320   :  { %v839_v62 = vsub.f32 0.0, %v835_v55  ;;  %1125 = vmatpush.bf16.msra.mxu2 %v7895_v56  ;;  %v7943_v56 = vor.u32 %v9617_v52, %v7942_v51  ;;  %v8110_v51 = vld [vmem:[%s12892_s12 + $0x88] sm:$0xf] }
 0x321   :  { %v9720_v52 = vld [vmem:[%s12892_s12 + $0xa4] sm:$0xf0] }
 0x322   :  { %v10051_v58 = vpop.eup %10050  ;;  %v846_v60 = vmul.f32 1.442695, %v839_v62 }
 0x323   :  { %v10053_v61 = vpop.eup %10052  ;;  %v850_v63 = vadd.f32 1.0, %v10051_v58  ;;  %v7899_v58 = vor.u32 %v9603_v54, %v7896_v57  ;;  %v9613_v57 = vld [vmem:[#allocation13 + $0x54] sm:$0xf] }
 0x324   :  { %v10987_v1 = vmul.f32 %v10053_v61, %v833_v31  ;;  %10054 = vpow2.f32 %v846_v60  ;;  %v9624_v31 = vld [vmem:[#allocation13 + $0xa4] sm:$0xf0]  ;;  %v9604_v61 = vld [vmem:[#allocation13 + $0xc] sm:$0xf] }
 0x325   :  { %10056 = vrcp.f32 %v850_v63  ;;  %v7967_v33 = vor.u32 %v9624_v31, %v7966_v30  ;;  %v7904_v63 = vld [vmem:[#allocation13 + $0x28] sm:$0xf0]  ;;  %1144 = vmatpush.bf16.msrb.mxu3 %v7899_v58  ;;  %v9634_v30 = vld [vmem:[#allocation13 + $0xf4] sm:$0xf0]  ;;  %v9630_v31 = vld [vmem:[#allocation13 + $0xdc] sm:$0xf] }
 0x326   :  { %7889 = vmatmul.msk.f32.gmra.mxu1 %vm870_vm5, %v10987_v1  ;;  %v8019_v35 = vor.u32 %v9630_v31, %v8016_v34  ;;  %v7950_v58 = vld [vmem:[#allocation13 + $0x58] sm:$0xf] }
 0x327   :  { %1161 = vmatpush.bf16.msrb.mxu0 %v7967_v33  ;;  %v8015_v33 = vor.u32 %v9634_v30, %v8014_v28 }
 0x329   :  { %1217 = vmatpush.bf16.msra.mxu3 %v8011_v27 }
 0x32a   :  { %v10055_v0 = vpop.eup %10054 }
 0x32b   :  { %v10057_v2 = vpop.eup %10056  ;;  %v851_v3 = vadd.f32 1.0, %v10055_v0  ;;  %1162 = vmatpush.bf16.msrb.mxu0 %v7935_v48 }
 0x32c   :  { %v10991_v4 = vmul.f32 %v10057_v2, %v834_v44  ;;  %v7907_v2 = vor.u32 %v9604_v61, %v7904_v63  ;;  %v9614_v63 = vld [vmem:[#allocation13 + $0x5c] sm:$0xf] }
 0x32d   :  { %10058 = vrcp.f32 %v851_v3 }
 0x32e   :  { %7890 = vmatmul.msk.f32.gmra.mxu1 %vm870_vm5, %v10991_v4 }
 0x32f   :  { %1182 = vmatpush.bf16.msra.mxu1 %v7907_v2  ;;  %v7910_v2 = vld [vmem:[#allocation13 + $0x10] sm:$0xf] }
 0x333   :  { %v10059_v5 = vpop.eup %10058  ;;  %1255 = vmatpush.bf16.msrb.mxu1 %v8019_v35 }
 0x334   :  { %v10995_v6 = vmul.f32 %v10059_v5, %v835_v55  ;;  %v9608_v55 = vld [vmem:[#allocation13 + $0x24] sm:$0xf0] }
 0x335   :  { %v7903_v60 = vor.u32 %v9608_v55, %v7902_v29  ;;  %v7944_v29 = vld [vmem:[#allocation13 + $0x70] sm:$0xf0] }
 0x336   :  { %7891 = vmatmul.msk.f32.gmra.mxu1 %vm870_vm5, %v10995_v6 }
 0x337   :  { %1163 = vmatpush.bf16.msrb.mxu0 %v7903_v60  ;;  %v9618_v60 = vld [vmem:[#allocation13 + $0x74] sm:$0xf0]  ;;  %1256 = vmatpush.bf16.msrb.mxu1 %v7987_v49 }
 0x338   :  { %v7951_v61 = vor.u32 %v9618_v60, %v7950_v58  ;;  %v8078_v58 = vld [vmem:[%s12892_s12 + $0x48] sm:$0xf] }
 0x33b   :  { %1236 = vmatpush.bf16.msra.mxu0 %v8015_v33 }
 0x39b   :  { %v900_v20 = vpop.f32.mrf.mxu1 }
 0x39c   :  { %v11005_v23 = vadd.f32 %v11002_v7, %v900_v20  ;;  %v9633_v20 = vld [vmem:[#allocation13 + $0xec] sm:$0xf0] }
 0x39d   :  { %v8007_v24 = vor.u32 %v9633_v20, %v8006_v19  ;;  %v7920_v19 = vld [vmem:[#allocation13 + $0x38] sm:$0xf0] }
 0x39e   :  { %v916_v17 = vand.u32 2147483647, %v11005_v23  ;;  %v912_v38 = vmax.f32 %v11005_v23, 0.0 }
 0x39f   :  { %1198 = vmatpush.bf16.msrb.mxu2 %v8007_v24 }
 0x3a0   :  { %v920_v36 = vsub.f32 0.0, %v916_v17 }
 0x3a2   :  { %v924_v44 = vmul.f32 1.442695, %v920_v36  ;;  %v7974_v36 = vld [vmem:[#allocation13 + $0x90] sm:$0xf] }
 0x3a3   :  { %v903_v47 = vpop.f32.mrf.mxu1  ;;  %v7975_v40 = vor.u32 %v9625_v37, %v7974_v36  ;;  %v9723_v36 = vld [vmem:[%s12892_s12 + $0xc4] sm:$0xf] }
 0x3a4   :  { %10060 = vpow2.f32 %v924_v44  ;;  %v11009_v50 = vadd.f32 %v11002_v7, %v903_v47  ;;  %v9626_v44 = vld [vmem:[#allocation13 + $0xb4] sm:$0xf0] }
 0x3a5   :  { %1199 = vmatpush.bf16.msrb.mxu2 %v7975_v40  ;;  %v7983_v48 = vor.u32 %v9626_v44, %v7982_v42  ;;  %v9724_v42 = vld [vmem:[%s12892_s12 + $0xcc] sm:$0xf]  ;;  %v8102_v44 = vld [vmem:[%s12892_s12 + $0x80] sm:$0xf] }
 0x3a6   :  { %v917_v62 = vand.u32 2147483647, %v11009_v50  ;;  %v913_v23 = vmax.f32 %v11009_v50, 0.0 }
 0x3a7   :  { %1237 = vmatpush.bf16.msra.mxu0 %v7983_v48  ;;  %v8103_v48 = vor.u32 %v9719_v45, %v8102_v44  ;;  %v9722_v44 = vld [vmem:[%s12892_s12 + $0xb4] sm:$0xf0] }
 0x3a8   :  { %v921_v0 = vsub.f32 0.0, %v917_v62  ;;  %v7947_v62 = vor.u32 %v9613_v57, %v7944_v29  ;;  %v9711_v57 = vld [vmem:[%s12892_s12 + $0x5c] sm:$0xf0] }
 0x3a9   :  { %1200 = vmatpush.bf16.msrb.mxu2 %v7943_v56  ;;  %v8070_v56 = vld [vmem:[%s12892_s12 + $0x40] sm:$0xf] }
 0x3aa   :  { %v10061_v3 = vpop.eup %10060  ;;  %v926_v5 = vmul.f32 1.442695, %v921_v0  ;;  %v7952_v0 = vld [vmem:[#allocation13 + $0x78] sm:$0xf0]  ;;  %v8071_v60 = vor.u32 %v9711_v57, %v8070_v56 }
 0x3ab   :  { %v932_v8 = vadd.f32 1.0, %v10061_v3  ;;  %v906_v9 = vpop.f32.mrf.mxu1  ;;  %v7955_v50 = vor.u32 %v9614_v63, %v7952_v0  ;;  %1238 = vmatpush.bf16.msra.mxu0 %v7951_v61  ;;  %v9712_v61 = vld [vmem:[%s12892_s12 + $0x64] sm:$0xf0]  ;;  %v9708_v63 = vld [vmem:[%s12892_s12 + $0x4c] sm:$0xf] }
 0x3ac   :  { %10062 = vpow2.f32 %v926_v5  ;;  %v11013_v10 = vadd.f32 %v11002_v7, %v906_v9  ;;  %v9605_v9 = vld [vmem:[#allocation13 + $0x14] sm:$0xf]  ;;  %v8080_v0 = vld [vmem:[%s12892_s12 + $0x68] sm:$0xf0]  ;;  %v9710_v56 = vld [vmem:[%s12892_s12 + $0x5c] sm:$0xf] }
 0x3ad   :  { %10064 = vlog2.f32 %v932_v8  ;;  %v9609_v8 = vld [vmem:[#allocation13 + $0x2c] sm:$0xf0]  ;;  %1257 = vmatpush.bf16.msrb.mxu1 %v7955_v50  ;;  %v8079_v50 = vor.u32 %v9712_v61, %v8078_v58  ;;  %v8096_v57 = vld [vmem:[%s12892_s12 + $0x78] sm:$0xf0] }
 0x3ae   :  { %v918_v11 = vand.u32 2147483647, %v11013_v10  ;;  %v914_v31 = vmax.f32 %v11013_v10, 0.0  ;;  %v8134_v10 = vld [vmem:[%s12892_s12 + $0xc0] sm:$0xf]  ;;  %v8099_v58 = vor.u32 %v9710_v56, %v8096_v57 }
 0x3af   :  { %v9705_v61 = vld [vmem:[%s12892_s12 + $0x2c] sm:$0xf0]  ;;  %v9639_v56 = vld [vmem:[#allocation13 + $0x11c] sm:$0xf0]  ;;  %v9635_v57 = vld [vmem:[#allocation13 + $0x104] sm:$0xf] }
 0x3b0   :  { %v922_v12 = vsub.f32 0.0, %v918_v11  ;;  %v7912_v11 = vld [vmem:[#allocation13 + $0x30] sm:$0xf0] }
 0x3b2   :  { %v10063_v13 = vpop.eup %10062  ;;  %v928_v14 = vmul.f32 1.442695, %v922_v12  ;;  %v7918_v12 = vld [vmem:[#allocation13 + $0x18] sm:$0xf] }
 0x3b3   :  { %v10065_v15 = vpop.eup %10064  ;;  %v933_v16 = vadd.f32 1.0, %v10063_v13  ;;  %v909_v18 = vpop.f32.mrf.mxu1  ;;  %v9610_v13 = vld [vmem:[#allocation13 + $0x34] sm:$0xf0] }
 0x3b4   :  { %10066 = vpow2.f32 %v928_v14  ;;  %v11017_v21 = vadd.f32 %v11002_v7, %v909_v18  ;;  %v937_v17 = vmul.f32 0.6931472, %v10065_v15  ;;  %v9621_v7 = vld [vmem:[#allocation13 + $0x94] sm:$0xf]  ;;  %v9606_v14 = vld [vmem:[#allocation13 + $0x1c] sm:$0xf]  ;;  %v7915_v18 = vor.u32 %v9605_v9, %v7912_v11 }
 0x3b5   :  { %10068 = vlog2.f32 %v933_v16  ;;  %v7979_v43 = vor.u32 %v9621_v7, %v7976_v41  ;;  %v7911_v16 = vor.u32 %v9609_v8, %v7910_v2  ;;  %v7919_v20 = vor.u32 %v9610_v13, %v7918_v12  ;;  %v8136_v7 = vld [vmem:[%s12892_s12 + $0xe0] sm:$0xf0]  ;;  %v8038_v9 = vld [vmem:[%s12892_s12] sm:$0xf] }
 0x3b6   :  { %v919_v32 = vand.u32 2147483647, %v11017_v21  ;;  %v11022_v3 = vadd.f32 %v937_v17, %v912_v38  ;;  %v7923_v24 = vor.u32 %v9606_v14, %v7920_v19  ;;  %v915_v17 = vmax.f32 %v11017_v21, 0.0  ;;  %v9727_v21 = vld [vmem:[%s12892_s12 + $0xdc] sm:$0xf0] }
 0x3b7   :  { %1218 = vmatpush.bf16.msra.mxu3 %v7979_v43  ;;  %1201 = vmatpush.bf16.msrb.mxu2 %v7911_v16  ;;  %v8135_v37 = vor.u32 %v9727_v21, %v8134_v10  ;;  %v8142_v38 = vld [vmem:[%s12892_s12 + $0xc8] sm:$0xf]  ;;  %v8139_v40 = vor.u32 %v9723_v36, %v8136_v7  ;;  %v8144_v43 = vld [vmem:[%s12892_s12 + $0xe8] sm:$0xf0]  ;;  %v8083_v8 = vor.u32 %v9708_v63, %v8080_v0  ;;  %v9703_v11 = vld [vmem:[%s12892_s12 + $0x1c] sm:$0xf0] }
 0x3b8   :  { %v923_v39 = vsub.f32 0.0, %v919_v32  ;;  %1239 = vmatpush.bf16.msra.mxu0 %v7919_v20  ;;  %1258 = vmatpush.bf16.msrb.mxu1 %v7923_v24  ;;  %v8147_v22 = vor.u32 %v9724_v42, %v8144_v43  ;;  %v9699_v12 = vld [vmem:[%s12892_s12 + $0x4] sm:$0xf]  ;;  %v8046_v14 = vld [vmem:[%s12892_s12 + $0x8] sm:$0xf]  ;;  %v8039_v20 = vor.u32 %v9703_v11, %v8038_v9 }
 0x3b9   :  { %v8040_v13 = vld [vmem:[%s12892_s12 + $0x20] sm:$0xf0]  ;;  %v9704_v16 = vld [vmem:[%s12892_s12 + $0x24] sm:$0xf0]  ;;  %v8048_v19 = vld [vmem:[%s12892_s12 + $0x28] sm:$0xf0] }
 0x3ba   :  { %v10067_v46 = vpop.eup %10066  ;;  %v930_v47 = vmul.f32 1.442695, %v923_v39  ;;  %v9728_v39 = vld [vmem:[%s12892_s12 + $0xe4] sm:$0xf0]  ;;  %v8043_v24 = vor.u32 %v9699_v12, %v8040_v13  ;;  %v9726_v21 = vld [vmem:[%s12892_s12 + $0xdc] sm:$0xf] }
 0x3bb   :  { %v10069_v53 = vpop.eup %10068  ;;  %v934_v54 = vadd.f32 1.0, %v10067_v46  ;;  %1219 = vmatpush.bf16.msra.mxu3 %v7947_v62  ;;  %v8143_v41 = vor.u32 %v9728_v39, %v8142_v38  ;;  %v9715_v46 = vld [vmem:[%s12892_s12 + $0x84] sm:$0xf]  ;;  %v8160_v36 = vld [vmem:[%s12892_s12 + $0xf8] sm:$0xf0] }
 0x3bc   :  { %v939_v55 = vmul.f32 0.6931472, %v10069_v53  ;;  %10070 = vpow2.f32 %v930_v47  ;;  %v8104_v47 = vld [vmem:[%s12892_s12 + $0xa0] sm:$0xf0]  ;;  %v9716_v53 = vld [vmem:[%s12892_s12 + $0x8c] sm:$0xf]  ;;  %v8163_v7 = vor.u32 %v9726_v21, %v8160_v36 }
 0x3bd   :  { %10072 = vlog2.f32 %v934_v54  ;;  %v8107_v49 = vor.u32 %v9715_v46, %v8104_v47  ;;  %v8112_v54 = vld [vmem:[%s12892_s12 + $0xa8] sm:$0xf0]  ;;  %v8072_v62 = vld [vmem:[%s12892_s12 + $0x60] sm:$0xf0]  ;;  %v9721_v38 = vld [vmem:[%s12892_s12 + $0xac] sm:$0xf0] }
 0x3be   :  { %v11024_v5 = vadd.f32 %v939_v55, %v913_v23  ;;  %v8111_v23 = vor.u32 %v9720_v52, %v8110_v51  ;;  %v8115_v29 = vor.u32 %v9716_v53, %v8112_v54  ;;  %v9707_v55 = vld [vmem:[%s12892_s12 + $0x44] sm:$0xf]  ;;  %v9717_v39 = vld [vmem:[%s12892_s12 + $0x94] sm:$0xf]  ;;  %v8126_v43 = vld [vmem:[%s12892_s12 + $0x98] sm:$0xf] }
 0x3bf   :  { %1220 = vmatpush.bf16.msra.mxu3 %v7915_v18  ;;  %v8075_v2 = vor.u32 %v9707_v55, %v8072_v62  ;;  %v9700_v18 = vld [vmem:[%s12892_s12 + $0xc] sm:$0xf]  ;;  %v8127_v45 = vor.u32 %v9722_v44, %v8126_v43  ;;  %v8128_v46 = vld [vmem:[%s12892_s12 + $0xb8] sm:$0xf0]  ;;  %v8086_v47 = vld [vmem:[%s12892_s12 + $0x50] sm:$0xf] }
 0x3c0   :  { %v11028_v15 = vpack.c.bf16 %v11024_v5, %v11022_v3  ;;  %v9709_v51 = vld [vmem:[%s12892_s12 + $0x54] sm:$0xf]  ;;  %v8094_v53 = vld [vmem:[%s12892_s12 + $0x58] sm:$0xf]  ;;  %v1367_v62 = vmul.f32 %v11024_v5, %v10987_v1  ;;  %v8064_v9 = vld [vmem:[%s12892_s12 + $0x38] sm:$0xf0] }
 0x3c1   :  { %v8088_v52 = vld [vmem:[%s12892_s12 + $0x70] sm:$0xf0]  ;;  %v9714_v54 = vld [vmem:[%s12892_s12 + $0x74] sm:$0xf0]  ;;  %v8248_v21 = vld [vmem:[#allocation13 + $0x1a0] sm:$0xf0] }
 0x3c2   :  { %v10071_v25 = vpop.eup %10070  ;;  %8020 = vmatmul.msk.bf16.vlgmr.msra.gmra.mxu2 %vm870_vm5, %v11028_v15  ;;  %8022 = vmatmul.msk.bf16.vlgmr.msrb.gmra.mxu3 %vm870_vm5, %v11028_v15  ;;  %v8095_v55 = vor.u32 %v9714_v54, %v8094_v53  ;;  %v9701_v63 = vld [vmem:[%s12892_s12 + $0x14] sm:$0xf]  ;;  %v8062_v5 = vld [vmem:[%s12892_s12 + $0x18] sm:$0xf]  ;;  %v9647_v43 = vld [vmem:[#allocation13 + $0x15c] sm:$0xf0] }
 0x3c3   :  { %v935_v26 = vadd.f32 1.0, %v10071_v25  ;;  %8024 = vmatmul.msk.bf16.vlgmr.msrb.gmra.mxu0 %vm870_vm5, %v11028_v15  ;;  %8026 = vmatmul.msk.bf16.vlgmr.msra.gmra.mxu1 %vm870_vm5, %v11028_v15  ;;  %v10073_v27 = vpop.eup %10072  ;;  %v8047_v25 = vor.u32 %v9704_v16, %v8046_v14  ;;  %v8056_v0 = vld [vmem:[%s12892_s12 + $0x30] sm:$0xf0]  ;;  %v8182_v54 = vld [vmem:[#allocation13 + $0x100] sm:$0xf] }
 0x3c4   :  { %v941_v28 = vmul.f32 0.6931472, %v10073_v27  ;;  %1574 = vmatpush.bf16.msra.mxu2 %v8135_v37  ;;  %1593 = vmatpush.bf16.msrb.mxu3 %v8139_v40  ;;  %v9729_v27 = vld [vmem:[%s12892_s12 + $0xec] sm:$0xf0]  ;;  %v8120_v40 = vld [vmem:[%s12892_s12 + $0xb0] sm:$0xf0] }
 0x3c5   :  { %10074 = vlog2.f32 %v935_v26  ;;  %1612 = vmatpush.bf16.msrb.mxu0 %v8143_v41  ;;  %1631 = vmatpush.bf16.msra.mxu1 %v8147_v22  ;;  %v8051_v26 = vor.u32 %v9700_v18, %v8048_v19  ;;  %v8118_v37 = vld [vmem:[%s12892_s12 + $0x90] sm:$0xf]  ;;  %v8123_v42 = vor.u32 %v9717_v39, %v8120_v40  ;;  %v9718_v22 = vld [vmem:[%s12892_s12 + $0x9c] sm:$0xf]  ;;  %v9652_v39 = vld [vmem:[#allocation13 + $0x18c] sm:$0xf] }
 0x3c6   :  { %v11040_v33 = vadd.f32 %v941_v28, %v914_v31  ;;  %v9725_v28 = vld [vmem:[%s12892_s12 + $0xd4] sm:$0xf]  ;;  %v8119_v41 = vor.u32 %v9721_v38, %v8118_v37  ;;  %v9656_v38 = vld [vmem:[#allocation13 + $0x1a4] sm:$0xf0] }
 0x3c7   :  { %v8152_v31 = vld [vmem:[%s12892_s12 + $0xf0] sm:$0xf0] }
 0x3c8   :  { %1575 = vmatpush.bf16.msra.mxu2 %v8103_v48  ;;  %1594 = vmatpush.bf16.msrb.mxu3 %v8107_v49  ;;  %v9713_v48 = vld [vmem:[%s12892_s12 + $0x6c] sm:$0xf0]  ;;  %v8131_v49 = vor.u32 %v9718_v22, %v8128_v46  ;;  %v1368_v18 = vmul.f32 %v11040_v33, %v10991_v4  ;;  %v9643_v22 = vld [vmem:[#allocation13 + $0x144] sm:$0xf]  ;;  %v8222_v46 = vld [vmem:[#allocation13 + $0x148] sm:$0xf] }
 0x3c9   :  { %1613 = vmatpush.bf16.msrb.mxu0 %v8111_v23  ;;  %1632 = vmatpush.bf16.msra.mxu1 %v8115_v29  ;;  %v8087_v23 = vor.u32 %v9713_v48, %v8086_v47  ;;  %v8091_v29 = vor.u32 %v9709_v51, %v8088_v52  ;;  %v9648_v48 = vld [vmem:[#allocation13 + $0x164] sm:$0xf0]  ;;  %v8224_v51 = vld [vmem:[#allocation13 + $0x168] sm:$0xf0] }
 0x3ca   :  { %v8223_v53 = vor.u32 %v9648_v48, %v8222_v46  ;;  %v9641_v48 = vld [vmem:[#allocation13 + $0x12c] sm:$0xf0] }
 0x3cb   :  { %v10075_v30 = vpop.eup %10074 }
 0x3cc   :  { %v943_v32 = vmul.f32 0.6931472, %v10075_v30  ;;  %1576 = vmatpush.bf16.msra.mxu2 %v8071_v60  ;;  %1595 = vmatpush.bf16.msrb.mxu3 %v8075_v2  ;;  %v8054_v60 = vld [vmem:[%s12892_s12 + $0x10] sm:$0xf]  ;;  %v1366_v2 = vmul.f32 %v11022_v3, %v10983_v59  ;;  %v8059_v3 = vor.u32 %v9701_v63, %v8056_v0  ;;  %v9636_v63 = vld [vmem:[#allocation13 + $0x10c] sm:$0xf] }
 0x3cd   :  { %1614 = vmatpush.bf16.msrb.mxu0 %v8079_v50  ;;  %1633 = vmatpush.bf16.msra.mxu1 %v8083_v8  ;;  %v9706_v50 = vld [vmem:[%s12892_s12 + $0x34] sm:$0xf0]  ;;  %v9702_v8 = vld [vmem:[%s12892_s12 + $0x1c] sm:$0xf]  ;;  %v8055_v12 = vor.u32 %v9705_v61, %v8054_v60  ;;  %v8192_v0 = vld [vmem:[#allocation13 + $0x128] sm:$0xf0] }
 0x3ce   :  { %v11042_v34 = vadd.f32 %v943_v32, %v915_v17  ;;  %v8158_v17 = vld [vmem:[%s12892_s12 + $0xd8] sm:$0xf]  ;;  %v11268_v11 = vpack.c.bf16 %v1367_v62, %v1366_v2  ;;  %v8063_v13 = vor.u32 %v9706_v50, %v8062_v5  ;;  %v8067_v14 = vor.u32 %v9702_v8, %v8064_v9  ;;  %v8190_v62 = vld [vmem:[#allocation13 + $0x108] sm:$0xf]  ;;  %v8294_v2 = vld [vmem:[#allocation13 + $0x1d0] sm:$0xf] }
 0x3cf   :  { %v9730_v32 = vld [vmem:[%s12892_s12 + $0xf4] sm:$0xf0]  ;;  %v8195_v5 = vor.u32 %v9636_v63, %v8192_v0  ;;  %v9665_v50 = vld [vmem:[#allocation13 + $0x1ec] sm:$0xf0]  ;;  %v9661_v8 = vld [vmem:[#allocation13 + $0x1d4] sm:$0xf] }
 0x3d0   :  { %v11046_v35 = vpack.c.bf16 %v11042_v34, %v11040_v33  ;;  %1577 = vmatpush.bf16.msra.mxu2 %v8039_v20  ;;  %1596 = vmatpush.bf16.msrb.mxu3 %v8043_v24  ;;  %v8159_v10 = vor.u32 %v9730_v32, %v8158_v17  ;;  %v1369_v16 = vmul.f32 %v11042_v34, %v10995_v6  ;;  %v8278_v20 = vld [vmem:[#allocation13 + $0x1c0] sm:$0xf]  ;;  %v9659_v34 = vld [vmem:[#allocation13 + $0x1c4] sm:$0xf]  ;;  %v8286_v33 = vld [vmem:[#allocation13 + $0x1c8] sm:$0xf] }
 0x3d1   :  { %1615 = vmatpush.bf16.msrb.mxu0 %v8047_v25  ;;  %1634 = vmatpush.bf16.msra.mxu1 %v8051_v26  ;;  %v9663_v24 = vld [vmem:[#allocation13 + $0x1dc] sm:$0xf0]  ;;  %v8280_v26 = vld [vmem:[#allocation13 + $0x1e0] sm:$0xf0]  ;;  %v8295_v9 = vor.u32 %v9665_v50, %v8294_v2 }
 0x3d2   :  { %8021 = vmatmul.msk.bf16.gmra.mxu2 %vm870_vm5, %v11046_v35  ;;  %8023 = vmatmul.msk.bf16.gmra.mxu3 %vm870_vm5, %v11046_v35  ;;  %v11282_v19 = vpack.c.bf16 %v1369_v16, %v1368_v18  ;;  %v8279_v25 = vor.u32 %v9663_v24, %v8278_v20  ;;  %v8246_v17 = vld [vmem:[#allocation13 + $0x180] sm:$0xf]  ;;  %v9662_v16 = vld [vmem:[#allocation13 + $0x1dc] sm:$0xf]  ;;  %v8262_v24 = vld [vmem:[#allocation13 + $0x190] sm:$0xf] }
 0x3d3   :  { %8025 = vmatmul.msk.bf16.gmra.mxu0 %vm870_vm5, %v11046_v35  ;;  %8027 = vmatmul.msk.bf16.gmra.mxu1 %vm870_vm5, %v11046_v35  ;;  %v8304_v18 = vld [vmem:[#allocation13 + $0x1f8] sm:$0xf0] }
 0x3d4   :  { %v8307_v20 = vor.u32 %v9662_v16, %v8304_v18  ;;  %v11322_v16 = vpack.c.bf16 %v10995_v6, %v10991_v4 }
 0x3e2   :  { %8028 = vmatmul.msk.bf16.vlgmr.msrb.gmra.mxu2 %vm870_vm5, %v11028_v15  ;;  %8030 = vmatmul.msk.bf16.vlgmr.msra.gmra.mxu3 %vm870_vm5, %v11028_v15 }
 0x3e3   :  { %8032 = vmatmul.msk.bf16.vlgmr.msra.gmra.mxu0 %vm870_vm5, %v11028_v15  ;;  %8034 = vmatmul.msk.bf16.vlgmr.msrb.gmra.mxu1 %vm870_vm5, %v11028_v15  ;;  %v8150_v15 = vld [vmem:[%s12892_s12 + $0xd0] sm:$0xf] }
 0x3e4   :  { %v8151_v30 = vor.u32 %v9729_v27, %v8150_v15  ;;  %1688 = vmatpush.bf16.msra.mxu0 %v8159_v10  ;;  %1707 = vmatpush.bf16.msrb.mxu1 %v8163_v7  ;;  %v9664_v15 = vld [vmem:[#allocation13 + $0x1e4] sm:$0xf0]  ;;  %v8283_v27 = vor.u32 %v9659_v34, %v8280_v26  ;;  %v9651_v10 = vld [vmem:[#allocation13 + $0x184] sm:$0xf]  ;;  %v9657_v34 = vld [vmem:[#allocation13 + $0x1ac] sm:$0xf0] }
 0x3e5   :  { %v8251_v37 = vor.u32 %v9651_v10, %v8248_v21  ;;  %v8254_v7 = vld [vmem:[#allocation13 + $0x188] sm:$0xf]  ;;  %v8264_v26 = vld [vmem:[#allocation13 + $0x1b0] sm:$0xf0]  ;;  %v8230_v21 = vld [vmem:[#allocation13 + $0x150] sm:$0xf] }
 0x3e6   :  { %1650 = vmatpush.bf16.msrb.mxu2 %v8151_v30  ;;  %v9660_v30 = vld [vmem:[#allocation13 + $0x1cc] sm:$0xf]  ;;  %v8255_v40 = vor.u32 %v9656_v38, %v8254_v7 }
 0x3e8   :  { %1689 = vmatpush.bf16.msra.mxu0 %v8127_v45  ;;  %1708 = vmatpush.bf16.msrb.mxu1 %v8131_v49  ;;  %v8216_v45 = vld [vmem:[#allocation13 + $0x160] sm:$0xf0]  ;;  %v9644_v49 = vld [vmem:[#allocation13 + $0x14c] sm:$0xf] }
 0x3e9   :  { %v8219_v52 = vor.u32 %v9643_v22, %v8216_v45  ;;  %v8240_v45 = vld [vmem:[#allocation13 + $0x178] sm:$0xf0] }
 0x3ea   :  { %1651 = vmatpush.bf16.msrb.mxu2 %v8119_v41  ;;  %v8256_v41 = vld [vmem:[#allocation13 + $0x1a8] sm:$0xf0] }
 0x3eb   :  { %v8259_v44 = vor.u32 %v9652_v39, %v8256_v41 }
 0x3ec   :  { %1690 = vmatpush.bf16.msra.mxu0 %v8095_v55  ;;  %1709 = vmatpush.bf16.msrb.mxu1 %v8099_v58  ;;  %v8184_v55 = vld [vmem:[#allocation13 + $0x120] sm:$0xf0]  ;;  %v9640_v58 = vld [vmem:[#allocation13 + $0x124] sm:$0xf0] }
 0x3ed   :  { %v8187_v60 = vor.u32 %v9635_v57, %v8184_v55  ;;  %v8191_v61 = vor.u32 %v9640_v58, %v8190_v62  ;;  %v9638_v58 = vld [vmem:[#allocation13 + $0x11c] sm:$0xf] }
 0x3ee   :  { %1652 = vmatpush.bf16.msrb.mxu2 %v8087_v23  ;;  %v8227_v23 = vor.u32 %v9644_v49, %v8224_v51  ;;  %v9637_v49 = vld [vmem:[#allocation13 + $0x114] sm:$0xf] }
 0x3f0   :  { %1691 = vmatpush.bf16.msra.mxu0 %v8063_v13  ;;  %1710 = vmatpush.bf16.msrb.mxu1 %v8067_v14 }
 0x3f2   :  { %8029 = vmatmul.msk.bf16.gmra.mxu2 %vm870_vm5, %v11046_v35  ;;  %8031 = vmatmul.msk.bf16.gmra.mxu3 %vm870_vm5, %v11046_v35 }
 0x3f3   :  { %8033 = vmatmul.msk.bf16.gmra.mxu0 %vm870_vm5, %v11046_v35  ;;  %8035 = vmatmul.msk.bf16.gmra.mxu1 %vm870_vm5, %v11046_v35  ;;  %v8155_v35 = vor.u32 %v9725_v28, %v8152_v31  ;;  %v8287_v28 = vor.u32 %v9664_v15, %v8286_v33  ;;  %v8288_v31 = vld [vmem:[#allocation13 + $0x1e8] sm:$0xf0]  ;;  %v8270_v33 = vld [vmem:[#allocation13 + $0x198] sm:$0xf] }
 0x3f4   :  { %1653 = vmatpush.bf16.msrb.mxu2 %v8055_v12  ;;  %v8291_v32 = vor.u32 %v9660_v30, %v8288_v31  ;;  %v8302_v12 = vld [vmem:[#allocation13 + $0x1d8] sm:$0xf]  ;;  %v9654_v30 = vld [vmem:[#allocation13 + $0x19c] sm:$0xf] }
 0x3f5   :  { %1669 = vmatpush.bf16.msra.mxu3 %v8155_v35  ;;  %v9655_v35 = vld [vmem:[#allocation13 + $0x19c] sm:$0xf0]  ;;  %v9658_v15 = vld [vmem:[#allocation13 + $0x1b4] sm:$0xf0]  ;;  %v8272_v31 = vld [vmem:[#allocation13 + $0x1b8] sm:$0xf0] }
 0x3f6   :  { %v8247_v36 = vor.u32 %v9655_v35, %v8246_v17  ;;  %v8275_v17 = vor.u32 %v9654_v30, %v8272_v31 }
 0x3f9   :  { %1670 = vmatpush.bf16.msra.mxu3 %v8123_v42  ;;  %v8214_v42 = vld [vmem:[#allocation13 + $0x140] sm:$0xf] }
 0x3fa   :  { %v8215_v47 = vor.u32 %v9647_v43, %v8214_v42  ;;  %v8238_v42 = vld [vmem:[#allocation13 + $0x158] sm:$0xf] }
 0x3fb   :  { %v9650_v43 = vld [vmem:[#allocation13 + $0x174] sm:$0xf0] }
 0x3fc   :  { %v8239_v22 = vor.u32 %v9650_v43, %v8238_v42 }
 0x3fd   :  { %1671 = vmatpush.bf16.msra.mxu3 %v8091_v29  ;;  %v8183_v29 = vor.u32 %v9639_v56, %v8182_v54  ;;  %v8206_v54 = vld [vmem:[#allocation13 + $0x118] sm:$0xf] }
 0x3fe   :  { %v9642_v56 = vld [vmem:[#allocation13 + $0x134] sm:$0xf0] }
 0x3ff   :  { %v8207_v62 = vor.u32 %v9642_v56, %v8206_v54 }
 0x401   :  { %1672 = vmatpush.bf16.msra.mxu3 %v8059_v3  ;;  %v9666_v3 = vld [vmem:[#allocation13 + $0x1f4] sm:$0xf0] }
 0x402   :  { %8164 = vmatmul.msk.bf16.vlgmr.msra.gmra.mxu2 %vm870_vm5, %v11268_v11  ;;  %8166 = vmatmul.msk.bf16.vlgmr.msrb.gmra.mxu3 %vm870_vm5, %v11268_v11  ;;  %v8303_v14 = vor.u32 %v9666_v3, %v8302_v12 }
 0x403   :  { %8168 = vmatmul.msk.bf16.vlgmr.msrb.gmra.mxu0 %vm870_vm5, %v11268_v11  ;;  %8170 = vmatmul.msk.bf16.vlgmr.msra.gmra.mxu1 %vm870_vm5, %v11268_v11 }
 0x404   :  { %1892 = vmatpush.bf16.msra.mxu2 %v8279_v25  ;;  %1930 = vmatpush.bf16.msrb.mxu0 %v8287_v28  ;;  %v9653_v25 = vld [vmem:[#allocation13 + $0x194] sm:$0xf]  ;;  %v8271_v28 = vor.u32 %v9658_v15, %v8270_v33 }
 0x405   :  { %1911 = vmatpush.bf16.msrb.mxu3 %v8283_v27  ;;  %1949 = vmatpush.bf16.msra.mxu1 %v8291_v32  ;;  %v8267_v27 = vor.u32 %v9653_v25, %v8264_v26  ;;  %v11310_v32 = vpack.c.bf16 %v10987_v1, %v10983_v59 }
 0x408   :  { %1893 = vmatpush.bf16.msra.mxu2 %v8247_v36  ;;  %1931 = vmatpush.bf16.msrb.mxu0 %v8255_v40  ;;  %v9649_v36 = vld [vmem:[#allocation13 + $0x16c] sm:$0xf0]  ;;  %v8232_v40 = vld [vmem:[#allocation13 + $0x170] sm:$0xf0] }
 0x409   :  { %1912 = vmatpush.bf16.msrb.mxu3 %v8251_v37  ;;  %1950 = vmatpush.bf16.msra.mxu1 %v8259_v44  ;;  %v9645_v37 = vld [vmem:[#allocation13 + $0x154] sm:$0xf]  ;;  %v8231_v39 = vor.u32 %v9649_v36, %v8230_v21  ;;  %v9646_v44 = vld [vmem:[#allocation13 + $0x15c] sm:$0xf] }
 0x40a   :  { %v8235_v41 = vor.u32 %v9645_v37, %v8232_v40  ;;  %v8243_v46 = vor.u32 %v9646_v44, %v8240_v45  ;;  %v8422_v40 = vld [vmem:[#allocation13 + $0x2c0] sm:$0xf]  ;;  %v9691_v45 = vld [vmem:[#allocation13 + $0x2c4] sm:$0xf] }
 0x40c   :  { %1894 = vmatpush.bf16.msra.mxu2 %v8215_v47  ;;  %1932 = vmatpush.bf16.msrb.mxu0 %v8223_v53  ;;  %v8198_v47 = vld [vmem:[#allocation13 + $0x110] sm:$0xf] }
 0x40d   :  { %1913 = vmatpush.bf16.msrb.mxu3 %v8219_v52  ;;  %1951 = vmatpush.bf16.msra.mxu1 %v8227_v23  ;;  %v8199_v53 = vor.u32 %v9641_v48, %v8198_v47  ;;  %v8200_v23 = vld [vmem:[#allocation13 + $0x130] sm:$0xf0]  ;;  %v8424_v47 = vld [vmem:[#allocation13 + $0x2e0] sm:$0xf0]  ;;  %v8430_v48 = vld [vmem:[#allocation13 + $0x2c8] sm:$0xf] }
 0x40e   :  { %v8203_v55 = vor.u32 %v9637_v49, %v8200_v23  ;;  %v9696_v49 = vld [vmem:[#allocation13 + $0x2e4] sm:$0xf0] }
 0x410   :  { %1895 = vmatpush.bf16.msra.mxu2 %v8183_v29  ;;  %1933 = vmatpush.bf16.msrb.mxu0 %v8191_v61 }
 0x411   :  { %1914 = vmatpush.bf16.msrb.mxu3 %v8187_v60  ;;  %1952 = vmatpush.bf16.msra.mxu1 %v8195_v5  ;;  %v8208_v60 = vld [vmem:[#allocation13 + $0x138] sm:$0xf0] }
 0x412   :  { %8165 = vmatmul.msk.bf16.gmra.mxu2 %vm870_vm5, %v11282_v19  ;;  %8167 = vmatmul.msk.bf16.gmra.mxu3 %vm870_vm5, %v11282_v19  ;;  %v8211_v0 = vor.u32 %v9638_v58, %v8208_v60 }
 0x413   :  { %8169 = vmatmul.msk.bf16.gmra.mxu0 %vm870_vm5, %v11282_v19  ;;  %8171 = vmatmul.msk.bf16.gmra.mxu1 %vm870_vm5, %v11282_v19 }
 0x422   :  { %8172 = vmatmul.msk.bf16.vlgmr.msrb.gmra.mxu2 %vm870_vm5, %v11268_v11  ;;  %8174 = vmatmul.msk.bf16.vlgmr.msra.gmra.mxu3 %vm870_vm5, %v11268_v11 }
 0x423   :  { %8176 = vmatmul.msk.bf16.vlgmr.msra.gmra.mxu0 %vm870_vm5, %v11268_v11  ;;  %8178 = vmatmul.msk.bf16.vlgmr.msrb.gmra.mxu1 %vm870_vm5, %v11268_v11  ;;  %v8296_v11 = vld [vmem:[#allocation13 + $0x1f0] sm:$0xf0] }
 0x424   :  { %v8299_v13 = vor.u32 %v9661_v8, %v8296_v11  ;;  %1968 = vmatpush.bf16.msrb.mxu2 %v8295_v9  ;;  %2006 = vmatpush.bf16.msra.mxu0 %v8303_v14 }
 0x425   :  { %2025 = vmatpush.bf16.msrb.mxu1 %v8307_v20 }
 0x426   :  { %1987 = vmatpush.bf16.msra.mxu3 %v8299_v13 }
 0x428   :  { %2007 = vmatpush.bf16.msra.mxu0 %v8271_v28 }
 0x429   :  { %2026 = vmatpush.bf16.msrb.mxu1 %v8275_v17 }
 0x42a   :  { %1988 = vmatpush.bf16.msra.mxu3 %v8267_v27 }
 0x42c   :  { %2008 = vmatpush.bf16.msra.mxu0 %v8239_v22  ;;  %v9695_v22 = vld [vmem:[#allocation13 + $0x2dc] sm:$0xf0] }
 0x42d   :  { %2027 = vmatpush.bf16.msrb.mxu1 %v8243_v46  ;;  %v8423_v46 = vor.u32 %v9695_v22, %v8422_v40 }
 0x42e   :  { %1989 = vmatpush.bf16.msra.mxu3 %v8235_v41 }
 0x430   :  { %2009 = vmatpush.bf16.msra.mxu0 %v8207_v62 }
 0x431   :  { %2028 = vmatpush.bf16.msrb.mxu1 %v8211_v0 }
 0x432   :  { %8173 = vmatmul.msk.bf16.gmra.mxu2 %vm870_vm5, %v11282_v19  ;;  %8175 = vmatmul.msk.bf16.gmra.mxu3 %vm870_vm5, %v11282_v19 }
 0x433   :  { %8177 = vmatmul.msk.bf16.gmra.mxu0 %vm870_vm5, %v11282_v19  ;;  %8179 = vmatmul.msk.bf16.gmra.mxu1 %vm870_vm5, %v11282_v19  ;;  %v8263_v19 = vor.u32 %v9657_v34, %v8262_v24 }
 0x434   :  { %1990 = vmatpush.bf16.msra.mxu3 %v8203_v55 }
 0x435   :  { %1969 = vmatpush.bf16.msrb.mxu2 %v8263_v19 }
 0x439   :  { %1970 = vmatpush.bf16.msrb.mxu2 %v8231_v39 }
 0x43d   :  { %1971 = vmatpush.bf16.msrb.mxu2 %v8199_v53  ;;  %v8431_v53 = vor.u32 %v9696_v49, %v8430_v48  ;;  %v8358_v48 = vld [vmem:[#allocation13 + $0x240] sm:$0xf] }
 0x440   :  { %v1165_v35 = vpop.f32.mrf.mxu0  ;;  %v1184_v10 = vpop.f32.mrf.mxu1 }
 0x441   :  { %v1274_v7 = vmul.f32 1.442695, %v1165_v35  ;;  %v1276_v38 = vmul.f32 1.442695, %v1184_v10 }
 0x442   :  { %8308 = vmatmul.msk.bf16.vlgmr.msra.gmra.mxu2 %vm870_vm5, %v11310_v32  ;;  %8310 = vmatmul.msk.bf16.vlgmr.msrb.gmra.mxu3 %vm870_vm5, %v11310_v32 }
 0x443   :  { %10076 = vpow2.f32 %v1274_v7  ;;  %8312 = vmatmul.msk.bf16.vlgmr.msrb.gmra.mxu0 %vm870_vm5, %v11310_v32  ;;  %8314 = vmatmul.msk.bf16.vlgmr.msra.gmra.mxu1 %vm870_vm5, %v11310_v32 }
 0x444   :  { %10078 = vpow2.f32 %v1276_v38  ;;  %3076 = vmatpush.bf16.msra.mxu2 %v8423_v46  ;;  %3114 = vmatpush.bf16.msrb.mxu0 %v8431_v53 }
 0x445   :  { %v1127_v51 = vpop.f32.mrf.mxu2  ;;  %v1146_v52 = vpop.f32.mrf.mxu3 }
 0x446   :  { %v1270_v57 = vmul.f32 1.442695, %v1127_v51  ;;  %v1272_v29 = vmul.f32 1.442695, %v1146_v52  ;;  %v8427_v52 = vor.u32 %v9691_v45, %v8424_v47 }
 0x448   :  { %10080 = vpow2.f32 %v1270_v57  ;;  %v1167_v61 = vpop.f32.mrf.mxu0  ;;  %v1186_v63 = vpop.f32.mrf.mxu1  ;;  %v9692_v57 = vld [vmem:[#allocation13 + $0x2cc] sm:$0xf]  ;;  %3095 = vmatpush.bf16.msrb.mxu3 %v8427_v52 }
 0x449   :  { %v10077_v5 = vpop.eup %10076  ;;  %10082 = vpow2.f32 %v1272_v29  ;;  %v1290_v2 = vmul.f32 1.442695, %v1167_v61  ;;  %v1292_v50 = vmul.f32 1.442695, %v1186_v63  ;;  %v8432_v63 = vld [vmem:[#allocation13 + $0x2e8] sm:$0xf0] }
 0x44a   :  { %v10079_v8 = vpop.eup %10078  ;;  %1336 = vst [vmem:[#allocation4 + $0xd8] sm:$0xff] %v10077_v5 }
 0x44b   :  { %1337 = vst [vmem:[#allocation4 + $0x18] sm:$0xff] %v10079_v8  ;;  %10084 = vpow2.f32 %v1290_v2 }
 0x44c   :  { %10086 = vpow2.f32 %v1292_v50  ;;  %v8435_v50 = vor.u32 %v9692_v57, %v8432_v63  ;;  %v9675_v57 = vld [vmem:[#allocation13 + $0x244] sm:$0xf] }
 0x44d   :  { %v1129_v9 = vpop.f32.mrf.mxu2  ;;  %v1148_v11 = vpop.f32.mrf.mxu3 }
 0x44e   :  { %v10081_v12 = vpop.eup %10080  ;;  %v1286_v3 = vmul.f32 1.442695, %v1129_v9  ;;  %v1288_v13 = vmul.f32 1.442695, %v1148_v11  ;;  %v8390_v9 = vld [vmem:[#allocation13 + $0x280] sm:$0xf]  ;;  %3133 = vmatpush.bf16.msra.mxu1 %v8435_v50 }
 0x44f   :  { %v10083_v14 = vpop.eup %10082  ;;  %1334 = vst [vmem:[#allocation4 + $0xb0] sm:$0xff] %v10081_v12  ;;  %v9687_v11 = vld [vmem:[#allocation13 + $0x29c] sm:$0xf0] }
 0x450   :  { %1335 = vst [vmem:[#allocation4] sm:$0xff] %v10083_v14  ;;  %10088 = vpow2.f32 %v1286_v3  ;;  %v1170_v18 = vpop.f32.mrf.mxu0  ;;  %v1189_v20 = vpop.f32.mrf.mxu1  ;;  %v8391_v3 = vor.u32 %v9687_v11, %v8390_v9  ;;  %v8392_v14 = vld [vmem:[#allocation13 + $0x2a0] sm:$0xf0] }
 0x451   :  { %v10085_v24 = vpop.eup %10084  ;;  %10090 = vpow2.f32 %v1288_v13  ;;  %v1306_v25 = vmul.f32 1.442695, %v1170_v18  ;;  %v1308_v19 = vmul.f32 1.442695, %v1189_v20  ;;  %v9683_v13 = vld [vmem:[#allocation13 + $0x284] sm:$0xf] }
 0x452   :  { %v10087_v34 = vpop.eup %10086  ;;  %1344 = vst [vmem:[#allocation4 + $0xe8] sm:$0xff] %v10085_v24  ;;  %8309 = vmatmul.msk.bf16.gmra.mxu2 %vm870_vm5, %v11322_v16  ;;  %8311 = vmatmul.msk.bf16.gmra.mxu3 %vm870_vm5, %v11322_v16  ;;  %v8395_v20 = vor.u32 %v9683_v13, %v8392_v14 }
 0x453   :  { %1345 = vst [vmem:[#allocation4 + $0xb8] sm:$0xff] %v10087_v34  ;;  %8313 = vmatmul.msk.bf16.gmra.mxu0 %vm870_vm5, %v11322_v16  ;;  %8315 = vmatmul.msk.bf16.gmra.mxu1 %vm870_vm5, %v11322_v16  ;;  %10092 = vpow2.f32 %v1306_v25 }
 0x454   :  { %10094 = vpow2.f32 %v1308_v19  ;;  %3077 = vmatpush.bf16.msra.mxu2 %v8391_v3  ;;  %3096 = vmatpush.bf16.msrb.mxu3 %v8395_v20  ;;  %v9671_v20 = vld [vmem:[#allocation13 + $0x21c] sm:$0xf0] }
 0x455   :  { %v1132_v26 = vpop.f32.mrf.mxu2  ;;  %v1151_v33 = vpop.f32.mrf.mxu3 }
 0x456   :  { %v10089_v15 = vpop.eup %10088  ;;  %v1302_v17 = vmul.f32 1.442695, %v1132_v26  ;;  %v1304_v35 = vmul.f32 1.442695, %v1151_v33 }
 0x457   :  { %v10091_v27 = vpop.eup %10090  ;;  %1342 = vst [vmem:[#allocation4 + $0x80] sm:$0xff] %v10089_v15 }
 0x458   :  { %1343 = vst [vmem:[#allocation4 + $0x88] sm:$0xff] %v10091_v27  ;;  %v1172_v28 = vpop.f32.mrf.mxu0  ;;  %v1191_v30 = vpop.f32.mrf.mxu1  ;;  %10096 = vpow2.f32 %v1302_v17 }
 0x459   :  { %v10093_v31 = vpop.eup %10092  ;;  %v1322_v10 = vmul.f32 1.442695, %v1172_v28  ;;  %v1324_v36 = vmul.f32 1.442695, %v1191_v30  ;;  %10098 = vpow2.f32 %v1304_v35  ;;  %v8398_v35 = vld [vmem:[#allocation13 + $0x288] sm:$0xf] }
 0x45a   :  { %v10095_v21 = vpop.eup %10094  ;;  %1352 = vst [vmem:[#allocation4 + $0x40] sm:$0xff] %v10093_v31 }
 0x45b   :  { %1353 = vst [vmem:[#allocation4 + $0xc8] sm:$0xff] %v10095_v21  ;;  %10100 = vpow2.f32 %v1322_v10  ;;  %v9688_v10 = vld [vmem:[#allocation13 + $0x2a4] sm:$0xf0] }
 0x45c   :  { %10102 = vpow2.f32 %v1324_v36  ;;  %v8399_v21 = vor.u32 %v9688_v10, %v8398_v35  ;;  %v9684_v36 = vld [vmem:[#allocation13 + $0x28c] sm:$0xf]  ;;  %v9697_v10 = vld [vmem:[#allocation13 + $0x2ec] sm:$0xf0] }
 0x45d   :  { %v1134_v37 = vpop.f32.mrf.mxu2  ;;  %v1153_v7 = vpop.f32.mrf.mxu3 }
 0x45e   :  { %v1318_v41 = vmul.f32 1.442695, %v1134_v37  ;;  %v1320_v42 = vmul.f32 1.442695, %v1153_v7  ;;  %v10097_v51 = vpop.eup %10096  ;;  %v8400_v37 = vld [vmem:[#allocation13 + $0x2a8] sm:$0xf0]  ;;  %3115 = vmatpush.bf16.msrb.mxu0 %v8399_v21 }
 0x45f   :  { %v10099_v23 = vpop.eup %10098  ;;  %1350 = vst [vmem:[#allocation4 + $0x38] sm:$0xff] %v10097_v51  ;;  %v9693_v21 = vld [vmem:[#allocation13 + $0x2d4] sm:$0xf] }
 0x460   :  { %v1241_v38 = vpop.f32.mrf.mxu0  ;;  %v1260_v39 = vpop.f32.mrf.mxu1  ;;  %10104 = vpow2.f32 %v1318_v41  ;;  %1351 = vst [vmem:[#allocation4 + $0x58] sm:$0xff] %v10099_v23 }
 0x461   :  { %v1282_v43 = vmul.f32 1.442695, %v1241_v38  ;;  %v1284_v44 = vmul.f32 1.442695, %v1260_v39  ;;  %10106 = vpow2.f32 %v1320_v42  ;;  %v10101_v29 = vpop.eup %10100  ;;  %v8403_v39 = vor.u32 %v9684_v36, %v8400_v37  ;;  %v8440_v36 = vld [vmem:[#allocation13 + $0x2f0] sm:$0xf0] }
 0x462   :  { %8316 = vmatmul.msk.bf16.vlgmr.msrb.gmra.mxu2 %vm870_vm5, %v11310_v32  ;;  %8318 = vmatmul.msk.bf16.vlgmr.msra.gmra.mxu3 %vm870_vm5, %v11310_v32  ;;  %v10103_v58 = vpop.eup %10102  ;;  %1360 = vst [vmem:[#allocation4 + $0x10] sm:$0x3] %v10101_v29  ;;  %v8360_v29 = vld [vmem:[#allocation13 + $0x260] sm:$0xf0] }
 0x463   :  { %8320 = vmatmul.msk.bf16.vlgmr.msra.gmra.mxu0 %vm870_vm5, %v11310_v32  ;;  %8322 = vmatmul.msk.bf16.vlgmr.msrb.gmra.mxu1 %vm870_vm5, %v11310_v32  ;;  %10108 = vpow2.f32 %v1282_v43  ;;  %1361 = vst [vmem:[#allocation4 + $0x28] sm:$0x3] %v10103_v58  ;;  %v9680_v58 = vld [vmem:[#allocation13 + $0x264] sm:$0xf0] }
 0x464   :  { %10110 = vpow2.f32 %v1284_v44  ;;  %3134 = vmatpush.bf16.msra.mxu1 %v8403_v39 }
 0x465   :  { %v1203_v54 = vpop.f32.mrf.mxu2  ;;  %v1222_v56 = vpop.f32.mrf.mxu3 }
 0x466   :  { %v1278_v55 = vmul.f32 1.442695, %v1203_v54  ;;  %v1280_v62 = vmul.f32 1.442695, %v1222_v56  ;;  %v10105_v0 = vpop.eup %10104  ;;  %v9679_v54 = vld [vmem:[#allocation13 + $0x25c] sm:$0xf0] }
 0x467   :  { %v10107_v8 = vpop.eup %10106  ;;  %1358 = vst [vmem:[#allocation4 + $0xa8] sm:$0x3] %v10105_v0  ;;  %v8359_v56 = vor.u32 %v9679_v54, %v8358_v48  ;;  %v8414_v54 = vld [vmem:[#allocation13 + $0x298] sm:$0xf] }
 0x468   :  { %10112 = vpow2.f32 %v1278_v55  ;;  %v1243_v60 = vpop.f32.mrf.mxu0  ;;  %v1262_v61 = vpop.f32.mrf.mxu1  ;;  %1359 = vst [vmem:[#allocation4 + $0xd0] sm:$0x3] %v10107_v8  ;;  %v8363_v55 = vor.u32 %v9675_v57, %v8360_v29  ;;  %v8368_v8 = vld [vmem:[#allocation13 + $0x268] sm:$0xf0] }
 0x469   :  { %10114 = vpow2.f32 %v1280_v62  ;;  %v1298_v5 = vmul.f32 1.442695, %v1243_v60  ;;  %v1300_v2 = vmul.f32 1.442695, %v1262_v61  ;;  %v10109_v12 = vpop.eup %10108  ;;  %3078 = vmatpush.bf16.msra.mxu2 %v8359_v56  ;;  %v8366_v62 = vld [vmem:[#allocation13 + $0x248] sm:$0xf] }
 0x46a   :  { %v10111_v18 = vpop.eup %10110  ;;  %1340 = vst [vmem:[#allocation4 + $0x30] sm:$0xff] %v10109_v12  ;;  %v8367_v60 = vor.u32 %v9680_v58, %v8366_v62  ;;  %3097 = vmatpush.bf16.msrb.mxu3 %v8363_v55  ;;  %v9690_v55 = vld [vmem:[#allocation13 + $0x2b4] sm:$0xf0]  ;;  %v9686_v62 = vld [vmem:[#allocation13 + $0x29c] sm:$0xf] }
 0x46b   :  { %10116 = vpow2.f32 %v1298_v5  ;;  %1341 = vst [vmem:[#allocation4 + $0x48] sm:$0xff] %v10111_v18  ;;  %v9676_v5 = vld [vmem:[#allocation13 + $0x24c] sm:$0xf]  ;;  %v8326_v18 = vld [vmem:[#allocation13 + $0x200] sm:$0xf] }
 0x46c   :  { %10118 = vpow2.f32 %v1300_v2  ;;  %3116 = vmatpush.bf16.msrb.mxu0 %v8367_v60  ;;  %v8371_v13 = vor.u32 %v9676_v5, %v8368_v8  ;;  %v8416_v58 = vld [vmem:[#allocation13 + $0x2b8] sm:$0xf0]  ;;  %v8415_v60 = vor.u32 %v9690_v55, %v8414_v54  ;;  %v8374_v5 = vld [vmem:[#allocation13 + $0x250] sm:$0xf] }
 0x46d   :  { %v1205_v24 = vpop.f32.mrf.mxu2  ;;  %v1224_v34 = vpop.f32.mrf.mxu3 }
 0x46e   :  { %v10113_v25 = vpop.eup %10112  ;;  %v1294_v26 = vmul.f32 1.442695, %v1205_v24  ;;  %v1296_v33 = vmul.f32 1.442695, %v1224_v34  ;;  %v9667_v24 = vld [vmem:[#allocation13 + $0x204] sm:$0xf]  ;;  %3135 = vmatpush.bf16.msra.mxu1 %v8371_v13  ;;  %v8327_v34 = vor.u32 %v9671_v20, %v8326_v18 }
 0x46f   :  { %v10115_v19 = vpop.eup %10114  ;;  %1338 = vst [vmem:[#allocation4 + $0x50] sm:$0xff] %v10113_v25  ;;  %v8328_v25 = vld [vmem:[#allocation13 + $0x220] sm:$0xf0]  ;;  %v9682_v13 = vld [vmem:[#allocation13 + $0x274] sm:$0xf0] }
 0x470   :  { %v1246_v15 = vpop.f32.mrf.mxu0  ;;  %v1265_v27 = vpop.f32.mrf.mxu1  ;;  %1339 = vst [vmem:[#allocation4 + $0x68] sm:$0xff] %v10115_v19  ;;  %10120 = vpow2.f32 %v1294_v26  ;;  %v8334_v19 = vld [vmem:[#allocation13 + $0x208] sm:$0xf]  ;;  %3079 = vmatpush.bf16.msra.mxu2 %v8327_v34  ;;  %v8384_v34 = vld [vmem:[#allocation13 + $0x278] sm:$0xf0] }
 0x471   :  { %v10117_v28 = vpop.eup %10116  ;;  %v1314_v30 = vmul.f32 1.442695, %v1246_v15  ;;  %10122 = vpow2.f32 %v1296_v33  ;;  %v1316_v17 = vmul.f32 1.442695, %v1265_v27  ;;  %v9672_v26 = vld [vmem:[#allocation13 + $0x224] sm:$0xf0]  ;;  %v8331_v33 = vor.u32 %v9667_v24, %v8328_v25 }
 0x472   :  { %v10119_v31 = vpop.eup %10118  ;;  %1348 = vst [vmem:[#allocation4 + $0x8] sm:$0xff] %v10117_v28  ;;  %8317 = vmatmul.msk.bf16.gmra.mxu2 %vm870_vm5, %v11322_v16  ;;  %8319 = vmatmul.msk.bf16.gmra.mxu3 %vm870_vm5, %v11322_v16  ;;  %v8335_v15 = vor.u32 %v9672_v26, %v8334_v19  ;;  %v9668_v27 = vld [vmem:[#allocation13 + $0x20c] sm:$0xf]  ;;  %v9678_v24 = vld [vmem:[#allocation13 + $0x25c] sm:$0xf] }
 0x473   :  { %1349 = vst [vmem:[#allocation4 + $0x78] sm:$0xff] %v10119_v31  ;;  %8321 = vmatmul.msk.bf16.gmra.mxu0 %vm870_vm5, %v11322_v16  ;;  %8323 = vmatmul.msk.bf16.gmra.mxu1 %vm870_vm5, %v11322_v16  ;;  %10124 = vpow2.f32 %v1314_v30  ;;  %v8336_v28 = vld [vmem:[#allocation13 + $0x228] sm:$0xf0]  ;;  %v8438_v30 = vld [vmem:[#allocation13 + $0x2d0] sm:$0xf] }
 0x474   :  { %10126 = vpow2.f32 %v1316_v17  ;;  %v8339_v31 = vor.u32 %v9668_v27, %v8336_v28  ;;  %3098 = vmatpush.bf16.msrb.mxu3 %v8331_v33  ;;  %3117 = vmatpush.bf16.msrb.mxu0 %v8335_v15  ;;  %v8439_v37 = vor.u32 %v9697_v10, %v8438_v30  ;;  %v8342_v19 = vld [vmem:[#allocation13 + $0x210] sm:$0xf]  ;;  %v8387_v33 = vor.u32 %v9678_v24, %v8384_v34  ;;  %v9669_v27 = vld [vmem:[#allocation13 + $0x214] sm:$0xf]  ;;  %v9674_v10 = vld [vmem:[#allocation13 + $0x234] sm:$0xf0] }
 0x475   :  { %v1208_v7 = vpop.f32.mrf.mxu2  ;;  %v1227_v38 = vpop.f32.mrf.mxu3  ;;  %v9673_v26 = vld [vmem:[#allocation13 + $0x22c] sm:$0xf0]  ;;  %v8344_v28 = vld [vmem:[#allocation13 + $0x230] sm:$0xf0] }
 0x476   :  { %v10121_v40 = vpop.eup %10120  ;;  %v1310_v47 = vmul.f32 1.442695, %v1208_v7  ;;  %v1312_v49 = vmul.f32 1.442695, %v1227_v38  ;;  %v8443_v7 = vor.u32 %v9693_v21, %v8440_v36  ;;  %3136 = vmatpush.bf16.msra.mxu1 %v8339_v31  ;;  %3152 = vmatpush.bf16.msrb.mxu2 %v8439_v37  ;;  %v8343_v15 = vor.u32 %v9673_v26, %v8342_v19  ;;  %v8350_v31 = vld [vmem:[#allocation13 + $0x218] sm:$0xf] }
 0x477   :  { %v10123_v41 = vpop.eup %10122  ;;  %1346 = vst [vmem:[#allocation4 + $0x60] sm:$0xff] %v10121_v40  ;;  %v8347_v30 = vor.u32 %v9669_v27, %v8344_v28  ;;  %v9670_v21 = vld [vmem:[#allocation13 + $0x21c] sm:$0xf]  ;;  %v2146_v27 = vld [vmem:[#allocation4 + $0xd8] sm:$0xc] }
 0x478   :  { %v1248_v42 = vpop.f32.mrf.mxu0  ;;  %v1267_v43 = vpop.f32.mrf.mxu1  ;;  %1347 = vst [vmem:[#allocation4 + $0xf0] sm:$0xff] %v10123_v41  ;;  %10128 = vpow2.f32 %v1310_v47  ;;  %3171 = vmatpush.bf16.msra.mxu3 %v8443_v7  ;;  %v9689_v47 = vld [vmem:[#allocation13 + $0x2ac] sm:$0xf0]  ;;  %v8352_v36 = vld [vmem:[#allocation13 + $0x238] sm:$0xf0] }
 0x479   :  { %v10125_v44 = vpop.eup %10124  ;;  %v1330_v51 = vmul.f32 1.442695, %v1248_v42  ;;  %10130 = vpow2.f32 %v1312_v49  ;;  %v1332_v23 = vmul.f32 1.442695, %v1267_v43  ;;  %v8446_v42 = vld [vmem:[#allocation13 + $0x2d8] sm:$0xf] }
 0x47a   :  { %v10127_v22 = vpop.eup %10126  ;;  %1356 = vst [vmem:[#allocation4 + $0x70] sm:$0xff] %v10125_v44  ;;  %v9698_v43 = vld [vmem:[#allocation13 + $0x2f4] sm:$0xf0]  ;;  %v9694_v44 = vld [vmem:[#allocation13 + $0x2dc] sm:$0xf] }
 0x47b   :  { %1357 = vst [vmem:[#allocation4 + $0xc0] sm:$0xff] %v10127_v22  ;;  %10132 = vpow2.f32 %v1330_v51  ;;  %v8447_v22 = vor.u32 %v9698_v43, %v8446_v42  ;;  %v9685_v51 = vld [vmem:[#allocation13 + $0x294] sm:$0xf] }
 0x47c   :  { %10134 = vpow2.f32 %v1332_v23  ;;  %v8408_v23 = vld [vmem:[#allocation13 + $0x2b0] sm:$0xf0] }
 0x47d   :  { %v1210_v45 = vpop.f32.mrf.mxu2  ;;  %v1229_v46 = vpop.f32.mrf.mxu3  ;;  %3190 = vmatpush.bf16.msra.mxu0 %v8447_v22  ;;  %v8411_v29 = vor.u32 %v9685_v51, %v8408_v23 }
 0x47e   :  { %v10129_v0 = vpop.eup %10128  ;;  %v1326_v9 = vmul.f32 1.442695, %v1210_v45  ;;  %v1328_v14 = vmul.f32 1.442695, %v1229_v46  ;;  %v8448_v45 = vld [vmem:[#allocation13 + $0x2f8] sm:$0xf0] }
 0x47f   :  { %v10131_v2 = vpop.eup %10130  ;;  %1354 = vst [vmem:[#allocation4 + $0xe0] sm:$0xff] %v10129_v0  ;;  %v8406_v46 = vld [vmem:[#allocation13 + $0x290] sm:$0xf]  ;;  %v8451_v48 = vor.u32 %v9694_v44, %v8448_v45  ;;  %v8419_v0 = vor.u32 %v9686_v62, %v8416_v58  ;;  %3172 = vmatpush.bf16.msra.mxu3 %v8411_v29 }
 0x480   :  { %v11348_v52 = vpop.f32.mrf.mxu0  ;;  %v11350_v53 = vpop.f32.mrf.mxu1  ;;  %1355 = vst [vmem:[#allocation4 + $0x90] sm:$0xff] %v10131_v2  ;;  %10136 = vpow2.f32 %v1326_v9  ;;  %v8407_v49 = vor.u32 %v9689_v47, %v8406_v46  ;;  %v9681_v2 = vld [vmem:[#allocation13 + $0x26c] sm:$0xf0]  ;;  %v8376_v9 = vld [vmem:[#allocation13 + $0x270] sm:$0xf0] }
 0x481   :  { %v10133_v50 = vpop.eup %10132  ;;  %10138 = vpow2.f32 %v1328_v14  ;;  %3209 = vmatpush.bf16.msrb.mxu1 %v8451_v48  ;;  %v8375_v8 = vor.u32 %v9681_v2, %v8374_v5  ;;  %3191 = vmatpush.bf16.msra.mxu0 %v8415_v60 }
 0x482   :  { %v10135_v3 = vpop.eup %10134  ;;  %1364 = vst [vmem:[#allocation4 + $0x20] sm:$0x3] %v10133_v50  ;;  %8452 = vmatmul.msk.bf16.vlgmr.msra.gmra.mxu2 %vm870_vm5, %v11310_v32  ;;  %8454 = vmatmul.msk.bf16.vlgmr.msrb.gmra.mxu3 %vm870_vm5, %v11310_v32  ;;  %v9677_v50 = vld [vmem:[#allocation13 + $0x254] sm:$0xf] }
 0x483   :  { %1365 = vst [vmem:[#allocation4 + $0x98] sm:$0x3] %v10135_v3  ;;  %8456 = vmatmul.msk.bf16.vlgmr.msrb.gmra.mxu0 %vm870_vm5, %v11310_v32  ;;  %8458 = vmatmul.msk.bf16.vlgmr.msra.gmra.mxu1 %vm870_vm5, %v11310_v32  ;;  %v8382_v3 = vld [vmem:[#allocation13 + $0x258] sm:$0xf]  ;;  %v8379_v20 = vor.u32 %v9677_v50, %v8376_v9 }
 0x484   :  { %3153 = vmatpush.bf16.msrb.mxu2 %v8407_v49  ;;  %v8383_v25 = vor.u32 %v9682_v13, %v8382_v3  ;;  %v2107_v13 = vld [vmem:[#allocation4 + $0x18] sm:$0x3] }
 0x485   :  { %v11352_v61 = vpop.f32.mrf.mxu2  ;;  %v11354_v63 = vpop.f32.mrf.mxu3  ;;  %3210 = vmatpush.bf16.msrb.mxu1 %v8419_v0  ;;  %3173 = vmatpush.bf16.msra.mxu3 %v8379_v20 }
 0x486   :  { %v10137_v38 = vpop.eup %10136  ;;  %3192 = vmatpush.bf16.msra.mxu0 %v8383_v25 }
 0x487   :  { %v10139_v41 = vpop.eup %10138  ;;  %1362 = vst [vmem:[#allocation4 + $0xa0] sm:$0x3] %v10137_v38  ;;  %v8351_v38 = vor.u32 %v9674_v10, %v8350_v31  ;;  %v2147_v31 = vld [vmem:[#allocation4 + $0x18] sm:$0xc] }
 0x488   :  { %v11356_v11 = vpop.f32.mrf.mxu0  ;;  %v11358_v12 = vpop.f32.mrf.mxu1  ;;  %1363 = vst [vmem:[#allocation4 + $0xf8] sm:$0x3] %v10139_v41  ;;  %3154 = vmatpush.bf16.msrb.mxu2 %v8375_v8  ;;  %v8355_v41 = vor.u32 %v9670_v21, %v8352_v36  ;;  %v2106_v8 = vld [vmem:[#allocation4 + $0xd8] sm:$0x3] }
 0x489   :  { %3211 = vmatpush.bf16.msrb.mxu1 %v8387_v33  ;;  %3174 = vmatpush.bf16.msra.mxu3 %v8347_v30  ;;  %v2114_v24 = vmul.f32 0.0, %v2106_v8  ;;  %v2105_v33 = vld [vmem:[#allocation4] sm:$0x3]  ;;  %v2210_v8 = vld [vmem:[#allocation4 + $0xd8] sm:$0x30] }
 0x48a   :  { %3193 = vmatpush.bf16.msra.mxu0 %v8351_v38  ;;  %v2113_v10 = vmul.f32 0.0, %v2105_v33 }
 0x48c   :  { %3155 = vmatpush.bf16.msrb.mxu2 %v8343_v15 }
 0x48d   :  { %v11360_v17 = vpop.f32.mrf.mxu2  ;;  %v11362_v35 = vpop.f32.mrf.mxu3  ;;  %3212 = vmatpush.bf16.msrb.mxu1 %v8355_v41 }
 0x490   :  { %v11366_v39 = vpop.f32.mrf.mxu0  ;;  %v11368_v40 = vpop.f32.mrf.mxu1 }
 0x492   :  { %8453 = vmatmul.msk.bf16.gmra.mxu2 %vm870_vm5, %v11322_v16  ;;  %8455 = vmatmul.msk.bf16.gmra.mxu3 %vm870_vm5, %v11322_v16 }
 0x493   :  { %8457 = vmatmul.msk.bf16.gmra.mxu0 %vm870_vm5, %v11322_v16  ;;  %8459 = vmatmul.msk.bf16.gmra.mxu1 %vm870_vm5, %v11322_v16 }
 0x495   :  { %v11376_v56 = vpop.f32.mrf.mxu2  ;;  %v11378_v57 = vpop.f32.mrf.mxu3 }
 0x498   :  { %v11380_v14 = vpop.f32.mrf.mxu0  ;;  %v11382_v18 = vpop.f32.mrf.mxu1 }
 0x49d   :  { %v11384_v37 = vpop.f32.mrf.mxu2  ;;  %v11386_v7 = vpop.f32.mrf.mxu3 }
 0x4a0   :  { %v11390_v42 = vpop.f32.mrf.mxu0  ;;  %v11392_v43 = vpop.f32.mrf.mxu1 }
 0x4a2   :  { %8460 = vmatmul.msk.bf16.vlgmr.msrb.gmra.mxu2 %vm870_vm5, %v11310_v32  ;;  %8462 = vmatmul.msk.bf16.vlgmr.msra.gmra.mxu3 %vm870_vm5, %v11310_v32 }
 0x4a3   :  { %8464 = vmatmul.msk.bf16.vlgmr.msra.gmra.mxu0 %vm870_vm5, %v11310_v32  ;;  %8466 = vmatmul.msk.bf16.vlgmr.msrb.gmra.mxu1 %vm870_vm5, %v11310_v32 }
 0x4a5   :  { %v11400_v44 = vpop.f32.mrf.mxu2  ;;  %v11402_v22 = vpop.f32.mrf.mxu3 }
 0x4a8   :  { %v11404_v45 = vpop.f32.mrf.mxu0  ;;  %v11406_v46 = vpop.f32.mrf.mxu1 }
 0x4ad   :  { %v11408_v47 = vpop.f32.mrf.mxu2  ;;  %v11410_v48 = vpop.f32.mrf.mxu3 }
 0x4b0   :  { %v11414_v49 = vpop.f32.mrf.mxu0  ;;  %v11416_v51 = vpop.f32.mrf.mxu1 }
 0x4b2   :  { %8461 = vmatmul.msk.bf16.gmra.mxu2 %vm870_vm5, %v11322_v16  ;;  %8463 = vmatmul.msk.bf16.gmra.mxu3 %vm870_vm5, %v11322_v16 }
 0x4b3   :  { %8465 = vmatmul.msk.bf16.gmra.mxu0 %vm870_vm5, %v11322_v16  ;;  %8467 = vmatmul.msk.bf16.gmra.mxu1 %vm870_vm5, %v11322_v16  ;;  %v2104_v16 = vld [vmem:[#allocation4 + $0xb0] sm:$0x3] }
 0x4b4   :  { %v2112_v28 = vmul.f32 0.0, %v2104_v16  ;;  %v2211_v16 = vld [vmem:[#allocation4 + $0x18] sm:$0x30] }
 0x4b5   :  { %v11424_v23 = vpop.f32.mrf.mxu2  ;;  %v11426_v54 = vpop.f32.mrf.mxu3 }
 0x4b8   :  { %v11428_v29 = vpop.f32.mrf.mxu0  ;;  %v11430_v55 = vpop.f32.mrf.mxu1 }
 0x4bd   :  { %v11432_v62 = vpop.f32.mrf.mxu2  ;;  %v11434_v58 = vpop.f32.mrf.mxu3 }
 0x4c0   :  { %v1935_v60 = vpop.f32.mrf.mxu0  ;;  %v1954_v0 = vpop.f32.mrf.mxu1 }
 0x4c1   :  { %v2042_v32 = vmul.f32 %v1935_v60, %v11348_v52  ;;  %v2043_v5 = vmul.f32 %v1954_v0, %v11350_v53  ;;  %v2115_v53 = vmul.f32 0.0, %v2107_v13  ;;  %v2144_v13 = vld [vmem:[#allocation4 + $0xb0] sm:$0xc] }
 0x4c3   :  { %2074 = vst [vmem:[#allocation5 + $0xe8] sm:$0xff] %v2042_v32 }
 0x4c4   :  { %2075 = vst [vmem:[#allocation5 + $0x78] sm:$0xff] %v2043_v5 }
 0x4c5   :  { %v1897_v2 = vpop.f32.mrf.mxu2  ;;  %v1916_v50 = vpop.f32.mrf.mxu3 }
 0x4c6   :  { %v2040_v9 = vmul.f32 %v1897_v2, %v11352_v61  ;;  %v2041_v3 = vmul.f32 %v1916_v50, %v11354_v63 }
 0x4c8   :  { %2072 = vst [vmem:[#allocation5 + $0x80] sm:$0xff] %v2040_v9  ;;  %v1937_v20 = vpop.f32.mrf.mxu0  ;;  %v1956_v25 = vpop.f32.mrf.mxu1 }
 0x4c9   :  { %2073 = vst [vmem:[#allocation5 + $0xc8] sm:$0xff] %v2041_v3  ;;  %v2050_v52 = vmul.f32 %v1937_v20, %v11356_v11  ;;  %v2051_v63 = vmul.f32 %v1956_v25, %v11358_v12 }
 0x4ca   :  { %v2122_v34 = vld [vmem:[#allocation5 + $0xe8] sm:$0x3]  ;;  %v2186_v38 = vld [vmem:[#allocation5 + $0xe8] sm:$0xc] }
 0x4cb   :  { %v2130_v19 = vadd.f32 %v2122_v34, %v2114_v24  ;;  %v2123_v26 = vld [vmem:[#allocation5 + $0x78] sm:$0x3]  ;;  %2082 = vst [vmem:[#allocation5 + $0x38] sm:$0xff] %v2050_v52  ;;  %v2187_v2 = vld [vmem:[#allocation5 + $0x78] sm:$0xc] }
 0x4cc   :  { %v2131_v15 = vadd.f32 %v2123_v26, %v2115_v53  ;;  %2083 = vst [vmem:[#allocation5 + $0x40] sm:$0xff] %v2051_v63  ;;  %v2145_v53 = vld [vmem:[#allocation4] sm:$0xc] }
 0x4cd   :  { %2138 = vst [vmem:[#allocation6 + $0xc0] sm:$0x3] %v2130_v19  ;;  %v2162_v61 = vrot.slane %v2130_v19, 6  ;;  %v1899_v36 = vpop.f32.mrf.mxu2  ;;  %v1918_v32 = vpop.f32.mrf.mxu3 }
 0x4ce   :  { %2139 = vst [vmem:[#allocation6 + $0x10] sm:$0x3] %v2131_v15  ;;  %v2163_v30 = vrot.slane %v2131_v15, 6  ;;  %v2048_v3 = vmul.f32 %v1899_v36, %v11360_v17  ;;  %v2049_v52 = vmul.f32 %v1918_v32, %v11362_v35  ;;  %v2274_v35 = vld [vmem:[#allocation4 + $0xd8] sm:$0xc0] }
 0x4cf   :  { %v2178_v11 = vmul.f32 %v2162_v61, %v2146_v27  ;;  %v2120_v21 = vld [vmem:[#allocation5 + $0x80] sm:$0x3]  ;;  %v2184_v26 = vld [vmem:[#allocation5 + $0x80] sm:$0xc]  ;;  %v2250_v61 = vld [vmem:[#allocation5 + $0xe8] sm:$0x30] }
 0x4d0   :  { %v2179_v41 = vmul.f32 %v2163_v30, %v2147_v31  ;;  %v2128_v60 = vadd.f32 %v2120_v21, %v2112_v28  ;;  %v2121_v0 = vld [vmem:[#allocation5 + $0xc8] sm:$0x3]  ;;  %v1940_v15 = vpop.f32.mrf.mxu0  ;;  %v2185_v17 = vld [vmem:[#allocation5 + $0xc8] sm:$0xc]  ;;  %2080 = vst [vmem:[#allocation5 + $0xd0] sm:$0xff] %v2048_v3 }
 0x4d1   :  { %v2194_v5 = vadd.f32 %v2186_v38, %v2178_v11  ;;  %v2129_v50 = vadd.f32 %v2121_v0, %v2113_v10  ;;  %v2251_v30 = vld [vmem:[#allocation5 + $0x78] sm:$0x30]  ;;  %2081 = vst [vmem:[#allocation5 + $0xb0] sm:$0xff] %v2049_v52  ;;  %v2058_v21 = vmul.f32 %v1940_v15, %v11366_v39  ;;  %v2208_v36 = vld [vmem:[#allocation4 + $0xb0] sm:$0x30] }
 0x4d2   :  { %v2195_v12 = vadd.f32 %v2187_v2, %v2179_v41  ;;  %2136 = vst [vmem:[#allocation6 + $0xb0] sm:$0x3] %v2128_v60  ;;  %v2160_v9 = vrot.slane %v2128_v60, 6  ;;  %v2209_v60 = vld [vmem:[#allocation4] sm:$0x30] }
 0x4d3   :  { %2202 = vst [vmem:[#allocation6 + $0xc0] sm:$0xc] %v2194_v5  ;;  %v2226_v20 = vrot.slane %v2194_v5, 6  ;;  %v2161_v24 = vrot.slane %v2129_v50, 6  ;;  %v2275_v5 = vld [vmem:[#allocation4 + $0x18] sm:$0xc0] }
 0x4d4   :  { %2203 = vst [vmem:[#allocation6 + $0x10] sm:$0xc] %v2195_v12  ;;  %v2227_v34 = vrot.slane %v2195_v12, 6  ;;  %v2176_v25 = vmul.f32 %v2160_v9, %v2144_v13  ;;  %v1959_v12 = vpop.f32.mrf.mxu1  ;;  %v2314_v9 = vld [vmem:[#allocation5 + $0xe8] sm:$0xc0] }
 0x4d5   :  { %v2242_v19 = vmul.f32 %v2226_v20, %v2210_v8  ;;  %2137 = vst [vmem:[#allocation6 + $0xb8] sm:$0x3] %v2129_v50  ;;  %v2177_v33 = vmul.f32 %v2161_v24, %v2145_v53  ;;  %v2248_v50 = vld [vmem:[#allocation5 + $0x80] sm:$0x30]  ;;  %v2249_v20 = vld [vmem:[#allocation5 + $0xc8] sm:$0x30] }
 0x4d6   :  { %v2243_v63 = vmul.f32 %v2227_v34, %v2211_v16  ;;  %v2192_v27 = vadd.f32 %v2184_v26, %v2176_v25  ;;  %2090 = vst [vmem:[#allocation5 + $0x50] sm:$0xff] %v2058_v21  ;;  %v2315_v24 = vld [vmem:[#allocation5 + $0x78] sm:$0xc0]  ;;  %v2272_v53 = vld [vmem:[#allocation4 + $0xb0] sm:$0xc0]  ;;  %v2059_v16 = vmul.f32 %v1959_v12, %v11368_v40 }
 0x4d7   :  { %v2258_v28 = vadd.f32 %v2250_v61, %v2242_v19  ;;  %v2193_v31 = vadd.f32 %v2185_v17, %v2177_v33  ;;  %v2273_v19 = vld [vmem:[#allocation4] sm:$0xc0]  ;;  %v2338_v15 = vld [vmem:[#allocation4 + $0xe8] sm:$0x3] }
 0x4d8   :  { %v2259_v10 = vadd.f32 %v2251_v30, %v2243_v63  ;;  %2200 = vst [vmem:[#allocation6 + $0xb0] sm:$0xc] %v2192_v27  ;;  %v2224_v11 = vrot.slane %v2192_v27, 6  ;;  %v2339_v27 = vld [vmem:[#allocation4 + $0xb8] sm:$0x3] }
 0x4d9   :  { %2266 = vst [vmem:[#allocation6 + $0xc0] sm:$0x30] %v2258_v28  ;;  %v2290_v38 = vrot.slane %v2258_v28, 6  ;;  %v2225_v41 = vrot.slane %v2193_v31, 6  ;;  %v2312_v17 = vld [vmem:[#allocation5 + $0x80] sm:$0xc0] }
 0x4da   :  { %2267 = vst [vmem:[#allocation6 + $0x10] sm:$0x30] %v2259_v10  ;;  %v2291_v0 = vrot.slane %v2259_v10, 6  ;;  %v2240_v32 = vmul.f32 %v2224_v11, %v2208_v36  ;;  %v2313_v10 = vld [vmem:[#allocation5 + $0xc8] sm:$0xc0] }
 0x4db   :  { %v2306_v2 = vmul.f32 %v2290_v38, %v2274_v35  ;;  %2201 = vst [vmem:[#allocation6 + $0xb8] sm:$0xc] %v2193_v31  ;;  %v2241_v8 = vmul.f32 %v2225_v41, %v2209_v60  ;;  %v1902_v31 = vpop.f32.mrf.mxu2  ;;  %v2378_v11 = vld [vmem:[#allocation5 + $0x38] sm:$0x3]  ;;  %v2379_v38 = vld [vmem:[#allocation5 + $0x40] sm:$0x3] }
 0x4dc   :  { %v2307_v3 = vmul.f32 %v2291_v0, %v2275_v5  ;;  %v2256_v13 = vadd.f32 %v2248_v50, %v2240_v32  ;;  %2091 = vst [vmem:[#allocation5 + $0xa0] sm:$0xff] %v2059_v16  ;;  %v2402_v41 = vld [vmem:[#allocation4 + $0xe8] sm:$0xc]  ;;  %v2056_v32 = vmul.f32 %v1902_v31, %v11376_v56  ;;  %v2336_v5 = vld [vmem:[#allocation4 + $0x80] sm:$0x3] }
 0x4dd   :  { %v2322_v39 = vadd.f32 %v2314_v9, %v2306_v2  ;;  %v2257_v52 = vadd.f32 %v2249_v20, %v2241_v8  ;;  %v2337_v8 = vld [vmem:[#allocation4 + $0x88] sm:$0x3]  ;;  %v2376_v20 = vld [vmem:[#allocation5 + $0xd0] sm:$0x3]  ;;  %v2443_v16 = vld [vmem:[#allocation5 + $0x40] sm:$0xc] }
 0x4de   :  { %v2323_v34 = vadd.f32 %v2315_v24, %v2307_v3  ;;  %2264 = vst [vmem:[#allocation6 + $0xb0] sm:$0x30] %v2256_v13  ;;  %v2288_v25 = vrot.slane %v2256_v13, 6  ;;  %v2403_v3 = vld [vmem:[#allocation4 + $0xb8] sm:$0xc]  ;;  %v1921_v24 = vpop.f32.mrf.mxu3 }
 0x4df   :  { %2330 = vst [vmem:[#allocation6 + $0xc0] sm:$0xc0] %v2322_v39  ;;  %v2354_v26 = vrot.slane %v2322_v39, 6  ;;  %v2289_v33 = vrot.slane %v2257_v52, 6 }
 0x4e0   :  { %2331 = vst [vmem:[#allocation6 + $0x10] sm:$0xc0] %v2323_v34  ;;  %v2355_v61 = vrot.slane %v2323_v34, 6  ;;  %v2304_v63 = vmul.f32 %v2288_v25, %v2272_v53  ;;  %v2377_v25 = vld [vmem:[#allocation5 + $0xb0] sm:$0x3] }
 0x4e1   :  { %2265 = vst [vmem:[#allocation6 + $0xb8] sm:$0x30] %v2257_v52  ;;  %v2305_v28 = vmul.f32 %v2289_v33, %v2273_v19  ;;  %v2370_v30 = vmul.f32 %v2354_v26, %v2338_v15  ;;  %v2442_v52 = vld [vmem:[#allocation5 + $0x38] sm:$0xc]  ;;  %v2466_v26 = vld [vmem:[#allocation4 + $0xe8] sm:$0x30] }
 0x4e2   :  { %v2320_v35 = vadd.f32 %v2312_v17, %v2304_v63  ;;  %v2371_v21 = vmul.f32 %v2355_v61, %v2339_v27  ;;  %2088 = vst [vmem:[#allocation5 + $0x10] sm:$0xff] %v2056_v32  ;;  %v2057_v61 = vmul.f32 %v1921_v24, %v11378_v57  ;;  %v2400_v63 = vld [vmem:[#allocation4 + $0x80] sm:$0xc]  ;;  %v2531_v24 = vld [vmem:[#allocation4 + $0xb8] sm:$0xc0] }
 0x4e3   :  { %v2321_v40 = vadd.f32 %v2313_v10, %v2305_v28  ;;  %v2386_v36 = vadd.f32 %v2378_v11, %v2370_v30  ;;  %v2401_v28 = vld [vmem:[#allocation4 + $0x88] sm:$0xc]  ;;  %v2440_v11 = vld [vmem:[#allocation5 + $0xd0] sm:$0xc] }
 0x4e4   :  { %2328 = vst [vmem:[#allocation6 + $0xb0] sm:$0xc0] %v2320_v35  ;;  %v2352_v60 = vrot.slane %v2320_v35, 6  ;;  %v2387_v0 = vadd.f32 %v2379_v38, %v2371_v21  ;;  %v2467_v35 = vld [vmem:[#allocation4 + $0xb8] sm:$0x30] }
 0x4e5   :  { %2329 = vst [vmem:[#allocation6 + $0xb8] sm:$0xc0] %v2321_v40  ;;  %v2353_v2 = vrot.slane %v2321_v40, 6  ;;  %v2418_v50 = vrot.slane %v2386_v36, 6  ;;  %v1942_v40 = vpop.f32.mrf.mxu0 }
 0x4e6   :  { %2394 = vst [vmem:[#allocation6 + $0x48] sm:$0x3] %v2386_v36  ;;  %v2419_v12 = vrot.slane %v2387_v0, 6  ;;  %v2368_v9 = vmul.f32 %v2352_v60, %v2336_v5  ;;  %v2506_v36 = vld [vmem:[#allocation5 + $0x38] sm:$0x30] }
 0x4e7   :  { %v2434_v13 = vmul.f32 %v2418_v50, %v2402_v41  ;;  %2395 = vst [vmem:[#allocation6 + $0x40] sm:$0x3] %v2387_v0  ;;  %v2369_v39 = vmul.f32 %v2353_v2, %v2337_v8  ;;  %v2441_v60 = vld [vmem:[#allocation5 + $0xb0] sm:$0xc]  ;;  %v2507_v0 = vld [vmem:[#allocation5 + $0x40] sm:$0x30]  ;;  %v2066_v8 = vmul.f32 %v1942_v40, %v11380_v14  ;;  %v1904_v14 = vpop.f32.mrf.mxu2 }
 0x4e8   :  { %v2435_v53 = vmul.f32 %v2419_v12, %v2403_v3  ;;  %v2384_v34 = vadd.f32 %v2376_v20, %v2368_v9  ;;  %2089 = vst [vmem:[#allocation5 + $0x70] sm:$0xff] %v2057_v61  ;;  %v2530_v5 = vld [vmem:[#allocation4 + $0xe8] sm:$0xc0]  ;;  %v2464_v12 = vld [vmem:[#allocation4 + $0x80] sm:$0x30] }
 0x4e9   :  { %v2450_v56 = vadd.f32 %v2442_v52, %v2434_v13  ;;  %v2385_v19 = vadd.f32 %v2377_v25, %v2369_v39  ;;  %v2465_v13 = vld [vmem:[#allocation4 + $0x88] sm:$0x30]  ;;  %v1961_v25 = vpop.f32.mrf.mxu1  ;;  %2098 = vst [vmem:[#allocation5 + $0xf8] sm:$0x3] %v2066_v8 }
 0x4ea   :  { %v2451_v33 = vadd.f32 %v2443_v16, %v2435_v53  ;;  %2392 = vst [vmem:[#allocation6 + $0x58] sm:$0x3] %v2384_v34  ;;  %v2416_v15 = vrot.slane %v2384_v34, 6  ;;  %v2504_v53 = vld [vmem:[#allocation5 + $0xd0] sm:$0x30] }
 0x4eb   :  { %2458 = vst [vmem:[#allocation6 + $0x48] sm:$0xc] %v2450_v56  ;;  %v2482_v27 = vrot.slane %v2450_v56, 6  ;;  %v2417_v17 = vrot.slane %v2385_v19, 6  ;;  %v2570_v56 = vld [vmem:[#allocation5 + $0x38] sm:$0xc0] }
 0x4ec   :  { %2459 = vst [vmem:[#allocation6 + $0x40] sm:$0xc] %v2451_v33  ;;  %v2483_v30 = vrot.slane %v2451_v33, 6  ;;  %v2432_v31 = vmul.f32 %v2416_v15, %v2400_v63  ;;  %v2571_v15 = vld [vmem:[#allocation5 + $0x40] sm:$0xc0] }
 0x4ed   :  { %v2498_v10 = vmul.f32 %v2482_v27, %v2466_v26  ;;  %2393 = vst [vmem:[#allocation6] sm:$0x3] %v2385_v19  ;;  %v2433_v21 = vmul.f32 %v2417_v17, %v2401_v28  ;;  %v2505_v26 = vld [vmem:[#allocation5 + $0xb0] sm:$0x30]  ;;  %v2528_v63 = vld [vmem:[#allocation4 + $0x80] sm:$0xc0]  ;;  %v2067_v28 = vmul.f32 %v1961_v25, %v11382_v18 }
 0x4ee   :  { %v2499_v38 = vmul.f32 %v2483_v30, %v2467_v35  ;;  %v2448_v41 = vadd.f32 %v2440_v11, %v2432_v31  ;;  %v2529_v30 = vld [vmem:[#allocation4 + $0x88] sm:$0xc0]  ;;  %v2594_v11 = vld [vmem:[#allocation4 + $0x40] sm:$0x3] }
 0x4ef   :  { %v2514_v57 = vadd.f32 %v2506_v36, %v2498_v10  ;;  %v2449_v32 = vadd.f32 %v2441_v60, %v2433_v21  ;;  %v2064_v10 = vmul.f32 %v1904_v14, %v11384_v37  ;;  %v2595_v36 = vld [vmem:[#allocation4 + $0xc8] sm:$0x3]  ;;  %2099 = vst [vmem:[#allocation5 + $0xc0] sm:$0x3] %v2067_v28  ;;  %v2658_v37 = vld [vmem:[#allocation4 + $0x40] sm:$0xc] }
 0x4f0   :  { %v2515_v2 = vadd.f32 %v2507_v0, %v2499_v38  ;;  %2456 = vst [vmem:[#allocation6 + $0x58] sm:$0xc] %v2448_v41  ;;  %v2480_v50 = vrot.slane %v2448_v41, 6  ;;  %v2568_v38 = vld [vmem:[#allocation5 + $0xd0] sm:$0xc0] }
 0x4f1   :  { %2522 = vst [vmem:[#allocation6 + $0x48] sm:$0x30] %v2514_v57  ;;  %v2546_v9 = vrot.slane %v2514_v57, 6  ;;  %v2481_v3 = vrot.slane %v2449_v32, 6  ;;  %v1923_v57 = vpop.f32.mrf.mxu3  ;;  %v2030_v14 = vpop.f32.mrf.mxu1 }
 0x4f2   :  { %2523 = vst [vmem:[#allocation6 + $0x40] sm:$0x30] %v2515_v2  ;;  %v2547_v20 = vrot.slane %v2515_v2, 6  ;;  %v2496_v39 = vmul.f32 %v2480_v50, %v2464_v12  ;;  %v2011_v2 = vpop.f32.mrf.mxu0  ;;  %v2635_v12 = vld [vmem:[#allocation5 + $0xa0] sm:$0x3] }
 0x4f3   :  { %v2562_v52 = vmul.f32 %v2546_v9, %v2530_v5  ;;  %2457 = vst [vmem:[#allocation6] sm:$0xc] %v2449_v32  ;;  %v2497_v34 = vmul.f32 %v2481_v3, %v2465_v13  ;;  %v2569_v32 = vld [vmem:[#allocation5 + $0xb0] sm:$0xc0]  ;;  %v2634_v5 = vld [vmem:[#allocation5 + $0x50] sm:$0x3]  ;;  %v2065_v13 = vmul.f32 %v1923_v57, %v11386_v7 }
 0x4f4   :  { %v2563_v16 = vmul.f32 %v2547_v20, %v2531_v24  ;;  %v2512_v19 = vadd.f32 %v2504_v53, %v2496_v39  ;;  %2096 = vst [vmem:[#allocation5 + $0x88] sm:$0x3] %v2064_v10  ;;  %v2592_v20 = vld [vmem:[#allocation4 + $0x38] sm:$0x3]  ;;  %v2633_v7 = vld [vmem:[#allocation5 + $0x70] sm:$0x3]  ;;  %v2047_v10 = vmul.f32 %v2030_v14, %v11392_v43 }
 0x4f5   :  { %v2578_v33 = vadd.f32 %v2570_v56, %v2562_v52  ;;  %v2513_v61 = vadd.f32 %v2505_v26, %v2497_v34  ;;  %v2046_v52 = vmul.f32 %v2011_v2, %v11390_v42  ;;  %v2593_v53 = vld [vmem:[#allocation4 + $0x58] sm:$0x3]  ;;  %v2659_v56 = vld [vmem:[#allocation4 + $0xc8] sm:$0xc]  ;;  %2097 = vst [vmem:[#allocation5 + $0x48] sm:$0x3] %v2065_v13 }
 0x4f6   :  { %v2579_v27 = vadd.f32 %v2571_v15, %v2563_v16  ;;  %2520 = vst [vmem:[#allocation6 + $0x58] sm:$0x30] %v2512_v19  ;;  %v2544_v17 = vrot.slane %v2512_v19, 6  ;;  %v2632_v19 = vld [vmem:[#allocation5 + $0x10] sm:$0x3] }
 0x4f7   :  { %2586 = vst [vmem:[#allocation6 + $0x48] sm:$0xc0] %v2578_v33  ;;  %v2610_v31 = vrot.slane %v2578_v33, 6  ;;  %v2545_v35 = vrot.slane %v2513_v61, 6  ;;  %v2698_v33 = vld [vmem:[#allocation5 + $0x50] sm:$0xc] }
 0x4f8   :  { %2587 = vst [vmem:[#allocation6 + $0x40] sm:$0xc0] %v2579_v27  ;;  %v2611_v21 = vrot.slane %v2579_v27, 6  ;;  %v2560_v40 = vmul.f32 %v2544_v17, %v2528_v63  ;;  %v1973_v63 = vpop.f32.mrf.mxu2  ;;  %v2699_v17 = vld [vmem:[#allocation5 + $0xa0] sm:$0xc] }
 0x4f9   :  { %2521 = vst [vmem:[#allocation6] sm:$0x30] %v2513_v61  ;;  %v2561_v41 = vmul.f32 %v2545_v35, %v2529_v30  ;;  %v2626_v60 = vmul.f32 %v2610_v31, %v2594_v11  ;;  %v2722_v42 = vld [vmem:[#allocation4 + $0x40] sm:$0x30]  ;;  %v2656_v30 = vld [vmem:[#allocation4 + $0x38] sm:$0xc] }
 0x4fa   :  { %v2576_v0 = vadd.f32 %v2568_v38, %v2560_v40  ;;  %v2627_v18 = vmul.f32 %v2611_v21, %v2595_v36  ;;  %2078 = vst [vmem:[#allocation5 + $0x58] sm:$0xff] %v2046_v52  ;;  %v2723_v11 = vld [vmem:[#allocation4 + $0xc8] sm:$0x30]  ;;  %v2657_v21 = vld [vmem:[#allocation4 + $0x58] sm:$0xc]  ;;  %v2044_v38 = vmul.f32 %v1973_v63, %v11400_v44 }
 0x4fb   :  { %v2577_v50 = vadd.f32 %v2569_v32, %v2561_v41  ;;  %v2642_v8 = vadd.f32 %v2634_v5, %v2626_v60  ;;  %v2110_v41 = vld [vmem:[#allocation4 + $0x30] sm:$0x3]  ;;  %v2696_v5 = vld [vmem:[#allocation5 + $0x10] sm:$0xc]  ;;  %v2762_v2 = vld [vmem:[#allocation5 + $0x50] sm:$0x30] }
 0x4fc   :  { %2584 = vst [vmem:[#allocation6 + $0x58] sm:$0xc0] %v2576_v0  ;;  %v2608_v9 = vrot.slane %v2576_v0, 6  ;;  %v2643_v3 = vadd.f32 %v2635_v12, %v2627_v18  ;;  %v2111_v0 = vld [vmem:[#allocation4 + $0x48] sm:$0x3] }
 0x4fd   :  { %2585 = vst [vmem:[#allocation6] sm:$0xc0] %v2577_v50  ;;  %v2609_v39 = vrot.slane %v2577_v50, 6  ;;  %v2674_v24 = vrot.slane %v2642_v8, 6  ;;  %v2697_v43 = vld [vmem:[#allocation5 + $0x70] sm:$0xc] }
 0x4fe   :  { %2650 = vst [vmem:[#allocation6 + $0xf8] sm:$0x3] %v2642_v8  ;;  %v2675_v34 = vrot.slane %v2643_v3, 6  ;;  %v2624_v25 = vmul.f32 %v2608_v9, %v2592_v20  ;;  %v2720_v12 = vld [vmem:[#allocation4 + $0x38] sm:$0x30] }
 0x4ff   :  { %v2690_v16 = vmul.f32 %v2674_v24, %v2658_v37  ;;  %2651 = vst [vmem:[#allocation6 + $0xe8] sm:$0x3] %v2643_v3  ;;  %v2625_v26 = vmul.f32 %v2609_v39, %v2593_v53  ;;  %v2118_v37 = vmul.f32 0.0, %v2110_v41  ;;  %v2763_v3 = vld [vmem:[#allocation5 + $0xa0] sm:$0x30] }
 0x500   :  { %v2691_v15 = vmul.f32 %v2675_v34, %v2659_v56  ;;  %v2640_v61 = vadd.f32 %v2632_v19, %v2624_v25  ;;  %2079 = vst [vmem:[#allocation5 + $0xa8] sm:$0xff] %v2047_v10  ;;  %v2786_v44 = vld [vmem:[#allocation4 + $0x40] sm:$0xc0]  ;;  %v2721_v20 = vld [vmem:[#allocation4 + $0x58] sm:$0x30]  ;;  %v2119_v34 = vmul.f32 0.0, %v2111_v0 }
 0x501   :  { %v2706_v27 = vadd.f32 %v2698_v33, %v2690_v16  ;;  %v2641_v28 = vadd.f32 %v2633_v7, %v2625_v26  ;;  %2076 = vst [vmem:[#allocation5 + $0x8] sm:$0xff] %v2044_v38  ;;  %v2126_v52 = vld [vmem:[#allocation5 + $0x58] sm:$0x3]  ;;  %v2787_v53 = vld [vmem:[#allocation4 + $0xc8] sm:$0xc0] }
 0x502   :  { %v2707_v31 = vadd.f32 %v2699_v17, %v2691_v15  ;;  %2648 = vst [vmem:[#allocation6 + $0xa0] sm:$0x3] %v2640_v61  ;;  %v2672_v35 = vrot.slane %v2640_v61, 6  ;;  %v2134_v16 = vadd.f32 %v2126_v52, %v2118_v37  ;;  %v2150_v19 = vld [vmem:[#allocation4 + $0x30] sm:$0xc]  ;;  %v9754_v15 = vld [vmem:[%s12921_s24 + $0xb8] sm:$0xff] }
 0x503   :  { %2714 = vst [vmem:[#allocation6 + $0xf8] sm:$0xc] %v2706_v27  ;;  %v2738_v40 = vrot.slane %v2706_v27, 6  ;;  %v2673_v36 = vrot.slane %v2641_v28, 6  ;;  %v2108_v26 = vld [vmem:[#allocation4 + $0x50] sm:$0x3]  ;;  %3860 = vmatpush.bf16.msrb.mxu0 %v9754_v15 }
 0x504   :  { %2715 = vst [vmem:[#allocation6 + $0xe8] sm:$0xc] %v2707_v31  ;;  %v2739_v60 = vrot.slane %v2707_v31, 6  ;;  %v2688_v57 = vmul.f32 %v2672_v35, %v2656_v30  ;;  %v2760_v7 = vld [vmem:[#allocation5 + $0x10] sm:$0x30]  ;;  %v2166_v27 = vrot.slane %v2134_v16, 6 }
 0x505   :  { %v2754_v32 = vmul.f32 %v2738_v40, %v2722_v42  ;;  %2649 = vst [vmem:[#allocation6 + $0x18] sm:$0x3] %v2641_v28  ;;  %v2689_v18 = vmul.f32 %v2673_v36, %v2657_v21  ;;  %v9762_v17 = vld [vmem:[%s12921_s24 + $0xf8] sm:$0xff]  ;;  %v2826_v28 = vld [vmem:[#allocation5 + $0x50] sm:$0xc0]  ;;  %v2116_v41 = vmul.f32 0.0, %v2108_v26 }
 0x506   :  { %v2755_v50 = vmul.f32 %v2739_v60, %v2723_v11  ;;  %v2704_v8 = vadd.f32 %v2696_v5, %v2688_v57  ;;  %v2761_v31 = vld [vmem:[#allocation5 + $0x70] sm:$0x30]  ;;  %2142 = vst [vmem:[#allocation6 + $0xd0] sm:$0x3] %v2134_v16  ;;  %v2784_v35 = vld [vmem:[#allocation4 + $0x38] sm:$0xc0]  ;;  %v2182_v40 = vmul.f32 %v2166_v27, %v2150_v19  ;;  %3879 = vmatpush.bf16.msra.mxu1 %v9762_v17 }
 0x507   :  { %v2770_v9 = vadd.f32 %v2762_v2, %v2754_v32  ;;  %v2705_v13 = vadd.f32 %v2697_v43, %v2689_v18  ;;  %v2827_v11 = vld [vmem:[#allocation5 + $0xa0] sm:$0xc0]  ;;  %v2127_v36 = vld [vmem:[#allocation5 + $0xa8] sm:$0x3]  ;;  %v2785_v38 = vld [vmem:[#allocation4 + $0x58] sm:$0xc0] }
 0x508   :  { %v2771_v39 = vadd.f32 %v2763_v3, %v2755_v50  ;;  %2712 = vst [vmem:[#allocation6 + $0xa0] sm:$0xc] %v2704_v8  ;;  %v2736_v24 = vrot.slane %v2704_v8, 6  ;;  %v2190_v0 = vld [vmem:[#allocation5 + $0x58] sm:$0xc]  ;;  %v2135_v32 = vadd.f32 %v2127_v36, %v2119_v34  ;;  %v9761_v16 = vld [vmem:[%s12921_s24 + $0xf0] sm:$0xff] }
 0x509   :  { %2778 = vst [vmem:[#allocation6 + $0xf8] sm:$0x30] %v2770_v9  ;;  %v2802_v25 = vrot.slane %v2770_v9, 6  ;;  %v2737_v56 = vrot.slane %v2705_v13, 6  ;;  %v2198_v18 = vadd.f32 %v2190_v0, %v2182_v40  ;;  %v2124_v2 = vld [vmem:[#allocation5 + $0x8] sm:$0x3]  ;;  %v1992_v9 = vpop.f32.mrf.mxu3  ;;  %v1975_v0 = vpop.f32.mrf.mxu2 }
 0x50a   :  { %2779 = vst [vmem:[#allocation6 + $0xe8] sm:$0x30] %v2771_v39  ;;  %v2803_v14 = vrot.slane %v2771_v39, 6  ;;  %v2752_v33 = vmul.f32 %v2736_v24, %v2720_v12  ;;  %v2214_v50 = vld [vmem:[#allocation4 + $0x30] sm:$0x30]  ;;  %v2167_v12 = vrot.slane %v2135_v32, 6  ;;  %v2132_v37 = vadd.f32 %v2124_v2, %v2116_v41  ;;  %3880 = vmatpush.bf16.msra.mxu1 %v9761_v16 }
 0x50b   :  { %v2818_v61 = vmul.f32 %v2802_v25, %v2786_v44  ;;  %2713 = vst [vmem:[#allocation6 + $0x18] sm:$0xc] %v2705_v13  ;;  %v2753_v63 = vmul.f32 %v2737_v56, %v2721_v20  ;;  %v2151_v8 = vld [vmem:[#allocation4 + $0x48] sm:$0xc]  ;;  %v2148_v3 = vld [vmem:[#allocation4 + $0x50] sm:$0xc]  ;;  %v2013_v25 = vpop.f32.mrf.mxu0  ;;  %v2032_v56 = vpop.f32.mrf.mxu1 }
 0x50c   :  { %v2819_v42 = vmul.f32 %v2803_v14, %v2787_v53  ;;  %v2768_v30 = vadd.f32 %v2760_v7, %v2752_v33  ;;  %v2824_v13 = vld [vmem:[#allocation5 + $0x10] sm:$0xc0]  ;;  %v2230_v20 = vrot.slane %v2198_v18, 6  ;;  %2206 = vst [vmem:[#allocation6 + $0xd0] sm:$0xc] %v2198_v18  ;;  %v2183_v53 = vmul.f32 %v2167_v12, %v2151_v8  ;;  %v9738_v33 = vld [vmem:[%s12921_s24 + $0x38] sm:$0xff] }
 0x50d   :  { %v11469_v10 = vadd.f32 %v2826_v28, %v2818_v61  ;;  %v2769_v21 = vadd.f32 %v2761_v31, %v2753_v63  ;;  %v9753_v39 = vld [vmem:[%s12921_s24 + $0xb0] sm:$0xff]  ;;  %v2164_v34 = vrot.slane %v2132_v37, 6  ;;  %2143 = vst [vmem:[#allocation6 + $0x68] sm:$0x3] %v2135_v32  ;;  %v2191_v14 = vld [vmem:[#allocation5 + $0xa8] sm:$0xc]  ;;  %3822 = vmatpush.bf16.msra.mxu2 %v9738_v33 }
 0x50e   :  { %v11471_v60 = vadd.f32 %v2827_v11, %v2819_v42  ;;  %2776 = vst [vmem:[#allocation6 + $0xa0] sm:$0x30] %v2768_v30  ;;  %v2800_v57 = vrot.slane %v2768_v30, 6  ;;  %v2825_v52 = vld [vmem:[#allocation5 + $0x70] sm:$0xc0]  ;;  %v2246_v26 = vmul.f32 %v2230_v20, %v2214_v50  ;;  %3861 = vmatpush.bf16.msrb.mxu0 %v9753_v39  ;;  %v9746_v15 = vld [vmem:[%s12921_s24 + $0x78] sm:$0xff]  ;;  %v2199_v7 = vadd.f32 %v2191_v14, %v2183_v53 }
 0x50f   :  { %2842 = vst [vmem:[#allocation6 + $0xf8] sm:$0xc0] %v11469_v10  ;;  %v2801_v5 = vrot.slane %v2769_v21, 6  ;;  %v2254_v61 = vld [vmem:[#allocation5 + $0x58] sm:$0x30]  ;;  %v2180_v63 = vmul.f32 %v2164_v34, %v2148_v3  ;;  %3841 = vmatpush.bf16.msrb.mxu3 %v9746_v15  ;;  %v2045_v30 = vmul.f32 %v1992_v9, %v11402_v22  ;;  %v2054_v11 = vmul.f32 %v2013_v25, %v11404_v45  ;;  %v9752_v8 = vld [vmem:[%s12921_s24 + $0xa8] sm:$0xff] }
 0x510   :  { %2843 = vst [vmem:[#allocation6 + $0xe8] sm:$0xc0] %v11471_v60  ;;  %v2816_v43 = vmul.f32 %v2800_v57, %v2784_v35  ;;  %v2262_v27 = vadd.f32 %v2254_v61, %v2246_v26  ;;  %v2188_v17 = vld [vmem:[#allocation5 + $0x8] sm:$0xc]  ;;  %v2231_v28 = vrot.slane %v2199_v7, 6  ;;  %v2055_v45 = vmul.f32 %v2032_v56, %v11406_v46 }
 0x511   :  { %2777 = vst [vmem:[#allocation6 + $0x18] sm:$0x30] %v2769_v21  ;;  %v2817_v44 = vmul.f32 %v2801_v5, %v2785_v38  ;;  %v2196_v42 = vadd.f32 %v2188_v17, %v2180_v63  ;;  %v2215_v31 = vld [vmem:[#allocation4 + $0x48] sm:$0x30]  ;;  %v2278_v21 = vld [vmem:[#allocation4 + $0x30] sm:$0xc0]  ;;  %v11495_v2 = vpop.f32.mrf.mxu3  ;;  %v2052_v3 = vmul.f32 %v1975_v0, %v11408_v47 }
 0x512   :  { %v11478_v24 = vadd.f32 %v2824_v13, %v2816_v43  ;;  %2207 = vst [vmem:[#allocation6 + $0x68] sm:$0xc] %v2199_v7  ;;  %v2294_v35 = vrot.slane %v2262_v27, 6  ;;  %v2247_v40 = vmul.f32 %v2231_v28, %v2215_v31  ;;  %v2212_v38 = vld [vmem:[#allocation4 + $0x50] sm:$0x30]  ;;  %v9760_v43 = vld [vmem:[%s12921_s24 + $0xe8] sm:$0xff]  ;;  %3862 = vmatpush.bf16.msrb.mxu0 %v9752_v8  ;;  %v11509_v31 = vpop.f32.mrf.mxu2 }
 0x513   :  { %v11483_v19 = vadd.f32 %v2825_v52, %v2817_v44  ;;  %2270 = vst [vmem:[#allocation6 + $0xd0] sm:$0x30] %v2262_v27  ;;  %v2228_v36 = vrot.slane %v2196_v42, 6  ;;  %v2255_v57 = vld [vmem:[#allocation5 + $0xa8] sm:$0x30]  ;;  %v11505_v13 = vpop.f32.mrf.mxu0  ;;  %v11507_v44 = vpop.f32.mrf.mxu1  ;;  %3881 = vmatpush.bf16.msra.mxu1 %v9760_v43 }
 0x514   :  { %2840 = vst [vmem:[#allocation6 + $0xa0] sm:$0xc0] %v11478_v24  ;;  %v2310_v41 = vmul.f32 %v2294_v35, %v2278_v21  ;;  %v2318_v32 = vld [vmem:[#allocation5 + $0x58] sm:$0xc0]  ;;  %v2263_v5 = vadd.f32 %v2255_v57, %v2247_v40  ;;  %v2252_v50 = vld [vmem:[#allocation5 + $0x8] sm:$0x30] }
 0x515   :  { %2841 = vst [vmem:[#allocation6 + $0x18] sm:$0xc0] %v11483_v19  ;;  %v2244_v18 = vmul.f32 %v2228_v36, %v2212_v38  ;;  %v2279_v12 = vld [vmem:[#allocation4 + $0x48] sm:$0xc0]  ;;  %v2109_v20 = vld [vmem:[#allocation4 + $0x68] sm:$0x3] }
 0x516   :  { %2140 = vst [vmem:[#allocation6 + $0x28] sm:$0x3] %v2132_v37  ;;  %v2326_v22 = vadd.f32 %v2318_v32, %v2310_v41  ;;  %v2295_v37 = vrot.slane %v2263_v5, 6  ;;  %v2276_v39 = vld [vmem:[#allocation4 + $0x50] sm:$0xc0]  ;;  %v2117_v56 = vmul.f32 0.0, %v2109_v20  ;;  %v2053_v20 = vmul.f32 %v11495_v2, %v11410_v48 }
 0x517   :  { %2204 = vst [vmem:[#allocation6 + $0x28] sm:$0xc] %v2196_v42  ;;  %v2260_v9 = vadd.f32 %v2252_v50, %v2244_v18  ;;  %v2342_v34 = vld [vmem:[#allocation4 + $0x8] sm:$0x3]  ;;  %v2319_v25 = vld [vmem:[#allocation5 + $0xa8] sm:$0xc0] }
 0x518   :  { %2077 = vst [vmem:[#allocation5 + $0x90] sm:$0xff] %v2045_v30  ;;  %v2358_v46 = vrot.slane %v2326_v22, 6  ;;  %v2311_v52 = vmul.f32 %v2295_v37, %v2279_v12  ;;  %v2316_v14 = vld [vmem:[#allocation5 + $0x8] sm:$0xc0]  ;;  %v2343_v63 = vld [vmem:[#allocation4 + $0x78] sm:$0x3] }
 0x519   :  { %2086 = vst [vmem:[#allocation5 + $0x18] sm:$0xff] %v2054_v11  ;;  %v2292_v53 = vrot.slane %v2260_v9, 6  ;;  %v11511_v35 = vpop.f32.mrf.mxu3  ;;  %v2149_v11 = vld [vmem:[#allocation4 + $0x68] sm:$0xc]  ;;  %v2340_v21 = vld [vmem:[#allocation4 + $0x60] sm:$0x3] }
 0x51a   :  { %2271 = vst [vmem:[#allocation6 + $0x68] sm:$0x30] %v2263_v5  ;;  %v2327_v16 = vadd.f32 %v2319_v25, %v2311_v52  ;;  %v2374_v47 = vmul.f32 %v2358_v46, %v2342_v34  ;;  %v9737_v32 = vld [vmem:[%s12921_s24 + $0x30] sm:$0xff]  ;;  %v2406_v5 = vld [vmem:[#allocation4 + $0x8] sm:$0xc]  ;;  %v2062_v34 = vmul.f32 %v11505_v13, %v11414_v49  ;;  %v9751_v25 = vld [vmem:[%s12921_s24 + $0xa0] sm:$0xff] }
 0x51b   :  { %2334 = vst [vmem:[#allocation6 + $0xd0] sm:$0xc0] %v2326_v22  ;;  %v2308_v26 = vmul.f32 %v2292_v53, %v2276_v39  ;;  %v11513_v57 = vpop.f32.mrf.mxu0  ;;  %v11515_v0 = vpop.f32.mrf.mxu1  ;;  %v2407_v50 = vld [vmem:[#allocation4 + $0x78] sm:$0xc]  ;;  %3823 = vmatpush.bf16.msra.mxu2 %v9737_v32  ;;  %v2213_v12 = vld [vmem:[#allocation4 + $0x68] sm:$0x30]  ;;  %3863 = vmatpush.bf16.msrb.mxu0 %v9751_v25  ;;  %v2063_v32 = vmul.f32 %v11507_v44, %v11416_v51 }
 0x51c   :  { %2268 = vst [vmem:[#allocation6 + $0x28] sm:$0x30] %v2260_v9  ;;  %v2359_v15 = vrot.slane %v2327_v16, 6  ;;  %v9745_v46 = vld [vmem:[%s12921_s24 + $0x70] sm:$0xff]  ;;  %v2404_v39 = vld [vmem:[#allocation4 + $0x60] sm:$0xc] }
 0x51d   :  { %2087 = vst [vmem:[#allocation5 + $0x68] sm:$0xff] %v2055_v45  ;;  %v2324_v61 = vadd.f32 %v2316_v14, %v2308_v26  ;;  %v9736_v48 = vld [vmem:[%s12921_s24 + $0x28] sm:$0xff]  ;;  %3842 = vmatpush.bf16.msrb.mxu3 %v9745_v46  ;;  %v9750_v14 = vld [vmem:[%s12921_s24 + $0x98] sm:$0xff]  ;;  %v9757_v51 = vld [vmem:[%s12921_s24 + $0xd0] sm:$0xff] }
 0x51e   :  { %2084 = vst [vmem:[#allocation5 + $0xe0] sm:$0xff] %v2052_v3  ;;  %v2375_v30 = vmul.f32 %v2359_v15, %v2343_v63  ;;  %v9744_v49 = vld [vmem:[%s12921_s24 + $0x68] sm:$0xff]  ;;  %v2468_v44 = vld [vmem:[#allocation4 + $0x60] sm:$0x30]  ;;  %v2535_v25 = vld [vmem:[#allocation4 + $0x78] sm:$0xc0] }
 0x51f   :  { %v2125_v33 = vld [vmem:[#allocation5 + $0x90] sm:$0x3]  ;;  %2335 = vst [vmem:[#allocation6 + $0x68] sm:$0xc0] %v2327_v16  ;;  %v2356_v17 = vrot.slane %v2324_v61, 6  ;;  %3824 = vmatpush.bf16.msra.mxu2 %v9736_v48  ;;  %3864 = vmatpush.bf16.msrb.mxu0 %v9750_v14  ;;  %v9748_v14 = vld [vmem:[%s12921_s24 + $0x88] sm:$0xff] }
 0x520   :  { %v2133_v7 = vadd.f32 %v2125_v33, %v2117_v56  ;;  %v2382_v27 = vld [vmem:[#allocation5 + $0x18] sm:$0x3]  ;;  %2332 = vst [vmem:[#allocation6 + $0x28] sm:$0xc0] %v2324_v61  ;;  %v2189_v18 = vld [vmem:[#allocation5 + $0x90] sm:$0xc] }
 0x521   :  { %v2390_v42 = vadd.f32 %v2382_v27, %v2374_v47  ;;  %v2372_v41 = vmul.f32 %v2356_v17, %v2340_v21  ;;  %v2446_v37 = vld [vmem:[#allocation5 + $0x18] sm:$0xc]  ;;  %v9759_v56 = vld [vmem:[%s12921_s24 + $0xe0] sm:$0xff]  ;;  %v2470_v15 = vld [vmem:[#allocation4 + $0x8] sm:$0x30]  ;;  %2085 = vst [vmem:[#allocation5 + $0x60] sm:$0xff] %v2053_v20  ;;  %3843 = vmatpush.bf16.msrb.mxu3 %v9744_v49 }
 0x522   :  { %v2165_v28 = vrot.slane %v2133_v7, 6  ;;  %2141 = vst [vmem:[#allocation6 + $0x30] sm:$0x3] %v2133_v7  ;;  %3882 = vmatpush.bf16.msra.mxu1 %v9759_v56  ;;  %v9758_v33 = vld [vmem:[%s12921_s24 + $0xd8] sm:$0xff]  ;;  %v2253_v61 = vld [vmem:[#allocation5 + $0x90] sm:$0x30] }
 0x523   :  { %2398 = vst [vmem:[#allocation6 + $0xe0] sm:$0x3] %v2390_v42  ;;  %v2422_v36 = vrot.slane %v2390_v42, 6  ;;  %v2471_v27 = vld [vmem:[#allocation4 + $0x78] sm:$0x30]  ;;  %v9735_v21 = vld [vmem:[%s12921_s24 + $0x20] sm:$0xff] }
 0x524   :  { %v2181_v40 = vmul.f32 %v2165_v28, %v2149_v11  ;;  %v2383_v38 = vld [vmem:[#allocation5 + $0x68] sm:$0x3]  ;;  %v2447_v16 = vld [vmem:[#allocation5 + $0x68] sm:$0xc]  ;;  %2094 = vst [vmem:[#allocation5 + $0x20] sm:$0xff] %v2062_v34  ;;  %v11547_v11 = vpop.f32.mrf.mxu3  ;;  %3825 = vmatpush.bf16.msra.mxu2 %v9735_v21  ;;  %v9734_v20 = vld [vmem:[%s12921_s24 + $0x18] sm:$0xff] }
 0x525   :  { %v2391_v22 = vadd.f32 %v2383_v38, %v2375_v30  ;;  %v2438_v8 = vmul.f32 %v2422_v36, %v2406_v5  ;;  %v2380_v43 = vld [vmem:[#allocation5 + $0xe0] sm:$0x3]  ;;  %v2444_v42 = vld [vmem:[#allocation5 + $0xe0] sm:$0xc]  ;;  %v11545_v30 = vpop.f32.mrf.mxu2  ;;  %v2510_v36 = vld [vmem:[#allocation5 + $0x18] sm:$0x30] }
 0x526   :  { %v2197_v45 = vadd.f32 %v2189_v18, %v2181_v40  ;;  %v2388_v3 = vadd.f32 %v2380_v43, %v2372_v41  ;;  %v2277_v40 = vld [vmem:[#allocation4 + $0x68] sm:$0xc0]  ;;  %v9743_v5 = vld [vmem:[%s12921_s24 + $0x60] sm:$0xff]  ;;  %3883 = vmatpush.bf16.msra.mxu1 %v9758_v33  ;;  %2095 = vst [vmem:[#allocation5 + $0xf0] sm:$0xff] %v2063_v32  ;;  %v9742_v34 = vld [vmem:[%s12921_s24 + $0x58] sm:$0xff] }
 0x527   :  { %2399 = vst [vmem:[#allocation6 + $0x80] sm:$0x3] %v2391_v22  ;;  %v2423_v9 = vrot.slane %v2391_v22, 6  ;;  %v2454_v53 = vadd.f32 %v2446_v37, %v2438_v8  ;;  %v9749_v8 = vld [vmem:[%s12921_s24 + $0x90] sm:$0xff]  ;;  %v2534_v46 = vld [vmem:[#allocation4 + $0x8] sm:$0xc0]  ;;  %3844 = vmatpush.bf16.msrb.mxu3 %v9743_v5 }
 0x528   :  { %2205 = vst [vmem:[#allocation6 + $0x30] sm:$0xc] %v2197_v45  ;;  %v2229_v52 = vrot.slane %v2197_v45, 6  ;;  %v2420_v26 = vrot.slane %v2388_v3, 6  ;;  %v11557_v45 = vpop.f32.mrf.mxu1  ;;  %3865 = vmatpush.bf16.msrb.mxu0 %v9749_v8  ;;  %3826 = vmatpush.bf16.msra.mxu2 %v9734_v20  ;;  %v2532_v33 = vld [vmem:[#allocation4 + $0x60] sm:$0xc0] }
 0x529   :  { %v2439_v2 = vmul.f32 %v2423_v9, %v2407_v50  ;;  %2396 = vst [vmem:[#allocation6 + $0x78] sm:$0x3] %v2388_v3  ;;  %v2486_v47 = vrot.slane %v2454_v53, 6  ;;  %v3119_v50 = vpop.f32.mrf.mxu0  ;;  %v2511_v3 = vld [vmem:[#allocation5 + $0x68] sm:$0x30]  ;;  %v3227_v21 = vld [vmem:[#allocation6 + $0x10] sm:$0xff] }
 0x52a   :  { %v2245_v13 = vmul.f32 %v2229_v52, %v2213_v12  ;;  %2462 = vst [vmem:[#allocation6 + $0xe0] sm:$0xc] %v2454_v53  ;;  %v2436_v63 = vmul.f32 %v2420_v26, %v2404_v39  ;;  %v2317_v39 = vld [vmem:[#allocation5 + $0x90] sm:$0xc0]  ;;  %3884 = vmatpush.bf16.msra.mxu1 %v9757_v51  ;;  %v2574_v26 = vld [vmem:[#allocation5 + $0x18] sm:$0xc0] }
 0x52b   :  { %v2455_v7 = vadd.f32 %v2447_v16, %v2439_v2  ;;  %v2502_v28 = vmul.f32 %v2486_v47, %v2470_v15  ;;  %v2508_v2 = vld [vmem:[#allocation5 + $0xe0] sm:$0x30]  ;;  %v2341_v16 = vld [vmem:[#allocation4 + $0xf0] sm:$0x3]  ;;  %v2060_v47 = vmul.f32 %v11509_v31, %v11424_v23  ;;  %v2575_v23 = vld [vmem:[#allocation5 + $0x68] sm:$0xc0]  ;;  %3845 = vmatpush.bf16.msrb.mxu3 %v9742_v34 }
 0x52c   :  { %v2261_v17 = vadd.f32 %v2253_v61, %v2245_v13  ;;  %v2452_v41 = vadd.f32 %v2444_v42, %v2436_v63  ;;  %3866 = vmatpush.bf16.msrb.mxu0 %v9748_v14  ;;  %v3234_v5 = vld [vmem:[#allocation6 + $0x48] sm:$0xff]  ;;  %v9741_v8 = vld [vmem:[%s12921_s24 + $0x50] sm:$0xff]  ;;  %v2572_v20 = vld [vmem:[#allocation5 + $0xe0] sm:$0xc0] }
 0x52d   :  { %2463 = vst [vmem:[#allocation6 + $0x80] sm:$0xc] %v2455_v7  ;;  %v2487_v38 = vrot.slane %v2455_v7, 6  ;;  %v2518_v22 = vadd.f32 %v2510_v36, %v2502_v28  ;;  %v3226_v7 = vld [vmem:[#allocation6 + $0xc0] sm:$0xff]  ;;  %v3081_v63 = vpop.f32.mrf.mxu2  ;;  %v2598_v28 = vld [vmem:[#allocation4 + $0x70] sm:$0x3] }
 0x52e   :  { %2269 = vst [vmem:[#allocation6 + $0x30] sm:$0x30] %v2261_v17  ;;  %v2293_v18 = vrot.slane %v2261_v17, 6  ;;  %v2484_v12 = vrot.slane %v2452_v41, 6  ;;  %v9756_v17 = vld [vmem:[%s12921_s24 + $0xc8] sm:$0xff] }
 0x52f   :  { %v2503_v43 = vmul.f32 %v2487_v38, %v2471_v27  ;;  %2460 = vst [vmem:[#allocation6 + $0x78] sm:$0xc] %v2452_v41  ;;  %v2550_v9 = vrot.slane %v2518_v22, 6  ;;  %v11576_v27 = vpop.f32.mrf.mxu3  ;;  %v3258_v41 = vmul.f32 %v3226_v7, %v3119_v50  ;;  %3885 = vmatpush.bf16.msra.mxu1 %v9756_v17  ;;  %v9747_v50 = vld [vmem:[%s12921_s24 + $0x80] sm:$0xff]  ;;  %3846 = vmatpush.bf16.msrb.mxu3 %v9741_v8  ;;  %v2662_v14 = vld [vmem:[#allocation4 + $0x70] sm:$0xc] }
 0x530   :  { %v2309_v37 = vmul.f32 %v2293_v18, %v2277_v40  ;;  %2526 = vst [vmem:[#allocation6 + $0xe0] sm:$0x30] %v2518_v22  ;;  %v2500_v53 = vmul.f32 %v2484_v12, %v2468_v44  ;;  %v9733_v40 = vld [vmem:[%s12921_s24 + $0x10] sm:$0xff]  ;;  %v3140_v18 = vpop.f32.mrf.mxu1  ;;  %v3235_v22 = vld [vmem:[#allocation6 + $0x40] sm:$0xff]  ;;  %3867 = vmatpush.bf16.msrb.mxu0 %v9747_v50 }
 0x531   :  { %v2519_v52 = vadd.f32 %v2511_v3, %v2503_v43  ;;  %v2566_v48 = vmul.f32 %v2550_v9, %v2534_v46  ;;  %v3121_v32 = vpop.f32.mrf.mxu0  ;;  %v2381_v43 = vld [vmem:[#allocation5 + $0x60] sm:$0x3]  ;;  %2092 = vst [vmem:[#allocation5 + $0xd8] sm:$0xff] %v2060_v47  ;;  %3827 = vmatpush.bf16.msra.mxu2 %v9733_v40  ;;  %v9740_v47 = vld [vmem:[%s12921_s24 + $0x48] sm:$0xff]  ;;  %v2445_v40 = vld [vmem:[#allocation5 + $0x60] sm:$0xc] }
 0x532   :  { %v2325_v56 = vadd.f32 %v2317_v39, %v2309_v37  ;;  %v2516_v13 = vadd.f32 %v2508_v2, %v2500_v53  ;;  %v3266_v12 = vmul.f32 %v3234_v5, %v3121_v32  ;;  %v3267_v37 = vmul.f32 %v3235_v22, %v3140_v18  ;;  %v9755_v9 = vld [vmem:[%s12921_s24 + $0xc0] sm:$0xff]  ;;  %v2405_v53 = vld [vmem:[#allocation4 + $0xf0] sm:$0xc] }
 0x533   :  { %2527 = vst [vmem:[#allocation6 + $0x80] sm:$0x30] %v2519_v52  ;;  %v2551_v49 = vrot.slane %v2519_v52, 6  ;;  %v2582_v61 = vadd.f32 %v2574_v26, %v2566_v48  ;;  %v2599_v3 = vld [vmem:[#allocation4 + $0xc0] sm:$0x3]  ;;  %v3259_v52 = vmul.f32 %v3227_v21, %v11557_v45  ;;  %v2061_v48 = vmul.f32 %v11511_v35, %v11426_v54  ;;  %3886 = vmatpush.bf16.msra.mxu1 %v9755_v9 }
 0x534   :  { %2333 = vst [vmem:[#allocation6 + $0x30] sm:$0xc0] %v2325_v56  ;;  %v2357_v15 = vrot.slane %v2325_v56, 6  ;;  %v2548_v31 = vrot.slane %v2516_v13, 6  ;;  %v2638_v56 = vld [vmem:[#allocation5 + $0x20] sm:$0x3]  ;;  %v3290_v2 = vpack.c.bf16 %v3266_v12, %v3258_v41  ;;  %3847 = vmatpush.bf16.msrb.mxu3 %v9740_v47  ;;  %v2070_v9 = vmul.f32 %v11513_v57, %v11428_v29 }
 0x535   :  { %v2567_v42 = vmul.f32 %v2551_v49, %v2535_v25  ;;  %2524 = vst [vmem:[#allocation6 + $0x78] sm:$0x30] %v2516_v13  ;;  %v2614_v36 = vrot.slane %v2582_v61, 6  ;;  %v2596_v26 = vld [vmem:[#allocation4 + $0xe0] sm:$0x3]  ;;  %v3291_v45 = vpack.c.bf16 %v3267_v37, %v3259_v52 }
 0x536   :  { %2590 = vst [vmem:[#allocation6 + $0xe0] sm:$0xc0] %v2582_v61  ;;  %v2373_v38 = vmul.f32 %v2357_v15, %v2341_v16  ;;  %v2564_v44 = vmul.f32 %v2548_v31, %v2532_v33  ;;  %v9732_v16 = vld [vmem:[%s12921_s24 + $0x8] sm:$0xff]  ;;  %v2639_v33 = vld [vmem:[#allocation5 + $0xf0] sm:$0x3]  ;;  %v9731_v21 = vld [vmem:[%s12921_s24] sm:$0xff]  ;;  %3868 = vmatmul.bf16.vlgmr.msrb.gmra.mxu0 %v3290_v2 }
 0x537   :  { %v2583_v51 = vadd.f32 %v2575_v23, %v2567_v42  ;;  %v2630_v39 = vmul.f32 %v2614_v36, %v2598_v28  ;;  %v3224_v15 = vld [vmem:[#allocation6 + $0xb0] sm:$0xff]  ;;  %v3225_v28 = vld [vmem:[#allocation6 + $0xb8] sm:$0xff]  ;;  %3828 = vmatpush.bf16.msra.mxu2 %v9732_v16  ;;  %v3083_v42 = vpop.f32.mrf.mxu2  ;;  %v3102_v31 = vpop.f32.mrf.mxu3  ;;  %2093 = vst [vmem:[#allocation5 + $0x30] sm:$0xff] %v2061_v48  ;;  %v3233_v32 = vld [vmem:[#allocation6] sm:$0xff]  ;;  %3887 = vmatmul.bf16.vlgmr.msra.gmra.mxu1 %v3291_v45 }
 0x538   :  { %v2389_v46 = vadd.f32 %v2381_v43, %v2373_v38  ;;  %v2580_v25 = vadd.f32 %v2572_v20, %v2564_v44  ;;  %v3256_v17 = vmul.f32 %v3224_v15, %v3081_v63  ;;  %v3232_v23 = vld [vmem:[#allocation6 + $0x58] sm:$0xff]  ;;  %v9739_v63 = vld [vmem:[%s12921_s24 + $0x40] sm:$0xff]  ;;  %v3265_v44 = vmul.f32 %v3233_v32, %v3102_v31  ;;  %v2469_v43 = vld [vmem:[#allocation4 + $0xf0] sm:$0x30]  ;;  %2102 = vst [vmem:[#allocation5 + $0x28] sm:$0x3] %v2070_v9 }
 0x539   :  { %2591 = vst [vmem:[#allocation6 + $0x80] sm:$0xc0] %v2583_v51  ;;  %v2615_v34 = vrot.slane %v2583_v51, 6  ;;  %v2646_v13 = vadd.f32 %v2638_v56, %v2630_v39  ;;  %v3264_v41 = vmul.f32 %v3232_v23, %v3083_v42  ;;  %v2663_v5 = vld [vmem:[#allocation4 + $0xc0] sm:$0xc]  ;;  %v3257_v51 = vmul.f32 %v3225_v28, %v11576_v27  ;;  %v9786_v20 = vld [vmem:[%s12921_s24 + $0x1b8] sm:$0xff]  ;;  %v11617_v29 = vpop.f32.mrf.mxu0  ;;  %3848 = vmatpush.bf16.msrb.mxu3 %v9739_v63 }
 0x53a   :  { %2397 = vst [vmem:[#allocation6 + $0xd8] sm:$0x3] %v2389_v46  ;;  %v2421_v49 = vrot.slane %v2389_v46, 6  ;;  %v2612_v54 = vrot.slane %v2580_v25, 6  ;;  %v2636_v8 = vld [vmem:[#allocation5 + $0xd8] sm:$0x3]  ;;  %3936 = vmatpush.bf16.msra.mxu0 %v9786_v20  ;;  %v2071_v31 = vmul.f32 %v11515_v0, %v11430_v55 }
 0x53b   :  { %2588 = vst [vmem:[#allocation6 + $0x78] sm:$0xc0] %v2580_v25  ;;  %v2631_v35 = vmul.f32 %v2615_v34, %v2599_v3  ;;  %v2678_v7 = vrot.slane %v2646_v13, 6  ;;  %v2702_v12 = vld [vmem:[#allocation5 + $0x20] sm:$0xc]  ;;  %v3288_v3 = vpack.c.bf16 %v3264_v41, %v3256_v17  ;;  %v3289_v27 = vpack.c.bf16 %v3265_v44, %v3257_v51  ;;  %3829 = vmatpush.bf16.msra.mxu2 %v9731_v21  ;;  %v9785_v2 = vld [vmem:[%s12921_s24 + $0x1b0] sm:$0xff]  ;;  %v11630_v21 = vpop.f32.mrf.mxu1 }
 0x53c   :  { %v2437_v61 = vmul.f32 %v2421_v49, %v2405_v53  ;;  %2654 = vst [vmem:[#allocation6 + $0x38] sm:$0x3] %v2646_v13  ;;  %v2628_v38 = vmul.f32 %v2612_v54, %v2596_v26  ;;  %v2660_v46 = vld [vmem:[#allocation4 + $0xe0] sm:$0xc]  ;;  %v9794_v53 = vld [vmem:[%s12921_s24 + $0x1f8] sm:$0xff]  ;;  %v9793_v16 = vld [vmem:[%s12921_s24 + $0x1f0] sm:$0xff]  ;;  %v2068_v41 = vmul.f32 %v11545_v30, %v11432_v62 }
 0x53d   :  { %v2647_v36 = vadd.f32 %v2639_v33, %v2631_v35  ;;  %v2694_v22 = vmul.f32 %v2678_v7, %v2662_v14  ;;  %v2703_v25 = vld [vmem:[#allocation5 + $0xf0] sm:$0xc]  ;;  %3955 = vmatpush.bf16.msrb.mxu1 %v9794_v53  ;;  %v2726_v26 = vld [vmem:[#allocation4 + $0x70] sm:$0x30]  ;;  %v2509_v49 = vld [vmem:[#allocation5 + $0x60] sm:$0x30]  ;;  %3849 = vmatmul.bf16.vlgmr.msrb.gmra.mxu3 %v3289_v27 }
 0x53e   :  { %v2453_v18 = vadd.f32 %v2445_v40, %v2437_v61  ;;  %v2644_v50 = vadd.f32 %v2636_v8, %v2628_v38  ;;  %3830 = vmatmul.bf16.vlgmr.msra.gmra.mxu2 %v3288_v3  ;;  %v2727_v47 = vld [vmem:[#allocation4 + $0xc0] sm:$0x30]  ;;  %v2866_v14 = vrot.slane %v11469_v10, 6  ;;  %v2867_v54 = vrot.slane %v11471_v60, 6  ;;  %v2700_v15 = vld [vmem:[#allocation5 + $0xd8] sm:$0xc]  ;;  %3937 = vmatpush.bf16.msra.mxu0 %v9785_v2 }
 0x53f   :  { %2655 = vst [vmem:[#allocation6 + $0x70] sm:$0x3] %v2647_v36  ;;  %v2679_v37 = vrot.slane %v2647_v36, 6  ;;  %v2710_v52 = vadd.f32 %v2702_v12, %v2694_v22  ;;  %v2850_v61 = vld [vmem:[#allocation4 + $0x10] sm:$0x3]  ;;  %v2864_v17 = vrot.slane %v11478_v24, 6  ;;  %v11635_v32 = vpop.f32.mrf.mxu2  ;;  %v11637_v55 = vpop.f32.mrf.mxu3 }
 0x540   :  { %2461 = vst [vmem:[#allocation6 + $0xd8] sm:$0xc] %v2453_v18  ;;  %v2485_v39 = vrot.slane %v2453_v18, 6  ;;  %v2676_v56 = vrot.slane %v2644_v50, 6  ;;  %v2533_v7 = vld [vmem:[#allocation4 + $0xf0] sm:$0xc0]  ;;  %v2882_v44 = vmul.f32 %v2866_v14, %v2850_v61 }
 0x541   :  { %v2695_v34 = vmul.f32 %v2679_v37, %v2663_v5  ;;  %2652 = vst [vmem:[#allocation6 + $0x90] sm:$0x3] %v2644_v50  ;;  %v2742_v48 = vrot.slane %v2710_v52, 6  ;;  %v2766_v28 = vld [vmem:[#allocation5 + $0x20] sm:$0x30]  ;;  %v2865_v40 = vrot.slane %v11483_v19, 6  ;;  %3956 = vmatpush.bf16.msrb.mxu1 %v9793_v16 }
 0x542   :  { %v2501_v57 = vmul.f32 %v2485_v39, %v2469_v43  ;;  %2718 = vst [vmem:[#allocation6 + $0x38] sm:$0xc] %v2710_v52  ;;  %v2692_v45 = vmul.f32 %v2676_v56, %v2660_v46  ;;  %v2724_v10 = vld [vmem:[#allocation4 + $0xe0] sm:$0x30]  ;;  %v2790_v63 = vld [vmem:[#allocation4 + $0x70] sm:$0xc0] }
 0x543   :  { %v2711_v13 = vadd.f32 %v2703_v25, %v2695_v34  ;;  %v2758_v33 = vmul.f32 %v2742_v48, %v2726_v26  ;;  %v9770_v0 = vld [vmem:[%s12921_s24 + $0x138] sm:$0xff]  ;;  %v9784_v62 = vld [vmem:[%s12921_s24 + $0x1a8] sm:$0xff]  ;;  %v2767_v51 = vld [vmem:[#allocation5 + $0xf0] sm:$0x30]  ;;  %2103 = vst [vmem:[#allocation5 + $0x98] sm:$0x3] %v2071_v31 }
 0x544   :  { %v2517_v35 = vadd.f32 %v2509_v49, %v2501_v57  ;;  %v2708_v23 = vadd.f32 %v2700_v15, %v2692_v45  ;;  %v9778_v22 = vld [vmem:[%s12921_s24 + $0x178] sm:$0xff]  ;;  %v9792_v43 = vld [vmem:[%s12921_s24 + $0x1e8] sm:$0xff]  ;;  %v2573_v50 = vld [vmem:[#allocation5 + $0x60] sm:$0xc0]  ;;  %3898 = vmatpush.bf16.msrb.mxu2 %v9770_v0  ;;  %2100 = vst [vmem:[#allocation5 + $0xb8] sm:$0x3] %v2068_v41  ;;  %3938 = vmatpush.bf16.msra.mxu0 %v9784_v62 }
 0x545   :  { %2719 = vst [vmem:[#allocation6 + $0x70] sm:$0xc] %v2711_v13  ;;  %v2743_v42 = vrot.slane %v2711_v13, 6  ;;  %v2774_v38 = vadd.f32 %v2766_v28, %v2758_v33  ;;  %v2851_v12 = vld [vmem:[#allocation4 + $0x28] sm:$0x3]  ;;  %3917 = vmatpush.bf16.msra.mxu3 %v9778_v22  ;;  %v9769_v20 = vld [vmem:[%s12921_s24 + $0x130] sm:$0xff]  ;;  %3957 = vmatpush.bf16.msrb.mxu1 %v9792_v43  ;;  %v2069_v49 = vmul.f32 %v11547_v11, %v11434_v58  ;;  %v11665_v13 = vpop.f32.mrf.mxu0 }
 0x546   :  { %2525 = vst [vmem:[#allocation6 + $0xd8] sm:$0x30] %v2517_v35  ;;  %v2549_v36 = vrot.slane %v2517_v35, 6  ;;  %v2740_v18 = vrot.slane %v2708_v23, 6  ;;  %v2890_v37 = vld [vmem:[#allocation5 + $0xf8] sm:$0x3]  ;;  %v2883_v15 = vmul.f32 %v2867_v54, %v2851_v12 }
 0x547   :  { %v2759_v5 = vmul.f32 %v2743_v42, %v2727_v47  ;;  %2716 = vst [vmem:[#allocation6 + $0x90] sm:$0xc] %v2708_v23  ;;  %v2806_v8 = vrot.slane %v2774_v38, 6  ;;  %v9777_v46 = vld [vmem:[%s12921_s24 + $0x170] sm:$0xff]  ;;  %v2848_v39 = vld [vmem:[#allocation4 + $0xa8] sm:$0x3]  ;;  %v2898_v33 = vadd.f32 %v2890_v37, %v2882_v44  ;;  %v11687_v22 = vpop.f32.mrf.mxu2  ;;  %v11689_v44 = vpop.f32.mrf.mxu3 }
 0x548   :  { %v2565_v30 = vmul.f32 %v2549_v36, %v2533_v7  ;;  %2782 = vst [vmem:[#allocation6 + $0x38] sm:$0x30] %v2774_v38  ;;  %v2756_v3 = vmul.f32 %v2740_v18, %v2724_v10  ;;  %v2791_v52 = vld [vmem:[#allocation4 + $0xc0] sm:$0xc0]  ;;  %v2764_v34 = vld [vmem:[#allocation5 + $0xd8] sm:$0x30]  ;;  %3899 = vmatpush.bf16.msrb.mxu2 %v9769_v20  ;;  %v2880_v58 = vmul.f32 %v2864_v17, %v2848_v39 }
 0x549   :  { %v2775_v9 = vadd.f32 %v2767_v51, %v2759_v5  ;;  %v2822_v53 = vmul.f32 %v2806_v8, %v2790_v63  ;;  %v9783_v25 = vld [vmem:[%s12921_s24 + $0x1a0] sm:$0xff]  ;;  %v2849_v57 = vld [vmem:[#allocation4 + $0xd0] sm:$0x3]  ;;  %v2831_v35 = vld [vmem:[#allocation5 + $0xf0] sm:$0xc0]  ;;  %3918 = vmatpush.bf16.msra.mxu3 %v9777_v46  ;;  %v11685_v63 = vpop.f32.mrf.mxu1 }
 0x54a   :  { %v2581_v27 = vadd.f32 %v2573_v50, %v2565_v30  ;;  %v9791_v56 = vld [vmem:[%s12921_s24 + $0x1e0] sm:$0xff]  ;;  %v2597_v48 = vld [vmem:[#allocation4 + $0x90] sm:$0x3]  ;;  %v2772_v26 = vadd.f32 %v2764_v34, %v2756_v3  ;;  %v9768_v11 = vld [vmem:[%s12921_s24 + $0x128] sm:$0xff]  ;;  %v2881_v23 = vmul.f32 %v2865_v40, %v2849_v57  ;;  %3939 = vmatpush.bf16.msra.mxu0 %v9783_v25  ;;  %2101 = vst [vmem:[#allocation5] sm:$0x3] %v2069_v49 }
 0x54b   :  { %v2830_v2 = vld [vmem:[#allocation5 + $0x20] sm:$0xc0]  ;;  %2783 = vst [vmem:[#allocation6 + $0x70] sm:$0x30] %v2775_v9  ;;  %v2807_v16 = vrot.slane %v2775_v9, 6  ;;  %v9776_v42 = vld [vmem:[%s12921_s24 + $0x168] sm:$0xff]  ;;  %3958 = vmatpush.bf16.msrb.mxu1 %v9791_v56 }
 0x54c   :  { %v2788_v45 = vld [vmem:[#allocation4 + $0xe0] sm:$0xc0]  ;;  %2589 = vst [vmem:[#allocation6 + $0xd8] sm:$0xc0] %v2581_v27  ;;  %v2613_v47 = vrot.slane %v2581_v27, 6  ;;  %v2838_v14 = vadd.f32 %v2830_v2, %v2822_v53  ;;  %v2804_v28 = vrot.slane %v2772_v26, 6  ;;  %3900 = vmatpush.bf16.msrb.mxu2 %v9768_v11 }
 0x54d   :  { %v2891_v61 = vld [vmem:[#allocation5 + $0xc0] sm:$0x3]  ;;  %v2823_v7 = vmul.f32 %v2807_v16, %v2791_v52  ;;  %2780 = vst [vmem:[#allocation6 + $0x90] sm:$0x30] %v2772_v26  ;;  %v9782_v24 = vld [vmem:[%s12921_s24 + $0x198] sm:$0xff]  ;;  %3919 = vmatpush.bf16.msra.mxu3 %v9776_v42  ;;  %v9781_v9 = vld [vmem:[%s12921_s24 + $0x190] sm:$0xff] }
 0x54e   :  { %2846 = vst [vmem:[#allocation6 + $0x38] sm:$0xc0] %v2838_v14  ;;  %v2870_v60 = vrot.slane %v2838_v14, 6  ;;  %v2629_v54 = vmul.f32 %v2613_v47, %v2597_v48  ;;  %v9790_v17 = vld [vmem:[%s12921_s24 + $0x1d8] sm:$0xff]  ;;  %v2854_v31 = vld [vmem:[#allocation4 + $0x20] sm:$0x3]  ;;  %v2820_v38 = vmul.f32 %v2804_v28, %v2788_v45  ;;  %v2899_v0 = vadd.f32 %v2891_v61, %v2883_v15  ;;  %3940 = vmatpush.bf16.msra.mxu0 %v9782_v24  ;;  %v11703_v48 = vpop.f32.mrf.mxu0 }
 0x54f   :  { %v2888_v10 = vld [vmem:[#allocation5 + $0x88] sm:$0x3]  ;;  %v2839_v36 = vadd.f32 %v2831_v35, %v2823_v7  ;;  %v2637_v41 = vld [vmem:[#allocation5 + $0x30] sm:$0x3]  ;;  %v2855_v19 = vld [vmem:[#allocation4 + $0x98] sm:$0x3]  ;;  %3959 = vmatpush.bf16.msrb.mxu1 %v9790_v17 }
 0x550   :  { %v2889_v40 = vld [vmem:[#allocation5 + $0x48] sm:$0x3]  ;;  %v2828_v5 = vld [vmem:[#allocation5 + $0xd8] sm:$0xc0]  ;;  %v2645_v18 = vadd.f32 %v2637_v41, %v2629_v54  ;;  %2906 = vst [vmem:[#allocation6 + $0x50] sm:$0x3] %v2898_v33  ;;  %v2896_v51 = vadd.f32 %v2888_v10, %v2880_v58  ;;  %v2886_v20 = vmul.f32 %v2870_v60, %v2854_v31  ;;  %v11727_v31 = vpop.f32.mrf.mxu2  ;;  %v11735_v41 = vpop.f32.mrf.mxu3 }
 0x551   :  { %v2661_v62 = vld [vmem:[#allocation4 + $0x90] sm:$0xc]  ;;  %2847 = vst [vmem:[#allocation6 + $0x70] sm:$0xc0] %v2839_v36  ;;  %v2871_v30 = vrot.slane %v2839_v36, 6  ;;  %v2836_v8 = vadd.f32 %v2828_v5, %v2820_v38  ;;  %v9767_v43 = vld [vmem:[%s12921_s24 + $0x120] sm:$0xff]  ;;  %v2897_v50 = vadd.f32 %v2889_v40, %v2881_v23  ;;  %v11719_v60 = vpop.f32.mrf.mxu1 }
 0x552   :  { %v9775_v12 = vld [vmem:[%s12921_s24 + $0x160] sm:$0xff]  ;;  %2653 = vst [vmem:[#allocation6 + $0x20] sm:$0x3] %v2645_v18  ;;  %v2677_v37 = vrot.slane %v2645_v18, 6  ;;  %v9789_v3 = vld [vmem:[%s12921_s24 + $0x1d0] sm:$0xff]  ;;  %v3242_v57 = vld [vmem:[#allocation6 + $0xf8] sm:$0xff]  ;;  %3901 = vmatpush.bf16.msrb.mxu2 %v9767_v43  ;;  %3941 = vmatpush.bf16.msra.mxu0 %v9781_v9 }
 0x553   :  { %v2852_v46 = vld [vmem:[#allocation4 + $0xa0] sm:$0x3]  ;;  %2844 = vst [vmem:[#allocation6 + $0x90] sm:$0xc0] %v2836_v8  ;;  %v2868_v39 = vrot.slane %v2836_v8, 6  ;;  %v2887_v27 = vmul.f32 %v2871_v30, %v2855_v19  ;;  %3920 = vmatpush.bf16.msra.mxu3 %v9775_v12  ;;  %v9766_v2 = vld [vmem:[%s12921_s24 + $0x118] sm:$0xff]  ;;  %3960 = vmatpush.bf16.msrb.mxu1 %v9789_v3  ;;  %v3274_v7 = vmul.f32 %v3242_v57, %v11617_v29 }
 0x554   :  { %v2894_v52 = vld [vmem:[#allocation5 + $0x28] sm:$0x3]  ;;  %v2693_v53 = vmul.f32 %v2677_v37, %v2661_v62  ;;  %v2701_v34 = vld [vmem:[#allocation5 + $0x30] sm:$0xc]  ;;  %v2895_v25 = vld [vmem:[#allocation5 + $0x98] sm:$0x3] }
 0x555   :  { %2907 = vst [vmem:[#allocation6 + $0x88] sm:$0x3] %v2899_v0  ;;  %v2902_v56 = vadd.f32 %v2894_v52, %v2886_v20  ;;  %v9774_v16 = vld [vmem:[%s12921_s24 + $0x158] sm:$0xff]  ;;  %v2903_v26 = vadd.f32 %v2895_v25, %v2887_v27  ;;  %v9780_v45 = vld [vmem:[%s12921_s24 + $0x188] sm:$0xff]  ;;  %v2884_v14 = vmul.f32 %v2868_v39, %v2852_v46  ;;  %v2725_v15 = vld [vmem:[#allocation4 + $0x90] sm:$0x30] }
 0x556   :  { %2904 = vst [vmem:[#allocation6 + $0xa8] sm:$0x3] %v2896_v51  ;;  %v2709_v49 = vadd.f32 %v2701_v34, %v2693_v53  ;;  %v9788_v47 = vld [vmem:[%s12921_s24 + $0x1c8] sm:$0xff]  ;;  %v2892_v35 = vld [vmem:[#allocation5 + $0xb8] sm:$0x3]  ;;  %v3240_v42 = vld [vmem:[#allocation6 + $0xa0] sm:$0xff]  ;;  %3902 = vmatpush.bf16.msrb.mxu2 %v9766_v2  ;;  %3942 = vmatpush.bf16.msra.mxu0 %v9780_v45  ;;  %v3197_v12 = vpop.f32.mrf.mxu0 }
 0x557   :  { %2905 = vst [vmem:[#allocation6 + $0xf0] sm:$0x3] %v2897_v50  ;;  %v3250_v33 = vld [vmem:[#allocation6 + $0x50] sm:$0x3]  ;;  %v3243_v28 = vld [vmem:[#allocation6 + $0xe8] sm:$0xff]  ;;  %v2900_v11 = vadd.f32 %v2892_v35, %v2884_v14  ;;  %3921 = vmatpush.bf16.msra.mxu3 %v9774_v16  ;;  %v3241_v29 = vld [vmem:[#allocation6 + $0x18] sm:$0xff]  ;;  %3961 = vmatpush.bf16.msrb.mxu1 %v9788_v47  ;;  %v3272_v0 = vmul.f32 %v3240_v42, %v11635_v32 }
 0x558   :  { %2910 = vst [vmem:[#allocation6 + $0x60] sm:$0x3] %v2902_v56  ;;  %v2741_v61 = vrot.slane %v2709_v49, 6  ;;  %v3282_v58 = vmul.f32 %v3250_v33, %v11665_v13  ;;  %v9765_v54 = vld [vmem:[%s12921_s24 + $0x110] sm:$0xff]  ;;  %v9779_v13 = vld [vmem:[%s12921_s24 + $0x180] sm:$0xff]  ;;  %v3275_v40 = vmul.f32 %v3243_v28, %v11630_v21  ;;  %v3273_v62 = vmul.f32 %v3241_v29, %v11637_v55  ;;  %v9772_v51 = vld [vmem:[%s12921_s24 + $0x148] sm:$0xff]  ;;  %v3159_v52 = vpop.f32.mrf.mxu2  ;;  %v3178_v34 = vpop.f32.mrf.mxu3 }
 0x559   :  { %2717 = vst [vmem:[#allocation6 + $0x20] sm:$0xc] %v2709_v49  ;;  %v9773_v23 = vld [vmem:[%s12921_s24 + $0x150] sm:$0xff]  ;;  %v9787_v10 = vld [vmem:[%s12921_s24 + $0x1c0] sm:$0xff]  ;;  %v9764_v32 = vld [vmem:[%s12921_s24 + $0x108] sm:$0xff]  ;;  %v3216_v46 = vpop.f32.mrf.mxu1 }
 0x55a   :  { %2911 = vst [vmem:[#allocation6 + $0x8] sm:$0x3] %v2903_v26  ;;  %v2757_v24 = vmul.f32 %v2741_v61, %v2725_v15  ;;  %v3298_v17 = vpack.c.bf16 %v3282_v58, %v3274_v7  ;;  %v2765_v36 = vld [vmem:[#allocation5 + $0x30] sm:$0x30]  ;;  %3903 = vmatpush.bf16.msrb.mxu2 %v9765_v54  ;;  %3943 = vmatpush.bf16.msra.mxu0 %v9779_v13  ;;  %v2789_v55 = vld [vmem:[#allocation4 + $0x90] sm:$0xc0] }
 0x55b   :  { %2908 = vst [vmem:[#allocation6 + $0xc8] sm:$0x3] %v2900_v11  ;;  %3922 = vmatpush.bf16.msra.mxu3 %v9773_v23  ;;  %3962 = vmatpush.bf16.msrb.mxu1 %v9787_v10  ;;  %v2829_v9 = vld [vmem:[#allocation5 + $0x30] sm:$0xc0]  ;;  %v9771_v3 = vld [vmem:[%s12921_s24 + $0x140] sm:$0xff]  ;;  %v3236_v35 = vld [vmem:[#allocation6 + $0x78] sm:$0xff] }
 0x55c   :  { %v3251_v38 = vld [vmem:[#allocation6 + $0x88] sm:$0x3]  ;;  %v2773_v19 = vadd.f32 %v2765_v36, %v2757_v24  ;;  %3873 = vmatmul.bf16.gmra.mxu0 %v3298_v17  ;;  %v9763_v20 = vld [vmem:[%s12921_s24 + $0x100] sm:$0xff]  ;;  %v2853_v27 = vld [vmem:[#allocation4 + $0xf8] sm:$0x3]  ;;  %v3268_v15 = vmul.f32 %v3236_v35, %v3159_v52 }
 0x55d   :  { %v3283_v5 = vmul.f32 %v3251_v38, %v11685_v63  ;;  %v3248_v18 = vld [vmem:[#allocation6 + $0xa8] sm:$0x3]  ;;  %v3238_v53 = vld [vmem:[#allocation6 + $0xe0] sm:$0xff]  ;;  %v3230_v2 = vld [vmem:[#allocation6 + $0xd0] sm:$0xff] }
 0x55e   :  { %v3280_v30 = vmul.f32 %v3248_v18, %v11687_v22  ;;  %v3249_v8 = vld [vmem:[#allocation6 + $0xf0] sm:$0x3]  ;;  %2781 = vst [vmem:[#allocation6 + $0x20] sm:$0x30] %v2773_v19  ;;  %v2805_v43 = vrot.slane %v2773_v19, 6  ;;  %3904 = vmatpush.bf16.msrb.mxu2 %v9764_v32  ;;  %v3270_v25 = vmul.f32 %v3238_v53, %v3197_v12  ;;  %v3262_v16 = vmul.f32 %v3230_v2, %v11703_v48  ;;  %v3239_v49 = vld [vmem:[#allocation6 + $0x80] sm:$0xff]  ;;  %v3200_v45 = vpop.f32.mrf.mxu0 }
 0x55f   :  { %v3299_v21 = vpack.c.bf16 %v3283_v5, %v3275_v40  ;;  %v3281_v63 = vmul.f32 %v3249_v8, %v11689_v44  ;;  %3923 = vmatpush.bf16.msra.mxu3 %v9772_v51  ;;  %v2893_v57 = vld [vmem:[#allocation5] sm:$0x3]  ;;  %v3271_v14 = vmul.f32 %v3239_v49, %v3216_v46  ;;  %v3231_v33 = vld [vmem:[#allocation6 + $0x68] sm:$0xff]  ;;  %v3237_v61 = vld [vmem:[#allocation6 + $0xd8] sm:$0xff] }
 0x560   :  { %v3296_v22 = vpack.c.bf16 %v3280_v30, %v3272_v0  ;;  %v2821_v37 = vmul.f32 %v2805_v43, %v2789_v55  ;;  %v3294_v47 = vpack.c.bf16 %v3270_v25, %v3262_v16  ;;  %v3263_v7 = vmul.f32 %v3231_v33, %v11719_v60  ;;  %v3228_v28 = vld [vmem:[#allocation6 + $0x28] sm:$0xff]  ;;  %v3229_v42 = vld [vmem:[#allocation6 + $0x30] sm:$0xff]  ;;  %v3162_v24 = vpop.f32.mrf.mxu2  ;;  %v3181_v17 = vpop.f32.mrf.mxu3  ;;  %v3254_v10 = vld [vmem:[#allocation6 + $0x60] sm:$0x3] }
 0x561   :  { %v3297_v50 = vpack.c.bf16 %v3281_v63, %v3273_v62  ;;  %3892 = vmatmul.bf16.gmra.mxu1 %v3299_v21  ;;  %v3269_v58 = vmul.f32 %v3237_v61, %v3178_v34  ;;  %v3260_v11 = vmul.f32 %v3228_v28, %v11727_v31  ;;  %v3219_v54 = vpop.f32.mrf.mxu1  ;;  %v3261_v48 = vmul.f32 %v3229_v42, %v11735_v41  ;;  %v3246_v36 = vld [vmem:[#allocation6 + $0x38] sm:$0xff]  ;;  %v3255_v19 = vld [vmem:[#allocation6 + $0x8] sm:$0x3]  ;;  %v3247_v31 = vld [vmem:[#allocation6 + $0x70] sm:$0xff] }
 0x562   :  { %3835 = vmatmul.bf16.gmra.mxu2 %v3296_v22  ;;  %v2837_v44 = vadd.f32 %v2829_v9, %v2821_v37  ;;  %v3295_v23 = vpack.c.bf16 %v3271_v14, %v3263_v7  ;;  %v3278_v40 = vmul.f32 %v3246_v36, %v3200_v45  ;;  %v3252_v5 = vld [vmem:[#allocation6 + $0xc8] sm:$0x3]  ;;  %v3244_v62 = vld [vmem:[#allocation6 + $0x90] sm:$0xff]  ;;  %v3279_v63 = vmul.f32 %v3247_v31, %v3219_v54  ;;  %v4025_v46 = vld [vmem:[%s12922_s11 + $0x38] sm:$0xff] }
 0x563   :  { %3854 = vmatmul.bf16.gmra.mxu3 %v3297_v50  ;;  %3905 = vmatpush.bf16.msrb.mxu2 %v9763_v20  ;;  %v3292_v29 = vpack.c.bf16 %v3268_v15, %v3260_v11  ;;  %v3293_v13 = vpack.c.bf16 %v3269_v58, %v3261_v48  ;;  %v3276_v55 = vmul.f32 %v3244_v62, %v3162_v24  ;;  %v4023_v25 = vld [vmem:[%s12922_s11 + $0x28] sm:$0xff]  ;;  %v4021_v2 = vld [vmem:[%s12922_s11 + $0x18] sm:$0xff]  ;;  %v4020_v49 = vld [vmem:[%s12922_s11 + $0x10] sm:$0xff] }
 0x564   :  { %2845 = vst [vmem:[#allocation6 + $0x20] sm:$0xc0] %v2837_v44  ;;  %v2869_v39 = vrot.slane %v2837_v44, 6  ;;  %3924 = vmatpush.bf16.msra.mxu3 %v9771_v3  ;;  %v4019_v45 = vld [vmem:[%s12922_s11 + $0x8] sm:$0xff]  ;;  %v4018_v33 = vld [vmem:[%s12922_s11] sm:$0xff] }
 0x566   :  { %v2885_v56 = vmul.f32 %v2869_v39, %v2853_v27  ;;  %v3202_v60 = vpop.f32.mrf.mxu0  ;;  %v4024_v39 = vld [vmem:[%s12922_s11 + $0x30] sm:$0xff] }
 0x567   :  { %v3286_v38 = vmul.f32 %v3254_v10, %v3202_v60  ;;  %4046 = vmatpush.msra.mxu2 %v4025_v46 }
 0x568   :  { %v2901_v26 = vadd.f32 %v2893_v57, %v2885_v56  ;;  %v3164_v8 = vpop.f32.mrf.mxu2  ;;  %v3183_v21 = vpop.f32.mrf.mxu3  ;;  %v4022_v56 = vld [vmem:[%s12922_s11 + $0x20] sm:$0xff] }
 0x569   :  { %v3221_v18 = vpop.f32.mrf.mxu1  ;;  %v3302_v41 = vpack.c.bf16 %v3286_v38, %v3278_v40  ;;  %v3284_v43 = vmul.f32 %v3252_v5, %v3164_v8  ;;  %4047 = vmatpush.msra.mxu2 %v4024_v39  ;;  %v4170_v40 = vld [vmem:[#allocation10 + $0x38] sm:$0xff]  ;;  %v4169_v5 = vld [vmem:[#allocation10 + $0x30] sm:$0xff] }
 0x56a   :  { %2909 = vst [vmem:[#allocation6 + $0x98] sm:$0x3] %v2901_v26  ;;  %v3287_v30 = vmul.f32 %v3255_v19, %v3221_v18  ;;  %v10018_v26 = vld [vmem:[%s12894_s14 + $0x6] ss:$0 sm:$0xff]  ;;  %4195 = vmatpush.msrb.mxu3 %v4170_v40  ;;  %v4003_v18 = vpop.permute.xlu0 %4002 }
 0x56b   :  { %v3245_v51 = vld [vmem:[#allocation6 + $0x20] sm:$0xff]  ;;  %v3300_v37 = vpack.c.bf16 %v3284_v43, %v3276_v55  ;;  %4048 = vmatpush.msra.mxu2 %v4023_v25  ;;  %v3434_v14 = vmul.f32 %v10018_v26, %v10983_v59  ;;  %v3435_v11 = vmul.f32 %v10018_v26, %v10987_v1  ;;  %v4168_v1 = vld [vmem:[#allocation10 + $0x28] sm:$0xff] }
 0x56c   :  { %3944 = vmatmul.bf16.vlgmr.msra.gmra.mxu0 %v3294_v47  ;;  %v3277_v22 = vmul.f32 %v3245_v51, %v3181_v17  ;;  %v3303_v12 = vpack.c.bf16 %v3287_v30, %v3279_v63  ;;  %4196 = vmatpush.msrb.mxu3 %v4169_v5 }
 0x56d   :  { %4049 = vmatpush.msra.mxu2 %v4022_v56 }
 0x56e   :  { %4197 = vmatpush.msrb.mxu3 %v4168_v1 }
 0x56f   :  { %4050 = vmatpush.msra.mxu2 %v4021_v2 }
 0x571   :  { %3963 = vmatmul.bf16.vlgmr.msrb.gmra.mxu1 %v3295_v23  ;;  %v3253_v0 = vld [vmem:[#allocation6 + $0x98] sm:$0x3]  ;;  %4051 = vmatpush.msra.mxu2 %v4020_v49 }
 0x572   :  { %3906 = vmatmul.bf16.vlgmr.msrb.gmra.mxu2 %v3292_v29  ;;  %v3285_v32 = vmul.f32 %v3253_v0, %v3183_v21 }
 0x573   :  { %3925 = vmatmul.bf16.vlgmr.msra.gmra.mxu3 %v3293_v13  ;;  %4052 = vmatpush.msra.mxu2 %v4019_v45  ;;  %v3436_v13 = vmul.f32 %v10018_v26, %v10991_v4  ;;  %v3437_v4 = vmul.f32 %v10018_v26, %v10995_v6 }
 0x574   :  { %v3301_v50 = vpack.c.bf16 %v3285_v32, %v3277_v22 }
 0x575   :  { %4053 = vmatpush.msra.mxu2 %v4018_v33 }
 0x57c   :  { %3949 = vmatmul.bf16.gmra.mxu0 %v3302_v41 }
 0x581   :  { %3968 = vmatmul.bf16.gmra.mxu1 %v3303_v12 }
 0x582   :  { %3911 = vmatmul.bf16.gmra.mxu2 %v3300_v37 }
 0x583   :  { %3930 = vmatmul.bf16.gmra.mxu3 %v3301_v50 }
 0x5b3   :  { %v3869_v9 = vpop.f32.mrf.mxu0 }
 0x5b4   :  { %v3888_v3 = vpop.f32.mrf.mxu1 }
 0x5bb   :  { %v3871_v52 = vpop.f32.mrf.mxu0 }
 0x5bc   :  { %v3890_v27 = vpop.f32.mrf.mxu1 }
 0x5c0   :  { %v3850_v20 = vpop.f32.mrf.mxu3 }
 0x5c1   :  { %v3831_v44 = vpop.f32.mrf.mxu2 }
 0x5c2   :  { %v3832_v15 = vadd.f32 %v3831_v44, %v3434_v14 }
 0x5c4   :  { %v3851_v28 = vadd.f32 %v3850_v20, %v3832_v15  ;;  %v4009_v15 = vpop.permute.xlu0 %4008 }
 0x5c6   :  { %v3870_v54 = vadd.f32 %v3869_v9, %v3851_v28  ;;  %v4167_v28 = vld [vmem:[#allocation10 + $0x20] sm:$0xff] }
 0x5c7   :  { %4198 = vmatpush.msrb.mxu3 %v4167_v28 }
 0x5c8   :  { %v3852_v34 = vpop.f32.mrf.mxu3  ;;  %v3889_v59 = vadd.f32 %v3888_v3, %v3870_v54  ;;  %v4005_v3 = vpop.permute.xlu1 %4004 }
 0x5c9   :  { %v3833_v53 = vpop.f32.mrf.mxu2 }
 0x5ca   :  { %v3834_v48 = vadd.f32 %v3833_v53, %v3435_v11 }
 0x5cc   :  { %v3853_v24 = vadd.f32 %v3852_v34, %v3834_v48 }
 0x5ce   :  { %v3872_v60 = vadd.f32 %v3871_v52, %v3853_v24 }
 0x5d0   :  { %v3891_v41 = vadd.f32 %v3890_v27, %v3872_v60 }
 0x5d9   :  { %v3874_v57 = vpop.f32.mrf.mxu0 }
 0x5de   :  { %v3893_v16 = vpop.f32.mrf.mxu1 }
 0x5e1   :  { %v3876_v61 = vpop.f32.mrf.mxu0 }
 0x5e5   :  { %v3836_v47 = vpop.f32.mrf.mxu2 }
 0x5e6   :  { %v3855_v35 = vpop.f32.mrf.mxu3  ;;  %v3895_v7 = vpop.f32.mrf.mxu1  ;;  %v3837_v38 = vadd.f32 %v3836_v47, %v3436_v13 }
 0x5e8   :  { %v3856_v0 = vadd.f32 %v3855_v35, %v3837_v38 }
 0x5e9   :  { %v3945_v23 = vpop.f32.mrf.mxu0 }
 0x5ea   :  { %v3875_v32 = vadd.f32 %v3874_v57, %v3856_v0  ;;  %v4007_v57 = vpop.permute.xlu2 %4006 }
 0x5ec   :  { %v3894_v9 = vadd.f32 %v3893_v16, %v3875_v32 }
 0x5ed   :  { %v3838_v58 = vpop.f32.mrf.mxu2 }
 0x5ee   :  { %v3857_v42 = vpop.f32.mrf.mxu3  ;;  %v3964_v29 = vpop.f32.mrf.mxu1  ;;  %v3839_v55 = vadd.f32 %v3838_v58, %v3437_v4  ;;  %v4227_v4 = vld [vmem:[%s12887_s7 + $0x18] sm:$0x3] }
 0x5f0   :  { %v3858_v37 = vadd.f32 %v3857_v42, %v3839_v55  ;;  %v4225_v55 = vld [vmem:[%s12887_s7 + $0x8] sm:$0xff] }
 0x5f1   :  { %v3947_v30 = vpop.f32.mrf.mxu0 }
 0x5f2   :  { %v3877_v6 = vadd.f32 %v3876_v61, %v3858_v37 }
 0x5f4   :  { %v3896_v56 = vadd.f32 %v3895_v7, %v3877_v6  ;;  %v10019_v6 = vld [vmem:[%s12894_s14 + $0xa] ss:$0 sm:$0xff] }
 0x5f5   :  { %v3907_v17 = vpop.f32.mrf.mxu2 }
 0x5f6   :  { %v3908_v10 = vadd.f32 %v3907_v17, %v3889_v59  ;;  %v3926_v36 = vpop.f32.mrf.mxu3  ;;  %v3966_v63 = vpop.f32.mrf.mxu1 }
 0x5f8   :  { %v3927_v19 = vadd.f32 %v3926_v36, %v3908_v10 }
 0x5f9   :  { %v3950_v52 = vpop.f32.mrf.mxu0 }
 0x5fa   :  { %v3946_v31 = vadd.f32 %v3945_v23, %v3927_v19 }
 0x5fc   :  { %v3965_v62 = vadd.f32 %v3964_v29, %v3946_v31 }
 0x5fd   :  { %v3909_v8 = vpop.f32.mrf.mxu2 }
 0x5fe   :  { %v4014_v51 = vmul.f32 %v4003_v18, %v3965_v62  ;;  %v3910_v43 = vadd.f32 %v3909_v8, %v3891_v41  ;;  %v3928_v21 = vpop.f32.mrf.mxu3  ;;  %v3969_v53 = vpop.f32.mrf.mxu1  ;;  %v4224_v8 = vld [vmem:[%s12887_s7] sm:$0xff] }
 0x600   :  { %v3929_v22 = vadd.f32 %v3928_v21, %v3910_v43  ;;  %8724 = vmatmul.msk.f32.vlgmr.msra.gmra.mxu2 %vm870_vm5, %v4014_v51  ;;  %v8737_v51 = vld [vmem:[%s12887_s7 + $0x20] sm:$0xff] }
 0x601   :  { %v3952_v47 = vpop.f32.mrf.mxu0 }
 0x602   :  { %v3948_v12 = vadd.f32 %v3947_v30, %v3929_v22  ;;  %v8746_v22 = vld [vmem:[%s12887_s7 + $0x40] sm:$0xff] }
 0x604   :  { %v3967_v50 = vadd.f32 %v3966_v63, %v3948_v12  ;;  %v8738_v12 = vld [vmem:[%s12887_s7 + $0x28] sm:$0xff] }
 0x605   :  { %v3912_v44 = vpop.f32.mrf.mxu2 }
 0x606   :  { %v3913_v20 = vadd.f32 %v3912_v44, %v3894_v9  ;;  %v3931_v46 = vpop.f32.mrf.mxu3  ;;  %v4015_v39 = vmul.f32 %v4005_v3, %v3967_v50  ;;  %v3971_v35 = vpop.f32.mrf.mxu1  ;;  %v4226_v9 = vld [vmem:[%s12887_s7 + $0x10] sm:$0xff]  ;;  %v8747_v3 = vld [vmem:[%s12887_s7 + $0x48] sm:$0xff] }
 0x607   :  { %v8739_v44 = vld [vmem:[%s12887_s7 + $0x30] sm:$0xff] }
 0x608   :  { %v3932_v27 = vadd.f32 %v3931_v46, %v3913_v20  ;;  %8725 = vmatmul.msk.f32.gmra.mxu2 %vm870_vm5, %v4015_v39  ;;  %v8748_v20 = vld [vmem:[%s12887_s7 + $0x50] sm:$0xff]  ;;  %v8740_v46 = vld [vmem:[%s12887_s7 + $0x38] sm:$0x3] }
 0x609   :  { %v8749_v39 = vld [vmem:[%s12887_s7 + $0x58] sm:$0x3] }
 0x60a   :  { %v3951_v34 = vadd.f32 %v3950_v52, %v3932_v27 }
 0x60c   :  { %v3970_v25 = vadd.f32 %v3969_v53, %v3951_v34  ;;  %v10021_v53 = vld [vmem:[%s12894_s14 + $0x9] ss:$0 sm:$0xff] }
 0x60d   :  { %v3914_v2 = vpop.f32.mrf.mxu2 }
 0x60e   :  { %v4016_v26 = vmul.f32 %v4007_v57, %v3970_v25  ;;  %v3915_v49 = vadd.f32 %v3914_v2, %v3896_v56  ;;  %v3933_v45 = vpop.f32.mrf.mxu3  ;;  %v10020_v25 = vld [vmem:[%s12894_s14 + $0xb] ss:$0 sm:$0xff]  ;;  %v10022_v2 = vld [vmem:[%s12894_s14 + $0x8] ss:$0 sm:$0xff] }
 0x610   :  { %v3934_v16 = vadd.f32 %v3933_v45, %v3915_v49  ;;  %8726 = vmatmul.msk.f32.gmra.mxu2 %vm870_vm5, %v4016_v26 }
 0x612   :  { %v3953_v14 = vadd.f32 %v3952_v47, %v3934_v16  ;;  %v11902_v47 = vld [vmem:[%s12894_s14 + $0x7] ss:$0 sm:$0xff] }
 0x614   :  { %v3972_v33 = vadd.f32 %v3971_v35, %v3953_v14  ;;  %v4424_v35 = vld [vmem:[#allocation11 + $0x78] sm:$0xff] }
 0x615   :  { %4447 = vmatpush.msra.mxu3 %v4424_v35 }
 0x616   :  { %v4017_v61 = vmul.f32 %v4009_v15, %v3972_v33 }
 0x618   :  { %8727 = vmatmul.msk.f32.gmra.mxu2 %vm870_vm5, %v4017_v61  ;;  %v4423_v61 = vld [vmem:[#allocation11 + $0x70] sm:$0xff] }
 0x619   :  { %4448 = vmatpush.msra.mxu3 %v4423_v61 }
 0x683   :  { %v4055_v58 = vpop.f32.mrf.mxu2 }
 0x684   :  { %8728 = vmatmul.msk.f32.vlgmr.msrb.gmra.mxu3 %vm610_vm2, %v4055_v58 }
 0x68b   :  { %v4058_v7 = vpop.f32.mrf.mxu2 }
 0x68c   :  { %8729 = vmatmul.msk.f32.gmra.mxu3 %vm610_vm2, %v4058_v7 }
 0x693   :  { %v4061_v11 = vpop.f32.mrf.mxu2 }
 0x694   :  { %8730 = vmatmul.msk.f32.gmra.mxu3 %vm610_vm2, %v4061_v11  ;;  %v4422_v11 = vld [vmem:[#allocation11 + $0x68] sm:$0xff] }
 0x695   :  { %4449 = vmatpush.msra.mxu3 %v4422_v11 }
 0x69b   :  { %v4064_v42 = vpop.f32.mrf.mxu2 }
 0x69c   :  { %8731 = vmatmul.msk.f32.gmra.mxu3 %vm610_vm2, %v4064_v42 }
 0x707   :  { %v11798_v54 = vpop.f32.mrf.mxu3 }
 0x708   :  { %v7530_v48 = vsub.f32 0.0, %v11798_v54  ;;  %v4214_v34 = vmul.f32 %v10019_v6, %v11798_v54 }
 0x70a   :  { %v7534_v23 = vmul.f32 1.442695, %v7530_v48  ;;  %v4220_v26 = vadd.f32 %v10020_v25, %v4214_v34  ;;  %v4421_v48 = vld [vmem:[#allocation11 + $0x60] sm:$0xff] }
 0x70b   :  { %4450 = vmatpush.msra.mxu3 %v4421_v48  ;;  %v9823_v48 = vld [vmem:[#allocation13 + $0x3dc] sm:$0xf0] }
 0x70c   :  { %10140 = vpow2.f32 %v7534_v23 }
 0x70f   :  { %v11801_v24 = vpop.f32.mrf.mxu3 }
 0x710   :  { %v7531_v59 = vsub.f32 0.0, %v11801_v24  ;;  %v4215_v33 = vmul.f32 %v10019_v6, %v11801_v24 }
 0x712   :  { %v10141_v29 = vpop.eup %10140  ;;  %v7536_v17 = vmul.f32 1.442695, %v7531_v59  ;;  %v4221_v42 = vadd.f32 %v10020_v25, %v4215_v33 }
 0x713   :  { %v7542_v13 = vadd.f32 1.0, %v10141_v29 }
 0x714   :  { %10142 = vpow2.f32 %v7536_v17 }
 0x715   :  { %10144 = vrcp.f32 %v7542_v13  ;;  %v4420_v13 = vld [vmem:[#allocation11 + $0x58] sm:$0xff] }
 0x716   :  { %4451 = vmatpush.msra.mxu3 %v4420_v13  ;;  %v8865_v13 = vld [vmem:[#allocation13 + $0x3c8] sm:$0xf] }
 0x717   :  { %v11804_v10 = vpop.f32.mrf.mxu3 }
 0x718   :  { %v7532_v36 = vsub.f32 0.0, %v11804_v10 }
 0x71a   :  { %v10143_v60 = vpop.eup %10142  ;;  %v7538_v38 = vmul.f32 1.442695, %v7532_v36  ;;  %v4216_v36 = vmul.f32 %v10019_v6, %v11804_v10 }
 0x71b   :  { %v10145_v19 = vpop.eup %10144  ;;  %v7543_v40 = vadd.f32 1.0, %v10143_v60 }
 0x71c   :  { %v7550_v5 = vmul.f32 %v10145_v19, %v11798_v54  ;;  %10146 = vpow2.f32 %v7538_v38  ;;  %v4419_v19 = vld [vmem:[#allocation11 + $0x50] sm:$0xff] }
 0x71d   :  { %10148 = vrcp.f32 %v7543_v40  ;;  %4452 = vmatpush.msra.mxu3 %v4419_v19  ;;  %v8867_v19 = vld [vmem:[#allocation13 + $0x3e8] sm:$0xf0] }
 0x71e   :  { %7558 = vrot.lane.b32.xlu1 %v7550_v5, %s12920_s23 }
 0x71f   :  { %v11809_v31 = vpop.f32.mrf.mxu3 }
 0x720   :  { %8732 = vmatpush.msk.msrb.mxu0 %vm681_vm3, %v11809_v31  ;;  %9995 = vmatpush.msk.msrb.mxu2 %vm681_vm3, %v11809_v31  ;;  %v7533_v1 = vsub.f32 0.0, %v11809_v31 }
 0x721   :  { %8741 = vmatpush.msk.msra.mxu1 %vm681_vm3, %v11809_v31 }
 0x722   :  { %v10147_v18 = vpop.eup %10146  ;;  %4256 = vmatpush.msrb.mxu0 %v11804_v10  ;;  %9996 = vmatpush.msrb.mxu2 %v11804_v10  ;;  %v7540_v0 = vmul.f32 1.442695, %v7533_v1 }
 0x723   :  { %v10149_v62 = vpop.eup %10148  ;;  %4311 = vmatpush.msra.mxu1 %v11804_v10  ;;  %v7544_v41 = vadd.f32 1.0, %v10147_v18  ;;  %v4418_v18 = vld [vmem:[#allocation11 + $0x48] sm:$0xff] }
 0x724   :  { %4257 = vmatpush.msrb.mxu0 %v11801_v24  ;;  %9997 = vmatpush.msrb.mxu2 %v11801_v24  ;;  %v7551_v30 = vmul.f32 %v10149_v62, %v11801_v24  ;;  %10150 = vpow2.f32 %v7540_v0  ;;  %v4222_v0 = vadd.f32 %v10020_v25, %v4216_v36 }
 0x725   :  { %4312 = vmatpush.msra.mxu1 %v11801_v24  ;;  %10152 = vrcp.f32 %v7544_v41  ;;  %4453 = vmatpush.msra.mxu3 %v4418_v18  ;;  %v4417_v41 = vld [vmem:[#allocation11 + $0x40] sm:$0xff] }
 0x726   :  { %7560 = vrot.lane.b32.xlu2 %v7551_v30, %s12920_s23  ;;  %4258 = vmatpush.msrb.mxu0 %v11798_v54  ;;  %v9815_v18 = vld [vmem:[#allocation13 + $0x39c] sm:$0xf0] }
 0x727   :  { %9998 = vmatpush.msrb.mxu2 %v11798_v54  ;;  %4313 = vmatpush.msra.mxu1 %v11798_v54 }
 0x728   :  { %8733 = vmatmul.msk.f32.vlgmr.msrb.gmra.mxu0 %vm668_vm4, %v4224_v8  ;;  %8736 = vmatmul.msk.f32.vlgmr.msrb.gmra.mxu2 %vm668_vm4, %v4227_v4 }
 0x729   :  { %8742 = vmatmul.msk.f32.vlgmr.msra.gmra.mxu1 %vm668_vm4, %v8737_v51  ;;  %8750 = vmatpush.msk.msra.mxu2 %vm681_vm3, %v11809_v31 }
 0x72a   :  { %v10151_v43 = vpop.eup %10150  ;;  %4454 = vmatpush.msra.mxu3 %v4417_v41 }
 0x72b   :  { %v10153_v21 = vpop.eup %10152  ;;  %4366 = vmatpush.msra.mxu2 %v11804_v10  ;;  %v7545_v63 = vadd.f32 1.0, %v10151_v43 }
 0x72c   :  { %v7552_v32 = vmul.f32 %v10153_v21, %v11804_v10 }
 0x72d   :  { %4367 = vmatpush.msra.mxu2 %v11801_v24  ;;  %10154 = vrcp.f32 %v7545_v63  ;;  %v4217_v63 = vmul.f32 %v10019_v6, %v11809_v31 }
 0x72e   :  { %7562 = vrot.lane.b32.xlu0 %v7552_v32, %s12920_s23 }
 0x72f   :  { %4368 = vmatpush.msra.mxu2 %v11798_v54 }
 0x730   :  { %8734 = vmatmul.msk.f32.gmra.mxu0 %vm668_vm4, %v4225_v55  ;;  %8751 = vmatmul.msk.f32.vlgmr.msra.gmra.mxu2 %vm668_vm4, %v8746_v22 }
 0x731   :  { %8743 = vmatmul.msk.f32.gmra.mxu1 %vm668_vm4, %v8738_v12 }
 0x733   :  { %v10155_v37 = vpop.eup %10154 }
 0x734   :  { %v7553_v50 = vmul.f32 %v10155_v37, %v11809_v31 }
 0x736   :  { %7564 = vrot.lane.b32.xlu1 %v7553_v50, %s12920_s23  ;;  %v4223_v50 = vadd.f32 %v10020_v25, %v4217_v63 }
 0x738   :  { %8735 = vmatmul.msk.f32.gmra.mxu0 %vm668_vm4, %v4226_v9  ;;  %8752 = vmatmul.msk.f32.gmra.mxu2 %vm668_vm4, %v8747_v3 }
 0x739   :  { %8744 = vmatmul.msk.f32.gmra.mxu1 %vm668_vm4, %v8739_v44 }
 0x740   :  { %8753 = vmatmul.msk.f32.gmra.mxu2 %vm668_vm4, %v8748_v20 }
 0x741   :  { %8745 = vmatmul.msk.f32.gmra.mxu1 %vm668_vm4, %v8740_v46 }
 0x748   :  { %8754 = vmatmul.msk.f32.gmra.mxu2 %vm668_vm4, %v8749_v39 }
 0x7a5   :  { %v4260_v52 = vpop.f32.mrf.mxu0 }
 0x7a6   :  { %v4315_v27 = vpop.f32.mrf.mxu1  ;;  %v4274_v57 = vmul.f32 %v10021_v53, %v4260_v52 }
 0x7a7   :  { %v4329_v16 = vmul.f32 %v10022_v2, %v4315_v27 }
 0x7a8   :  { %v4278_v45 = vadd.f32 %v4274_v57, %v4220_v26 }
 0x7aa   :  { %v4333_v28 = vadd.f32 %v4329_v16, %v4278_v45 }
 0x7ab   :  { %v4269_v56 = vpop.f32.mrf.mxu2 }
 0x7ac   :  { %v4277_v12 = vmul.f32 %v10021_v53, %v4269_v56 }
 0x7ad   :  { %v4263_v49 = vpop.f32.mrf.mxu0 }
 0x7ae   :  { %v4318_v14 = vpop.f32.mrf.mxu1  ;;  %v4275_v58 = vmul.f32 %v10021_v53, %v4263_v49  ;;  %v4281_v20 = vadd.f32 %v4277_v12, %v4223_v50  ;;  %v9807_v50 = vld [vmem:[#allocation13 + $0x35c] sm:$0xf0] }
 0x7af   :  { %v4330_v59 = vmul.f32 %v10022_v2, %v4318_v14 }
 0x7b0   :  { %v4279_v23 = vadd.f32 %v4275_v58, %v4221_v42 }
 0x7b2   :  { %v4334_v40 = vadd.f32 %v4330_v59, %v4279_v23  ;;  %v9819_v23 = vld [vmem:[#allocation13 + $0x3c4] sm:$0xf] }
 0x7b3   :  { %v4370_v15 = vpop.f32.mrf.mxu2 }
 0x7b4   :  { %v4384_v7 = vmul.f32 %v11902_v47, %v4370_v15  ;;  %v11930_v15 = vld [vmem:[%s12894_s14 + $0xc] ss:$0 sm:$0xff] }
 0x7b5   :  { %v4266_v17 = vpop.f32.mrf.mxu0 }
 0x7b6   :  { %v4388_v54 = vadd.f32 %v4384_v7, %v4333_v28  ;;  %v4321_v60 = vpop.f32.mrf.mxu1  ;;  %v4276_v5 = vmul.f32 %v10021_v53, %v4266_v17  ;;  %v8859_v17 = vld [vmem:[#allocation13 + $0x3e0] sm:$0xf0] }
 0x7b7   :  { %v4331_v8 = vmul.f32 %v10022_v2, %v4321_v60  ;;  %v8862_v36 = vor.u32 %v9819_v23, %v8859_v17 }
 0x7b8   :  { %v4392_v29 = vsub.f32 0.0, %v4388_v54  ;;  %v4280_v30 = vadd.f32 %v4276_v5, %v4222_v0  ;;  %v9811_v0 = vld [vmem:[#allocation13 + $0x384] sm:$0xf] }
 0x7b9   :  { %4697 = vmatpush.bf16.msrb.mxu1 %v8862_v36 }
 0x7ba   :  { %v4396_v24 = vmul.f32 1.442695, %v4392_v29  ;;  %v4335_v32 = vadd.f32 %v4331_v8, %v4280_v30  ;;  %v8827_v30 = vld [vmem:[#allocation13 + $0x3a0] sm:$0xf0]  ;;  %v8833_v8 = vld [vmem:[#allocation13 + $0x388] sm:$0xf] }
 0x7bb   :  { %v4373_v38 = vpop.f32.mrf.mxu2 }
 0x7bc   :  { %10156 = vpow2.f32 %v4396_v24  ;;  %v4385_v1 = vmul.f32 %v11902_v47, %v4373_v38  ;;  %v9824_v24 = vld [vmem:[#allocation13 + $0x3e4] sm:$0xf0]  ;;  %v9820_v38 = vld [vmem:[#allocation13 + $0x3cc] sm:$0xf] }
 0x7bd   :  { %v8866_v60 = vor.u32 %v9824_v24, %v8865_v13  ;;  %v8870_v5 = vor.u32 %v9820_v38, %v8867_v19  ;;  %v8873_v13 = vld [vmem:[#allocation13 + $0x3d0] sm:$0xf]  ;;  %v9821_v38 = vld [vmem:[#allocation13 + $0x3d4] sm:$0xf] }
 0x7be   :  { %v4389_v62 = vadd.f32 %v4385_v1, %v4334_v40  ;;  %v4324_v22 = vpop.f32.mrf.mxu1  ;;  %v8825_v1 = vld [vmem:[#allocation13 + $0x380] sm:$0xf]  ;;  %v9825_v24 = vld [vmem:[#allocation13 + $0x3ec] sm:$0xf0]  ;;  %v8875_v19 = vld [vmem:[#allocation13 + $0x3f0] sm:$0xf0] }
 0x7bf   :  { %v4332_v9 = vmul.f32 %v10022_v2, %v4324_v22  ;;  %4716 = vmatpush.bf16.msrb.mxu2 %v8866_v60  ;;  %4735 = vmatpush.bf16.msrb.mxu3 %v8870_v5  ;;  %v8826_v41 = vor.u32 %v9815_v18, %v8825_v1  ;;  %v8874_v60 = vor.u32 %v9825_v24, %v8873_v13  ;;  %v8881_v5 = vld [vmem:[#allocation13 + $0x3d8] sm:$0xf]  ;;  %v9822_v18 = vld [vmem:[#allocation13 + $0x3dc] sm:$0xf] }
 0x7c0   :  { %v4393_v4 = vsub.f32 0.0, %v4389_v62  ;;  %v9826_v1 = vld [vmem:[#allocation13 + $0x3f4] sm:$0xf0]  ;;  %v8787_v13 = vld [vmem:[#allocation13 + $0x338] sm:$0xf0] }
 0x7c1   :  { %v4336_v31 = vadd.f32 %v4332_v9, %v4281_v20  ;;  %v8795_v20 = vld [vmem:[#allocation13 + $0x360] sm:$0xf0] }
 0x7c2   :  { %v10157_v10 = vpop.eup %10156  ;;  %v4398_v51 = vmul.f32 1.442695, %v4393_v4  ;;  %v8830_v4 = vor.u32 %v9811_v0, %v8827_v30  ;;  %v8883_v30 = vld [vmem:[#allocation13 + $0x3f8] sm:$0xf0] }
 0x7c3   :  { %v4404_v43 = vadd.f32 1.0, %v10157_v10  ;;  %v4376_v21 = vpop.f32.mrf.mxu2  ;;  %v9816_v10 = vld [vmem:[#allocation13 + $0x3a4] sm:$0xf0] }
 0x7c4   :  { %10158 = vpow2.f32 %v4398_v51  ;;  %v4386_v55 = vmul.f32 %v11902_v47, %v4376_v21  ;;  %v9812_v51 = vld [vmem:[#allocation13 + $0x38c] sm:$0xf]  ;;  %4698 = vmatpush.bf16.msrb.mxu1 %v8830_v4  ;;  %v9817_v4 = vld [vmem:[#allocation13 + $0x3ac] sm:$0xf0] }
 0x7c5   :  { %10160 = vrcp.f32 %v4404_v43  ;;  %v8835_v43 = vld [vmem:[#allocation13 + $0x3a8] sm:$0xf0] }
 0x7c6   :  { %v4390_v37 = vadd.f32 %v4386_v55, %v4335_v32  ;;  %v8834_v32 = vor.u32 %v9816_v10, %v8833_v8  ;;  %v8838_v55 = vor.u32 %v9812_v51, %v8835_v43  ;;  %v8886_v8 = vor.u32 %v9822_v18, %v8883_v30  ;;  %v9813_v10 = vld [vmem:[#allocation13 + $0x394] sm:$0xf] }
 0x7c8   :  { %v4394_v3 = vsub.f32 0.0, %v4390_v37  ;;  %4717 = vmatpush.bf16.msrb.mxu2 %v8834_v32  ;;  %4736 = vmatpush.bf16.msrb.mxu3 %v8838_v55  ;;  %v8849_v32 = vld [vmem:[#allocation13 + $0x398] sm:$0xf] }
 0x7ca   :  { %v10159_v44 = vpop.eup %10158  ;;  %v4400_v46 = vmul.f32 1.442695, %v4394_v3 }
 0x7cb   :  { %v10161_v39 = vpop.eup %10160  ;;  %v4405_v52 = vadd.f32 1.0, %v10159_v44  ;;  %v4379_v27 = vpop.f32.mrf.mxu2  ;;  %v9803_v44 = vld [vmem:[#allocation13 + $0x344] sm:$0xf] }
 0x7cc   :  { %v11910_v34 = vmul.f32 %v10161_v39, %v4388_v54  ;;  %10162 = vpow2.f32 %v4400_v46  ;;  %v4387_v6 = vmul.f32 %v11902_v47, %v4379_v27  ;;  %v8857_v54 = vld [vmem:[#allocation13 + $0x3c0] sm:$0xf]  ;;  %v8801_v46 = vld [vmem:[#allocation13 + $0x348] sm:$0xf]  ;;  %v8798_v39 = vor.u32 %v9803_v44, %v8795_v20  ;;  %v9804_v27 = vld [vmem:[#allocation13 + $0x34c] sm:$0xf] }
 0x7cd   :  { %10164 = vrcp.f32 %v4405_v52  ;;  %v8858_v29 = vor.u32 %v9823_v48, %v8857_v54  ;;  %v9808_v52 = vld [vmem:[#allocation13 + $0x364] sm:$0xf0] }
 0x7ce   :  { %v4391_v57 = vadd.f32 %v4387_v6, %v4336_v31  ;;  %8755 = vmatmul.msk.f32.vlgmr.msra.gmra.mxu3 %vm870_vm5, %v11910_v34  ;;  %v8803_v31 = vld [vmem:[#allocation13 + $0x368] sm:$0xf0]  ;;  %4699 = vmatpush.bf16.msrb.mxu1 %v8798_v39  ;;  %v9809_v39 = vld [vmem:[#allocation13 + $0x36c] sm:$0xf0] }
 0x7cf   :  { %4678 = vmatpush.bf16.msra.mxu0 %v8858_v29 }
 0x7d0   :  { %v4395_v53 = vsub.f32 0.0, %v4391_v57 }
 0x7d2   :  { %v10163_v25 = vpop.eup %10162  ;;  %v4402_v56 = vmul.f32 1.442695, %v4395_v53  ;;  %v8806_v53 = vor.u32 %v9804_v27, %v8803_v31 }
 0x7d3   :  { %v10165_v2 = vpop.eup %10164  ;;  %v4406_v26 = vadd.f32 1.0, %v10163_v25  ;;  %4679 = vmatpush.bf16.msra.mxu0 %v8826_v41  ;;  %v8761_v25 = vld [vmem:[#allocation13 + $0x300] sm:$0xf]  ;;  %v8882_v41 = vor.u32 %v9826_v1, %v8881_v5 }
 0x7d4   :  { %v11915_v49 = vmul.f32 %v10165_v2, %v4389_v62  ;;  %10166 = vpow2.f32 %v4402_v56  ;;  %v9799_v56 = vld [vmem:[#allocation13 + $0x31c] sm:$0xf0]  ;;  %v9795_v2 = vld [vmem:[#allocation13 + $0x304] sm:$0xf]  ;;  %4737 = vmatpush.bf16.msrb.mxu3 %v8806_v53 }
 0x7d5   :  { %10168 = vrcp.f32 %v4406_v26 }
 0x7d6   :  { %8756 = vmatmul.msk.f32.gmra.mxu3 %vm870_vm5, %v11915_v49 }
 0x7da   :  { %v10167_v45 = vpop.eup %10166 }
 0x7db   :  { %v10169_v16 = vpop.eup %10168  ;;  %v4407_v47 = vadd.f32 1.0, %v10167_v45  ;;  %v8762_v45 = vor.u32 %v9799_v56, %v8761_v25  ;;  %v8817_v56 = vld [vmem:[#allocation13 + $0x358] sm:$0xf] }
 0x7dc   :  { %v11919_v14 = vmul.f32 %v10169_v16, %v4390_v37  ;;  %v8793_v37 = vld [vmem:[#allocation13 + $0x340] sm:$0xf]  ;;  %v8763_v16 = vld [vmem:[#allocation13 + $0x320] sm:$0xf0] }
 0x7dd   :  { %10170 = vrcp.f32 %v4407_v47  ;;  %v8794_v3 = vor.u32 %v9807_v50, %v8793_v37  ;;  %v8769_v47 = vld [vmem:[#allocation13 + $0x308] sm:$0xf]  ;;  %v8851_v37 = vld [vmem:[#allocation13 + $0x3b8] sm:$0xf0] }
 0x7de   :  { %8757 = vmatmul.msk.f32.gmra.mxu3 %vm870_vm5, %v11919_v14 }
 0x7df   :  { %4680 = vmatpush.bf16.msra.mxu0 %v8794_v3 }
 0x7e3   :  { %v10171_v35 = vpop.eup %10170  ;;  %4681 = vmatpush.bf16.msra.mxu0 %v8762_v45  ;;  %v9806_v45 = vld [vmem:[#allocation13 + $0x35c] sm:$0xf] }
 0x7e4   :  { %v11923_v33 = vmul.f32 %v10171_v35, %v4391_v57  ;;  %v8802_v57 = vor.u32 %v9808_v52, %v8801_v46  ;;  %v8766_v35 = vor.u32 %v9795_v2, %v8763_v16  ;;  %v8809_v46 = vld [vmem:[#allocation13 + $0x350] sm:$0xf]  ;;  %v9810_v2 = vld [vmem:[#allocation13 + $0x374] sm:$0xf0]  ;;  %v8819_v16 = vld [vmem:[#allocation13 + $0x378] sm:$0xf0] }
 0x7e5   :  { %v8810_v31 = vor.u32 %v9809_v39, %v8809_v46  ;;  %v8977_v46 = vld [vmem:[%s12892_s12 + $0x88] sm:$0xf] }
 0x7e6   :  { %8758 = vmatmul.msk.f32.gmra.mxu3 %vm870_vm5, %v11923_v33  ;;  %4718 = vmatpush.bf16.msrb.mxu2 %v8802_v57  ;;  %v8811_v57 = vld [vmem:[#allocation13 + $0x370] sm:$0xf0]  ;;  %v9912_v39 = vld [vmem:[%s12892_s12 + $0xa4] sm:$0xf0] }
 0x7e7   :  { %4700 = vmatpush.bf16.msrb.mxu1 %v8766_v35  ;;  %4754 = vmatpush.bf16.msrb.mxu0 %v8874_v60 }
 0x851   :  { %v4456_v61 = vpop.f32.mrf.mxu3 }
 0x852   :  { %v11933_v28 = vadd.f32 %v11930_v15, %v4456_v61  ;;  %v9800_v61 = vld [vmem:[#allocation13 + $0x324] sm:$0xf0] }
 0x853   :  { %v8770_v54 = vor.u32 %v9800_v61, %v8769_v47  ;;  %v8777_v47 = vld [vmem:[#allocation13 + $0x310] sm:$0xf] }
 0x854   :  { %v4472_v58 = vand.u32 2147483647, %v11933_v28  ;;  %v4468_v51 = vmax.f32 %v11933_v28, 0.0 }
 0x855   :  { %4719 = vmatpush.bf16.msrb.mxu2 %v8770_v54  ;;  %v9802_v54 = vld [vmem:[#allocation13 + $0x334] sm:$0xf0] }
 0x856   :  { %v4476_v7 = vsub.f32 0.0, %v4472_v58  ;;  %v9796_v58 = vld [vmem:[#allocation13 + $0x30c] sm:$0xf] }
 0x858   :  { %v4480_v11 = vmul.f32 1.442695, %v4476_v7  ;;  %v8771_v7 = vld [vmem:[#allocation13 + $0x328] sm:$0xf0] }
 0x859   :  { %v4459_v42 = vpop.f32.mrf.mxu3  ;;  %v8774_v48 = vor.u32 %v9796_v58, %v8771_v7  ;;  %4792 = vmatpush.bf16.msra.mxu2 %v8882_v41  ;;  %v9801_v58 = vld [vmem:[#allocation13 + $0x32c] sm:$0xf0]  ;;  %v9797_v7 = vld [vmem:[#allocation13 + $0x314] sm:$0xf] }
 0x85a   :  { %10172 = vpow2.f32 %v4480_v11  ;;  %v11937_v59 = vadd.f32 %v11930_v15, %v4459_v42 }
 0x85b   :  { %4738 = vmatpush.bf16.msrb.mxu3 %v8774_v48  ;;  %v9798_v48 = vld [vmem:[#allocation13 + $0x31c] sm:$0xf] }
 0x85c   :  { %v4473_v40 = vand.u32 2147483647, %v11937_v59  ;;  %v4469_v28 = vmax.f32 %v11937_v59, 0.0  ;;  %v8822_v59 = vor.u32 %v9806_v45, %v8819_v16  ;;  %v8790_v60 = vor.u32 %v9798_v48, %v8787_v13  ;;  %v9900_v45 = vld [vmem:[%s12892_s12 + $0x4c] sm:$0xf] }
 0x85d   :  { %v8947_v16 = vld [vmem:[%s12892_s12 + $0x68] sm:$0xf0]  ;;  %v8913_v48 = vld [vmem:[%s12892_s12 + $0x8] sm:$0xf] }
 0x85e   :  { %v4477_v62 = vsub.f32 0.0, %v4473_v40  ;;  %v8878_v40 = vor.u32 %v9821_v38, %v8875_v19  ;;  %v8915_v13 = vld [vmem:[%s12892_s12 + $0x28] sm:$0xf0] }
 0x85f   :  { %4811 = vmatpush.bf16.msra.mxu3 %v8886_v8 }
 0x860   :  { %v10173_v21 = vpop.eup %10172  ;;  %v4482_v63 = vmul.f32 1.442695, %v4477_v62  ;;  %4773 = vmatpush.bf16.msra.mxu1 %v8878_v40 }
 0x861   :  { %v4488_v22 = vadd.f32 1.0, %v10173_v21  ;;  %v4462_v12 = vpop.f32.mrf.mxu3 }
 0x862   :  { %10174 = vpow2.f32 %v4482_v63  ;;  %v11941_v9 = vadd.f32 %v11930_v15, %v4462_v12  ;;  %v8843_v63 = vld [vmem:[#allocation13 + $0x3b0] sm:$0xf0]  ;;  %v9814_v12 = vld [vmem:[#allocation13 + $0x39c] sm:$0xf] }
 0x863   :  { %10176 = vlog2.f32 %v4488_v22  ;;  %v8846_v55 = vor.u32 %v9813_v10, %v8843_v63  ;;  %v9818_v22 = vld [vmem:[#allocation13 + $0x3b4] sm:$0xf0]  ;;  %v8854_v20 = vor.u32 %v9814_v12, %v8851_v37  ;;  %v9003_v10 = vld [vmem:[%s12892_s12 + $0xe0] sm:$0xf0]  ;;  %v9911_v37 = vld [vmem:[%s12892_s12 + $0x9c] sm:$0xf0] }
 0x864   :  { %v4474_v6 = vand.u32 2147483647, %v11941_v9  ;;  %v8850_v44 = vor.u32 %v9818_v22, %v8849_v32  ;;  %v4470_v18 = vmax.f32 %v11941_v9, 0.0  ;;  %v9001_v9 = vld [vmem:[%s12892_s12 + $0xc0] sm:$0xf] }
 0x865   :  { %4774 = vmatpush.bf16.msra.mxu1 %v8846_v55  ;;  %4812 = vmatpush.bf16.msra.mxu3 %v8854_v20  ;;  %v9916_v32 = vld [vmem:[%s12892_s12 + $0xcc] sm:$0xf]  ;;  %v8969_v22 = vld [vmem:[%s12892_s12 + $0x80] sm:$0xf] }
 0x866   :  { %v4478_v26 = vsub.f32 0.0, %v4474_v6  ;;  %v9805_v6 = vld [vmem:[#allocation13 + $0x354] sm:$0xf]  ;;  %4793 = vmatpush.bf16.msra.mxu2 %v8850_v44  ;;  %v9011_v55 = vld [vmem:[%s12892_s12 + $0xe8] sm:$0xf0]  ;;  %v8970_v44 = vor.u32 %v9911_v37, %v8969_v22 }
 0x867   :  { %v8814_v25 = vor.u32 %v9805_v6, %v8811_v57  ;;  %v9014_v12 = vor.u32 %v9916_v32, %v9011_v55  ;;  %v9903_v6 = vld [vmem:[%s12892_s12 + $0x5c] sm:$0xf0]  ;;  %v8993_v55 = vld [vmem:[%s12892_s12 + $0x98] sm:$0xf] }
 0x868   :  { %v10175_v11 = vpop.eup %10174  ;;  %v4484_v42 = vmul.f32 1.442695, %v4478_v26  ;;  %v8818_v26 = vor.u32 %v9810_v2, %v8817_v56  ;;  %v8945_v56 = vld [vmem:[%s12892_s12 + $0x48] sm:$0xf]  ;;  %v9914_v22 = vld [vmem:[%s12892_s12 + $0xb4] sm:$0xf0] }
 0x869   :  { %v10177_v23 = vpop.eup %10176  ;;  %v4489_v29 = vadd.f32 1.0, %v10175_v11  ;;  %v4465_v17 = vpop.f32.mrf.mxu3  ;;  %v8779_v11 = vld [vmem:[#allocation13 + $0x330] sm:$0xf0]  ;;  %4775 = vmatpush.bf16.msra.mxu1 %v8814_v25  ;;  %4813 = vmatpush.bf16.msra.mxu3 %v8822_v59  ;;  %v8939_v25 = vld [vmem:[%s12892_s12 + $0x60] sm:$0xf0]  ;;  %v8994_v37 = vor.u32 %v9914_v22, %v8993_v55 }
 0x86a   :  { %10178 = vpow2.f32 %v4484_v42  ;;  %v11945_v36 = vadd.f32 %v11930_v15, %v4465_v17  ;;  %v4493_v0 = vmul.f32 0.6931472, %v10177_v23  ;;  %v8841_v15 = vld [vmem:[#allocation13 + $0x390] sm:$0xf]  ;;  %v8785_v42 = vld [vmem:[#allocation13 + $0x318] sm:$0xf]  ;;  %4794 = vmatpush.bf16.msra.mxu2 %v8818_v26  ;;  %v8782_v17 = vor.u32 %v9797_v7, %v8779_v11 }
 0x86b   :  { %10180 = vlog2.f32 %v4489_v29  ;;  %v8842_v21 = vor.u32 %v9817_v4, %v8841_v15  ;;  %v8778_v29 = vor.u32 %v9801_v58, %v8777_v47  ;;  %v8786_v24 = vor.u32 %v9802_v54, %v8785_v42  ;;  %v9915_v15 = vld [vmem:[%s12892_s12 + $0xc4] sm:$0xf]  ;;  %v9904_v26 = vld [vmem:[%s12892_s12 + $0x64] sm:$0xf0]  ;;  %v8905_v7 = vld [vmem:[%s12892_s12] sm:$0xf] }
 0x86c   :  { %v4475_v62 = vand.u32 2147483647, %v11945_v36  ;;  %v11950_v35 = vadd.f32 %v4493_v0, %v4468_v51  ;;  %v4471_v0 = vmax.f32 %v11945_v36, 0.0  ;;  %v9919_v36 = vld [vmem:[%s12892_s12 + $0xdc] sm:$0xf0]  ;;  %v8946_v59 = vor.u32 %v9904_v26, %v8945_v56 }
 0x86d   :  { %4755 = vmatpush.bf16.msrb.mxu0 %v8842_v21  ;;  %4776 = vmatpush.bf16.msra.mxu1 %v8782_v17  ;;  %v9002_v4 = vor.u32 %v9919_v36, %v9001_v9  ;;  %v9009_v51 = vld [vmem:[%s12892_s12 + $0xc8] sm:$0xf]  ;;  %v9006_v21 = vor.u32 %v9915_v15, %v9003_v10  ;;  %v8950_v58 = vor.u32 %v9900_v45, %v8947_v16  ;;  %v9895_v11 = vld [vmem:[%s12892_s12 + $0x1c] sm:$0xf0]  ;;  %v9891_v42 = vld [vmem:[%s12892_s12 + $0x4] sm:$0xf] }
 0x86e   :  { %v4479_v43 = vsub.f32 0.0, %v4475_v62  ;;  %4795 = vmatpush.bf16.msra.mxu2 %v8786_v24  ;;  %4814 = vmatpush.bf16.msra.mxu3 %v8790_v60  ;;  %v8907_v54 = vld [vmem:[%s12892_s12 + $0x20] sm:$0xf0]  ;;  %v9892_v17 = vld [vmem:[%s12892_s12 + $0xc] sm:$0xf]  ;;  %v8906_v24 = vor.u32 %v9895_v11, %v8905_v7 }
 0x86f   :  { %v8910_v60 = vor.u32 %v9891_v42, %v8907_v54  ;;  %v9918_v36 = vld [vmem:[%s12892_s12 + $0xdc] sm:$0xf]  ;;  %v9897_v26 = vld [vmem:[%s12892_s12 + $0x2c] sm:$0xf0]  ;;  %v9893_v45 = vld [vmem:[%s12892_s12 + $0x14] sm:$0xf] }
 0x870   :  { %v10179_v50 = vpop.eup %10178  ;;  %v4486_v3 = vmul.f32 1.442695, %v4479_v43  ;;  %v9920_v43 = vld [vmem:[%s12892_s12 + $0xe4] sm:$0xf0]  ;;  %v9027_v15 = vld [vmem:[%s12892_s12 + $0xf8] sm:$0xf0] }
 0x871   :  { %v10181_v52 = vpop.eup %10180  ;;  %v4490_v27 = vadd.f32 1.0, %v10179_v50  ;;  %4756 = vmatpush.bf16.msrb.mxu0 %v8810_v31  ;;  %v9010_v63 = vor.u32 %v9920_v43, %v9009_v51  ;;  %v9907_v50 = vld [vmem:[%s12892_s12 + $0x84] sm:$0xf]  ;;  %v8937_v31 = vld [vmem:[%s12892_s12 + $0x40] sm:$0xf]  ;;  %v9030_v10 = vor.u32 %v9918_v36, %v9027_v15 }
 0x872   :  { %v4495_v53 = vmul.f32 0.6931472, %v10181_v52  ;;  %10182 = vpow2.f32 %v4486_v3  ;;  %v8971_v3 = vld [vmem:[%s12892_s12 + $0xa0] sm:$0xf0]  ;;  %v9908_v52 = vld [vmem:[%s12892_s12 + $0x8c] sm:$0xf]  ;;  %v8938_v2 = vor.u32 %v9903_v6, %v8937_v31 }
 0x873   :  { %10184 = vlog2.f32 %v4490_v27  ;;  %v8974_v20 = vor.u32 %v9907_v50, %v8971_v3  ;;  %v8979_v27 = vld [vmem:[%s12892_s12 + $0xa8] sm:$0xf0]  ;;  %v9913_v51 = vld [vmem:[%s12892_s12 + $0xac] sm:$0xf0]  ;;  %v9909_v43 = vld [vmem:[%s12892_s12 + $0x94] sm:$0xf] }
 0x874   :  { %v11952_v61 = vadd.f32 %v4495_v53, %v4469_v28  ;;  %v8978_v28 = vor.u32 %v9912_v39, %v8977_v46  ;;  %v8982_v57 = vor.u32 %v9908_v52, %v8979_v27  ;;  %v9899_v53 = vld [vmem:[%s12892_s12 + $0x44] sm:$0xf]  ;;  %v8995_v50 = vld [vmem:[%s12892_s12 + $0xb8] sm:$0xf0]  ;;  %v8953_v3 = vld [vmem:[%s12892_s12 + $0x50] sm:$0xf] }
 0x875   :  { %4757 = vmatpush.bf16.msrb.mxu0 %v8778_v29  ;;  %v8942_v47 = vor.u32 %v9899_v53, %v8939_v25  ;;  %v9896_v29 = vld [vmem:[%s12892_s12 + $0x24] sm:$0xf0]  ;;  %v9901_v46 = vld [vmem:[%s12892_s12 + $0x54] sm:$0xf]  ;;  %v8961_v52 = vld [vmem:[%s12892_s12 + $0x58] sm:$0xf] }
 0x876   :  { %v11956_v23 = vpack.c.bf16 %v11952_v61, %v11950_v35  ;;  %v8955_v39 = vld [vmem:[%s12892_s12 + $0x70] sm:$0xf0]  ;;  %v9906_v27 = vld [vmem:[%s12892_s12 + $0x74] sm:$0xf0]  ;;  %v9902_v31 = vld [vmem:[%s12892_s12 + $0x5c] sm:$0xf]  ;;  %v4923_v25 = vmul.f32 %v11952_v61, %v11915_v49 }
 0x877   :  { %v8963_v6 = vld [vmem:[%s12892_s12 + $0x78] sm:$0xf0]  ;;  %v8962_v53 = vor.u32 %v9906_v27, %v8961_v52  ;;  %v8923_v16 = vld [vmem:[%s12892_s12 + $0x30] sm:$0xf0]  ;;  %v8929_v61 = vld [vmem:[%s12892_s12 + $0x18] sm:$0xf] }
 0x878   :  { %v10183_v38 = vpop.eup %10182  ;;  %8887 = vmatmul.msk.bf16.vlgmr.msra.gmra.mxu0 %vm870_vm5, %v11956_v23  ;;  %8889 = vmatmul.msk.bf16.vlgmr.msrb.gmra.mxu1 %vm870_vm5, %v11956_v23  ;;  %v8966_v56 = vor.u32 %v9902_v31, %v8963_v6  ;;  %v8931_v7 = vld [vmem:[%s12892_s12 + $0x38] sm:$0xf0]  ;;  %v9115_v36 = vld [vmem:[#allocation13 + $0x4a0] sm:$0xf0]  ;;  %v9839_v55 = vld [vmem:[#allocation13 + $0x45c] sm:$0xf0] }
 0x879   :  { %v4491_v19 = vadd.f32 1.0, %v10183_v38  ;;  %8891 = vmatmul.msk.bf16.vlgmr.msrb.gmra.mxu2 %vm870_vm5, %v11956_v23  ;;  %8893 = vmatmul.msk.bf16.vlgmr.msrb.gmra.mxu3 %vm870_vm5, %v11956_v23  ;;  %v10185_v40 = vpop.eup %10184  ;;  %v8914_v38 = vor.u32 %v9896_v29, %v8913_v48  ;;  %v9049_v27 = vld [vmem:[#allocation13 + $0x400] sm:$0xf]  ;;  %v9827_v6 = vld [vmem:[#allocation13 + $0x404] sm:$0xf] }
 0x87a   :  { %v4497_v5 = vmul.f32 0.6931472, %v10185_v40  ;;  %5130 = vmatpush.bf16.msra.mxu0 %v9002_v4  ;;  %5149 = vmatpush.bf16.msrb.mxu1 %v9006_v21  ;;  %v9921_v40 = vld [vmem:[%s12892_s12 + $0xec] sm:$0xf0]  ;;  %v8987_v21 = vld [vmem:[%s12892_s12 + $0xb0] sm:$0xf0] }
 0x87b   :  { %10186 = vlog2.f32 %v4491_v19  ;;  %5168 = vmatpush.bf16.msrb.mxu2 %v9010_v63  ;;  %5187 = vmatpush.bf16.msrb.mxu3 %v9014_v12  ;;  %v8918_v19 = vor.u32 %v9892_v17, %v8915_v13  ;;  %v8985_v4 = vld [vmem:[%s12892_s12 + $0x90] sm:$0xf]  ;;  %v8990_v32 = vor.u32 %v9909_v43, %v8987_v21  ;;  %v9910_v12 = vld [vmem:[%s12892_s12 + $0x9c] sm:$0xf]  ;;  %v9844_v43 = vld [vmem:[#allocation13 + $0x48c] sm:$0xf] }
 0x87c   :  { %v11968_v41 = vadd.f32 %v4497_v5, %v4470_v18  ;;  %v9917_v5 = vld [vmem:[%s12892_s12 + $0xd4] sm:$0xf]  ;;  %v8986_v63 = vor.u32 %v9913_v51, %v8985_v4  ;;  %v9848_v51 = vld [vmem:[#allocation13 + $0x4a4] sm:$0xf0]  ;;  %v9831_v31 = vld [vmem:[#allocation13 + $0x41c] sm:$0xf0] }
 0x87d   :  { %v9019_v18 = vld [vmem:[%s12892_s12 + $0xf0] sm:$0xf0] }
 0x87e   :  { %5131 = vmatpush.bf16.msra.mxu0 %v8970_v44  ;;  %5150 = vmatpush.bf16.msrb.mxu1 %v8974_v20  ;;  %v9905_v44 = vld [vmem:[%s12892_s12 + $0x6c] sm:$0xf0]  ;;  %v8998_v20 = vor.u32 %v9910_v12, %v8995_v50  ;;  %v4924_v17 = vmul.f32 %v11968_v41, %v11919_v14  ;;  %v9835_v12 = vld [vmem:[#allocation13 + $0x444] sm:$0xf]  ;;  %v9089_v50 = vld [vmem:[#allocation13 + $0x448] sm:$0xf] }
 0x87f   :  { %5169 = vmatpush.bf16.msrb.mxu2 %v8978_v28  ;;  %5188 = vmatpush.bf16.msrb.mxu3 %v8982_v57  ;;  %v8954_v28 = vor.u32 %v9905_v44, %v8953_v3  ;;  %v8958_v57 = vor.u32 %v9901_v46, %v8955_v39  ;;  %v9840_v44 = vld [vmem:[#allocation13 + $0x464] sm:$0xf0]  ;;  %v9091_v46 = vld [vmem:[#allocation13 + $0x468] sm:$0xf0] }
 0x880   :  { %v9090_v52 = vor.u32 %v9840_v44, %v9089_v50 }
 0x881   :  { %v10187_v1 = vpop.eup %10186 }
 0x882   :  { %v4499_v62 = vmul.f32 0.6931472, %v10187_v1  ;;  %5132 = vmatpush.bf16.msra.mxu0 %v8938_v2  ;;  %5151 = vmatpush.bf16.msrb.mxu1 %v8942_v47  ;;  %v8921_v2 = vld [vmem:[%s12892_s12 + $0x10] sm:$0xf]  ;;  %v4922_v47 = vmul.f32 %v11950_v35, %v11910_v34  ;;  %v8926_v35 = vor.u32 %v9893_v45, %v8923_v16  ;;  %v9828_v45 = vld [vmem:[#allocation13 + $0x40c] sm:$0xf] }
 0x883   :  { %5170 = vmatpush.bf16.msrb.mxu2 %v8946_v59  ;;  %5189 = vmatpush.bf16.msrb.mxu3 %v8950_v58  ;;  %v9898_v59 = vld [vmem:[%s12892_s12 + $0x34] sm:$0xf0]  ;;  %v9894_v58 = vld [vmem:[%s12892_s12 + $0x1c] sm:$0xf]  ;;  %v8922_v42 = vor.u32 %v9897_v26, %v8921_v2  ;;  %v9059_v16 = vld [vmem:[#allocation13 + $0x428] sm:$0xf0] }
 0x884   :  { %v11970_v30 = vadd.f32 %v4499_v62, %v4471_v0  ;;  %v9025_v0 = vld [vmem:[%s12892_s12 + $0xd8] sm:$0xf]  ;;  %v12196_v11 = vpack.c.bf16 %v4923_v25, %v4922_v47  ;;  %v8930_v54 = vor.u32 %v9898_v59, %v8929_v61  ;;  %v8934_v48 = vor.u32 %v9894_v58, %v8931_v7  ;;  %v9057_v25 = vld [vmem:[#allocation13 + $0x408] sm:$0xf]  ;;  %v9161_v47 = vld [vmem:[#allocation13 + $0x4d0] sm:$0xf] }
 0x885   :  { %v9922_v62 = vld [vmem:[%s12892_s12 + $0xf4] sm:$0xf0]  ;;  %v9062_v61 = vor.u32 %v9828_v45, %v9059_v16  ;;  %v9857_v59 = vld [vmem:[#allocation13 + $0x4ec] sm:$0xf0]  ;;  %v9853_v58 = vld [vmem:[#allocation13 + $0x4d4] sm:$0xf] }
 0x886   :  { %v11974_v8 = vpack.c.bf16 %v11970_v30, %v11968_v41  ;;  %5133 = vmatpush.bf16.msra.mxu0 %v8906_v24  ;;  %5152 = vmatpush.bf16.msrb.mxu1 %v8910_v60  ;;  %v9026_v9 = vor.u32 %v9922_v62, %v9025_v0  ;;  %v4925_v29 = vmul.f32 %v11970_v30, %v11923_v33  ;;  %v9145_v24 = vld [vmem:[#allocation13 + $0x4c0] sm:$0xf]  ;;  %v9851_v30 = vld [vmem:[#allocation13 + $0x4c4] sm:$0xf]  ;;  %v9153_v41 = vld [vmem:[#allocation13 + $0x4c8] sm:$0xf] }
 0x887   :  { %5171 = vmatpush.bf16.msrb.mxu2 %v8914_v38  ;;  %5190 = vmatpush.bf16.msrb.mxu3 %v8918_v19  ;;  %v9855_v60 = vld [vmem:[#allocation13 + $0x4dc] sm:$0xf0]  ;;  %v9147_v19 = vld [vmem:[#allocation13 + $0x4e0] sm:$0xf0]  ;;  %v9162_v7 = vor.u32 %v9857_v59, %v9161_v47  ;;  %v9834_v45 = vld [vmem:[#allocation13 + $0x434] sm:$0xf0] }
 0x888   :  { %8888 = vmatmul.msk.bf16.gmra.mxu0 %vm870_vm5, %v11974_v8  ;;  %8890 = vmatmul.msk.bf16.gmra.mxu1 %vm870_vm5, %v11974_v8  ;;  %v12210_v13 = vpack.c.bf16 %v4925_v29, %v4924_v17  ;;  %v9146_v38 = vor.u32 %v9855_v60, %v9145_v24  ;;  %v9113_v0 = vld [vmem:[#allocation13 + $0x480] sm:$0xf]  ;;  %v9854_v29 = vld [vmem:[#allocation13 + $0x4dc] sm:$0xf] }
 0x889   :  { %8892 = vmatmul.msk.bf16.gmra.mxu2 %vm870_vm5, %v11974_v8  ;;  %8894 = vmatmul.msk.bf16.gmra.mxu3 %vm870_vm5, %v11974_v8  ;;  %v9171_v17 = vld [vmem:[#allocation13 + $0x4f8] sm:$0xf0] }
 0x88a   :  { %v9174_v24 = vor.u32 %v9854_v29, %v9171_v17  ;;  %v9830_v47 = vld [vmem:[#allocation13 + $0x41c] sm:$0xf] }
 0x88b   :  { %v9075_v59 = vld [vmem:[#allocation13 + $0x438] sm:$0xf0] }
 0x898   :  { %8895 = vmatmul.msk.bf16.vlgmr.msrb.gmra.mxu0 %vm870_vm5, %v11956_v23  ;;  %8897 = vmatmul.msk.bf16.vlgmr.msra.gmra.mxu1 %vm870_vm5, %v11956_v23 }
 0x899   :  { %8899 = vmatmul.msk.bf16.vlgmr.msra.gmra.mxu2 %vm870_vm5, %v11956_v23  ;;  %8901 = vmatmul.msk.bf16.vlgmr.msra.gmra.mxu3 %vm870_vm5, %v11956_v23  ;;  %v9017_v23 = vld [vmem:[%s12892_s12 + $0xd0] sm:$0xf] }
 0x89a   :  { %v9018_v1 = vor.u32 %v9921_v40, %v9017_v23  ;;  %5244 = vmatpush.bf16.msra.mxu2 %v9026_v9  ;;  %5263 = vmatpush.bf16.msra.mxu3 %v9030_v10  ;;  %v9856_v23 = vld [vmem:[#allocation13 + $0x4e4] sm:$0xf0]  ;;  %v9150_v40 = vor.u32 %v9851_v30, %v9147_v19  ;;  %v9843_v9 = vld [vmem:[#allocation13 + $0x484] sm:$0xf] }
 0x89b   :  { %v9118_v4 = vor.u32 %v9843_v9, %v9115_v36  ;;  %v9121_v10 = vld [vmem:[#allocation13 + $0x488] sm:$0xf]  ;;  %v9846_v9 = vld [vmem:[#allocation13 + $0x49c] sm:$0xf] }
 0x89c   :  { %5206 = vmatpush.bf16.msrb.mxu0 %v9018_v1  ;;  %v9852_v1 = vld [vmem:[#allocation13 + $0x4cc] sm:$0xf]  ;;  %v9122_v21 = vor.u32 %v9848_v51, %v9121_v10  ;;  %v9139_v36 = vld [vmem:[#allocation13 + $0x4b8] sm:$0xf0] }
 0x89d   :  { %v9142_v51 = vor.u32 %v9846_v9, %v9139_v36 }
 0x89e   :  { %5245 = vmatpush.bf16.msra.mxu2 %v8994_v37  ;;  %5264 = vmatpush.bf16.msra.mxu3 %v8998_v20  ;;  %v9083_v37 = vld [vmem:[#allocation13 + $0x460] sm:$0xf0]  ;;  %v9836_v20 = vld [vmem:[#allocation13 + $0x44c] sm:$0xf] }
 0x89f   :  { %v9086_v39 = vor.u32 %v9835_v12, %v9083_v37 }
 0x8a0   :  { %5207 = vmatpush.bf16.msrb.mxu0 %v8986_v63  ;;  %v9123_v63 = vld [vmem:[#allocation13 + $0x4a8] sm:$0xf0] }
 0x8a1   :  { %v9126_v22 = vor.u32 %v9844_v43, %v9123_v63  ;;  %v9841_v43 = vld [vmem:[#allocation13 + $0x46c] sm:$0xf0]  ;;  %v9099_v63 = vld [vmem:[#allocation13 + $0x470] sm:$0xf0] }
 0x8a2   :  { %5246 = vmatpush.bf16.msra.mxu2 %v8962_v53  ;;  %5265 = vmatpush.bf16.msra.mxu3 %v8966_v56  ;;  %v9051_v53 = vld [vmem:[#allocation13 + $0x420] sm:$0xf0]  ;;  %v9832_v56 = vld [vmem:[#allocation13 + $0x424] sm:$0xf0] }
 0x8a3   :  { %v9054_v2 = vor.u32 %v9827_v6, %v9051_v53  ;;  %v9058_v26 = vor.u32 %v9832_v56, %v9057_v25  ;;  %v9833_v53 = vld [vmem:[#allocation13 + $0x42c] sm:$0xf0]  ;;  %v9829_v25 = vld [vmem:[#allocation13 + $0x414] sm:$0xf] }
 0x8a4   :  { %5208 = vmatpush.bf16.msrb.mxu0 %v8954_v28  ;;  %v9094_v28 = vor.u32 %v9836_v20, %v9091_v46 }
 0x8a6   :  { %5247 = vmatpush.bf16.msra.mxu2 %v8930_v54  ;;  %5266 = vmatpush.bf16.msra.mxu3 %v8934_v48 }
 0x8a8   :  { %8896 = vmatmul.msk.bf16.gmra.mxu0 %vm870_vm5, %v11974_v8  ;;  %8898 = vmatmul.msk.bf16.gmra.mxu1 %vm870_vm5, %v11974_v8 }
 0x8a9   :  { %8900 = vmatmul.msk.bf16.gmra.mxu2 %vm870_vm5, %v11974_v8  ;;  %8902 = vmatmul.msk.bf16.gmra.mxu3 %vm870_vm5, %v11974_v8  ;;  %v9022_v8 = vor.u32 %v9917_v5, %v9019_v18  ;;  %v9154_v5 = vor.u32 %v9856_v23, %v9153_v41  ;;  %v9155_v18 = vld [vmem:[#allocation13 + $0x4e8] sm:$0xf0]  ;;  %v9129_v41 = vld [vmem:[#allocation13 + $0x490] sm:$0xf] }
 0x8aa   :  { %5209 = vmatpush.bf16.msrb.mxu0 %v8922_v42  ;;  %v9158_v62 = vor.u32 %v9852_v1, %v9155_v18  ;;  %v9169_v42 = vld [vmem:[#allocation13 + $0x4d8] sm:$0xf]  ;;  %v9849_v23 = vld [vmem:[#allocation13 + $0x4ac] sm:$0xf0]  ;;  %v9131_v1 = vld [vmem:[#allocation13 + $0x4b0] sm:$0xf0] }
 0x8ab   :  { %5225 = vmatpush.bf16.msra.mxu1 %v9022_v8  ;;  %v9847_v8 = vld [vmem:[#allocation13 + $0x49c] sm:$0xf0]  ;;  %v9137_v18 = vld [vmem:[#allocation13 + $0x498] sm:$0xf] }
 0x8ac   :  { %v9114_v15 = vor.u32 %v9847_v8, %v9113_v0  ;;  %v9850_v0 = vld [vmem:[#allocation13 + $0x4b4] sm:$0xf0] }
 0x8ad   :  { %v9138_v8 = vor.u32 %v9850_v0, %v9137_v18 }
 0x8af   :  { %5226 = vmatpush.bf16.msra.mxu1 %v8990_v32  ;;  %v9081_v32 = vld [vmem:[#allocation13 + $0x440] sm:$0xf] }
 0x8b0   :  { %v9082_v3 = vor.u32 %v9839_v55, %v9081_v32 }
 0x8b3   :  { %5227 = vmatpush.bf16.msra.mxu1 %v8958_v57  ;;  %v9050_v57 = vor.u32 %v9831_v31, %v9049_v27  ;;  %v9838_v27 = vld [vmem:[#allocation13 + $0x45c] sm:$0xf] }
 0x8b4   :  { %v9107_v31 = vld [vmem:[#allocation13 + $0x478] sm:$0xf0] }
 0x8b5   :  { %v9110_v6 = vor.u32 %v9838_v27, %v9107_v31 }
 0x8b7   :  { %5228 = vmatpush.bf16.msra.mxu1 %v8926_v35  ;;  %v9858_v35 = vld [vmem:[#allocation13 + $0x4f4] sm:$0xf0] }
 0x8b8   :  { %9031 = vmatmul.msk.bf16.vlgmr.msra.gmra.mxu0 %vm870_vm5, %v12196_v11  ;;  %9033 = vmatmul.msk.bf16.vlgmr.msrb.gmra.mxu1 %vm870_vm5, %v12196_v11  ;;  %v9170_v48 = vor.u32 %v9858_v35, %v9169_v42 }
 0x8b9   :  { %9035 = vmatmul.msk.bf16.vlgmr.msrb.gmra.mxu2 %vm870_vm5, %v12196_v11  ;;  %9037 = vmatmul.msk.bf16.vlgmr.msrb.gmra.mxu3 %vm870_vm5, %v12196_v11 }
 0x8ba   :  { %5448 = vmatpush.bf16.msra.mxu0 %v9146_v38  ;;  %5486 = vmatpush.bf16.msrb.mxu2 %v9154_v5  ;;  %v9130_v5 = vor.u32 %v9849_v23, %v9129_v41 }
 0x8bb   :  { %5467 = vmatpush.bf16.msrb.mxu1 %v9150_v40  ;;  %5505 = vmatpush.bf16.msrb.mxu3 %v9158_v62  ;;  %v9845_v40 = vld [vmem:[#allocation13 + $0x494] sm:$0xf] }
 0x8bc   :  { %v9134_v62 = vor.u32 %v9845_v40, %v9131_v1 }
 0x8be   :  { %5449 = vmatpush.bf16.msra.mxu0 %v9114_v15  ;;  %5487 = vmatpush.bf16.msrb.mxu2 %v9122_v21  ;;  %v9097_v15 = vld [vmem:[#allocation13 + $0x450] sm:$0xf]  ;;  %v9837_v21 = vld [vmem:[#allocation13 + $0x454] sm:$0xf] }
 0x8bf   :  { %5468 = vmatpush.bf16.msrb.mxu1 %v9118_v4  ;;  %5506 = vmatpush.bf16.msrb.mxu3 %v9126_v22  ;;  %v9098_v37 = vor.u32 %v9841_v43, %v9097_v15  ;;  %v9102_v50 = vor.u32 %v9837_v21, %v9099_v63  ;;  %v9883_v43 = vld [vmem:[#allocation13 + $0x5c4] sm:$0xf]  ;;  %v9297_v63 = vld [vmem:[#allocation13 + $0x5c8] sm:$0xf] }
 0x8c0   :  { %v9291_v21 = vld [vmem:[#allocation13 + $0x5e0] sm:$0xf0] }
 0x8c2   :  { %5450 = vmatpush.bf16.msra.mxu0 %v9082_v3  ;;  %5488 = vmatpush.bf16.msrb.mxu2 %v9090_v52  ;;  %v9105_v3 = vld [vmem:[#allocation13 + $0x458] sm:$0xf] }
 0x8c3   :  { %5469 = vmatpush.bf16.msrb.mxu1 %v9086_v39  ;;  %5507 = vmatpush.bf16.msrb.mxu3 %v9094_v28  ;;  %v9842_v39 = vld [vmem:[#allocation13 + $0x474] sm:$0xf0] }
 0x8c4   :  { %v9106_v28 = vor.u32 %v9842_v39, %v9105_v3 }
 0x8c6   :  { %5451 = vmatpush.bf16.msra.mxu0 %v9050_v57  ;;  %5489 = vmatpush.bf16.msrb.mxu2 %v9058_v26  ;;  %v9065_v57 = vld [vmem:[#allocation13 + $0x410] sm:$0xf]  ;;  %v9073_v26 = vld [vmem:[#allocation13 + $0x418] sm:$0xf] }
 0x8c7   :  { %5470 = vmatpush.bf16.msrb.mxu1 %v9054_v2  ;;  %5508 = vmatpush.bf16.msrb.mxu3 %v9062_v61  ;;  %v9066_v56 = vor.u32 %v9833_v53, %v9065_v57  ;;  %v9067_v2 = vld [vmem:[#allocation13 + $0x430] sm:$0xf0]  ;;  %v9074_v61 = vor.u32 %v9834_v45, %v9073_v26  ;;  %v9875_v26 = vld [vmem:[#allocation13 + $0x584] sm:$0xf] }
 0x8c8   :  { %9032 = vmatmul.msk.bf16.gmra.mxu0 %vm870_vm5, %v12210_v13  ;;  %9034 = vmatmul.msk.bf16.gmra.mxu1 %vm870_vm5, %v12210_v13  ;;  %v9070_v16 = vor.u32 %v9829_v25, %v9067_v2  ;;  %v9257_v25 = vld [vmem:[#allocation13 + $0x580] sm:$0xf]  ;;  %v9259_v45 = vld [vmem:[#allocation13 + $0x5a0] sm:$0xf0] }
 0x8c9   :  { %9036 = vmatmul.msk.bf16.gmra.mxu2 %vm870_vm5, %v12210_v13  ;;  %9038 = vmatmul.msk.bf16.gmra.mxu3 %vm870_vm5, %v12210_v13 }
 0x8d8   :  { %9039 = vmatmul.msk.bf16.vlgmr.msrb.gmra.mxu0 %vm870_vm5, %v12196_v11  ;;  %9041 = vmatmul.msk.bf16.vlgmr.msra.gmra.mxu1 %vm870_vm5, %v12196_v11 }
 0x8d9   :  { %9043 = vmatmul.msk.bf16.vlgmr.msra.gmra.mxu2 %vm870_vm5, %v12196_v11  ;;  %9045 = vmatmul.msk.bf16.vlgmr.msra.gmra.mxu3 %vm870_vm5, %v12196_v11  ;;  %v9163_v11 = vld [vmem:[#allocation13 + $0x4f0] sm:$0xf0] }
 0x8da   :  { %v9166_v54 = vor.u32 %v9853_v58, %v9163_v11  ;;  %5524 = vmatpush.bf16.msrb.mxu0 %v9162_v7  ;;  %5562 = vmatpush.bf16.msra.mxu2 %v9170_v48  ;;  %v9078_v11 = vor.u32 %v9830_v47, %v9075_v59  ;;  %v9880_v47 = vld [vmem:[#allocation13 + $0x5a4] sm:$0xf0]  ;;  %v9876_v59 = vld [vmem:[#allocation13 + $0x58c] sm:$0xf] }
 0x8db   :  { %5581 = vmatpush.bf16.msra.mxu3 %v9174_v24  ;;  %v12250_v24 = vpack.c.bf16 %v11923_v33, %v11919_v14 }
 0x8dc   :  { %5543 = vmatpush.bf16.msra.mxu1 %v9166_v54 }
 0x8de   :  { %5525 = vmatpush.bf16.msrb.mxu0 %v9130_v5  ;;  %5563 = vmatpush.bf16.msra.mxu2 %v9138_v8 }
 0x8df   :  { %5582 = vmatpush.bf16.msra.mxu3 %v9142_v51 }
 0x8e0   :  { %5544 = vmatpush.bf16.msra.mxu1 %v9134_v62 }
 0x8e2   :  { %5526 = vmatpush.bf16.msrb.mxu0 %v9098_v37  ;;  %5564 = vmatpush.bf16.msra.mxu2 %v9106_v28 }
 0x8e3   :  { %5583 = vmatpush.bf16.msra.mxu3 %v9110_v6 }
 0x8e4   :  { %5545 = vmatpush.bf16.msra.mxu1 %v9102_v50 }
 0x8e6   :  { %5527 = vmatpush.bf16.msrb.mxu0 %v9066_v56  ;;  %5565 = vmatpush.bf16.msra.mxu2 %v9074_v61  ;;  %v9879_v56 = vld [vmem:[#allocation13 + $0x59c] sm:$0xf0]  ;;  %v9262_v61 = vor.u32 %v9875_v26, %v9259_v45  ;;  %v9889_v26 = vld [vmem:[#allocation13 + $0x5ec] sm:$0xf0] }
 0x8e7   :  { %5584 = vmatpush.bf16.msra.mxu3 %v9078_v11  ;;  %v9258_v2 = vor.u32 %v9879_v56, %v9257_v25 }
 0x8e8   :  { %9040 = vmatmul.msk.bf16.gmra.mxu0 %vm870_vm5, %v12210_v13  ;;  %9042 = vmatmul.msk.bf16.gmra.mxu1 %vm870_vm5, %v12210_v13 }
 0x8e9   :  { %9044 = vmatmul.msk.bf16.gmra.mxu2 %vm870_vm5, %v12210_v13  ;;  %9046 = vmatmul.msk.bf16.gmra.mxu3 %vm870_vm5, %v12210_v13  ;;  %v12238_v13 = vpack.c.bf16 %v11915_v49, %v11910_v34 }
 0x8ea   :  { %5546 = vmatpush.bf16.msra.mxu1 %v9070_v16  ;;  %v9265_v16 = vld [vmem:[#allocation13 + $0x588] sm:$0xf] }
 0x8f5   :  { %v4683_v60 = vpop.f32.mrf.mxu0  ;;  %v4702_v30 = vpop.f32.mrf.mxu1 }
 0x8f6   :  { %v4826_v38 = vmul.f32 1.442695, %v4683_v60  ;;  %v4828_v19 = vmul.f32 1.442695, %v4702_v30 }
 0x8f8   :  { %10188 = vpow2.f32 %v4826_v38  ;;  %9175 = vmatmul.msk.bf16.vlgmr.msra.gmra.mxu0 %vm870_vm5, %v12238_v13  ;;  %9177 = vmatmul.msk.bf16.vlgmr.msrb.gmra.mxu1 %vm870_vm5, %v12238_v13 }
 0x8f9   :  { %10190 = vpow2.f32 %v4828_v19  ;;  %9179 = vmatmul.msk.bf16.vlgmr.msrb.gmra.mxu2 %vm870_vm5, %v12238_v13  ;;  %9181 = vmatmul.msk.bf16.vlgmr.msrb.gmra.mxu3 %vm870_vm5, %v12238_v13 }
 0x8fc   :  { %v4721_v4 = vpop.f32.mrf.mxu2  ;;  %v4740_v10 = vpop.f32.mrf.mxu3 }
 0x8fd   :  { %v4830_v32 = vmul.f32 1.442695, %v4721_v4  ;;  %v4832_v55 = vmul.f32 1.442695, %v4740_v10  ;;  %v4685_v22 = vpop.f32.mrf.mxu0  ;;  %v4704_v12 = vpop.f32.mrf.mxu1  ;;  %v9289_v4 = vld [vmem:[#allocation13 + $0x5c0] sm:$0xf] }
 0x8fe   :  { %v10189_v44 = vpop.eup %10188  ;;  %v4842_v20 = vmul.f32 1.442695, %v4685_v22  ;;  %v4844_v46 = vmul.f32 1.442695, %v4704_v12  ;;  %v9887_v10 = vld [vmem:[#allocation13 + $0x5dc] sm:$0xf0] }
 0x8ff   :  { %v10191_v52 = vpop.eup %10190  ;;  %4890 = vst [vmem:[#allocation4 + $0xb0] sm:$0xff] %v10189_v44  ;;  %10192 = vpow2.f32 %v4830_v32  ;;  %v9290_v51 = vor.u32 %v9887_v10, %v9289_v4  ;;  %v9294_v32 = vor.u32 %v9883_v43, %v9291_v21  ;;  %v9884_v22 = vld [vmem:[#allocation13 + $0x5cc] sm:$0xf]  ;;  %v9863_v43 = vld [vmem:[#allocation13 + $0x51c] sm:$0xf0] }
 0x900   :  { %4891 = vst [vmem:[#allocation4] sm:$0xff] %v10191_v52  ;;  %10194 = vpow2.f32 %v4832_v55  ;;  %v9888_v55 = vld [vmem:[#allocation13 + $0x5e4] sm:$0xf0]  ;;  %v9299_v12 = vld [vmem:[#allocation13 + $0x5e8] sm:$0xf0] }
 0x901   :  { %10196 = vpow2.f32 %v4842_v20  ;;  %6632 = vmatpush.bf16.msra.mxu0 %v9290_v51  ;;  %v9298_v3 = vor.u32 %v9888_v55, %v9297_v63  ;;  %v9302_v44 = vor.u32 %v9884_v22, %v9299_v12  ;;  %6651 = vmatpush.bf16.msrb.mxu1 %v9294_v32  ;;  %v9235_v4 = vld [vmem:[#allocation13 + $0x568] sm:$0xf0]  ;;  %v9193_v51 = vld [vmem:[#allocation13 + $0x500] sm:$0xf]  ;;  %v9859_v63 = vld [vmem:[#allocation13 + $0x504] sm:$0xf] }
 0x902   :  { %10198 = vpow2.f32 %v4844_v46  ;;  %v9194_v21 = vor.u32 %v9863_v43, %v9193_v51  ;;  %v9195_v32 = vld [vmem:[#allocation13 + $0x520] sm:$0xf0]  ;;  %v9201_v55 = vld [vmem:[#allocation13 + $0x508] sm:$0xf]  ;;  %v9283_v51 = vld [vmem:[#allocation13 + $0x5b8] sm:$0xf0] }
 0x903   :  { %6670 = vmatpush.bf16.msrb.mxu2 %v9298_v3  ;;  %6689 = vmatpush.bf16.msrb.mxu3 %v9302_v44  ;;  %v9198_v22 = vor.u32 %v9859_v63, %v9195_v32  ;;  %v9864_v12 = vld [vmem:[#allocation13 + $0x524] sm:$0xf0]  ;;  %v9241_v43 = vld [vmem:[#allocation13 + $0x550] sm:$0xf] }
 0x904   :  { %v4723_v58 = vpop.f32.mrf.mxu2  ;;  %v4742_v7 = vpop.f32.mrf.mxu3 }
 0x905   :  { %v10193_v42 = vpop.eup %10192  ;;  %v4846_v35 = vmul.f32 1.442695, %v4723_v58  ;;  %v4848_v54 = vmul.f32 1.442695, %v4742_v7  ;;  %v4688_v48 = vpop.f32.mrf.mxu0  ;;  %v9267_v58 = vld [vmem:[#allocation13 + $0x5a8] sm:$0xf0]  ;;  %6633 = vmatpush.bf16.msra.mxu0 %v9258_v2  ;;  %6652 = vmatpush.bf16.msrb.mxu1 %v9262_v61 }
 0x906   :  { %v4707_v29 = vpop.f32.mrf.mxu1  ;;  %v10195_v17 = vpop.eup %10194  ;;  %4892 = vst [vmem:[#allocation4 + $0xd8] sm:$0xff] %v10193_v42  ;;  %v4858_v60 = vmul.f32 1.442695, %v4688_v48  ;;  %v9266_v42 = vor.u32 %v9880_v47, %v9265_v16  ;;  %v9871_v48 = vld [vmem:[#allocation13 + $0x55c] sm:$0xf0] }
 0x907   :  { %v4860_v30 = vmul.f32 1.442695, %v4707_v29  ;;  %v10197_v38 = vpop.eup %10196  ;;  %4893 = vst [vmem:[#allocation4 + $0x18] sm:$0xff] %v10195_v17  ;;  %10200 = vpow2.f32 %v4846_v35  ;;  %v9270_v35 = vor.u32 %v9876_v59, %v9267_v58  ;;  %v9867_v29 = vld [vmem:[#allocation13 + $0x544] sm:$0xf] }
 0x908   :  { %v10199_v19 = vpop.eup %10198  ;;  %4898 = vst [vmem:[#allocation4 + $0x80] sm:$0xff] %v10197_v38  ;;  %10202 = vpow2.f32 %v4848_v54  ;;  %9176 = vmatmul.msk.bf16.gmra.mxu0 %vm870_vm5, %v12250_v24  ;;  %9178 = vmatmul.msk.bf16.gmra.mxu1 %vm870_vm5, %v12250_v24  ;;  %v9225_v54 = vld [vmem:[#allocation13 + $0x540] sm:$0xf]  ;;  %v9305_v2 = vld [vmem:[#allocation13 + $0x5d0] sm:$0xf] }
 0x909   :  { %4899 = vst [vmem:[#allocation4 + $0x88] sm:$0xff] %v10199_v19  ;;  %10204 = vpow2.f32 %v4858_v60  ;;  %9180 = vmatmul.msk.bf16.gmra.mxu2 %vm870_vm5, %v12250_v24  ;;  %9182 = vmatmul.msk.bf16.gmra.mxu3 %vm870_vm5, %v12250_v24  ;;  %v9306_v45 = vor.u32 %v9889_v26, %v9305_v2  ;;  %v9885_v16 = vld [vmem:[#allocation13 + $0x5d4] sm:$0xf]  ;;  %v9313_v47 = vld [vmem:[#allocation13 + $0x5d8] sm:$0xf] }
 0x90a   :  { %10206 = vpow2.f32 %v4860_v30  ;;  %6671 = vmatpush.bf16.msrb.mxu2 %v9266_v42  ;;  %6690 = vmatpush.bf16.msrb.mxu3 %v9270_v35  ;;  %v9307_v61 = vld [vmem:[#allocation13 + $0x5f0] sm:$0xf0]  ;;  %v9890_v58 = vld [vmem:[#allocation13 + $0x5f4] sm:$0xf0] }
 0x90b   :  { %v9310_v59 = vor.u32 %v9885_v16, %v9307_v61  ;;  %v9861_v2 = vld [vmem:[#allocation13 + $0x514] sm:$0xf]  ;;  %v9217_v61 = vld [vmem:[#allocation13 + $0x518] sm:$0xf] }
 0x90c   :  { %v4726_v41 = vpop.f32.mrf.mxu2  ;;  %v4745_v23 = vpop.f32.mrf.mxu3  ;;  %v9211_v16 = vld [vmem:[#allocation13 + $0x530] sm:$0xf0] }
 0x90d   :  { %v10201_v40 = vpop.eup %10200  ;;  %v4862_v5 = vmul.f32 1.442695, %v4726_v41  ;;  %v4864_v1 = vmul.f32 1.442695, %v4745_v23  ;;  %v4690_v18 = vpop.f32.mrf.mxu0  ;;  %v9226_v41 = vor.u32 %v9871_v48, %v9225_v54  ;;  %v9227_v23 = vld [vmem:[#allocation13 + $0x560] sm:$0xf0]  ;;  %v9314_v54 = vor.u32 %v9890_v58, %v9313_v47 }
 0x90e   :  { %v4709_v0 = vpop.f32.mrf.mxu1  ;;  %v10203_v62 = vpop.eup %10202  ;;  %4900 = vst [vmem:[#allocation4 + $0xe8] sm:$0xff] %v10201_v40  ;;  %v4874_v8 = vmul.f32 1.442695, %v4690_v18  ;;  %v9230_v18 = vor.u32 %v9867_v29, %v9227_v23  ;;  %v9866_v58 = vld [vmem:[#allocation13 + $0x534] sm:$0xf0] }
 0x90f   :  { %v4876_v9 = vmul.f32 1.442695, %v4709_v0  ;;  %v10205_v36 = vpop.eup %10204  ;;  %4901 = vst [vmem:[#allocation4 + $0xb8] sm:$0xff] %v10203_v62  ;;  %10208 = vpow2.f32 %v4862_v5  ;;  %v9233_v62 = vld [vmem:[#allocation13 + $0x548] sm:$0xf]  ;;  %6634 = vmatpush.bf16.msra.mxu0 %v9226_v41 }
 0x910   :  { %v10207_v15 = vpop.eup %10206  ;;  %4906 = vst [vmem:[#allocation4 + $0x38] sm:$0xff] %v10205_v36  ;;  %10210 = vpow2.f32 %v4864_v1  ;;  %6653 = vmatpush.bf16.msrb.mxu1 %v9230_v18  ;;  %v9877_v18 = vld [vmem:[#allocation13 + $0x594] sm:$0xf] }
 0x911   :  { %4907 = vst [vmem:[#allocation4 + $0x58] sm:$0xff] %v10207_v15  ;;  %10212 = vpow2.f32 %v4874_v8  ;;  %v9872_v8 = vld [vmem:[#allocation13 + $0x564] sm:$0xf0]  ;;  %v9868_v15 = vld [vmem:[#allocation13 + $0x54c] sm:$0xf] }
 0x912   :  { %10214 = vpow2.f32 %v4876_v9  ;;  %v9234_v36 = vor.u32 %v9872_v8, %v9233_v62  ;;  %v9238_v10 = vor.u32 %v9868_v15, %v9235_v4  ;;  %v9275_v8 = vld [vmem:[#allocation13 + $0x5b0] sm:$0xf0]  ;;  %v9882_v15 = vld [vmem:[#allocation13 + $0x5b4] sm:$0xf0]  ;;  %v9878_v4 = vld [vmem:[#allocation13 + $0x59c] sm:$0xf] }
 0x913   :  { %6635 = vmatpush.bf16.msra.mxu0 %v9194_v21  ;;  %v9873_v21 = vld [vmem:[#allocation13 + $0x56c] sm:$0xf0]  ;;  %v9286_v63 = vor.u32 %v9878_v4, %v9283_v51 }
 0x914   :  { %v4728_v37 = vpop.f32.mrf.mxu2  ;;  %v4747_v50 = vpop.f32.mrf.mxu3  ;;  %6672 = vmatpush.bf16.msrb.mxu2 %v9234_v36  ;;  %6691 = vmatpush.bf16.msrb.mxu3 %v9238_v10  ;;  %v9278_v36 = vor.u32 %v9877_v18, %v9275_v8  ;;  %v9242_v32 = vor.u32 %v9873_v21, %v9241_v43 }
 0x915   :  { %v10209_v20 = vpop.eup %10208  ;;  %v4878_v46 = vmul.f32 1.442695, %v4728_v37  ;;  %v4880_v39 = vmul.f32 1.442695, %v4747_v50  ;;  %v4759_v52 = vpop.f32.mrf.mxu0  ;;  %v9860_v37 = vld [vmem:[#allocation13 + $0x50c] sm:$0xf]  ;;  %6654 = vmatpush.bf16.msrb.mxu1 %v9198_v22 }
 0x916   :  { %v4778_v28 = vpop.f32.mrf.mxu1  ;;  %v10211_v27 = vpop.eup %10210  ;;  %4908 = vst [vmem:[#allocation4 + $0x40] sm:$0xff] %v10209_v20  ;;  %v4834_v31 = vmul.f32 1.442695, %v4759_v52  ;;  %v9203_v50 = vld [vmem:[#allocation13 + $0x528] sm:$0xf0]  ;;  %v9202_v20 = vor.u32 %v9864_v12, %v9201_v55 }
 0x917   :  { %v4836_v6 = vmul.f32 1.442695, %v4778_v28  ;;  %v10213_v57 = vpop.eup %10212  ;;  %4909 = vst [vmem:[#allocation4 + $0xc8] sm:$0xff] %v10211_v27  ;;  %10216 = vpow2.f32 %v4878_v46  ;;  %v9206_v46 = vor.u32 %v9860_v37, %v9203_v50  ;;  %v9869_v55 = vld [vmem:[#allocation13 + $0x554] sm:$0xf] }
 0x918   :  { %v10215_v53 = vpop.eup %10214  ;;  %4914 = vst [vmem:[#allocation4 + $0xa8] sm:$0x3] %v10213_v57  ;;  %10218 = vpow2.f32 %v4880_v39  ;;  %9183 = vmatmul.msk.bf16.vlgmr.msrb.gmra.mxu0 %vm870_vm5, %v12238_v13  ;;  %9185 = vmatmul.msk.bf16.vlgmr.msra.gmra.mxu1 %vm870_vm5, %v12238_v13  ;;  %v9243_v22 = vld [vmem:[#allocation13 + $0x570] sm:$0xf0]  ;;  %v9249_v12 = vld [vmem:[#allocation13 + $0x558] sm:$0xf] }
 0x919   :  { %4915 = vst [vmem:[#allocation4 + $0xd0] sm:$0x3] %v10215_v53  ;;  %10220 = vpow2.f32 %v4834_v31  ;;  %9187 = vmatmul.msk.bf16.vlgmr.msra.gmra.mxu2 %vm870_vm5, %v12238_v13  ;;  %9189 = vmatmul.msk.bf16.vlgmr.msra.gmra.mxu3 %vm870_vm5, %v12238_v13 }
 0x91a   :  { %10222 = vpow2.f32 %v4836_v6  ;;  %6673 = vmatpush.bf16.msrb.mxu2 %v9202_v20  ;;  %6692 = vmatpush.bf16.msrb.mxu3 %v9206_v46  ;;  %v9870_v20 = vld [vmem:[#allocation13 + $0x55c] sm:$0xf] }
 0x91b   :  { %6708 = vmatpush.bf16.msrb.mxu0 %v9306_v45  ;;  %6727 = vmatpush.bf16.msra.mxu1 %v9310_v59  ;;  %v9251_v46 = vld [vmem:[#allocation13 + $0x578] sm:$0xf0]  ;;  %v9214_v59 = vor.u32 %v9861_v2, %v9211_v16 }
 0x91c   :  { %v4797_v7 = vpop.f32.mrf.mxu2  ;;  %v4816_v11 = vpop.f32.mrf.mxu3 }
 0x91d   :  { %v10217_v17 = vpop.eup %10216  ;;  %v4838_v60 = vmul.f32 1.442695, %v4797_v7  ;;  %v4840_v30 = vmul.f32 1.442695, %v4816_v11  ;;  %v4761_v38 = vpop.f32.mrf.mxu0  ;;  %v9886_v7 = vld [vmem:[#allocation13 + $0x5dc] sm:$0xf] }
 0x91e   :  { %v4780_v19 = vpop.f32.mrf.mxu1  ;;  %v10219_v40 = vpop.eup %10218  ;;  %4916 = vst [vmem:[#allocation4 + $0x10] sm:$0x3] %v10217_v17  ;;  %v4850_v5 = vmul.f32 1.442695, %v4761_v38  ;;  %v9315_v11 = vld [vmem:[#allocation13 + $0x5f8] sm:$0xf0]  ;;  %6746 = vmatpush.bf16.msra.mxu2 %v9314_v54 }
 0x91f   :  { %v4852_v1 = vmul.f32 1.442695, %v4780_v19  ;;  %v10221_v0 = vpop.eup %10220  ;;  %4917 = vst [vmem:[#allocation4 + $0x28] sm:$0x3] %v10219_v40  ;;  %10224 = vpow2.f32 %v4838_v60  ;;  %v9318_v48 = vor.u32 %v9886_v7, %v9315_v11  ;;  %v9273_v19 = vld [vmem:[#allocation13 + $0x590] sm:$0xf]  ;;  %6728 = vmatpush.bf16.msra.mxu1 %v9278_v36 }
 0x920   :  { %v10223_v9 = vpop.eup %10222  ;;  %4894 = vst [vmem:[#allocation4 + $0x50] sm:$0xff] %v10221_v0  ;;  %10226 = vpow2.f32 %v4840_v30  ;;  %v9862_v7 = vld [vmem:[#allocation13 + $0x51c] sm:$0xf] }
 0x921   :  { %4895 = vst [vmem:[#allocation4 + $0x68] sm:$0xff] %v10223_v9  ;;  %10228 = vpow2.f32 %v4850_v5  ;;  %6765 = vmatpush.bf16.msra.mxu3 %v9318_v48  ;;  %v9281_v9 = vld [vmem:[#allocation13 + $0x598] sm:$0xf]  ;;  %v9219_v11 = vld [vmem:[#allocation13 + $0x538] sm:$0xf0] }
 0x922   :  { %10230 = vpow2.f32 %v4852_v1  ;;  %v9881_v1 = vld [vmem:[#allocation13 + $0x5ac] sm:$0xf0]  ;;  %v9282_v10 = vor.u32 %v9882_v15, %v9281_v9 }
 0x923   :  { %v9274_v62 = vor.u32 %v9881_v1, %v9273_v19 }
 0x924   :  { %v4799_v3 = vpop.f32.mrf.mxu2  ;;  %v4818_v44 = vpop.f32.mrf.mxu3  ;;  %6747 = vmatpush.bf16.msra.mxu2 %v9282_v10 }
 0x925   :  { %v10225_v39 = vpop.eup %10224  ;;  %v4854_v52 = vmul.f32 1.442695, %v4799_v3  ;;  %v4856_v28 = vmul.f32 1.442695, %v4818_v44  ;;  %v4764_v27 = vpop.f32.mrf.mxu0  ;;  %6709 = vmatpush.bf16.msrb.mxu0 %v9274_v62  ;;  %v9246_v3 = vor.u32 %v9869_v55, %v9243_v22  ;;  %v9874_v44 = vld [vmem:[#allocation13 + $0x574] sm:$0xf0]  ;;  %6766 = vmatpush.bf16.msra.mxu3 %v9286_v63 }
 0x926   :  { %v4783_v31 = vpop.f32.mrf.mxu1  ;;  %v10227_v6 = vpop.eup %10226  ;;  %4896 = vst [vmem:[#allocation4 + $0x30] sm:$0xff] %v10225_v39  ;;  %v4866_v57 = vmul.f32 1.442695, %v4764_v27 }
 0x927   :  { %v4868_v53 = vmul.f32 1.442695, %v4783_v31  ;;  %v10229_v25 = vpop.eup %10228  ;;  %4897 = vst [vmem:[#allocation4 + $0x48] sm:$0xff] %v10227_v6  ;;  %10232 = vpow2.f32 %v4854_v52  ;;  %v9209_v6 = vld [vmem:[#allocation13 + $0x510] sm:$0xf]  ;;  %6729 = vmatpush.bf16.msra.mxu1 %v9246_v3 }
 0x928   :  { %v10231_v56 = vpop.eup %10230  ;;  %4902 = vst [vmem:[#allocation4 + $0x60] sm:$0xff] %v10229_v25  ;;  %10234 = vpow2.f32 %v4856_v28  ;;  %9184 = vmatmul.msk.bf16.gmra.mxu0 %vm870_vm5, %v12250_v24  ;;  %9186 = vmatmul.msk.bf16.gmra.mxu1 %vm870_vm5, %v12250_v24  ;;  %v9254_v25 = vor.u32 %v9870_v20, %v9251_v46 }
 0x929   :  { %4903 = vst [vmem:[#allocation4 + $0xf0] sm:$0xff] %v10231_v56  ;;  %10236 = vpow2.f32 %v4866_v57  ;;  %9188 = vmatmul.msk.bf16.gmra.mxu2 %vm870_vm5, %v12250_v24  ;;  %9190 = vmatmul.msk.bf16.gmra.mxu3 %vm870_vm5, %v12250_v24  ;;  %v9865_v56 = vld [vmem:[#allocation13 + $0x52c] sm:$0xf0] }
 0x92a   :  { %10238 = vpow2.f32 %v4868_v53  ;;  %6710 = vmatpush.bf16.msrb.mxu0 %v9242_v32  ;;  %v9250_v53 = vor.u32 %v9874_v44, %v9249_v12  ;;  %v9210_v45 = vor.u32 %v9865_v56, %v9209_v6  ;;  %6767 = vmatpush.bf16.msra.mxu3 %v9254_v25 }
 0x92b   :  { %6730 = vmatpush.bf16.msra.mxu1 %v9214_v59  ;;  %v5663_v59 = vld [vmem:[#allocation4 + $0x18] sm:$0x3] }
 0x92c   :  { %v4802_v42 = vpop.f32.mrf.mxu2  ;;  %v4821_v35 = vpop.f32.mrf.mxu3  ;;  %6748 = vmatpush.bf16.msra.mxu2 %v9250_v53  ;;  %v5661_v53 = vld [vmem:[#allocation4] sm:$0x3] }
 0x92d   :  { %v10233_v29 = vpop.eup %10232  ;;  %v4870_v17 = vmul.f32 1.442695, %v4802_v42  ;;  %v4872_v60 = vmul.f32 1.442695, %v4821_v35  ;;  %v4766_v30 = vpop.f32.mrf.mxu0  ;;  %v9218_v42 = vor.u32 %v9866_v58, %v9217_v61  ;;  %v9222_v35 = vor.u32 %v9862_v7, %v9219_v11  ;;  %v5700_v58 = vld [vmem:[#allocation4 + $0xb0] sm:$0xc] }
 0x92e   :  { %v4785_v38 = vpop.f32.mrf.mxu1  ;;  %v10235_v41 = vpop.eup %10234  ;;  %4904 = vst [vmem:[#allocation4 + $0x8] sm:$0xff] %v10233_v29  ;;  %v4882_v23 = vmul.f32 1.442695, %v4766_v30  ;;  %6711 = vmatpush.bf16.msrb.mxu0 %v9210_v45 }
 0x92f   :  { %v4884_v40 = vmul.f32 1.442695, %v4785_v38  ;;  %v10237_v5 = vpop.eup %10236  ;;  %4905 = vst [vmem:[#allocation4 + $0x78] sm:$0xff] %v10235_v41  ;;  %10240 = vpow2.f32 %v4870_v17  ;;  %6768 = vmatpush.bf16.msra.mxu3 %v9222_v35 }
 0x930   :  { %v10239_v0 = vpop.eup %10238  ;;  %4910 = vst [vmem:[#allocation4 + $0xe0] sm:$0xff] %v10237_v5  ;;  %10242 = vpow2.f32 %v4872_v60  ;;  %6749 = vmatpush.bf16.msra.mxu2 %v9218_v42 }
 0x931   :  { %4911 = vst [vmem:[#allocation4 + $0x90] sm:$0xff] %v10239_v0  ;;  %10244 = vpow2.f32 %v4882_v23 }
 0x932   :  { %10246 = vpow2.f32 %v4884_v40 }
 0x934   :  { %v4804_v37 = vpop.f32.mrf.mxu2  ;;  %v4823_v50 = vpop.f32.mrf.mxu3 }
 0x935   :  { %v10241_v39 = vpop.eup %10240  ;;  %v4886_v52 = vmul.f32 1.442695, %v4804_v37  ;;  %v4888_v28 = vmul.f32 1.442695, %v4823_v50  ;;  %v12276_v27 = vpop.f32.mrf.mxu0 }
 0x936   :  { %v12278_v31 = vpop.f32.mrf.mxu1  ;;  %v10243_v57 = vpop.eup %10242  ;;  %4912 = vst [vmem:[#allocation4 + $0x70] sm:$0xff] %v10241_v39 }
 0x937   :  { %v10245_v26 = vpop.eup %10244  ;;  %4913 = vst [vmem:[#allocation4 + $0xc0] sm:$0xff] %v10243_v57  ;;  %10248 = vpow2.f32 %v4886_v52 }
 0x938   :  { %v10247_v47 = vpop.eup %10246  ;;  %4918 = vst [vmem:[#allocation4 + $0xa0] sm:$0x3] %v10245_v26  ;;  %10250 = vpow2.f32 %v4888_v28  ;;  %9319 = vmatmul.msk.bf16.vlgmr.msra.gmra.mxu0 %vm870_vm5, %v12238_v13  ;;  %9321 = vmatmul.msk.bf16.vlgmr.msrb.gmra.mxu1 %vm870_vm5, %v12238_v13 }
 0x939   :  { %4919 = vst [vmem:[#allocation4 + $0xf8] sm:$0x3] %v10247_v47  ;;  %9323 = vmatmul.msk.bf16.vlgmr.msrb.gmra.mxu2 %vm870_vm5, %v12238_v13  ;;  %9325 = vmatmul.msk.bf16.vlgmr.msrb.gmra.mxu3 %vm870_vm5, %v12238_v13  ;;  %v5662_v47 = vld [vmem:[#allocation4 + $0xd8] sm:$0x3] }
 0x93c   :  { %v5173_v54 = vpop.f32.mrf.mxu2  ;;  %v5192_v48 = vpop.f32.mrf.mxu3 }
 0x93d   :  { %v10249_v29 = vpop.eup %10248  ;;  %v5137_v17 = vpop.f32.mrf.mxu0 }
 0x93e   :  { %v5156_v60 = vpop.f32.mrf.mxu1  ;;  %v10251_v30 = vpop.eup %10250  ;;  %4920 = vst [vmem:[#allocation4 + $0x20] sm:$0x3] %v10249_v29 }
 0x93f   :  { %4921 = vst [vmem:[#allocation4 + $0x98] sm:$0x3] %v10251_v30  ;;  %v5701_v30 = vld [vmem:[#allocation4] sm:$0xc] }
 0x944   :  { %v12288_v38 = vpop.f32.mrf.mxu2  ;;  %v12290_v19 = vpop.f32.mrf.mxu3 }
 0x945   :  { %v12292_v41 = vpop.f32.mrf.mxu0 }
 0x946   :  { %v12294_v23 = vpop.f32.mrf.mxu1 }
 0x948   :  { %9320 = vmatmul.msk.bf16.gmra.mxu0 %vm870_vm5, %v12250_v24  ;;  %9322 = vmatmul.msk.bf16.gmra.mxu1 %vm870_vm5, %v12250_v24 }
 0x949   :  { %9324 = vmatmul.msk.bf16.gmra.mxu2 %vm870_vm5, %v12250_v24  ;;  %9326 = vmatmul.msk.bf16.gmra.mxu3 %vm870_vm5, %v12250_v24 }
 0x94c   :  { %v12304_v40 = vpop.f32.mrf.mxu2  ;;  %v12306_v5 = vpop.f32.mrf.mxu3 }
 0x94d   :  { %v12308_v1 = vpop.f32.mrf.mxu0 }
 0x94e   :  { %v12310_v18 = vpop.f32.mrf.mxu1 }
 0x954   :  { %v12312_v0 = vpop.f32.mrf.mxu2  ;;  %v12314_v62 = vpop.f32.mrf.mxu3 }
 0x955   :  { %v12316_v8 = vpop.f32.mrf.mxu0 }
 0x956   :  { %v12318_v9 = vpop.f32.mrf.mxu1 }
 0x958   :  { %9327 = vmatmul.msk.bf16.vlgmr.msrb.gmra.mxu0 %vm870_vm5, %v12238_v13  ;;  %9329 = vmatmul.msk.bf16.vlgmr.msra.gmra.mxu1 %vm870_vm5, %v12238_v13 }
 0x959   :  { %9331 = vmatmul.msk.bf16.vlgmr.msra.gmra.mxu2 %vm870_vm5, %v12238_v13  ;;  %9333 = vmatmul.msk.bf16.vlgmr.msra.gmra.mxu3 %vm870_vm5, %v12238_v13 }
 0x95c   :  { %v12328_v36 = vpop.f32.mrf.mxu2  ;;  %v12330_v15 = vpop.f32.mrf.mxu3 }
 0x95d   :  { %v12332_v4 = vpop.f32.mrf.mxu0 }
 0x95e   :  { %v12334_v10 = vpop.f32.mrf.mxu1 }
 0x964   :  { %v12336_v51 = vpop.f32.mrf.mxu2  ;;  %v12338_v43 = vpop.f32.mrf.mxu3 }
 0x965   :  { %v12340_v21 = vpop.f32.mrf.mxu0 }
 0x966   :  { %v12342_v63 = vpop.f32.mrf.mxu1 }
 0x968   :  { %9328 = vmatmul.msk.bf16.gmra.mxu0 %vm870_vm5, %v12250_v24  ;;  %9330 = vmatmul.msk.bf16.gmra.mxu1 %vm870_vm5, %v12250_v24 }
 0x969   :  { %9332 = vmatmul.msk.bf16.gmra.mxu2 %vm870_vm5, %v12250_v24  ;;  %9334 = vmatmul.msk.bf16.gmra.mxu3 %vm870_vm5, %v12250_v24  ;;  %v5660_v24 = vld [vmem:[#allocation4 + $0xb0] sm:$0x3] }
 0x96a   :  { %v5668_v2 = vmul.f32 0.0, %v5660_v24 }
 0x96c   :  { %v12352_v13 = vpop.f32.mrf.mxu2  ;;  %v12354_v32 = vpop.f32.mrf.mxu3 }
 0x96d   :  { %v12356_v55 = vpop.f32.mrf.mxu0 }
 0x96e   :  { %v12358_v22 = vpop.f32.mrf.mxu1 }
 0x974   :  { %v12360_v12 = vpop.f32.mrf.mxu2  ;;  %v12362_v37 = vpop.f32.mrf.mxu3 }
 0x975   :  { %v5453_v50 = vpop.f32.mrf.mxu0 }
 0x976   :  { %v5472_v3 = vpop.f32.mrf.mxu1  ;;  %v5596_v44 = vmul.f32 %v5453_v50, %v12276_v27  ;;  %v5669_v27 = vmul.f32 0.0, %v5661_v53  ;;  %v5670_v50 = vmul.f32 0.0, %v5662_v47 }
 0x977   :  { %v5597_v20 = vmul.f32 %v5472_v3, %v12278_v31  ;;  %v5671_v3 = vmul.f32 0.0, %v5663_v59  ;;  %v9954_v59 = vld [vmem:[%s12921_s24 + $0xf8] sm:$0xff] }
 0x978   :  { %5628 = vst [vmem:[#allocation5 + $0x80] sm:$0xff] %v5596_v44  ;;  %7435 = vmatpush.bf16.msrb.mxu3 %v9954_v59 }
 0x979   :  { %5629 = vst [vmem:[#allocation5 + $0xc8] sm:$0xff] %v5597_v20 }
 0x97c   :  { %v5491_v46 = vpop.f32.mrf.mxu2  ;;  %v5510_v39 = vpop.f32.mrf.mxu3 }
 0x97d   :  { %v5598_v52 = vmul.f32 %v5491_v46, %v5173_v54  ;;  %v5599_v28 = vmul.f32 %v5510_v39, %v5192_v48  ;;  %v5455_v6 = vpop.f32.mrf.mxu0 }
 0x97e   :  { %v5474_v57 = vpop.f32.mrf.mxu1  ;;  %v5604_v25 = vmul.f32 %v5455_v6, %v5137_v17 }
 0x97f   :  { %v5605_v56 = vmul.f32 %v5474_v57, %v5156_v60  ;;  %5630 = vst [vmem:[#allocation5 + $0xe8] sm:$0xff] %v5598_v52  ;;  %v5676_v26 = vld [vmem:[#allocation5 + $0x80] sm:$0x3]  ;;  %v5740_v60 = vld [vmem:[#allocation5 + $0x80] sm:$0xc] }
 0x980   :  { %5631 = vst [vmem:[#allocation5 + $0x78] sm:$0xff] %v5599_v28  ;;  %v5684_v45 = vadd.f32 %v5676_v26, %v5668_v2  ;;  %v5677_v31 = vld [vmem:[#allocation5 + $0xc8] sm:$0x3]  ;;  %v5741_v52 = vld [vmem:[#allocation5 + $0xc8] sm:$0xc] }
 0x981   :  { %5636 = vst [vmem:[#allocation5 + $0xd0] sm:$0xff] %v5604_v25  ;;  %v5685_v61 = vadd.f32 %v5677_v31, %v5669_v27  ;;  %v5764_v57 = vld [vmem:[#allocation4 + $0xb0] sm:$0x30]  ;;  %v5765_v25 = vld [vmem:[#allocation4] sm:$0x30]  ;;  %v9946_v31 = vld [vmem:[%s12921_s24 + $0xb8] sm:$0xff] }
 0x982   :  { %5637 = vst [vmem:[#allocation5 + $0xb0] sm:$0xff] %v5605_v56  ;;  %v5716_v16 = vrot.slane %v5684_v45, 6  ;;  %v5702_v56 = vld [vmem:[#allocation4 + $0xd8] sm:$0xc]  ;;  %v9937_v27 = vld [vmem:[%s12921_s24 + $0x70] sm:$0xff]  ;;  %7416 = vmatpush.bf16.msrb.mxu2 %v9946_v31 }
 0x983   :  { %5692 = vst [vmem:[#allocation6 + $0xb0] sm:$0x3] %v5684_v45  ;;  %v5717_v35 = vrot.slane %v5685_v61, 6  ;;  %v5703_v26 = vld [vmem:[#allocation4 + $0x18] sm:$0xc]  ;;  %v9929_v45 = vld [vmem:[%s12921_s24 + $0x30] sm:$0xff] }
 0x984   :  { %v5493_v7 = vpop.f32.mrf.mxu2  ;;  %v5512_v11 = vpop.f32.mrf.mxu3  ;;  %v5732_v42 = vmul.f32 %v5716_v16, %v5700_v58  ;;  %5693 = vst [vmem:[#allocation6 + $0xb8] sm:$0x3] %v5685_v61  ;;  %v5804_v58 = vld [vmem:[#allocation5 + $0x80] sm:$0x30] }
 0x985   :  { %v5606_v54 = vmul.f32 %v5493_v7, %v12288_v38  ;;  %v5607_v48 = vmul.f32 %v5512_v11, %v12290_v19  ;;  %v5458_v29 = vpop.f32.mrf.mxu0  ;;  %v5733_v46 = vmul.f32 %v5717_v35, %v5701_v30  ;;  %v9930_v38 = vld [vmem:[%s12921_s24 + $0x38] sm:$0xff] }
 0x986   :  { %v5477_v17 = vpop.f32.mrf.mxu1  ;;  %v5612_v44 = vmul.f32 %v5458_v29, %v12292_v41  ;;  %v5748_v24 = vadd.f32 %v5740_v60, %v5732_v42  ;;  %v5678_v39 = vld [vmem:[#allocation5 + $0xe8] sm:$0x3]  ;;  %v9938_v19 = vld [vmem:[%s12921_s24 + $0x78] sm:$0xff]  ;;  %7378 = vmatpush.bf16.msra.mxu0 %v9930_v38  ;;  %v5829_v38 = vld [vmem:[#allocation4] sm:$0xc0] }
 0x987   :  { %v5613_v20 = vmul.f32 %v5477_v17, %v12294_v23  ;;  %5638 = vst [vmem:[#allocation5 + $0x38] sm:$0xff] %v5606_v54  ;;  %v5686_v28 = vadd.f32 %v5678_v39, %v5670_v50  ;;  %v5679_v6 = vld [vmem:[#allocation5 + $0x78] sm:$0x3]  ;;  %v5749_v53 = vadd.f32 %v5741_v52, %v5733_v46  ;;  %7397 = vmatpush.bf16.msrb.mxu1 %v9938_v19  ;;  %v5743_v39 = vld [vmem:[#allocation5 + $0x78] sm:$0xc] }
 0x988   :  { %5639 = vst [vmem:[#allocation5 + $0x40] sm:$0xff] %v5607_v48  ;;  %v5780_v41 = vrot.slane %v5748_v24, 6  ;;  %v12376_v23 = vadd.f32 %v5679_v6, %v5671_v3  ;;  %v5742_v48 = vld [vmem:[#allocation5 + $0xe8] sm:$0xc]  ;;  %v5805_v3 = vld [vmem:[#allocation5 + $0xc8] sm:$0x30] }
 0x989   :  { %5644 = vst [vmem:[#allocation5 + $0x10] sm:$0xff] %v5612_v44  ;;  %v5718_v2 = vrot.slane %v5686_v28, 6  ;;  %v5781_v61 = vrot.slane %v5749_v53, 6  ;;  %v5828_v52 = vld [vmem:[#allocation4 + $0xb0] sm:$0xc0] }
 0x98a   :  { %5645 = vst [vmem:[#allocation5 + $0x70] sm:$0xff] %v5613_v20  ;;  %v5796_v16 = vmul.f32 %v5780_v41, %v5764_v57  ;;  %v5719_v47 = vrot.slane %v12376_v23, 6  ;;  %7379 = vmatpush.bf16.msra.mxu0 %v9929_v45  ;;  %v5766_v19 = vld [vmem:[#allocation4 + $0xd8] sm:$0x30]  ;;  %v5868_v57 = vld [vmem:[#allocation5 + $0x80] sm:$0xc0] }
 0x98b   :  { %5756 = vst [vmem:[#allocation6 + $0xb0] sm:$0xc] %v5748_v24  ;;  %v5734_v7 = vmul.f32 %v5718_v2, %v5702_v56  ;;  %v5797_v54 = vmul.f32 %v5781_v61, %v5765_v25  ;;  %7398 = vmatpush.bf16.msrb.mxu1 %v9937_v27  ;;  %v5806_v2 = vld [vmem:[#allocation5 + $0xe8] sm:$0x30] }
 0x98c   :  { %v5496_v11 = vpop.f32.mrf.mxu2  ;;  %v5515_v42 = vpop.f32.mrf.mxu3  ;;  %v5812_v35 = vadd.f32 %v5804_v58, %v5796_v16  ;;  %5757 = vst [vmem:[#allocation6 + $0xb8] sm:$0xc] %v5749_v53  ;;  %v5735_v29 = vmul.f32 %v5719_v47, %v5703_v26  ;;  %v5767_v26 = vld [vmem:[#allocation4 + $0x18] sm:$0x30]  ;;  %v5892_v16 = vld [vmem:[#allocation4 + $0x80] sm:$0x3] }
 0x98d   :  { %v5614_v17 = vmul.f32 %v5496_v11, %v12304_v40  ;;  %v5615_v60 = vmul.f32 %v5515_v42, %v12306_v5  ;;  %v5460_v30 = vpop.f32.mrf.mxu0  ;;  %5694 = vst [vmem:[#allocation6 + $0xc0] sm:$0x3] %v5686_v28  ;;  %v5750_v44 = vadd.f32 %v5742_v48, %v5734_v7  ;;  %v5813_v40 = vadd.f32 %v5805_v3, %v5797_v54  ;;  %v9928_v28 = vld [vmem:[%s12921_s24 + $0x28] sm:$0xff] }
 0x98e   :  { %v5479_v50 = vpop.f32.mrf.mxu1  ;;  %v5620_v20 = vmul.f32 %v5460_v30, %v12308_v1  ;;  %5820 = vst [vmem:[#allocation6 + $0xb0] sm:$0x30] %v5812_v35  ;;  %v5844_v46 = vrot.slane %v5812_v35, 6  ;;  %v12395_v5 = vadd.f32 %v5743_v39, %v5735_v29  ;;  %v9936_v1 = vld [vmem:[%s12921_s24 + $0x68] sm:$0xff]  ;;  %7380 = vmatpush.bf16.msra.mxu0 %v9928_v28  ;;  %v5807_v29 = vld [vmem:[#allocation5 + $0x78] sm:$0x30] }
 0x98f   :  { %v5621_v24 = vmul.f32 %v5479_v50, %v12310_v18  ;;  %5646 = vst [vmem:[#allocation5 + $0x50] sm:$0xff] %v5614_v17  ;;  %v5782_v6 = vrot.slane %v5750_v44, 6  ;;  %v5845_v41 = vrot.slane %v5813_v40, 6  ;;  %7399 = vmatpush.bf16.msrb.mxu1 %v9936_v1  ;;  %v5869_v58 = vld [vmem:[#allocation5 + $0xc8] sm:$0xc0] }
 0x990   :  { %5647 = vst [vmem:[#allocation5 + $0xa0] sm:$0xff] %v5615_v60  ;;  %v5860_v18 = vmul.f32 %v5844_v46, %v5828_v52  ;;  %v5783_v25 = vrot.slane %v12395_v5, 6  ;;  %v5830_v30 = vld [vmem:[#allocation4 + $0xd8] sm:$0xc0]  ;;  %v5932_v46 = vld [vmem:[#allocation5 + $0xd0] sm:$0x3] }
 0x991   :  { %5652 = vst [vmem:[#allocation5 + $0x88] sm:$0x3] %v5620_v20  ;;  %v5798_v53 = vmul.f32 %v5782_v6, %v5766_v19  ;;  %v5861_v45 = vmul.f32 %v5845_v41, %v5829_v38  ;;  %v5893_v20 = vld [vmem:[#allocation4 + $0x88] sm:$0x3]  ;;  %v5870_v39 = vld [vmem:[#allocation5 + $0xe8] sm:$0xc0] }
 0x992   :  { %5653 = vst [vmem:[#allocation5 + $0x48] sm:$0x3] %v5621_v24  ;;  %v5876_v56 = vadd.f32 %v5868_v57, %v5860_v18  ;;  %v5799_v31 = vmul.f32 %v5783_v25, %v5767_v26  ;;  %v5871_v6 = vld [vmem:[#allocation5 + $0x78] sm:$0xc0]  ;;  %v5956_v28 = vld [vmem:[#allocation4 + $0x80] sm:$0xc] }
 0x993   :  { %5821 = vst [vmem:[#allocation6 + $0xb8] sm:$0x30] %v5813_v40  ;;  %v5814_v27 = vadd.f32 %v5806_v2, %v5798_v53  ;;  %v5877_v54 = vadd.f32 %v5869_v58, %v5861_v45  ;;  %v9927_v18 = vld [vmem:[%s12921_s24 + $0x20] sm:$0xff]  ;;  %v5933_v41 = vld [vmem:[#allocation5 + $0xb0] sm:$0x3]  ;;  %v9944_v53 = vld [vmem:[%s12921_s24 + $0xa8] sm:$0xff] }
 0x994   :  { %v5498_v61 = vpop.f32.mrf.mxu2  ;;  %v5517_v47 = vpop.f32.mrf.mxu3  ;;  %5884 = vst [vmem:[#allocation6 + $0xb0] sm:$0xc0] %v5876_v56  ;;  %v5908_v59 = vrot.slane %v5876_v56, 6  ;;  %v12408_v50 = vadd.f32 %v5807_v29, %v5799_v31  ;;  %v9935_v38 = vld [vmem:[%s12921_s24 + $0x60] sm:$0xff]  ;;  %v9952_v25 = vld [vmem:[%s12921_s24 + $0xe8] sm:$0xff]  ;;  %7381 = vmatpush.bf16.msra.mxu0 %v9927_v18  ;;  %v9942_v18 = vld [vmem:[%s12921_s24 + $0x98] sm:$0xff] }
 0x995   :  { %v5622_v7 = vmul.f32 %v5498_v61, %v12312_v0  ;;  %v5623_v11 = vmul.f32 %v5517_v47, %v12314_v62  ;;  %v5529_v42 = vpop.f32.mrf.mxu0  ;;  %5758 = vst [vmem:[#allocation6 + $0xc0] sm:$0xc] %v5750_v44  ;;  %v5846_v48 = vrot.slane %v5814_v27, 6  ;;  %v5909_v0 = vrot.slane %v5877_v54, 6  ;;  %v5831_v62 = vld [vmem:[#allocation4 + $0x18] sm:$0xc0]  ;;  %7400 = vmatpush.bf16.msrb.mxu1 %v9935_v38 }
 0x996   :  { %v5548_v35 = vpop.f32.mrf.mxu1  ;;  %v5600_v17 = vmul.f32 %v5529_v42, %v12316_v8  ;;  %5822 = vst [vmem:[#allocation6 + $0xc0] sm:$0x30] %v5814_v27  ;;  %v5924_v3 = vmul.f32 %v5908_v59, %v5892_v16  ;;  %v5847_v44 = vrot.slane %v12408_v50, 6  ;;  %v9945_v8 = vld [vmem:[%s12921_s24 + $0xb0] sm:$0xff]  ;;  %v5957_v16 = vld [vmem:[#allocation4 + $0x88] sm:$0xc] }
 0x997   :  { %v5601_v60 = vmul.f32 %v5548_v35, %v12318_v9  ;;  %5654 = vst [vmem:[#allocation5 + $0xf8] sm:$0x3] %v5622_v7  ;;  %v5862_v24 = vmul.f32 %v5846_v48, %v5830_v30  ;;  %v9953_v9 = vld [vmem:[%s12921_s24 + $0xf0] sm:$0xff]  ;;  %v5925_v1 = vmul.f32 %v5909_v0, %v5893_v20  ;;  %7417 = vmatpush.bf16.msrb.mxu2 %v9945_v8  ;;  %v5894_v61 = vld [vmem:[#allocation4 + $0xe8] sm:$0x3]  ;;  %v9950_v38 = vld [vmem:[%s12921_s24 + $0xd8] sm:$0xff] }
 0x998   :  { %5655 = vst [vmem:[#allocation5 + $0xc0] sm:$0x3] %v5623_v11  ;;  %v12411_v52 = vadd.f32 %v5932_v46, %v5924_v3  ;;  %v5863_v19 = vmul.f32 %v5847_v44, %v5831_v62  ;;  %7436 = vmatpush.bf16.msrb.mxu3 %v9953_v9  ;;  %v5996_v11 = vld [vmem:[#allocation5 + $0xd0] sm:$0xc]  ;;  %v9951_v3 = vld [vmem:[%s12921_s24 + $0xe0] sm:$0xff] }
 0x999   :  { %5632 = vst [vmem:[#allocation5 + $0x8] sm:$0xff] %v5600_v17  ;;  %v5878_v40 = vadd.f32 %v5870_v39, %v5862_v24  ;;  %v12432_v2 = vadd.f32 %v5933_v41, %v5925_v1  ;;  %v5997_v0 = vld [vmem:[#allocation5 + $0xb0] sm:$0xc]  ;;  %v5935_v8 = vld [vmem:[#allocation5 + $0x40] sm:$0x3] }
 0x99a   :  { %5633 = vst [vmem:[#allocation5 + $0x90] sm:$0xff] %v5601_v60  ;;  %v5972_v57 = vrot.slane %v12411_v52, 6  ;;  %v5879_v27 = vadd.f32 %v5871_v6, %v5863_v19  ;;  %v5934_v60 = vld [vmem:[#allocation5 + $0x38] sm:$0x3]  ;;  %v9925_v62 = vld [vmem:[%s12921_s24 + $0x10] sm:$0xff] }
 0x99b   :  { %5885 = vst [vmem:[#allocation6 + $0xb8] sm:$0xc0] %v5877_v54  ;;  %v5910_v56 = vrot.slane %v5878_v40, 6  ;;  %v5973_v42 = vrot.slane %v12432_v2, 6  ;;  %7418 = vmatpush.bf16.msrb.mxu2 %v9944_v53  ;;  %v9933_v46 = vld [vmem:[%s12921_s24 + $0x50] sm:$0xff] }
 0x99c   :  { %v5567_v26 = vpop.f32.mrf.mxu2  ;;  %v5586_v45 = vpop.f32.mrf.mxu3  ;;  %5886 = vst [vmem:[#allocation6 + $0xc0] sm:$0xc0] %v5878_v40  ;;  %v5988_v31 = vmul.f32 %v5972_v57, %v5956_v28  ;;  %v5911_v29 = vrot.slane %v5879_v27, 6  ;;  %7437 = vmatpush.bf16.msrb.mxu3 %v9952_v25  ;;  %v6060_v40 = vld [vmem:[#allocation5 + $0xd0] sm:$0x30] }
 0x99d   :  { %v5602_v47 = vmul.f32 %v5567_v26, %v12328_v36  ;;  %v5603_v59 = vmul.f32 %v5586_v45, %v12330_v15  ;;  %v5531_v58 = vpop.f32.mrf.mxu0  ;;  %5695 = vst [vmem:[#allocation6 + $0x10] sm:$0x3] %v12376_v23  ;;  %v5926_v35 = vmul.f32 %v5910_v56, %v5894_v61  ;;  %v9926_v36 = vld [vmem:[%s12921_s24 + $0x18] sm:$0xff]  ;;  %v6020_v23 = vld [vmem:[#allocation4 + $0x80] sm:$0x30] }
 0x99e   :  { %v5550_v7 = vpop.f32.mrf.mxu1  ;;  %v5608_v54 = vmul.f32 %v5531_v58, %v12332_v4  ;;  %5759 = vst [vmem:[#allocation6 + $0x10] sm:$0xc] %v12395_v5  ;;  %v6004_v17 = vadd.f32 %v5996_v11, %v5988_v31  ;;  %v9934_v15 = vld [vmem:[%s12921_s24 + $0x58] sm:$0xff]  ;;  %v5989_v4 = vmul.f32 %v5973_v42, %v5957_v16  ;;  %v9943_v5 = vld [vmem:[%s12921_s24 + $0xa0] sm:$0xff]  ;;  %7382 = vmatpush.bf16.msra.mxu0 %v9926_v36  ;;  %v6021_v6 = vld [vmem:[#allocation4 + $0x88] sm:$0x30] }
 0x99f   :  { %v5609_v48 = vmul.f32 %v5550_v7, %v12334_v10  ;;  %5634 = vst [vmem:[#allocation5 + $0x58] sm:$0xff] %v5602_v47  ;;  %v12447_v30 = vadd.f32 %v5934_v60, %v5926_v35  ;;  %v5895_v10 = vld [vmem:[#allocation4 + $0xb8] sm:$0x3]  ;;  %7401 = vmatpush.bf16.msrb.mxu1 %v9934_v15  ;;  %v5958_v28 = vld [vmem:[#allocation4 + $0xe8] sm:$0xc]  ;;  %7419 = vmatpush.bf16.msrb.mxu2 %v9943_v5 }
 0x9a0   :  { %5635 = vst [vmem:[#allocation5 + $0xa8] sm:$0xff] %v5603_v59  ;;  %v6036_v20 = vrot.slane %v6004_v17, 6  ;;  %v5927_v24 = vmul.f32 %v5911_v29, %v5895_v10  ;;  %v12461_v39 = vadd.f32 %v5997_v0, %v5989_v4  ;;  %7438 = vmatpush.bf16.msrb.mxu3 %v9951_v3  ;;  %v5959_v56 = vld [vmem:[#allocation4 + $0xb8] sm:$0xc]  ;;  %v6084_v47 = vld [vmem:[#allocation4 + $0x80] sm:$0xc0] }
 0x9a1   :  { %5640 = vst [vmem:[#allocation5 + $0xe0] sm:$0xff] %v5608_v54  ;;  %v5974_v44 = vrot.slane %v12447_v30, 6  ;;  %v5998_v58 = vld [vmem:[#allocation5 + $0x38] sm:$0xc]  ;;  %v6061_v11 = vld [vmem:[#allocation5 + $0xb0] sm:$0x30] }
 0x9a2   :  { %5641 = vst [vmem:[#allocation5 + $0x60] sm:$0xff] %v5609_v48  ;;  %v6052_v9 = vmul.f32 %v6036_v20, %v6020_v23  ;;  %v12464_v1 = vadd.f32 %v5935_v8, %v5927_v24  ;;  %v6037_v19 = vrot.slane %v12461_v39, 6  ;;  %7383 = vmatpush.bf16.msra.mxu0 %v9925_v62  ;;  %v6085_v29 = vld [vmem:[#allocation4 + $0x88] sm:$0xc0]  ;;  %v5999_v36 = vld [vmem:[#allocation5 + $0x40] sm:$0xc] }
 0x9a3   :  { %5823 = vst [vmem:[#allocation6 + $0x10] sm:$0x30] %v12408_v50  ;;  %v5990_v57 = vmul.f32 %v5974_v44, %v5958_v28  ;;  %7402 = vmatpush.bf16.msrb.mxu1 %v9933_v46  ;;  %v9924_v50 = vld [vmem:[%s12921_s24 + $0x8] sm:$0xff]  ;;  %7420 = vmatpush.bf16.msrb.mxu2 %v9942_v18  ;;  %v6124_v15 = vld [vmem:[#allocation5 + $0xd0] sm:$0xc0]  ;;  %v9923_v4 = vld [vmem:[%s12921_s24] sm:$0xff] }
 0x9a4   :  { %v5569_v41 = vpop.f32.mrf.mxu2  ;;  %v5588_v53 = vpop.f32.mrf.mxu3  ;;  %5887 = vst [vmem:[#allocation6 + $0x10] sm:$0xc0] %v5879_v27  ;;  %v6068_v25 = vadd.f32 %v6060_v40, %v6052_v9  ;;  %v5975_v26 = vrot.slane %v12464_v1, 6  ;;  %v9932_v27 = vld [vmem:[%s12921_s24 + $0x48] sm:$0xff]  ;;  %v6053_v59 = vmul.f32 %v6037_v19, %v6021_v6  ;;  %7439 = vmatpush.bf16.msrb.mxu3 %v9950_v38  ;;  %v9931_v10 = vld [vmem:[%s12921_s24 + $0x40] sm:$0xff] }
 0x9a5   :  { %v5610_v45 = vmul.f32 %v5569_v41, %v12336_v51  ;;  %v5611_v31 = vmul.f32 %v5588_v53, %v12338_v43  ;;  %v5534_v16 = vpop.f32.mrf.mxu0  ;;  %5948 = vst [vmem:[#allocation6 + $0x58] sm:$0x3] %v12411_v52  ;;  %v12486_v42 = vadd.f32 %v5998_v58, %v5990_v57  ;;  %v9941_v52 = vld [vmem:[%s12921_s24 + $0x90] sm:$0xff]  ;;  %v9940_v20 = vld [vmem:[%s12921_s24 + $0x88] sm:$0xff]  ;;  %v6062_v24 = vld [vmem:[#allocation5 + $0x38] sm:$0x30] }
 0x9a6   :  { %v5553_v61 = vpop.f32.mrf.mxu1  ;;  %v5616_v51 = vmul.f32 %v5534_v16, %v12340_v21  ;;  %6012 = vst [vmem:[#allocation6 + $0x58] sm:$0xc] %v6004_v17  ;;  %v6100_v7 = vrot.slane %v6068_v25, 6  ;;  %v12488_v35 = vadd.f32 %v6061_v11, %v6053_v59  ;;  %v9949_v21 = vld [vmem:[%s12921_s24 + $0xd0] sm:$0xff]  ;;  %v5991_v54 = vmul.f32 %v5975_v26, %v5959_v56  ;;  %v6022_v17 = vld [vmem:[#allocation4 + $0xe8] sm:$0x30]  ;;  %7384 = vmatpush.bf16.msra.mxu0 %v9924_v50 }
 0x9a7   :  { %v5617_v43 = vmul.f32 %v5553_v61, %v12342_v63  ;;  %5642 = vst [vmem:[#allocation5 + $0x18] sm:$0xff] %v5610_v45  ;;  %v5664_v63 = vld [vmem:[#allocation4 + $0x50] sm:$0x3]  ;;  %v6038_v60 = vrot.slane %v12486_v42, 6  ;;  %7403 = vmatpush.bf16.msrb.mxu1 %v9932_v27  ;;  %7421 = vmatpush.bf16.msrb.mxu2 %v9941_v52  ;;  %v9948_v44 = vld [vmem:[%s12921_s24 + $0xc8] sm:$0xff]  ;;  %v9939_v58 = vld [vmem:[%s12921_s24 + $0x80] sm:$0xff] }
 0x9a8   :  { %5643 = vst [vmem:[#allocation5 + $0x68] sm:$0xff] %v5611_v31  ;;  %v6116_v48 = vmul.f32 %v6100_v7, %v6084_v47  ;;  %v6101_v23 = vrot.slane %v12488_v35, 6  ;;  %v12504_v5 = vadd.f32 %v5999_v36, %v5991_v54  ;;  %v5672_v62 = vmul.f32 0.0, %v5664_v63  ;;  %7440 = vmatpush.bf16.msrb.mxu3 %v9949_v21  ;;  %v6023_v8 = vld [vmem:[#allocation4 + $0xb8] sm:$0x30] }
 0x9a9   :  { %5648 = vst [vmem:[#allocation5 + $0xd8] sm:$0xff] %v5616_v51  ;;  %v6054_v0 = vmul.f32 %v6038_v60, %v6022_v17  ;;  %v5680_v40 = vld [vmem:[#allocation5 + $0x8] sm:$0x3]  ;;  %v6125_v38 = vld [vmem:[#allocation5 + $0xb0] sm:$0xc0]  ;;  %v9970_v11 = vld [vmem:[%s12921_s24 + $0x178] sm:$0xff] }
 0x9aa   :  { %5649 = vst [vmem:[#allocation5 + $0x30] sm:$0xff] %v5617_v43  ;;  %v6132_v3 = vadd.f32 %v6124_v15, %v6116_v48  ;;  %v6117_v46 = vmul.f32 %v6101_v23, %v6085_v29  ;;  %v6039_v9 = vrot.slane %v12504_v5, 6  ;;  %v12515_v57 = vadd.f32 %v5680_v40, %v5672_v62  ;;  %7385 = vmatpush.bf16.msra.mxu0 %v9923_v4  ;;  %v6086_v45 = vld [vmem:[#allocation4 + $0xe8] sm:$0xc0]  ;;  %v6148_v31 = vld [vmem:[#allocation4 + $0x38] sm:$0x3] }
 0x9ab   :  { %6076 = vst [vmem:[#allocation6 + $0x58] sm:$0x30] %v6068_v25  ;;  %v12513_v19 = vadd.f32 %v6062_v24, %v6054_v0  ;;  %7404 = vmatpush.bf16.msrb.mxu1 %v9931_v10  ;;  %v5665_v16 = vld [vmem:[#allocation4 + $0x68] sm:$0x3]  ;;  %v6149_v47 = vld [vmem:[#allocation4 + $0x58] sm:$0x3]  ;;  %7422 = vmatpush.bf16.msrb.mxu2 %v9940_v20 }
 0x9ac   :  { %v5572_v6 = vpop.f32.mrf.mxu2  ;;  %v5591_v28 = vpop.f32.mrf.mxu3  ;;  %6140 = vst [vmem:[#allocation6 + $0x58] sm:$0xc0] %v6132_v3  ;;  %v6164_v18 = vrot.slane %v6132_v3, 6  ;;  %v6133_v26 = vadd.f32 %v6125_v38, %v6117_v46  ;;  %v6055_v27 = vmul.f32 %v6039_v9, %v6023_v8  ;;  %7441 = vmatpush.bf16.msrb.mxu3 %v9948_v44  ;;  %v6126_v51 = vld [vmem:[#allocation5 + $0x38] sm:$0xc0]  ;;  %v5720_v48 = vrot.slane %v12515_v57, 6 }
 0x9ad   :  { %v5618_v41 = vmul.f32 %v5572_v6, %v12352_v13  ;;  %v5619_v53 = vmul.f32 %v5591_v28, %v12354_v32  ;;  %v5536_v25 = vpop.f32.mrf.mxu0  ;;  %5949 = vst [vmem:[#allocation6] sm:$0x3] %v12432_v2  ;;  %v6102_v13 = vrot.slane %v12513_v19, 6  ;;  %v6063_v32 = vld [vmem:[#allocation5 + $0x40] sm:$0x30]  ;;  %v5673_v29 = vmul.f32 0.0, %v5665_v16 }
 0x9ae   :  { %v5555_v56 = vpop.f32.mrf.mxu1  ;;  %v5624_v61 = vmul.f32 %v5536_v25, %v12356_v55  ;;  %6013 = vst [vmem:[#allocation6] sm:$0xc] %v12461_v39  ;;  %v6165_v59 = vrot.slane %v6133_v26, 6  ;;  %v6180_v2 = vmul.f32 %v6164_v18, %v6148_v31  ;;  %v9947_v55 = vld [vmem:[%s12921_s24 + $0xc0] sm:$0xff]  ;;  %v12533_v43 = vadd.f32 %v6063_v32, %v6055_v27  ;;  %v6188_v7 = vld [vmem:[#allocation5 + $0x10] sm:$0x3] }
 0x9af   :  { %v5625_v50 = vmul.f32 %v5555_v56, %v12358_v22  ;;  %5650 = vst [vmem:[#allocation5 + $0x20] sm:$0xff] %v5618_v41  ;;  %v9962_v22 = vld [vmem:[%s12921_s24 + $0x138] sm:$0xff]  ;;  %v6118_v39 = vmul.f32 %v6102_v13, %v6086_v45  ;;  %v5704_v63 = vld [vmem:[#allocation4 + $0x50] sm:$0xc]  ;;  %v5681_v17 = vld [vmem:[#allocation5 + $0x90] sm:$0x3]  ;;  %7473 = vmatpush.bf16.msra.mxu1 %v9970_v11  ;;  %7423 = vmatpush.bf16.msrb.mxu2 %v9939_v58 }
 0x9b0   :  { %5651 = vst [vmem:[#allocation5 + $0xf0] sm:$0xff] %v5619_v53  ;;  %v6087_v52 = vld [vmem:[#allocation4 + $0xb8] sm:$0xc0]  ;;  %v12538_v21 = vadd.f32 %v6188_v7, %v6180_v2  ;;  %v6181_v54 = vmul.f32 %v6165_v59, %v6149_v47  ;;  %7454 = vmatpush.bf16.msrb.mxu0 %v9962_v22  ;;  %v6103_v36 = vrot.slane %v12533_v43, 6  ;;  %v6212_v15 = vld [vmem:[#allocation4 + $0x38] sm:$0xc]  ;;  %7442 = vmatpush.bf16.msrb.mxu3 %v9947_v55 }
 0x9b1   :  { %5656 = vst [vmem:[#allocation5 + $0xb8] sm:$0x3] %v5624_v61  ;;  %v6134_v60 = vadd.f32 %v6126_v51, %v6118_v39  ;;  %v6189_v23 = vld [vmem:[#allocation5 + $0x70] sm:$0x3]  ;;  %v6150_v3 = vld [vmem:[#allocation4 + $0x40] sm:$0x3]  ;;  %v12546_v20 = vadd.f32 %v5681_v17, %v5673_v29  ;;  %v5736_v40 = vmul.f32 %v5720_v48, %v5704_v63 }
 0x9b2   :  { %5657 = vst [vmem:[#allocation5] sm:$0x3] %v5625_v50  ;;  %v6228_v4 = vrot.slane %v12538_v21, 6  ;;  %v12544_v10 = vadd.f32 %v6189_v23, %v6181_v54  ;;  %v5666_v0 = vld [vmem:[#allocation4 + $0x30] sm:$0x3]  ;;  %v6119_v44 = vmul.f32 %v6103_v36, %v6087_v52  ;;  %v6781_v27 = vld [vmem:[#allocation6 + $0xb8] sm:$0xff] }
 0x9b3   :  { %6077 = vst [vmem:[#allocation6] sm:$0x30] %v12488_v35  ;;  %v6166_v46 = vrot.slane %v6134_v60, 6  ;;  %v6127_v8 = vld [vmem:[#allocation5 + $0x40] sm:$0xc0]  ;;  %v12558_v50 = vmul.f32 0.0, %v5666_v0 }
 0x9b4   :  { %v5574_v24 = vpop.f32.mrf.mxu2  ;;  %v5593_v62 = vpop.f32.mrf.mxu3  ;;  %6141 = vst [vmem:[#allocation6] sm:$0xc0] %v6133_v26  ;;  %v6213_v9 = vld [vmem:[#allocation4 + $0x58] sm:$0xc]  ;;  %v6244_v38 = vmul.f32 %v6228_v4, %v6212_v15  ;;  %v6252_v41 = vld [vmem:[#allocation5 + $0x10] sm:$0xc]  ;;  %v12553_v25 = vadd.f32 %v6127_v8, %v6119_v44 }
 0x9b5   :  { %v5626_v35 = vmul.f32 %v5574_v24, %v12360_v12  ;;  %v5627_v6 = vmul.f32 %v5593_v62, %v12362_v37  ;;  %v6637_v28 = vpop.f32.mrf.mxu0  ;;  %5950 = vst [vmem:[#allocation6 + $0x48] sm:$0x3] %v12447_v30  ;;  %v6229_v53 = vrot.slane %v12544_v10, 6  ;;  %v6253_v56 = vld [vmem:[#allocation5 + $0x70] sm:$0xc]  ;;  %v6182_v26 = vmul.f32 %v6166_v46, %v6150_v3  ;;  %v9986_v29 = vld [vmem:[%s12921_s24 + $0x1f8] sm:$0xff] }
 0x9b6   :  { %v6656_v18 = vpop.f32.mrf.mxu1  ;;  %6014 = vst [vmem:[#allocation6 + $0x48] sm:$0xc] %v12486_v42  ;;  %v6190_v45 = vld [vmem:[#allocation5 + $0x50] sm:$0x3]  ;;  %v5705_v31 = vld [vmem:[#allocation4 + $0x68] sm:$0xc]  ;;  %v12555_v12 = vadd.f32 %v6252_v41, %v6244_v38  ;;  %7511 = vmatpush.bf16.msra.mxu3 %v9986_v29 }
 0x9b7   :  { %5658 = vst [vmem:[#allocation5 + $0x28] sm:$0x3] %v5626_v35  ;;  %v6245_v37 = vmul.f32 %v6229_v53, %v6213_v9  ;;  %v6151_v16 = vld [vmem:[#allocation4 + $0xc8] sm:$0x3]  ;;  %v5744_v61 = vld [vmem:[#allocation5 + $0x8] sm:$0xc]  ;;  %v12561_v47 = vadd.f32 %v6190_v45, %v6182_v26  ;;  %v12587_v36 = vmul.f32 %v6781_v27, %v6656_v18 }
 0x9b8   :  { %v5721_v30 = vrot.slane %v12546_v20, 6  ;;  %5659 = vst [vmem:[#allocation5 + $0x98] sm:$0x3] %v5627_v6  ;;  %v6780_v13 = vld [vmem:[#allocation6 + $0xb0] sm:$0xff]  ;;  %v6167_v42 = vrot.slane %v12553_v25, 6  ;;  %v12566_v2 = vadd.f32 %v5744_v61, %v5736_v40  ;;  %v6292_v58 = vrot.slane %v12555_v12, 6 }
 0x9b9   :  { %v6276_v32 = vld [vmem:[#allocation4 + $0x38] sm:$0x30]  ;;  %v9961_v59 = vld [vmem:[%s12921_s24 + $0x130] sm:$0xff]  ;;  %6078 = vst [vmem:[#allocation6 + $0x48] sm:$0x30] %v12513_v19  ;;  %v12570_v55 = vadd.f32 %v6253_v56, %v6245_v37  ;;  %v12575_v11 = vmul.f32 %v6780_v13, %v6637_v28  ;;  %v6230_v63 = vrot.slane %v12561_v47, 6 }
 0x9ba   :  { %v6214_v22 = vld [vmem:[#allocation4 + $0x40] sm:$0xc]  ;;  %v9969_v39 = vld [vmem:[%s12921_s24 + $0x170] sm:$0xff]  ;;  %v5737_v51 = vmul.f32 %v5721_v30, %v5705_v31  ;;  %6142 = vst [vmem:[#allocation6 + $0x48] sm:$0xc0] %v6134_v60  ;;  %v6183_v48 = vmul.f32 %v6167_v42, %v6151_v16  ;;  %7455 = vmatpush.bf16.msrb.mxu0 %v9961_v59  ;;  %v9978_v19 = vld [vmem:[%s12921_s24 + $0x1b8] sm:$0xff]  ;;  %v6308_v60 = vmul.f32 %v6292_v58, %v6276_v32 }
 0x9bb   :  { %v5745_v7 = vld [vmem:[#allocation5 + $0x90] sm:$0xc]  ;;  %v6316_v52 = vld [vmem:[#allocation5 + $0x10] sm:$0x30]  ;;  %v6277_v54 = vld [vmem:[#allocation4 + $0x58] sm:$0x30]  ;;  %7474 = vmatpush.bf16.msra.mxu1 %v9969_v39  ;;  %7492 = vmatpush.bf16.msra.mxu2 %v9978_v19 }
 0x9bc   :  { %v9960_v17 = vld [vmem:[%s12921_s24 + $0x128] sm:$0xff]  ;;  %5951 = vst [vmem:[#allocation6 + $0x40] sm:$0x3] %v12464_v1  ;;  %v6293_v15 = vrot.slane %v12570_v55, 6  ;;  %v6254_v23 = vld [vmem:[#allocation5 + $0x50] sm:$0xc]  ;;  %v12594_v0 = vadd.f32 %v5745_v7, %v5737_v51  ;;  %v6675_v24 = vpop.f32.mrf.mxu2  ;;  %v6694_v46 = vpop.f32.mrf.mxu3  ;;  %v6246_v1 = vmul.f32 %v6230_v63, %v6214_v22  ;;  %v6324_v56 = vadd.f32 %v6316_v52, %v6308_v60 }
 0x9bd   :  { %v6191_v4 = vld [vmem:[#allocation5 + $0xa0] sm:$0x3]  ;;  %v9968_v3 = vld [vmem:[%s12921_s24 + $0x168] sm:$0xff]  ;;  %v6783_v44 = vld [vmem:[#allocation6 + $0x10] sm:$0xff]  ;;  %6015 = vst [vmem:[#allocation6 + $0x40] sm:$0xc] %v12504_v5  ;;  %v6639_v38 = vpop.f32.mrf.mxu0 }
 0x9be   :  { %v6782_v62 = vld [vmem:[#allocation6 + $0xc0] sm:$0xff]  ;;  %v6317_v8 = vld [vmem:[#allocation5 + $0x70] sm:$0x30]  ;;  %v12597_v9 = vadd.f32 %v6191_v4, %v6183_v48  ;;  %v5784_v6 = vrot.slane %v12566_v2, 6  ;;  %v12605_v18 = vmul.f32 %v6783_v44, %v6694_v46  ;;  %v6788_v41 = vld [vmem:[#allocation6 + $0x58] sm:$0xff]  ;;  %v6658_v5 = vpop.f32.mrf.mxu1  ;;  %v6309_v26 = vmul.f32 %v6293_v15, %v6277_v54  ;;  %7456 = vmatpush.bf16.msrb.mxu0 %v9960_v17 }
 0x9bf   :  { %v9977_v40 = vld [vmem:[%s12921_s24 + $0x1b0] sm:$0xff]  ;;  %v12603_v28 = vmul.f32 %v6782_v62, %v6675_v24  ;;  %v6789_v53 = vld [vmem:[#allocation6] sm:$0xff]  ;;  %6079 = vst [vmem:[#allocation6 + $0x40] sm:$0x30] %v12533_v43  ;;  %v6215_v45 = vld [vmem:[#allocation4 + $0xc8] sm:$0xc]  ;;  %v6820_v37 = vmul.f32 %v6788_v41, %v6639_v38  ;;  %v12612_v30 = vadd.f32 %v6254_v23, %v6246_v1  ;;  %7475 = vmatpush.bf16.msra.mxu1 %v9968_v3 }
 0x9c0   :  { %v5768_v35 = vld [vmem:[#allocation4 + $0x50] sm:$0x30]  ;;  %v6821_v16 = vmul.f32 %v6789_v53, %v6658_v5  ;;  %6143 = vst [vmem:[#allocation6 + $0x40] sm:$0xc0] %v12553_v25  ;;  %v6340_v61 = vld [vmem:[#allocation4 + $0x38] sm:$0xc0]  ;;  %v6325_v32 = vadd.f32 %v6317_v8, %v6309_v26  ;;  %7493 = vmatpush.bf16.msra.mxu2 %v9977_v40 }
 0x9c1   :  { %v9985_v31 = vld [vmem:[%s12921_s24 + $0x1f0] sm:$0xff]  ;;  %v6231_v13 = vrot.slane %v12597_v9, 6  ;;  %v5808_v27 = vld [vmem:[#allocation5 + $0x8] sm:$0x30]  ;;  %6204 = vst [vmem:[#allocation6 + $0xa0] sm:$0x3] %v12538_v21  ;;  %v5800_v58 = vmul.f32 %v5784_v6, %v5768_v35  ;;  %v6844_v25 = vpack.c.bf16 %v6820_v37, %v12575_v11 }
 0x9c2   :  { %v5769_v42 = vld [vmem:[#allocation4 + $0x68] sm:$0x30]  ;;  %v6356_v43 = vrot.slane %v6324_v56, 6  ;;  %v6278_v59 = vld [vmem:[#allocation4 + $0x40] sm:$0x30]  ;;  %v5785_v22 = vrot.slane %v12594_v0, 6  ;;  %v6845_v51 = vpack.c.bf16 %v6821_v16, %v12587_v36  ;;  %7512 = vmatpush.bf16.msra.mxu3 %v9985_v31 }
 0x9c3   :  { %v5682_v39 = vld [vmem:[#allocation5 + $0x58] sm:$0x3]  ;;  %6268 = vst [vmem:[#allocation6 + $0xa0] sm:$0xc] %v12555_v12  ;;  %v6380_v7 = vld [vmem:[#allocation5 + $0x10] sm:$0xc0]  ;;  %v6247_v63 = vmul.f32 %v6231_v13, %v6215_v45  ;;  %v12627_v12 = vadd.f32 %v5808_v27, %v5800_v58  ;;  %7386 = vmatmul.bf16.vlgmr.msra.gmra.mxu0 %v6844_v25 }
 0x9c4   :  { %v6341_v52 = vld [vmem:[#allocation4 + $0x58] sm:$0xc0]  ;;  %v6294_v54 = vrot.slane %v12612_v30, 6  ;;  %v9959_v21 = vld [vmem:[%s12921_s24 + $0x120] sm:$0xff]  ;;  %6332 = vst [vmem:[#allocation6 + $0xa0] sm:$0x30] %v6324_v56  ;;  %v6372_v11 = vmul.f32 %v6356_v43, %v6340_v61  ;;  %v5801_v17 = vmul.f32 %v5785_v22, %v5769_v42  ;;  %7405 = vmatmul.bf16.vlgmr.msrb.gmra.mxu1 %v6845_v51  ;;  %v12639_v62 = vadd.f32 %v5682_v39, %v12558_v50  ;;  %v6677_v35 = vpop.f32.mrf.mxu2  ;;  %v6696_v38 = vpop.f32.mrf.mxu3 }
 0x9c5   :  { %v9967_v48 = vld [vmem:[%s12921_s24 + $0x160] sm:$0xff]  ;;  %v6357_v19 = vrot.slane %v6325_v32, 6  ;;  %6205 = vst [vmem:[#allocation6 + $0x18] sm:$0x3] %v12544_v10  ;;  %v6381_v36 = vld [vmem:[#allocation5 + $0x70] sm:$0xc0]  ;;  %7457 = vmatpush.bf16.msrb.mxu0 %v9959_v21 }
 0x9c6   :  { %v6255_v29 = vld [vmem:[#allocation5 + $0xa0] sm:$0xc]  ;;  %v6310_v60 = vmul.f32 %v6294_v54, %v6278_v59  ;;  %v6318_v15 = vld [vmem:[#allocation5 + $0x50] sm:$0x30]  ;;  %v5832_v4 = vld [vmem:[#allocation4 + $0x50] sm:$0xc0]  ;;  %v6388_v46 = vadd.f32 %v6380_v7, %v6372_v11  ;;  %7476 = vmatpush.bf16.msra.mxu1 %v9967_v48 }
 0x9c7   :  { %v12630_v23 = vadd.f32 %v6255_v29, %v6247_v63  ;;  %v9976_v3 = vld [vmem:[%s12921_s24 + $0x1a8] sm:$0xff]  ;;  %6269 = vst [vmem:[#allocation6 + $0x18] sm:$0xc] %v12570_v55  ;;  %v6373_v10 = vmul.f32 %v6357_v19, %v6341_v52  ;;  %v5848_v8 = vrot.slane %v12627_v12, 6  ;;  %v5809_v1 = vld [vmem:[#allocation5 + $0x90] sm:$0x30] }
 0x9c8   :  { %v9984_v24 = vld [vmem:[%s12921_s24 + $0x1e8] sm:$0xff]  ;;  %v9958_v40 = vld [vmem:[%s12921_s24 + $0x118] sm:$0xff]  ;;  %6333 = vst [vmem:[#allocation6 + $0x18] sm:$0x30] %v6325_v32  ;;  %v6326_v50 = vadd.f32 %v6318_v15, %v6310_v60  ;;  %v12647_v53 = vadd.f32 %v5809_v1, %v5801_v17  ;;  %7494 = vmatpush.bf16.msra.mxu2 %v9976_v3  ;;  %v5722_v56 = vrot.slane %v12639_v62, 6  ;;  %v6791_v31 = vld [vmem:[#allocation6 + $0x40] sm:$0xff] }
 0x9c9   :  { %v6279_v44 = vld [vmem:[#allocation4 + $0xc8] sm:$0x30]  ;;  %v6295_v41 = vrot.slane %v12630_v23, 6  ;;  %v6404_v5 = vld [vmem:[#allocation4 + $0xa8] sm:$0x3]  ;;  %v6420_v37 = vrot.slane %v6388_v46, 6  ;;  %v6389_v16 = vadd.f32 %v6381_v36, %v6373_v10  ;;  %v5864_v13 = vmul.f32 %v5848_v8, %v5832_v4  ;;  %7513 = vmatpush.bf16.msra.mxu3 %v9984_v24  ;;  %7458 = vmatpush.bf16.msrb.mxu0 %v9958_v40  ;;  %v12676_v40 = vpop.f32.mrf.mxu0 }
 0x9ca   :  { %v6790_v6 = vld [vmem:[#allocation6 + $0x48] sm:$0xff]  ;;  %6396 = vst [vmem:[#allocation6 + $0xa0] sm:$0xc0] %v6388_v46  ;;  %v6342_v61 = vld [vmem:[#allocation4 + $0x40] sm:$0xc0]  ;;  %v9966_v42 = vld [vmem:[%s12921_s24 + $0x158] sm:$0xff]  ;;  %v6823_v32 = vmul.f32 %v6791_v31, %v6696_v38 }
 0x9cb   :  { %v5872_v55 = vld [vmem:[#allocation5 + $0x8] sm:$0xc0]  ;;  %v5667_v26 = vld [vmem:[#allocation4 + $0x48] sm:$0x3]  ;;  %v6822_v45 = vmul.f32 %v6790_v6, %v6677_v35  ;;  %6206 = vst [vmem:[#allocation6 + $0xf8] sm:$0x3] %v12561_v47  ;;  %v6311_v58 = vmul.f32 %v6295_v41, %v6279_v44  ;;  %v6436_v54 = vmul.f32 %v6420_v37, %v6404_v5  ;;  %7477 = vmatpush.bf16.msra.mxu1 %v9966_v42  ;;  %v12681_v5 = vpop.f32.mrf.mxu1 }
 0x9cc   :  { %v5833_v27 = vld [vmem:[#allocation4 + $0x68] sm:$0xc0]  ;;  %v6444_v43 = vld [vmem:[#allocation5 + $0x88] sm:$0x3]  ;;  %v6358_v59 = vrot.slane %v6326_v50, 6  ;;  %v5849_v39 = vrot.slane %v12647_v53, 6  ;;  %v12659_v63 = vadd.f32 %v5872_v55, %v5864_v13  ;;  %v6847_v48 = vpack.c.bf16 %v6823_v32, %v12605_v18 }
 0x9cd   :  { %v6405_v22 = vld [vmem:[#allocation4 + $0xd0] sm:$0x3]  ;;  %v9975_v25 = vld [vmem:[%s12921_s24 + $0x1a0] sm:$0xff]  ;;  %v6846_v51 = vpack.c.bf16 %v6822_v45, %v12603_v28  ;;  %6397 = vst [vmem:[#allocation6 + $0x18] sm:$0xc0] %v6389_v16  ;;  %v6421_v7 = vrot.slane %v6389_v16, 6  ;;  %v6452_v15 = vadd.f32 %v6444_v43, %v6436_v54 }
 0x9ce   :  { %v6319_v52 = vld [vmem:[#allocation5 + $0xa0] sm:$0x30]  ;;  %v6445_v21 = vld [vmem:[#allocation5 + $0x48] sm:$0x3]  ;;  %6270 = vst [vmem:[#allocation6 + $0xf8] sm:$0xc] %v12612_v30  ;;  %v6374_v11 = vmul.f32 %v6358_v59, %v6342_v61  ;;  %v5865_v28 = vmul.f32 %v5849_v39, %v5833_v27  ;;  %7443 = vmatmul.bf16.vlgmr.msrb.gmra.mxu3 %v6847_v48  ;;  %7495 = vmatpush.bf16.msra.mxu2 %v9975_v25 }
 0x9cf   :  { %v9983_v47 = vld [vmem:[%s12921_s24 + $0x1e0] sm:$0xff]  ;;  %v6382_v19 = vld [vmem:[#allocation5 + $0x50] sm:$0xc0]  ;;  %v6327_v29 = vadd.f32 %v6319_v52, %v6311_v58  ;;  %v5706_v17 = vld [vmem:[#allocation4 + $0x30] sm:$0xc]  ;;  %7424 = vmatmul.bf16.vlgmr.msrb.gmra.mxu2 %v6846_v51  ;;  %v6437_v4 = vmul.f32 %v6421_v7, %v6405_v22  ;;  %v5912_v3 = vrot.slane %v12659_v63, 6  ;;  %v12689_v58 = vpop.f32.mrf.mxu2 }
 0x9d0   :  { %v5683_v36 = vld [vmem:[#allocation5 + $0xa8] sm:$0x3]  ;;  %6334 = vst [vmem:[#allocation6 + $0xf8] sm:$0x30] %v6326_v50  ;;  %v6343_v60 = vld [vmem:[#allocation4 + $0xc8] sm:$0xc0]  ;;  %v6390_v18 = vadd.f32 %v6382_v19, %v6374_v11  ;;  %7514 = vmatpush.bf16.msra.mxu3 %v9983_v47 }
 0x9d1   :  { %v5873_v24 = vld [vmem:[#allocation5 + $0x90] sm:$0xc0]  ;;  %v5675_v46 = vmul.f32 0.0, %v5667_v26  ;;  %v5896_v10 = vld [vmem:[#allocation4 + $0x60] sm:$0x3]  ;;  %v6359_v30 = vrot.slane %v6327_v29, 6  ;;  %v6453_v6 = vadd.f32 %v6445_v21, %v6437_v4 }
 0x9d2   :  { %6207 = vst [vmem:[#allocation6 + $0xe8] sm:$0x3] %v12597_v9  ;;  %v12668_v44 = vadd.f32 %v5873_v24, %v5865_v28  ;;  %v9957_v8 = vld [vmem:[%s12921_s24 + $0x110] sm:$0xff]  ;;  %v6383_v35 = vld [vmem:[#allocation5 + $0xa0] sm:$0xc0]  ;;  %v5738_v9 = vmul.f32 %v5722_v56, %v5706_v17  ;;  %v6422_v55 = vrot.slane %v6390_v18, 6  ;;  %v5928_v37 = vmul.f32 %v5912_v3, %v5896_v10  ;;  %v12699_v10 = vpop.f32.mrf.mxu3 }
 0x9d3   :  { %v9965_v1 = vld [vmem:[%s12921_s24 + $0x150] sm:$0xff]  ;;  %6271 = vst [vmem:[#allocation6 + $0xe8] sm:$0xc] %v12630_v23  ;;  %v12679_v50 = vadd.f32 %v5683_v36, %v5675_v46  ;;  %v6375_v26 = vmul.f32 %v6359_v30, %v6343_v60  ;;  %v5746_v31 = vld [vmem:[#allocation5 + $0x58] sm:$0xc]  ;;  %7459 = vmatpush.bf16.msrb.mxu0 %v9957_v8  ;;  %v6796_v60 = vld [vmem:[#allocation6 + $0xa0] sm:$0xff] }
 0x9d4   :  { %v6406_v38 = vld [vmem:[#allocation4 + $0x10] sm:$0x3]  ;;  %6398 = vst [vmem:[#allocation6 + $0xf8] sm:$0xc0] %v6390_v18  ;;  %v5913_v45 = vrot.slane %v12668_v44, 6  ;;  %v12684_v23 = vadd.f32 %v5746_v31, %v5738_v9  ;;  %7478 = vmatpush.bf16.msra.mxu1 %v9965_v1 }
 0x9d5   :  { %v5897_v41 = vld [vmem:[#allocation4 + $0xf0] sm:$0x3]  ;;  %6335 = vst [vmem:[#allocation6 + $0xe8] sm:$0x30] %v6327_v29  ;;  %v5723_v16 = vrot.slane %v12679_v50, 6  ;;  %v6391_v13 = vadd.f32 %v6383_v35, %v6375_v26  ;;  %v6438_v27 = vmul.f32 %v6422_v55, %v6406_v38  ;;  %v9956_v55 = vld [vmem:[%s12921_s24 + $0x108] sm:$0xff]  ;;  %v6828_v26 = vmul.f32 %v6796_v60, %v12676_v40 }
 0x9d6   :  { %v5936_v56 = vld [vmem:[#allocation5 + $0xe0] sm:$0x3]  ;;  %v6446_v61 = vld [vmem:[#allocation5 + $0xf8] sm:$0x3]  ;;  %6460 = vst [vmem:[#allocation6 + $0xa8] sm:$0x3] %v6452_v15  ;;  %v5929_v59 = vmul.f32 %v5913_v45, %v5897_v41  ;;  %v6644_v45 = vpop.f32.mrf.mxu0 }
 0x9d7   :  { %v5770_v42 = vld [vmem:[#allocation4 + $0x30] sm:$0x30]  ;;  %v5707_v43 = vld [vmem:[#allocation4 + $0x48] sm:$0xc]  ;;  %v12687_v32 = vadd.f32 %v5936_v56, %v5928_v37  ;;  %6461 = vst [vmem:[#allocation6 + $0xf0] sm:$0x3] %v6453_v6  ;;  %v6454_v54 = vadd.f32 %v6446_v61, %v6438_v27  ;;  %v6663_v27 = vpop.f32.mrf.mxu1  ;;  %7460 = vmatpush.bf16.msrb.mxu0 %v9956_v55 }
 0x9d8   :  { %v6407_v22 = vld [vmem:[#allocation4 + $0x28] sm:$0x3]  ;;  %v5786_v39 = vrot.slane %v12684_v23, 6  ;;  %v5739_v25 = vmul.f32 %v5723_v16, %v5707_v43  ;;  %v5960_v51 = vld [vmem:[#allocation4 + $0x60] sm:$0xc]  ;;  %v6423_v52 = vrot.slane %v6391_v13, 6 }
 0x9d9   :  { %v5937_v7 = vld [vmem:[#allocation5 + $0x60] sm:$0x3]  ;;  %6399 = vst [vmem:[#allocation6 + $0xe8] sm:$0xc0] %v6391_v13  ;;  %v5747_v47 = vld [vmem:[#allocation5 + $0xa8] sm:$0xc] }
 0x9da   :  { %v5976_v21 = vrot.slane %v12687_v32, 6  ;;  %v12693_v48 = vadd.f32 %v5937_v7, %v5929_v59  ;;  %v6447_v11 = vld [vmem:[#allocation5 + $0xc0] sm:$0x3]  ;;  %5696 = vst [vmem:[#allocation6 + $0x28] sm:$0x3] %v12515_v57  ;;  %v5802_v19 = vmul.f32 %v5786_v39, %v5770_v42  ;;  %v12696_v28 = vadd.f32 %v5747_v47, %v5739_v25  ;;  %v6797_v15 = vld [vmem:[#allocation6 + $0x18] sm:$0xff] }
 0x9db   :  { %v5810_v29 = vld [vmem:[#allocation5 + $0x58] sm:$0x30]  ;;  %v6000_v17 = vld [vmem:[#allocation5 + $0xe0] sm:$0xc]  ;;  %v5961_v36 = vld [vmem:[#allocation4 + $0xf0] sm:$0xc]  ;;  %v6439_v4 = vmul.f32 %v6423_v52, %v6407_v22 }
 0x9dc   :  { %6462 = vst [vmem:[#allocation6 + $0x50] sm:$0x3] %v6454_v54  ;;  %v5771_v3 = vld [vmem:[#allocation4 + $0x48] sm:$0x30]  ;;  %v5992_v24 = vmul.f32 %v5976_v21, %v5960_v51  ;;  %v5977_v46 = vrot.slane %v12693_v48, 6  ;;  %v12702_v18 = vadd.f32 %v5810_v29, %v5802_v19  ;;  %v5787_v57 = vrot.slane %v12696_v28, 6 }
 0x9dd   :  { %5760 = vst [vmem:[#allocation6 + $0x28] sm:$0xc] %v12566_v2  ;;  %v6001_v30 = vld [vmem:[#allocation5 + $0x60] sm:$0xc]  ;;  %v6798_v8 = vld [vmem:[#allocation6 + $0xf8] sm:$0xff]  ;;  %v6455_v1 = vadd.f32 %v6447_v11, %v6439_v4  ;;  %v9964_v61 = vld [vmem:[%s12921_s24 + $0x148] sm:$0xff]  ;;  %v6682_v11 = vpop.f32.mrf.mxu2 }
 0x9de   :  { %5824 = vst [vmem:[#allocation6 + $0x28] sm:$0x30] %v12627_v12  ;;  %v5834_v35 = vld [vmem:[#allocation4 + $0x30] sm:$0xc0]  ;;  %v5811_v6 = vld [vmem:[#allocation5 + $0xa8] sm:$0x30]  ;;  %v12706_v38 = vadd.f32 %v6000_v17, %v5992_v24  ;;  %v5993_v9 = vmul.f32 %v5977_v46, %v5961_v36  ;;  %v6829_v12 = vmul.f32 %v6797_v15, %v12681_v5  ;;  %v5803_v16 = vmul.f32 %v5787_v57, %v5771_v3 }
 0x9df   :  { %v9974_v41 = vld [vmem:[%s12921_s24 + $0x198] sm:$0xff]  ;;  %v6804_v31 = vld [vmem:[#allocation6 + $0xa8] sm:$0x3]  ;;  %5888 = vst [vmem:[#allocation6 + $0x28] sm:$0xc0] %v12659_v63  ;;  %v5850_v37 = vrot.slane %v12702_v18, 6  ;;  %7479 = vmatpush.bf16.msra.mxu1 %v9964_v61  ;;  %v6830_v21 = vmul.f32 %v6798_v8, %v12689_v58 }
 0x9e0   :  { %v9982_v2 = vld [vmem:[%s12921_s24 + $0x1d8] sm:$0xff]  ;;  %v6024_v56 = vld [vmem:[#allocation4 + $0x60] sm:$0x30]  ;;  %v6836_v13 = vmul.f32 %v6804_v31, %v6644_v45  ;;  %v6805_v42 = vld [vmem:[#allocation6 + $0xf0] sm:$0x3]  ;;  %v6040_v40 = vrot.slane %v12706_v38, 6  ;;  %v12725_v43 = vadd.f32 %v6001_v30, %v5993_v9  ;;  %7496 = vmatpush.bf16.msra.mxu2 %v9974_v41  ;;  %v5819_v39 = vadd.f32 %v5811_v6, %v5803_v16 }
 0x9e1   :  { %6463 = vst [vmem:[#allocation6 + $0x88] sm:$0x3] %v6455_v1  ;;  %7515 = vmatpush.bf16.msra.mxu3 %v9982_v2  ;;  %v9973_v63 = vld [vmem:[%s12921_s24 + $0x190] sm:$0xff]  ;;  %v6837_v5 = vmul.f32 %v6805_v42, %v6663_v27  ;;  %v5866_v59 = vmul.f32 %v5850_v37, %v5834_v35  ;;  %v5874_v22 = vld [vmem:[#allocation5 + $0x58] sm:$0xc0]  ;;  %v6799_v3 = vld [vmem:[#allocation6 + $0xe8] sm:$0xff]  ;;  %v6701_v1 = vpop.f32.mrf.mxu3 }
 0x9e2   :  { %5697 = vst [vmem:[#allocation6 + $0x30] sm:$0x3] %v12546_v20  ;;  %v6025_v25 = vld [vmem:[#allocation4 + $0xf0] sm:$0x30]  ;;  %v6852_v7 = vpack.c.bf16 %v6836_v13, %v6828_v26  ;;  %v6056_v52 = vmul.f32 %v6040_v40, %v6024_v56  ;;  %v6064_v54 = vld [vmem:[#allocation5 + $0xe0] sm:$0x30]  ;;  %v6831_v41 = vmul.f32 %v6799_v3, %v12699_v10  ;;  %v12753_v13 = vpop.f32.mrf.mxu0 }
 0x9e3   :  { %v9981_v51 = vld [vmem:[%s12921_s24 + $0x1d0] sm:$0xff]  ;;  %5761 = vst [vmem:[#allocation6 + $0x30] sm:$0xc] %v12594_v0  ;;  %v6041_v47 = vrot.slane %v12725_v43, 6  ;;  %v6853_v20 = vpack.c.bf16 %v6837_v5, %v6829_v12  ;;  %v5882_v29 = vadd.f32 %v5874_v22, %v5866_v59  ;;  %v5851_v17 = vrot.slane %v5819_v39, 6  ;;  %v9963_v40 = vld [vmem:[%s12921_s24 + $0x140] sm:$0xff] }
 0x9e4   :  { %v6806_v19 = vld [vmem:[#allocation6 + $0x50] sm:$0x3]  ;;  %5825 = vst [vmem:[#allocation6 + $0x30] sm:$0x30] %v12647_v53  ;;  %7391 = vmatmul.bf16.gmra.mxu0 %v6852_v7  ;;  %v5835_v60 = vld [vmem:[#allocation4 + $0x48] sm:$0xc0]  ;;  %v12739_v15 = vadd.f32 %v6064_v54, %v6056_v52  ;;  %7497 = vmatpush.bf16.msra.mxu2 %v9973_v63 }
 0x9e5   :  { %v6838_v36 = vmul.f32 %v6806_v19, %v6682_v11  ;;  %5889 = vst [vmem:[#allocation6 + $0x30] sm:$0xc0] %v12668_v44  ;;  %v6057_v0 = vmul.f32 %v6041_v47, %v6025_v25  ;;  %v5898_v4 = vld [vmem:[#allocation4 + $0x8] sm:$0x3]  ;;  %7410 = vmatmul.bf16.gmra.mxu1 %v6853_v20  ;;  %v5914_v58 = vrot.slane %v5882_v29, 6  ;;  %v5867_v24 = vmul.f32 %v5851_v17, %v5835_v60  ;;  %v9979_v60 = vld [vmem:[%s12921_s24 + $0x1c0] sm:$0xff] }
 0x9e6   :  { %5698 = vst [vmem:[#allocation6 + $0xd0] sm:$0x3] %v12639_v62  ;;  %v6088_v46 = vld [vmem:[#allocation4 + $0x60] sm:$0xc0]  ;;  %v6065_v53 = vld [vmem:[#allocation5 + $0x60] sm:$0x30]  ;;  %7516 = vmatpush.bf16.msra.mxu3 %v9981_v51  ;;  %7480 = vmatpush.bf16.msra.mxu1 %v9963_v40 }
 0x9e7   :  { %v6854_v57 = vpack.c.bf16 %v6838_v36, %v6830_v21  ;;  %5762 = vst [vmem:[#allocation6 + $0xd0] sm:$0xc] %v12684_v23  ;;  %v5875_v44 = vld [vmem:[#allocation5 + $0xa8] sm:$0xc0]  ;;  %v6104_v30 = vrot.slane %v12739_v15, 6  ;;  %v12744_v8 = vadd.f32 %v6065_v53, %v6057_v0  ;;  %v5930_v62 = vmul.f32 %v5914_v58, %v5898_v4  ;;  %v12770_v21 = vpop.f32.mrf.mxu1  ;;  %v9971_v36 = vld [vmem:[%s12921_s24 + $0x180] sm:$0xff] }
 0x9e8   :  { %v6807_v35 = vld [vmem:[#allocation6 + $0x88] sm:$0x3]  ;;  %5826 = vst [vmem:[#allocation6 + $0xd0] sm:$0x30] %v12702_v18  ;;  %v5883_v6 = vadd.f32 %v5875_v44, %v5867_v24  ;;  %v6089_v9 = vld [vmem:[#allocation4 + $0xf0] sm:$0xc0] }
 0x9e9   :  { %v6839_v2 = vmul.f32 %v6807_v35, %v6701_v1  ;;  %5890 = vst [vmem:[#allocation6 + $0xd0] sm:$0xc0] %v5882_v29  ;;  %7429 = vmatmul.bf16.gmra.mxu2 %v6854_v57  ;;  %v6120_v55 = vmul.f32 %v6104_v30, %v6088_v46  ;;  %v6105_v23 = vrot.slane %v12744_v8, 6  ;;  %v5938_v26 = vld [vmem:[#allocation5 + $0x18] sm:$0x3]  ;;  %v9972_v54 = vld [vmem:[%s12921_s24 + $0x188] sm:$0xff] }
 0x9ea   :  { %5699 = vst [vmem:[#allocation6 + $0x68] sm:$0x3] %v12679_v50  ;;  %v5915_v12 = vrot.slane %v5883_v6, 6  ;;  %v6128_v45 = vld [vmem:[#allocation5 + $0xe0] sm:$0xc0]  ;;  %v12750_v31 = vadd.f32 %v5938_v26, %v5930_v62  ;;  %v9980_v47 = vld [vmem:[%s12921_s24 + $0x1c8] sm:$0xff]  ;;  %7498 = vmatpush.bf16.msra.mxu2 %v9972_v54  ;;  %v6715_v35 = vpop.f32.mrf.mxu0 }
 0x9eb   :  { %v6855_v37 = vpack.c.bf16 %v6839_v2, %v6831_v41  ;;  %5763 = vst [vmem:[#allocation6 + $0x68] sm:$0xc] %v12696_v28  ;;  %v6136_v18 = vadd.f32 %v6128_v45, %v6120_v55  ;;  %v6121_v16 = vmul.f32 %v6105_v23, %v6089_v9  ;;  %v6129_v56 = vld [vmem:[#allocation5 + $0x60] sm:$0xc0]  ;;  %v5962_v10 = vld [vmem:[#allocation4 + $0x8] sm:$0xc]  ;;  %7517 = vmatpush.bf16.msra.mxu3 %v9980_v47 }
 0x9ec   :  { %v5899_v61 = vld [vmem:[#allocation4 + $0x78] sm:$0x3]  ;;  %5827 = vst [vmem:[#allocation6 + $0x68] sm:$0x30] %v5819_v39  ;;  %v5978_v27 = vrot.slane %v12750_v31, 6  ;;  %v9955_v50 = vld [vmem:[%s12921_s24 + $0x100] sm:$0xff] }
 0x9ed   :  { %v5931_v42 = vmul.f32 %v5915_v12, %v5899_v61  ;;  %v6152_v28 = vld [vmem:[#allocation4 + $0xe0] sm:$0x3]  ;;  %5891 = vst [vmem:[#allocation6 + $0x68] sm:$0xc0] %v5883_v6  ;;  %7448 = vmatmul.bf16.gmra.mxu3 %v6855_v37  ;;  %v6168_v63 = vrot.slane %v6136_v18, 6  ;;  %v6137_v5 = vadd.f32 %v6129_v56, %v6121_v16  ;;  %7461 = vmatpush.bf16.msrb.mxu0 %v9955_v50  ;;  %v6784_v62 = vld [vmem:[#allocation6 + $0x28] sm:$0xff] }
 0x9ee   :  { %v5939_v59 = vld [vmem:[#allocation5 + $0x68] sm:$0x3]  ;;  %5952 = vst [vmem:[#allocation6 + $0x78] sm:$0x3] %v12687_v32  ;;  %v5994_v22 = vmul.f32 %v5978_v27, %v5962_v10  ;;  %v6002_v39 = vld [vmem:[#allocation5 + $0x18] sm:$0xc]  ;;  %7499 = vmatpush.bf16.msra.mxu2 %v9971_v36  ;;  %v6816_v37 = vmul.f32 %v6784_v62, %v12753_v13 }
 0x9ef   :  { %v5947_v25 = vadd.f32 %v5939_v59, %v5931_v42  ;;  %v6153_v51 = vld [vmem:[#allocation4 + $0x90] sm:$0x3]  ;;  %6016 = vst [vmem:[#allocation6 + $0x78] sm:$0xc] %v12706_v38  ;;  %v6169_v7 = vrot.slane %v6137_v5, 6  ;;  %v6184_v52 = vmul.f32 %v6168_v63, %v6152_v28  ;;  %7518 = vmatpush.bf16.msra.mxu3 %v9979_v60  ;;  %v6734_v61 = vpop.f32.mrf.mxu1 }
 0x9f0   :  { %6080 = vst [vmem:[#allocation6 + $0x78] sm:$0x30] %v12739_v15  ;;  %v6010_v32 = vadd.f32 %v6002_v39, %v5994_v22  ;;  %v6192_v11 = vld [vmem:[#allocation5 + $0xd8] sm:$0x3]  ;;  %v6026_v19 = vld [vmem:[#allocation4 + $0x8] sm:$0x30] }
 0x9f1   :  { %v5979_v20 = vrot.slane %v5947_v25, 6  ;;  %6144 = vst [vmem:[#allocation6 + $0x78] sm:$0xc0] %v6136_v18  ;;  %v5963_v38 = vld [vmem:[#allocation4 + $0x78] sm:$0xc]  ;;  %v6200_v29 = vadd.f32 %v6192_v11, %v6184_v52  ;;  %v6185_v17 = vmul.f32 %v6169_v7, %v6153_v51  ;;  %v12787_v18 = vpop.f32.mrf.mxu2  ;;  %v6785_v28 = vld [vmem:[#allocation6 + $0x30] sm:$0xff]  ;;  %v12790_v52 = vpop.f32.mrf.mxu3 }
 0x9f2   :  { %5953 = vst [vmem:[#allocation6 + $0xd8] sm:$0x3] %v12693_v48  ;;  %v6042_v15 = vrot.slane %v6010_v32, 6  ;;  %v6193_v4 = vld [vmem:[#allocation5 + $0x30] sm:$0x3]  ;;  %v6817_v13 = vmul.f32 %v6785_v28, %v12770_v21 }
 0x9f3   :  { %v5995_v0 = vmul.f32 %v5979_v20, %v5963_v38  ;;  %6017 = vst [vmem:[#allocation6 + $0xd8] sm:$0xc] %v12725_v43  ;;  %v6003_v3 = vld [vmem:[#allocation5 + $0x68] sm:$0xc]  ;;  %v6232_v58 = vrot.slane %v6200_v29, 6  ;;  %v12781_v24 = vadd.f32 %v6193_v4, %v6185_v17 }
 0x9f4   :  { %6081 = vst [vmem:[#allocation6 + $0xd8] sm:$0x30] %v12744_v8  ;;  %v6058_v46 = vmul.f32 %v6042_v15, %v6026_v19  ;;  %v6216_v57 = vld [vmem:[#allocation4 + $0xe0] sm:$0xc]  ;;  %v6217_v44 = vld [vmem:[#allocation4 + $0x90] sm:$0xc] }
 0x9f5   :  { %v6011_v53 = vadd.f32 %v6003_v3, %v5995_v0  ;;  %6145 = vst [vmem:[#allocation6 + $0xd8] sm:$0xc0] %v6137_v5  ;;  %v6066_v30 = vld [vmem:[#allocation5 + $0x18] sm:$0x30]  ;;  %v6248_v1 = vmul.f32 %v6232_v58, %v6216_v57  ;;  %v6233_v48 = vrot.slane %v12781_v24, 6 }
 0x9f6   :  { %5954 = vst [vmem:[#allocation6 + $0xe0] sm:$0x3] %v12750_v31  ;;  %v6074_v43 = vadd.f32 %v6066_v30, %v6058_v46  ;;  %v6256_v9 = vld [vmem:[#allocation5 + $0xd8] sm:$0xc]  ;;  %v6090_v8 = vld [vmem:[#allocation4 + $0x8] sm:$0xc0] }
 0x9f7   :  { %v6043_v6 = vrot.slane %v6011_v53, 6  ;;  %6018 = vst [vmem:[#allocation6 + $0xe0] sm:$0xc] %v6010_v32  ;;  %v6027_v41 = vld [vmem:[#allocation4 + $0x78] sm:$0x30]  ;;  %v6264_v2 = vadd.f32 %v6256_v9, %v6248_v1  ;;  %v6249_v55 = vmul.f32 %v6233_v48, %v6217_v44  ;;  %v6786_v9 = vld [vmem:[#allocation6 + $0xd0] sm:$0xff] }
 0x9f8   :  { %v6792_v23 = vld [vmem:[#allocation6 + $0x78] sm:$0xff]  ;;  %6082 = vst [vmem:[#allocation6 + $0xe0] sm:$0x30] %v6074_v43  ;;  %v6106_v26 = vrot.slane %v6074_v43, 6  ;;  %v6257_v45 = vld [vmem:[#allocation5 + $0x30] sm:$0xc] }
 0x9f9   :  { %v6059_v12 = vmul.f32 %v6043_v6, %v6027_v41  ;;  %v6824_v16 = vmul.f32 %v6792_v23, %v6715_v35  ;;  %5955 = vst [vmem:[#allocation6 + $0x80] sm:$0x3] %v5947_v25  ;;  %v6067_v31 = vld [vmem:[#allocation5 + $0x68] sm:$0x30]  ;;  %v6296_v56 = vrot.slane %v6264_v2, 6  ;;  %v6265_v10 = vadd.f32 %v6257_v45, %v6249_v55  ;;  %v6753_v1 = vpop.f32.mrf.mxu2 }
 0x9fa   :  { %v6122_v27 = vmul.f32 %v6106_v26, %v6090_v8  ;;  %6019 = vst [vmem:[#allocation6 + $0x80] sm:$0xc] %v6011_v53  ;;  %v6280_v50 = vld [vmem:[#allocation4 + $0xe0] sm:$0x30]  ;;  %v6281_v40 = vld [vmem:[#allocation4 + $0x90] sm:$0x30]  ;;  %v6818_v26 = vmul.f32 %v6786_v9, %v12787_v18 }
 0x9fb   :  { %v6075_v42 = vadd.f32 %v6067_v31, %v6059_v12  ;;  %v6848_v63 = vpack.c.bf16 %v6824_v16, %v6816_v37  ;;  %v6130_v5 = vld [vmem:[#allocation5 + $0x18] sm:$0xc0]  ;;  %6208 = vst [vmem:[#allocation6 + $0x90] sm:$0x3] %v6200_v29  ;;  %v6312_v59 = vmul.f32 %v6296_v56, %v6280_v50  ;;  %v6297_v22 = vrot.slane %v6265_v10, 6  ;;  %v6772_v56 = vpop.f32.mrf.mxu3 }
 0x9fc   :  { %v6793_v39 = vld [vmem:[#allocation6 + $0xd8] sm:$0xff]  ;;  %v6138_v51 = vadd.f32 %v6130_v5, %v6122_v27  ;;  %6272 = vst [vmem:[#allocation6 + $0x90] sm:$0xc] %v6264_v2  ;;  %v6154_v11 = vld [vmem:[#allocation4 + $0x70] sm:$0x3]  ;;  %v6787_v5 = vld [vmem:[#allocation6 + $0x68] sm:$0xff] }
 0x9fd   :  { %6083 = vst [vmem:[#allocation6 + $0x80] sm:$0x30] %v6075_v42  ;;  %v6107_v25 = vrot.slane %v6075_v42, 6  ;;  %v6320_v7 = vld [vmem:[#allocation5 + $0xd8] sm:$0x30]  ;;  %v6825_v54 = vmul.f32 %v6793_v39, %v6734_v61  ;;  %v6313_v20 = vmul.f32 %v6297_v22, %v6281_v40  ;;  %7462 = vmatmul.bf16.vlgmr.msrb.gmra.mxu0 %v6848_v63  ;;  %v6718_v40 = vpop.f32.mrf.mxu0 }
 0x9fe   :  { %v6091_v47 = vld [vmem:[#allocation4 + $0x78] sm:$0xc0]  ;;  %v6328_v32 = vadd.f32 %v6320_v7, %v6312_v59  ;;  %6146 = vst [vmem:[#allocation6 + $0xe0] sm:$0xc0] %v6138_v51  ;;  %v6170_v19 = vrot.slane %v6138_v51, 6  ;;  %v6819_v51 = vmul.f32 %v6787_v5, %v12790_v52  ;;  %v6737_v7 = vpop.f32.mrf.mxu1 }
 0x9ff   :  { %v6123_v38 = vmul.f32 %v6107_v25, %v6091_v47  ;;  %v6321_v29 = vld [vmem:[#allocation5 + $0x30] sm:$0x30]  ;;  %v6849_v17 = vpack.c.bf16 %v6825_v54, %v6817_v13  ;;  %v6131_v21 = vld [vmem:[#allocation5 + $0x68] sm:$0xc0]  ;;  %v6344_v0 = vld [vmem:[#allocation4 + $0xe0] sm:$0xc0] }
 0xa00   :  { %6336 = vst [vmem:[#allocation6 + $0x90] sm:$0x30] %v6328_v32  ;;  %v6360_v36 = vrot.slane %v6328_v32, 6  ;;  %v6329_v60 = vadd.f32 %v6321_v29, %v6313_v20  ;;  %v6345_v4 = vld [vmem:[#allocation4 + $0x90] sm:$0xc0]  ;;  %v6186_v3 = vmul.f32 %v6170_v19, %v6154_v11 }
 0xa01   :  { %v6139_v15 = vadd.f32 %v6131_v21, %v6123_v38  ;;  %6209 = vst [vmem:[#allocation6 + $0x20] sm:$0x3] %v12781_v24  ;;  %7481 = vmatmul.bf16.vlgmr.msra.gmra.mxu1 %v6849_v17  ;;  %v6194_v53 = vld [vmem:[#allocation5 + $0x20] sm:$0x3]  ;;  %v6384_v44 = vld [vmem:[#allocation5 + $0xd8] sm:$0xc0] }
 0xa02   :  { %v6376_v58 = vmul.f32 %v6360_v36, %v6344_v0  ;;  %6273 = vst [vmem:[#allocation6 + $0x20] sm:$0xc] %v6265_v10  ;;  %v6361_v46 = vrot.slane %v6329_v60, 6  ;;  %v6202_v30 = vadd.f32 %v6194_v53, %v6186_v3  ;;  %v6218_v43 = vld [vmem:[#allocation4 + $0x70] sm:$0xc] }
 0xa03   :  { %6147 = vst [vmem:[#allocation6 + $0x80] sm:$0xc0] %v6139_v15  ;;  %v6171_v57 = vrot.slane %v6139_v15, 6  ;;  %v6155_v6 = vld [vmem:[#allocation4 + $0xc0] sm:$0x3] }
 0xa04   :  { %v6392_v48 = vadd.f32 %v6384_v44, %v6376_v58  ;;  %6337 = vst [vmem:[#allocation6 + $0x20] sm:$0x30] %v6329_v60  ;;  %v6377_v35 = vmul.f32 %v6361_v46, %v6345_v4  ;;  %v6385_v62 = vld [vmem:[#allocation5 + $0x30] sm:$0xc0]  ;;  %v6234_v24 = vrot.slane %v6202_v30, 6 }
 0xa05   :  { %6210 = vst [vmem:[#allocation6 + $0x38] sm:$0x3] %v6202_v30  ;;  %v6187_v8 = vmul.f32 %v6171_v57, %v6155_v6  ;;  %v6794_v41 = vld [vmem:[#allocation6 + $0xe0] sm:$0xff]  ;;  %v6195_v23 = vld [vmem:[#allocation5 + $0xf0] sm:$0x3]  ;;  %v6720_v57 = vpop.f32.mrf.mxu0 }
 0xa06   :  { %6400 = vst [vmem:[#allocation6 + $0x90] sm:$0xc0] %v6392_v48  ;;  %v6424_v2 = vrot.slane %v6392_v48, 6  ;;  %v6393_v55 = vadd.f32 %v6385_v62, %v6377_v35  ;;  %v6826_v12 = vmul.f32 %v6794_v41, %v6753_v1  ;;  %v6250_v45 = vmul.f32 %v6234_v24, %v6218_v43  ;;  %v6408_v16 = vld [vmem:[#allocation4 + $0xa0] sm:$0x3]  ;;  %v6739_v6 = vpop.f32.mrf.mxu1 }
 0xa07   :  { %v6203_v37 = vadd.f32 %v6195_v23, %v6187_v8  ;;  %v6409_v31 = vld [vmem:[#allocation4 + $0xf8] sm:$0x3]  ;;  %v6258_v61 = vld [vmem:[#allocation5 + $0x20] sm:$0xc]  ;;  %v6449_v39 = vld [vmem:[#allocation5] sm:$0x3] }
 0xa08   :  { %6401 = vst [vmem:[#allocation6 + $0x20] sm:$0xc0] %v6393_v55  ;;  %v6425_v10 = vrot.slane %v6393_v55, 6  ;;  %v6440_v27 = vmul.f32 %v6424_v2, %v6408_v16  ;;  %v6448_v42 = vld [vmem:[#allocation5 + $0xb8] sm:$0x3]  ;;  %v6850_v50 = vpack.c.bf16 %v6826_v12, %v6818_v26  ;;  %v6266_v28 = vadd.f32 %v6258_v61, %v6250_v45 }
 0xa09   :  { %6211 = vst [vmem:[#allocation6 + $0x70] sm:$0x3] %v6203_v37  ;;  %v6235_v63 = vrot.slane %v6203_v37, 6  ;;  %v6219_v22 = vld [vmem:[#allocation4 + $0xc0] sm:$0xc] }
 0xa0a   :  { %v6795_v59 = vld [vmem:[#allocation6 + $0x80] sm:$0xff]  ;;  %v6456_v18 = vadd.f32 %v6448_v42, %v6440_v27  ;;  %v6441_v13 = vmul.f32 %v6425_v10, %v6409_v31  ;;  %6274 = vst [vmem:[#allocation6 + $0x38] sm:$0xc] %v6266_v28  ;;  %v6298_v54 = vrot.slane %v6266_v28, 6  ;;  %7500 = vmatmul.bf16.vlgmr.msra.gmra.mxu2 %v6850_v50  ;;  %v6282_v32 = vld [vmem:[#allocation4 + $0x70] sm:$0x30]  ;;  %v6756_v31 = vpop.f32.mrf.mxu2  ;;  %v6775_v50 = vpop.f32.mrf.mxu3 }
 0xa0b   :  { %v6827_v25 = vmul.f32 %v6795_v59, %v6772_v56  ;;  %v6251_v47 = vmul.f32 %v6235_v63, %v6219_v22  ;;  %v6259_v20 = vld [vmem:[#allocation5 + $0xf0] sm:$0xc]  ;;  %v6322_v17 = vld [vmem:[#allocation5 + $0x20] sm:$0x30]  ;;  %v6346_v4 = vld [vmem:[#allocation4 + $0x70] sm:$0xc0] }
 0xa0c   :  { %6464 = vst [vmem:[#allocation6 + $0xc8] sm:$0x3] %v6456_v18  ;;  %v6457_v11 = vadd.f32 %v6449_v39, %v6441_v13  ;;  %v6314_v38 = vmul.f32 %v6298_v54, %v6282_v32  ;;  %v6283_v52 = vld [vmem:[#allocation4 + $0xc0] sm:$0x30]  ;;  %v6323_v3 = vld [vmem:[#allocation5 + $0xf0] sm:$0x30] }
 0xa0d   :  { %v6851_v19 = vpack.c.bf16 %v6827_v25, %v6819_v51  ;;  %v6267_v29 = vadd.f32 %v6259_v20, %v6251_v47  ;;  %v6800_v60 = vld [vmem:[#allocation6 + $0x90] sm:$0xff]  ;;  %v6386_v1 = vld [vmem:[#allocation5 + $0x20] sm:$0xc0]  ;;  %v6410_v12 = vld [vmem:[#allocation4 + $0x20] sm:$0x3] }
 0xa0e   :  { %6465 = vst [vmem:[#allocation6 + $0x98] sm:$0x3] %v6457_v11  ;;  %v6330_v21 = vadd.f32 %v6322_v17, %v6314_v38  ;;  %v6832_v30 = vmul.f32 %v6800_v60, %v6718_v40  ;;  %v6347_v24 = vld [vmem:[#allocation4 + $0xc0] sm:$0xc0]  ;;  %v6387_v23 = vld [vmem:[#allocation5 + $0xf0] sm:$0xc0] }
 0xa0f   :  { %6275 = vst [vmem:[#allocation6 + $0x70] sm:$0xc] %v6267_v29  ;;  %v6299_v36 = vrot.slane %v6267_v29, 6  ;;  %7519 = vmatmul.bf16.vlgmr.msra.gmra.mxu3 %v6851_v19  ;;  %v6801_v58 = vld [vmem:[#allocation6 + $0x20] sm:$0xff]  ;;  %v6450_v16 = vld [vmem:[#allocation5 + $0x28] sm:$0x3] }
 0xa10   :  { %6338 = vst [vmem:[#allocation6 + $0x38] sm:$0x30] %v6330_v21  ;;  %v6362_v15 = vrot.slane %v6330_v21, 6  ;;  %v6833_v62 = vmul.f32 %v6801_v58, %v6737_v7  ;;  %v6411_v61 = vld [vmem:[#allocation4 + $0x98] sm:$0x3]  ;;  %v9597_v20 = vld [vmem:[%s12922_s11 + $0x70] sm:$0xff] }
 0xa11   :  { %v6315_v0 = vmul.f32 %v6299_v36, %v6283_v52  ;;  %v6451_v42 = vld [vmem:[#allocation5 + $0x98] sm:$0x3]  ;;  %v9596_v29 = vld [vmem:[%s12922_s11 + $0x68] sm:$0xff]  ;;  %v9595_v17 = vld [vmem:[%s12922_s11 + $0x60] sm:$0xff] }
 0xa12   :  { %v6378_v46 = vmul.f32 %v6362_v15, %v6346_v4  ;;  %v6758_v63 = vpop.f32.mrf.mxu2  ;;  %v6777_v39 = vpop.f32.mrf.mxu3  ;;  %v9598_v32 = vld [vmem:[%s12922_s11 + $0x78] sm:$0xff]  ;;  %v10025_v58 = vld [vmem:[%s12894_s14 + $0xd] ss:$0 sm:$0xff] }
 0xa13   :  { %v6331_v53 = vadd.f32 %v6323_v3, %v6315_v0  ;;  %v6808_v44 = vld [vmem:[#allocation6 + $0xc8] sm:$0x3]  ;;  %7603 = vmatpush.msra.mxu0 %v9598_v32  ;;  %v9594_v15 = vld [vmem:[%s12922_s11 + $0x58] sm:$0xff]  ;;  %v9593_v0 = vld [vmem:[%s12922_s11 + $0x50] sm:$0xff] }
 0xa14   :  { %v6840_v48 = vmul.f32 %v6808_v44, %v6720_v57  ;;  %v6394_v35 = vadd.f32 %v6386_v1, %v6378_v46  ;;  %v9592_v46 = vld [vmem:[%s12922_s11 + $0x48] sm:$0xff] }
 0xa15   :  { %6339 = vst [vmem:[#allocation6 + $0x70] sm:$0x30] %v6331_v53  ;;  %v6363_v43 = vrot.slane %v6331_v53, 6  ;;  %v6809_v9 = vld [vmem:[#allocation6 + $0x98] sm:$0x3]  ;;  %7604 = vmatpush.msra.mxu0 %v9597_v20  ;;  %v9591_v53 = vld [vmem:[%s12922_s11 + $0x40] sm:$0xff] }
 0xa16   :  { %v6856_v8 = vpack.c.bf16 %v6840_v48, %v6832_v30  ;;  %v6841_v41 = vmul.f32 %v6809_v9, %v6739_v6  ;;  %6402 = vst [vmem:[#allocation6 + $0x38] sm:$0xc0] %v6394_v35  ;;  %v6426_v2 = vrot.slane %v6394_v35, 6  ;;  %v6990_v30 = vmul.f32 %v10025_v58, %v11910_v34 }
 0xa17   :  { %v6379_v55 = vmul.f32 %v6363_v43, %v6347_v24  ;;  %7605 = vmatpush.msra.mxu0 %v9596_v29  ;;  %v6991_v6 = vmul.f32 %v10025_v58, %v11915_v49 }
 0xa18   :  { %v6857_v26 = vpack.c.bf16 %v6841_v41, %v6833_v62  ;;  %7467 = vmatmul.bf16.gmra.mxu0 %v6856_v8  ;;  %v6442_v37 = vmul.f32 %v6426_v2, %v6410_v12 }
 0xa19   :  { %v6395_v45 = vadd.f32 %v6387_v23, %v6379_v55  ;;  %7606 = vmatpush.msra.mxu0 %v9595_v17 }
 0xa1a   :  { %7486 = vmatmul.bf16.gmra.mxu1 %v6857_v26  ;;  %v6458_v10 = vadd.f32 %v6450_v16, %v6442_v37 }
 0xa1b   :  { %6403 = vst [vmem:[#allocation6 + $0x70] sm:$0xc0] %v6395_v45  ;;  %v6427_v56 = vrot.slane %v6395_v45, 6  ;;  %7607 = vmatpush.msra.mxu0 %v9594_v15  ;;  %v7563_v15 = vpop.permute.xlu0 %7562 }
 0xa1c   :  { %6466 = vst [vmem:[#allocation6 + $0x60] sm:$0x3] %v6458_v10 }
 0xa1d   :  { %v6443_v27 = vmul.f32 %v6427_v56, %v6411_v61  ;;  %v6802_v28 = vld [vmem:[#allocation6 + $0x38] sm:$0xff]  ;;  %7608 = vmatpush.msra.mxu0 %v9593_v0 }
 0xa1e   :  { %v6834_v59 = vmul.f32 %v6802_v28, %v6756_v31 }
 0xa1f   :  { %v6459_v40 = vadd.f32 %v6451_v42, %v6443_v27  ;;  %7609 = vmatpush.msra.mxu0 %v9592_v46  ;;  %v7559_v27 = vpop.permute.xlu1 %7558 }
 0xa21   :  { %6467 = vst [vmem:[#allocation6 + $0x8] sm:$0x3] %v6459_v40  ;;  %7610 = vmatpush.msra.mxu0 %v9591_v53 }
 0xa22   :  { %v6803_v18 = vld [vmem:[#allocation6 + $0x70] sm:$0xff] }
 0xa23   :  { %v6810_v5 = vld [vmem:[#allocation6 + $0x60] sm:$0x3]  ;;  %v6835_v25 = vmul.f32 %v6803_v18, %v6775_v50  ;;  %v7561_v18 = vpop.permute.xlu2 %7560 }
 0xa24   :  { %v6842_v22 = vmul.f32 %v6810_v5, %v6758_v63  ;;  %v6992_v63 = vmul.f32 %v10025_v58, %v11919_v14 }
 0xa26   :  { %v6858_v13 = vpack.c.bf16 %v6842_v22, %v6834_v59 }
 0xa28   :  { %v6811_v51 = vld [vmem:[#allocation6 + $0x8] sm:$0x3]  ;;  %7505 = vmatmul.bf16.gmra.mxu2 %v6858_v13 }
 0xa29   :  { %v6843_v7 = vmul.f32 %v6811_v51, %v6777_v39  ;;  %v6993_v51 = vmul.f32 %v10025_v58, %v11923_v33 }
 0xa2b   :  { %v6859_v54 = vpack.c.bf16 %v6843_v7, %v6835_v25 }
 0xa2d   :  { %7524 = vmatmul.bf16.gmra.mxu3 %v6859_v54 }
 0xa40   :  { %v7387_v47 = vpop.f32.mrf.mxu0 }
 0xa41   :  { %v7406_v11 = vpop.f32.mrf.mxu1  ;;  %v7388_v1 = vadd.f32 %v7387_v47, %v6990_v30 }
 0xa43   :  { %v7407_v43 = vadd.f32 %v7406_v11, %v7388_v1 }
 0xa48   :  { %v7389_v19 = vpop.f32.mrf.mxu0 }
 0xa49   :  { %v7408_v36 = vpop.f32.mrf.mxu1  ;;  %v7390_v8 = vadd.f32 %v7389_v19, %v6991_v6 }
 0xa4b   :  { %v7409_v55 = vadd.f32 %v7408_v36, %v7390_v8 }
 0xa51   :  { %v7444_v21 = vpop.f32.mrf.mxu3 }
 0xa52   :  { %v7425_v38 = vpop.f32.mrf.mxu2 }
 0xa53   :  { %v7426_v9 = vadd.f32 %v7425_v38, %v7407_v43 }
 0xa55   :  { %v7445_v41 = vadd.f32 %v7444_v21, %v7426_v9 }
 0xa59   :  { %v7446_v3 = vpop.f32.mrf.mxu3 }
 0xa5a   :  { %v7427_v60 = vpop.f32.mrf.mxu2 }
 0xa5b   :  { %v7428_v12 = vadd.f32 %v7427_v60, %v7409_v55 }
 0xa5d   :  { %v7447_v16 = vadd.f32 %v7446_v3, %v7428_v12 }
 0xa61   :  { %v7392_v52 = vpop.f32.mrf.mxu0 }
 0xa62   :  { %v7411_v4 = vpop.f32.mrf.mxu1  ;;  %v7393_v59 = vadd.f32 %v7392_v52, %v6992_v63 }
 0xa64   :  { %v7412_v39 = vadd.f32 %v7411_v4, %v7393_v59 }
 0xa69   :  { %v7394_v57 = vpop.f32.mrf.mxu0 }
 0xa6a   :  { %v7413_v35 = vpop.f32.mrf.mxu1  ;;  %v7395_v54 = vadd.f32 %v7394_v57, %v6993_v51  ;;  %v7565_v57 = vpop.permute.xlu1 %7564 }
 0xa6c   :  { %v7430_v44 = vpop.f32.mrf.mxu2  ;;  %v7414_v32 = vadd.f32 %v7413_v35, %v7395_v54 }
 0xa6d   :  { %v7431_v25 = vadd.f32 %v7430_v44, %v7412_v39 }
 0xa70   :  { %v7449_v48 = vpop.f32.mrf.mxu3 }
 0xa71   :  { %v7450_v47 = vadd.f32 %v7449_v48, %v7431_v25 }
 0xa74   :  { %v7432_v24 = vpop.f32.mrf.mxu2 }
 0xa75   :  { %v7433_v19 = vadd.f32 %v7432_v24, %v7414_v32  ;;  %v10362_v24 = vmov 32.0  }
 0xa76   :  { %10252 = vrcp.f32 %v10362_v24 }
 0xa78   :  { %v7451_v2 = vpop.f32.mrf.mxu3 }
 0xa79   :  { %v7452_v17 = vadd.f32 %v7451_v2, %v7433_v19 }
 0xa7a   :  { %v7463_v62 = vpop.f32.mrf.mxu0 }
 0xa7b   :  { %v7464_v23 = vadd.f32 %v7463_v62, %v7445_v41 }
 0xa7c   :  { %v10253_v8 = vpop.eup %10252 }
 0xa7d   :  { %v7637_v41 = vmul.f32 32.0, %v10253_v8  ;;  %vm7641_vm6 = vweird.f32 %v10253_v8 }
 0xa7e   :  { %v7482_v26 = vpop.f32.mrf.mxu1 }
 0xa7f   :  { %v7483_v45 = vadd.f32 %v7482_v26, %v7464_v23  ;;  %v7638_v2 = vsub.f32 1.0, %v7637_v41 }
 0xa81   :  { %v7639_v55 = vmul.f32 %v10253_v8, %v7638_v2 }
 0xa82   :  { %v7465_v37 = vpop.f32.mrf.mxu0 }
 0xa83   :  { %v7466_v56 = vadd.f32 %v7465_v37, %v7447_v16  ;;  %v7640_v23 = vadd.f32 %v10253_v8, %v7639_v55 }
 0xa85   :  { %v12834_v26 = vsel %vm7641_vm6, %v10253_v8, %v7640_v23 }
 0xa86   :  { %v7484_v49 = vpop.f32.mrf.mxu1 }
 0xa87   :  { %v7485_v42 = vadd.f32 %v7484_v49, %v7466_v56 }
 0xa8d   :  { %v7501_v34 = vpop.f32.mrf.mxu2 }
 0xa8e   :  { %v7502_v31 = vadd.f32 %v7501_v34, %v7483_v45 }
 0xa92   :  { %v7520_v10 = vpop.f32.mrf.mxu3 }
 0xa93   :  { %v7521_v61 = vadd.f32 %v7520_v10, %v7502_v31 }
 0xa95   :  { %v7570_v50 = vmul.f32 %v7559_v27, %v7521_v61  ;;  %v7503_v40 = vpop.f32.mrf.mxu2  ;;  %v7468_v7 = vpop.f32.mrf.mxu0 }
 0xa96   :  { %v7504_v28 = vadd.f32 %v7503_v40, %v7485_v42  ;;  %v7469_v20 = vadd.f32 %v7468_v7, %v7450_v47 }
 0xa97   :  { %9599 = vmatmul.msk.f32.vlgmr.msra.gmra.mxu0 %vm870_vm5, %v7570_v50  ;;  %v7487_v11 = vpop.f32.mrf.mxu1 }
 0xa98   :  { %v7488_v38 = vadd.f32 %v7487_v11, %v7469_v20 }
 0xa9a   :  { %v7522_v5 = vpop.f32.mrf.mxu3 }
 0xa9b   :  { %v7523_v22 = vadd.f32 %v7522_v5, %v7504_v28 }
 0xa9d   :  { %v7571_v13 = vmul.f32 %v7561_v18, %v7523_v22  ;;  %v7470_v14 = vpop.f32.mrf.mxu0 }
 0xa9e   :  { %v7471_v36 = vadd.f32 %v7470_v14, %v7452_v17  ;;  %v10026_v17 = vld [vmem:[%s12923_s18] ss:$0 sm:$0xff] }
 0xa9f   :  { %9600 = vmatmul.msk.f32.gmra.mxu0 %vm870_vm5, %v7571_v13  ;;  %v7489_v0 = vpop.f32.mrf.mxu1 }
 0xaa0   :  { %v7490_v4 = vadd.f32 %v7489_v0, %v7471_v36 }
 0xaab   :  { %v7506_v29 = vpop.f32.mrf.mxu2 }
 0xaac   :  { %v7507_v21 = vadd.f32 %v7506_v29, %v7488_v38 }
 0xab0   :  { %v7525_v52 = vpop.f32.mrf.mxu3 }
 0xab1   :  { %v7526_v60 = vadd.f32 %v7525_v52, %v7507_v21  ;;  %v10027_v52 = vld [vmem:[%s12923_s18 + $0x1] ss:$0 sm:$0xff] }
 0xab3   :  { %v7572_v33 = vmul.f32 %v7563_v15, %v7526_v60  ;;  %v7508_v3 = vpop.f32.mrf.mxu2 }
 0xab4   :  { %v7509_v58 = vadd.f32 %v7508_v3, %v7490_v4 }
 0xab5   :  { %9601 = vmatmul.msk.f32.gmra.mxu0 %vm870_vm5, %v7572_v33 }
 0xab8   :  { %v7527_v46 = vpop.f32.mrf.mxu3 }
 0xab9   :  { %v7528_v53 = vadd.f32 %v7527_v46, %v7509_v58 }
 0xabb   :  { %v7573_v44 = vmul.f32 %v7565_v57, %v7528_v53 }
 0xabd   :  { %9602 = vmatmul.msk.f32.gmra.mxu0 %vm870_vm5, %v7573_v44 }
 0xb14   :  { %v7612_v30 = vpop.f32.mrf.mxu0 }
 0xb15   :  { %v7624_v1 = vsel %vm610_vm2, %v7612_v30, 0.0 }
 0xb16   :  { %7625 = vadd.xlane.f32.xlu2 %v7624_v1 }
 0xb1c   :  { %v7615_v48 = vpop.f32.mrf.mxu0 }
 0xb1d   :  { %v7627_v35 = vsel %vm610_vm2, %v7615_v48, 0.0 }
 0xb1e   :  { %7628 = vadd.xlane.f32.xlu0 %v7627_v35 }
 0xb32   :  { %v7618_v43 = vpop.f32.mrf.mxu0 }
 0xb33   :  { %v7630_v6 = vsel %vm610_vm2, %v7618_v43, 0.0 }
 0xb34   :  { %7631 = vadd.xlane.f32.xlu1 %v7630_v6 }
 0xb3a   :  { %v7621_v9 = vpop.f32.mrf.mxu0 }
 0xb3b   :  { %v7633_v62 = vsel %vm309_vm0, %v7621_v9, 0.0 }
 0xb3c   :  { %7634 = vadd.xlane.f32.xlu2 %v7633_v62 }
 0xb89   :  { %v7626_v12 = vpop.xlane.xlu2 %7625 }
 0xb8a   :  { %v7643_v45 = vmul.f32 %v12834_v26, %v7626_v12 }
 0xb8c   :  { %v7647_v37 = vsub.f32 %v7612_v30, %v7643_v45 }
 0xb8e   :  { %v7651_v34 = vmul.f32 %v7647_v37, %v7647_v37 }
 0xb90   :  { %v7655_v16 = vsel %vm610_vm2, %v7651_v34, 0.0 }
 0xb91   :  { %v7629_v31 = vpop.xlane.xlu0 %7628  ;;  %7656 = vadd.xlane.f32.xlu2 %v7655_v16 }
 0xb92   :  { %v7644_v56 = vmul.f32 %v12834_v26, %v7629_v31 }
 0xb94   :  { %v7648_v10 = vsub.f32 %v7615_v48, %v7644_v56 }
 0xb96   :  { %v7652_v61 = vmul.f32 %v7648_v10, %v7648_v10 }
 0xb98   :  { %v7658_v27 = vsel %vm610_vm2, %v7652_v61, 0.0 }
 0xb99   :  { %7659 = vadd.xlane.f32.xlu0 %v7658_v27 }
 0xba7   :  { %v7632_v49 = vpop.xlane.xlu1 %7631 }
 0xba8   :  { %v7645_v42 = vmul.f32 %v12834_v26, %v7632_v49 }
 0xbaa   :  { %v12841_v50 = vsub.f32 %v7618_v43, %v7645_v42 }
 0xbac   :  { %v7653_v40 = vmul.f32 %v12841_v50, %v12841_v50 }
 0xbae   :  { %v7661_v28 = vsel %vm610_vm2, %v7653_v40, 0.0 }
 0xbaf   :  { %7662 = vadd.xlane.f32.xlu1 %v7661_v28  ;;  %v7635_v63 = vpop.xlane.xlu2 %7634 }
 0xbb0   :  { %v7646_v5 = vmul.f32 %v12834_v26, %v7635_v63 }
 0xbb2   :  { %v12847_v59 = vsub.f32 %v7621_v9, %v7646_v5 }
 0xbb4   :  { %v7654_v22 = vmul.f32 %v12847_v59, %v12847_v59 }
 0xbb6   :  { %v7664_v18 = vsel %vm309_vm0, %v7654_v22, 0.0 }
 0xbb7   :  { %7665 = vadd.xlane.f32.xlu2 %v7664_v18 }
 0xc04   :  { %v7657_v13 = vpop.xlane.xlu2 %7656 }
 0xc05   :  { %v7667_v39 = vmul.f32 %v7657_v13, %v12834_v26 }
 0xc07   :  { %v7671_v51 = vadd.f32 1e-05, %v7667_v39 }
 0xc09   :  { %10254 = vrsqrt.f32 %v7671_v51  ;;  %vm7681_vm8 = vweird.f32 %v7671_v51 }
 0xc0c   :  { %v7660_v25 = vpop.xlane.xlu0 %7659 }
 0xc0d   :  { %v7668_v7 = vmul.f32 %v7660_v25, %v12834_v26 }
 0xc0f   :  { %v10255_v54 = vpop.eup %10254  ;;  %v7672_v47 = vadd.f32 1e-05, %v7668_v7 }
 0xc10   :  { %v7676_v32 = vmul.f32 %v10255_v54, %v7671_v51  ;;  %vm7682_vm7 = vweird.f32 %v10255_v54 }
 0xc11   :  { %10256 = vrsqrt.f32 %v7672_v47  ;;  %vm7683_vm9 = vmor %vm7681_vm8, %vm7682_vm7  ;;  %vm7691_vm11 = vweird.f32 %v7672_v47 }
 0xc12   :  { %v7677_v20 = vmul.f32 %v10255_v54, %v7676_v32 }
 0xc14   :  { %v7678_v11 = vmul.f32 0.5, %v7677_v20 }
 0xc16   :  { %v7679_v19 = vsub.f32 1.5, %v7678_v11 }
 0xc17   :  { %v10257_v38 = vpop.eup %10256 }
 0xc18   :  { %v7680_v14 = vmul.f32 %v10255_v54, %v7679_v19  ;;  %v7686_v29 = vmul.f32 %v10257_v38, %v7672_v47  ;;  %vm7692_vm10 = vweird.f32 %v10257_v38 }
 0xc19   :  { %vm7693_vm12 = vmor %vm7691_vm11, %vm7692_vm10 }
 0xc1a   :  { %v7684_v21 = vsel %vm7683_vm9, %v10255_v54, %v7680_v14  ;;  %v7687_v36 = vmul.f32 %v10257_v38, %v7686_v29 }
 0xc1b   :  { %v7715_v60 = vmul.f32 %v7684_v21, %v7647_v37 }
 0xc1c   :  { %v7688_v15 = vmul.f32 0.5, %v7687_v36 }
 0xc1d   :  { %v7721_v0 = vmul.f32 %v10026_v17, %v7715_v60 }
 0xc1e   :  { %v7689_v4 = vsub.f32 1.5, %v7688_v15 }
 0xc1f   :  { %v7727_v33 = vadd.f32 %v10027_v52, %v7721_v0 }
 0xc20   :  { %v7690_v3 = vmul.f32 %v10257_v38, %v7689_v4 }
 0xc21   :  { %7731 = vst.msk [vmem:[%s12924_s16] sm:$0xff] %vm610_vm2, %v7727_v33 }
 0xc22   :  { %v7694_v58 = vsel %vm7693_vm12, %v10257_v38, %v7690_v3  ;;  %v7663_v46 = vpop.xlane.xlu1 %7662 }
 0xc23   :  { %v7716_v53 = vmul.f32 %v7694_v58, %v7648_v10  ;;  %v7669_v57 = vmul.f32 %v7663_v46, %v12834_v26 }
 0xc25   :  { %v7722_v44 = vmul.f32 %v10026_v17, %v7716_v53  ;;  %v7673_v30 = vadd.f32 1e-05, %v7669_v57 }
 0xc27   :  { %v7728_v1 = vadd.f32 %v10027_v52, %v7722_v44  ;;  %10258 = vrsqrt.f32 %v7673_v30  ;;  %vm7701_vm14 = vweird.f32 %v7673_v30 }
 0xc29   :  { %7732 = vst.msk [vmem:[%s12924_s16 + $0x8] sm:$0xff] %vm610_vm2, %v7728_v1 }
 0xc2a   :  { %v7666_v48 = vpop.xlane.xlu2 %7665 }
 0xc2b   :  { %v7670_v35 = vmul.f32 %v7666_v48, %v12834_v26 }
 0xc2d   :  { %v10259_v43 = vpop.eup %10258  ;;  %v7674_v6 = vadd.f32 1e-05, %v7670_v35 }
 0xc2e   :  { %v7696_v9 = vmul.f32 %v10259_v43, %v7673_v30  ;;  %vm7702_vm13 = vweird.f32 %v10259_v43 }
 0xc2f   :  { %10260 = vrsqrt.f32 %v7674_v6  ;;  %vm7703_vm15 = vmor %vm7701_vm14, %vm7702_vm13  ;;  %vm7711_vm3 = vweird.f32 %v7674_v6 }
 0xc30   :  { %v7697_v62 = vmul.f32 %v10259_v43, %v7696_v9 }
 0xc32   :  { %v7698_v24 = vmul.f32 0.5, %v7697_v62 }
 0xc34   :  { %v7699_v8 = vsub.f32 1.5, %v7698_v24 }
 0xc35   :  { %v10261_v41 = vpop.eup %10260 }
 0xc36   :  { %v7700_v2 = vmul.f32 %v10259_v43, %v7699_v8  ;;  %v7706_v55 = vmul.f32 %v10261_v41, %v7674_v6  ;;  %vm7712_vm1 = vweird.f32 %v10261_v41 }
 0xc37   :  { %vm7713_vm4 = vmor %vm7711_vm3, %vm7712_vm1 }
 0xc38   :  { %v7704_v23 = vsel %vm7703_vm15, %v10259_v43, %v7700_v2  ;;  %v7707_v12 = vmul.f32 %v10261_v41, %v7706_v55 }
 0xc39   :  { %v7717_v45 = vmul.f32 %v7704_v23, %v12841_v50 }
 0xc3a   :  { %v7708_v37 = vmul.f32 0.5, %v7707_v12 }
 0xc3b   :  { %v7723_v34 = vmul.f32 %v10026_v17, %v7717_v45 }
 0xc3c   :  { %v7709_v26 = vsub.f32 1.5, %v7708_v37 }
 0xc3d   :  { %v7729_v16 = vadd.f32 %v10027_v52, %v7723_v34 }
 0xc3e   :  { %v7710_v31 = vmul.f32 %v10261_v41, %v7709_v26 }
 0xc3f   :  { %7733 = vst.msk [vmem:[%s12924_s16 + $0x10] sm:$0xff] %vm610_vm2, %v7729_v16 }
 0xc40   :  { %v7714_v56 = vsel %vm7713_vm4, %v10261_v41, %v7710_v31 }
 0xc41   :  { %v7718_v10 = vmul.f32 %v7714_v56, %v12847_v59 }
 0xc43   :  { %v7724_v61 = vmul.f32 %v10026_v17, %v7718_v10 }
 0xc45   :  { %v7730_v27 = vadd.f32 %v10027_v52, %v7724_v61 }
 0xc47   :  { %7734 = vst.msk [vmem:[%s12924_s16 + $0x18] sm:$0x3] %vm309_vm0, %v7730_v27 }
 0xc48   :  { %7739 = vsyncpa [#allocation8], 1 }
 0xc49   :  { %7740 = vsyncpa [#allocation12], 1 }
 0xc4a   :  { %7741 = vsyncpa [#allocation9], 1 }

</bundles_post_ra>
